<compile_context>
chip_gen: v7x
topology: tpu7x:2x2x1
jax: 0.10.0
libtpu: 0.0.40
codegen_flags: <defaults>
</compile_context>

<pallas_src>
import jax
import jax.numpy as jnp
import numpy as np
from jax import lax
from jax.experimental import pallas as pl
from jax.experimental.pallas import tpu as pltpu

# Config from the PyTorch module
NUM_CLASSES = 1
HIDDEN = 256
EMBED = 256
RNN_LAYERS = 2
SUBLANE = 8  # pad batch to a sublane multiple


def audio_bilstm_kernel(x_ref,
                        w_ih0_ref, w_hh0_ref, b_ih0_ref, b_hh0_ref,
                        w_ih1_ref, w_hh1_ref, b_ih1_ref, b_hh1_ref,
                        w_fc1_ref, b_fc1_ref, w_fc2_ref, b_fc2_ref,
                        out_ref,
                        gi0_ref, gi1_ref, hseq_ref):
    H = HIDDEN
    TB = x_ref.shape[0]          # T * Bp  (time-major, batch-padded, flattened)
    BP = out_ref.shape[0]        # padded batch
    T = TB // BP

    w_hh0 = w_hh0_ref[...]       # bf16 [H, 3H]
    w_hh1 = w_hh1_ref[...]       # bf16 [H, 3H]

    # Hoist the recurrent-bias broadcasts out of the loops (JAX does not CSE
    # broadcast_in_dim; keeping them inside would re-materialize them per step).
    b_hh0 = jnp.broadcast_to(b_hh0_ref[...], (BP, 3 * H))
    b_hh1 = jnp.broadcast_to(b_hh1_ref[...], (BP, 3 * H))

    def gru_gates(gi, gh, h_prev):
        # PyTorch GRU gate order along 3H: (r, z, n); 256-aligned slices.
        i_r, i_z, i_n = gi[:, 0:H], gi[:, H:2 * H], gi[:, 2 * H:3 * H]
        h_r, h_z, h_n = gh[:, 0:H], gh[:, H:2 * H], gh[:, 2 * H:3 * H]
        r = jax.nn.sigmoid(i_r + h_r)         # EUP
        z = jax.nn.sigmoid(i_z + h_z)         # EUP
        n = jnp.tanh(i_n + r * h_n)           # EUP + VPU
        return (1.0 - z) * n + z * h_prev     # VPU

    h0 = jnp.zeros((BP, H), jnp.float32)

    # ---------------- GRU layer 0 ----------------
    # Batched input projection: one [T*Bp, E] x [E, 3H] bf16 MXU matmul,
    # input bias folded in. Removes T tiny matmuls from the serial recurrence.
    gi0_ref[...] = (jnp.dot(x_ref[...], w_ih0_ref[...],
                            preferred_element_type=jnp.float32)
                    + b_ih0_ref[...])

    def l0_body(t, h_prev):
        row = pl.multiple_of(t * BP, BP)
        gi = gi0_ref[pl.ds(row, BP), :]                              # [Bp, 3H] f32
        gh = jnp.dot(h_prev.astype(jnp.bfloat16), w_hh0,
                     preferred_element_type=jnp.float32) + b_hh0     # [Bp, 3H]
        h = gru_gates(gi, gh, h_prev)
        hseq_ref[pl.ds(row, BP), :] = h                              # aligned f32 store
        return h

    lax.fori_loop(0, T, l0_body, h0, unroll=True)

    # ---------------- GRU layer 1 (inter-layer dropout = identity) ----------------
    # Batched input projection over the whole layer-0 hidden sequence.
    gi1_ref[...] = (jnp.dot(hseq_ref[...].astype(jnp.bfloat16), w_ih1_ref[...],
                            preferred_element_type=jnp.float32)
                    + b_ih1_ref[...])

    def l1_body(t, carry):
        h_prev, acc = carry
        row = pl.multiple_of(t * BP, BP)
        gi = gi1_ref[pl.ds(row, BP), :]
        gh = jnp.dot(h_prev.astype(jnp.bfloat16), w_hh1,
                     preferred_element_type=jnp.float32) + b_hh1
        h = gru_gates(gi, gh, h_prev)
        return h, acc + h                     # fused x.sum(dim=1) over time

    _, s = lax.fori_loop(0, T, l1_body, (h0, jnp.zeros((BP, H), jnp.float32)),
                         unroll=True)

    # ---------------- fc_audio: Dropout->Linear->ReLU->Dropout->Linear->ReLU ----------------
    y = jnp.maximum(
        jnp.dot(s.astype(jnp.bfloat16), w_fc1_ref[...],
                preferred_element_type=jnp.float32) + b_fc1_ref[...], 0.0)
    y = jnp.maximum(
        jnp.dot(y.astype(jnp.bfloat16), w_fc2_ref[...],
                preferred_element_type=jnp.float32) + b_fc2_ref[...], 0.0)
    out_ref[...] = y


def audio_bilstm_forward(x, p):
    """x: [B, T, EMBED] (batch_first, like the PyTorch module). Returns [B, NUM_CLASSES]."""
    B, T, E = x.shape
    BP = ((B + SUBLANE - 1) // SUBLANE) * SUBLANE      # pad batch to sublane multiple

    # time-major, batch-padded, flattened to [T*Bp, E]; bf16 for the MXU.
    x_tm = jnp.transpose(x, (1, 0, 2)).astype(jnp.float32)       # [T, B, E]
    x_tm = jnp.pad(x_tm, ((0, 0), (0, BP - B), (0, 0)))          # [T, Bp, E]
    x2d = x_tm.reshape(T * BP, E).astype(jnp.bfloat16)

    wT = lambda w: w.T.astype(jnp.bfloat16)            # [in, out], bf16
    row = lambda b: b[None, :].astype(jnp.float32)     # [1, out], f32

    ins = (
        x2d,
        wT(p['w_ih_l0']), wT(p['w_hh_l0']), row(p['b_ih_l0']), row(p['b_hh_l0']),
        wT(p['w_ih_l1']), wT(p['w_hh_l1']), row(p['b_ih_l1']), row(p['b_hh_l1']),
        wT(p['fc1_w']), row(p['fc1_b']),
        wT(p['fc2_w']), row(p['fc2_b']),
    )
    vmem = pl.BlockSpec(memory_space=pltpu.MemorySpace.VMEM)
    out = pl.pallas_call(
        audio_bilstm_kernel,
        out_shape=jax.ShapeDtypeStruct((BP, NUM_CLASSES), jnp.float32),
        in_specs=[vmem] * len(ins),
        out_specs=vmem,
        scratch_shapes=[
            pltpu.VMEM((T * BP, 3 * HIDDEN), jnp.float32),   # GI0 (batched x @ W_ih0 + b)
            pltpu.VMEM((T * BP, 3 * HIDDEN), jnp.float32),   # GI1 (batched hseq @ W_ih1 + b)
            pltpu.VMEM((T * BP, HIDDEN), jnp.float32),       # layer-0 hidden sequence
        ],
    )(*ins)
    return out[:B]


# ---------------- pure-JAX f32 reference (PyTorch semantics) ----------------

def _gru_layer_ref(x, w_ih, w_hh, b_ih, b_hh):
    B, T, _ = x.shape
    H = w_hh.shape[1]

    def step(h, x_t):
        gi = x_t @ w_ih.T + b_ih
        gh = h @ w_hh.T + b_hh
        i_r, i_z, i_n = jnp.split(gi, 3, axis=-1)
        h_r, h_z, h_n = jnp.split(gh, 3, axis=-1)
        r = jax.nn.sigmoid(i_r + h_r)
        z = jax.nn.sigmoid(i_z + h_z)
        n = jnp.tanh(i_n + r * h_n)
        h_new = (1.0 - z) * n + z * h
        return h_new, h_new

    h0 = jnp.zeros((B, H), jnp.float32)
    _, hs = lax.scan(step, h0, jnp.transpose(x, (1, 0, 2)))
    return jnp.transpose(hs, (1, 0, 2))


def forward_ref(x, p):
    h1 = _gru_layer_ref(x, p['w_ih_l0'], p['w_hh_l0'], p['b_ih_l0'], p['b_hh_l0'])
    h2 = _gru_layer_ref(h1, p['w_ih_l1'], p['w_hh_l1'], p['b_ih_l1'], p['b_hh_l1'])
    s = h2.sum(axis=1)
    y = jax.nn.relu(s @ p['fc1_w'].T + p['fc1_b'])
    y = jax.nn.relu(y @ p['fc2_w'].T + p['fc2_b'])
    return y


# ---------------- deterministic parameter init (xavier weights, zero biases) ----------------

def init_params(key):
    def xavier(k, shape):
        fan_out, fan_in = shape
        limit = float(np.sqrt(6.0 / (fan_in + fan_out)))
        return jax.random.uniform(k, shape, jnp.float32, -limit, limit)

    ks = jax.random.split(key, 6)
    H, E, C = HIDDEN, EMBED, NUM_CLASSES
    return {
        # GRU layer 0 (input size = EMBED)
        'w_ih_l0': xavier(ks[0], (3 * H, E)),
        'w_hh_l0': xavier(ks[1], (3 * H, H)),
        'b_ih_l0': jnp.zeros((3 * H,), jnp.float32),
        'b_hh_l0': jnp.zeros((3 * H,), jnp.float32),
        # GRU layer 1 (input size = HIDDEN, unidirectional)
        'w_ih_l1': xavier(ks[2], (3 * H, H)),
        'w_hh_l1': xavier(ks[3], (3 * H, H)),
        'b_ih_l1': jnp.zeros((3 * H,), jnp.float32),
        'b_hh_l1': jnp.zeros((3 * H,), jnp.float32),
        # fc_audio
        'fc1_w': xavier(ks[4], (H, H)),
        'fc1_b': jnp.zeros((H,), jnp.float32),
        'fc2_w': xavier(ks[5], (C, H)),
        'fc2_b': jnp.zeros((C,), jnp.float32),
    }


if __name__ == "__main__":
    key = jax.random.PRNGKey(0)
    pkey, xkey = jax.random.split(key)
    params = init_params(pkey)

    B, T = 2, 8                       # batch_size=2 from config, small sequence
    x = jax.random.normal(xkey, (B, T, EMBED), jnp.float32)

    out = jax.block_until_ready(audio_bilstm_forward(x, params))
    ref = forward_ref(x, params)

    # Kernel uses bf16 MXU inputs (f32 accumulation); tolerance relaxed vs. pure-f32 ref.
    np.testing.assert_allclose(np.asarray(out), np.asarray(ref), rtol=3e-2, atol=3e-2)

    print("KERNEL_OK")
</pallas_src>

<mosaic_0001>
module attributes {stable_mosaic.version = 11 : i64} {
  func.func @audio_bilstm_kernel(%arg0: memref<64x256xbf16, #tpu.memory_space<vmem>>, %arg1: memref<256x768xbf16, #tpu.memory_space<vmem>>, %arg2: memref<256x768xbf16, #tpu.memory_space<vmem>>, %arg3: memref<1x768xf32, #tpu.memory_space<vmem>>, %arg4: memref<1x768xf32, #tpu.memory_space<vmem>>, %arg5: memref<256x768xbf16, #tpu.memory_space<vmem>>, %arg6: memref<256x768xbf16, #tpu.memory_space<vmem>>, %arg7: memref<1x768xf32, #tpu.memory_space<vmem>>, %arg8: memref<1x768xf32, #tpu.memory_space<vmem>>, %arg9: memref<256x256xbf16, #tpu.memory_space<vmem>>, %arg10: memref<1x256xf32, #tpu.memory_space<vmem>>, %arg11: memref<256x1xbf16, #tpu.memory_space<vmem>>, %arg12: memref<1x1xf32, #tpu.memory_space<vmem>>, %arg13: memref<8x1xf32, #tpu.memory_space<vmem>>, %arg14: memref<64x768xf32, #tpu.memory_space<vmem>>, %arg15: memref<64x768xf32, #tpu.memory_space<vmem>>, %arg16: memref<64x256xf32, #tpu.memory_space<vmem>>) attributes {dimension_semantics = [], scalar_prefetch = 0 : i64, scratch_operands = 3 : i64, tpu.core_type = #tpu.core_type<tc>} {
    %c0 = arith.constant 0 : index
    %c0_0 = arith.constant 0 : index
    %0 = vector.load %arg2[%c0, %c0_0] : memref<256x768xbf16, #tpu.memory_space<vmem>>, vector<256x768xbf16>
    %c0_1 = arith.constant 0 : index
    %c0_2 = arith.constant 0 : index
    %1 = vector.load %arg6[%c0_1, %c0_2] : memref<256x768xbf16, #tpu.memory_space<vmem>>, vector<256x768xbf16>
    %c0_3 = arith.constant 0 : index
    %c0_4 = arith.constant 0 : index
    %2 = vector.load %arg4[%c0_3, %c0_4] : memref<1x768xf32, #tpu.memory_space<vmem>>, vector<1x768xf32>
    %3 = vector.shape_cast %2 : vector<1x768xf32> to vector<1x768xf32>
    %4 = vector.broadcast %3 : vector<1x768xf32> to vector<8x768xf32>
    %c0_5 = arith.constant 0 : index
    %c0_6 = arith.constant 0 : index
    %5 = vector.load %arg8[%c0_5, %c0_6] : memref<1x768xf32, #tpu.memory_space<vmem>>, vector<1x768xf32>
    %6 = vector.shape_cast %5 : vector<1x768xf32> to vector<1x768xf32>
    %7 = vector.broadcast %6 : vector<1x768xf32> to vector<8x768xf32>
    %cst = arith.constant 0.000000e+00 : f32
    %8 = vector.broadcast %cst : f32 to vector<8x256xf32>
    %c0_7 = arith.constant 0 : index
    %c0_8 = arith.constant 0 : index
    %9 = vector.load %arg0[%c0_7, %c0_8] : memref<64x256xbf16, #tpu.memory_space<vmem>>, vector<64x256xbf16>
    %c0_9 = arith.constant 0 : index
    %c0_10 = arith.constant 0 : index
    %10 = vector.load %arg1[%c0_9, %c0_10] : memref<256x768xbf16, #tpu.memory_space<vmem>>, vector<256x768xbf16>
    %cst_11 = arith.constant dense<0.000000e+00> : vector<64x768xf32>
    %11 = tpu.matmul %9, %10, %cst_11 {dimension_numbers = #tpu.dot_dimension_numbers<[1], [0], [0], [1], [0, 0, 1, 1], [], []>} : vector<64x256xbf16>, vector<256x768xbf16>, vector<64x768xf32> -> vector<64x768xf32>
    %c0_12 = arith.constant 0 : index
    %c0_13 = arith.constant 0 : index
    %12 = vector.load %arg3[%c0_12, %c0_13] : memref<1x768xf32, #tpu.memory_space<vmem>>, vector<1x768xf32>
    %13 = vector.broadcast %12 : vector<1x768xf32> to vector<64x768xf32>
    %14 = arith.addf %11, %13 : vector<64x768xf32>
    %c0_14 = arith.constant 0 : index
    %c0_15 = arith.constant 0 : index
    %15 = vector.load %arg14[%c0_14, %c0_15] : memref<64x768xf32, #tpu.memory_space<vmem>>, vector<64x768xf32>
    tpu.vector_store %arg14[%c0_14, %c0_15], %14 {strides = array<i32>} : memref<64x768xf32, #tpu.memory_space<vmem>>, vector<64x768xf32>,
    %c0_i32 = arith.constant 0 : i32
    %c8_i32 = arith.constant 8 : i32
    %16 = arith.muli %c0_i32, %c8_i32 : i32
    %17 = tpu.assume_multiple %16, 8 : i32
    %18 = arith.index_cast %17 : i32 to index
    %c0_16 = arith.constant 0 : index
    %19 = vector.load %arg14[%18, %c0_16] : memref<64x768xf32, #tpu.memory_space<vmem>>, vector<8x768xf32>
    %20 = arith.truncf %8 : vector<8x256xf32> to vector<8x256xbf16>
    %cst_17 = arith.constant dense<0.000000e+00> : vector<8x768xf32>
    %21 = tpu.matmul %20, %0, %cst_17 {dimension_numbers = #tpu.dot_dimension_numbers<[1], [0], [0], [1], [0, 0, 1, 1], [], []>} : vector<8x256xbf16>, vector<256x768xbf16>, vector<8x768xf32> -> vector<8x768xf32>
    %22 = arith.addf %21, %4 : vector<8x768xf32>
    %23 = vector.extract_strided_slice %19 {offsets = [0, 0], sizes = [8, 256], strides = [1, 1]} : vector<8x768xf32> to vector<8x256xf32>
    %24 = vector.extract_strided_slice %19 {offsets = [0, 256], sizes = [8, 256], strides = [1, 1]} : vector<8x768xf32> to vector<8x256xf32>
    %25 = vector.extract_strided_slice %19 {offsets = [0, 512], sizes = [8, 256], strides = [1, 1]} : vector<8x768xf32> to vector<8x256xf32>
    %26 = vector.extract_strided_slice %22 {offsets = [0, 0], sizes = [8, 256], strides = [1, 1]} : vector<8x768xf32> to vector<8x256xf32>
    %27 = vector.extract_strided_slice %22 {offsets = [0, 256], sizes = [8, 256], strides = [1, 1]} : vector<8x768xf32> to vector<8x256xf32>
    %28 = vector.extract_strided_slice %22 {offsets = [0, 512], sizes = [8, 256], strides = [1, 1]} : vector<8x768xf32> to vector<8x256xf32>
    %29 = arith.addf %23, %26 : vector<8x256xf32>
    %30 = arith.negf %29 : vector<8x256xf32>
    %31 = math.exp %30 : vector<8x256xf32>
    %cst_18 = arith.constant 1.000000e+00 : f32
    %32 = vector.broadcast %cst_18 : f32 to vector<8x256xf32>
    %33 = arith.addf %32, %31 : vector<8x256xf32>
    %34 = arith.divf %32, %33 : vector<8x256xf32>
    %35 = arith.addf %24, %27 : vector<8x256xf32>
    %36 = arith.negf %35 : vector<8x256xf32>
    %37 = math.exp %36 : vector<8x256xf32>
    %cst_19 = arith.constant 1.000000e+00 : f32
    %38 = vector.broadcast %cst_19 : f32 to vector<8x256xf32>
    %39 = arith.addf %38, %37 : vector<8x256xf32>
    %40 = arith.divf %38, %39 : vector<8x256xf32>
    %41 = arith.mulf %34, %28 : vector<8x256xf32>
    %42 = arith.addf %25, %41 : vector<8x256xf32>
    %43 = math.tanh %42 : vector<8x256xf32>
    %cst_20 = arith.constant 1.000000e+00 : f32
    %44 = vector.broadcast %cst_20 : f32 to vector<8x256xf32>
    %45 = arith.subf %44, %40 : vector<8x256xf32>
    %46 = arith.mulf %45, %43 : vector<8x256xf32>
    %47 = arith.mulf %40, %8 : vector<8x256xf32>
    %48 = arith.addf %46, %47 : vector<8x256xf32>
    %49 = arith.index_cast %17 : i32 to index
    %c0_21 = arith.constant 0 : index
    %50 = vector.load %arg16[%49, %c0_21] : memref<64x256xf32, #tpu.memory_space<vmem>>, vector<8x256xf32>
    tpu.vector_store %arg16[%49, %c0_21], %48 {strides = array<i32>} : memref<64x256xf32, #tpu.memory_space<vmem>>, vector<8x256xf32>,
    %c1_i32 = arith.constant 1 : i32
    %c8_i32_22 = arith.constant 8 : i32
    %51 = arith.muli %c1_i32, %c8_i32_22 : i32
    %52 = tpu.assume_multiple %51, 8 : i32
    %53 = arith.index_cast %52 : i32 to index
    %c0_23 = arith.constant 0 : index
    %54 = vector.load %arg14[%53, %c0_23] : memref<64x768xf32, #tpu.memory_space<vmem>>, vector<8x768xf32>
    %55 = arith.truncf %48 : vector<8x256xf32> to vector<8x256xbf16>
    %cst_24 = arith.constant dense<0.000000e+00> : vector<8x768xf32>
    %56 = tpu.matmul %55, %0, %cst_24 {dimension_numbers = #tpu.dot_dimension_numbers<[1], [0], [0], [1], [0, 0, 1, 1], [], []>} : vector<8x256xbf16>, vector<256x768xbf16>, vector<8x768xf32> -> vector<8x768xf32>
    %57 = arith.addf %56, %4 : vector<8x768xf32>
    %58 = vector.extract_strided_slice %54 {offsets = [0, 0], sizes = [8, 256], strides = [1, 1]} : vector<8x768xf32> to vector<8x256xf32>
    %59 = vector.extract_strided_slice %54 {offsets = [0, 256], sizes = [8, 256], strides = [1, 1]} : vector<8x768xf32> to vector<8x256xf32>
    %60 = vector.extract_strided_slice %54 {offsets = [0, 512], sizes = [8, 256], strides = [1, 1]} : vector<8x768xf32> to vector<8x256xf32>
    %61 = vector.extract_strided_slice %57 {offsets = [0, 0], sizes = [8, 256], strides = [1, 1]} : vector<8x768xf32> to vector<8x256xf32>
    %62 = vector.extract_strided_slice %57 {offsets = [0, 256], sizes = [8, 256], strides = [1, 1]} : vector<8x768xf32> to vector<8x256xf32>
    %63 = vector.extract_strided_slice %57 {offsets = [0, 512], sizes = [8, 256], strides = [1, 1]} : vector<8x768xf32> to vector<8x256xf32>
    %64 = arith.addf %58, %61 : vector<8x256xf32>
    %65 = arith.negf %64 : vector<8x256xf32>
    %66 = math.exp %65 : vector<8x256xf32>
    %cst_25 = arith.constant 1.000000e+00 : f32
    %67 = vector.broadcast %cst_25 : f32 to vector<8x256xf32>
    %68 = arith.addf %67, %66 : vector<8x256xf32>
    %69 = arith.divf %67, %68 : vector<8x256xf32>
    %70 = arith.addf %59, %62 : vector<8x256xf32>
    %71 = arith.negf %70 : vector<8x256xf32>
    %72 = math.exp %71 : vector<8x256xf32>
    %cst_26 = arith.constant 1.000000e+00 : f32
    %73 = vector.broadcast %cst_26 : f32 to vector<8x256xf32>
    %74 = arith.addf %73, %72 : vector<8x256xf32>
    %75 = arith.divf %73, %74 : vector<8x256xf32>
    %76 = arith.mulf %69, %63 : vector<8x256xf32>
    %77 = arith.addf %60, %76 : vector<8x256xf32>
    %78 = math.tanh %77 : vector<8x256xf32>
    %cst_27 = arith.constant 1.000000e+00 : f32
    %79 = vector.broadcast %cst_27 : f32 to vector<8x256xf32>
    %80 = arith.subf %79, %75 : vector<8x256xf32>
    %81 = arith.mulf %80, %78 : vector<8x256xf32>
    %82 = arith.mulf %75, %48 : vector<8x256xf32>
    %83 = arith.addf %81, %82 : vector<8x256xf32>
    %84 = arith.index_cast %52 : i32 to index
    %c0_28 = arith.constant 0 : index
    %85 = vector.load %arg16[%84, %c0_28] : memref<64x256xf32, #tpu.memory_space<vmem>>, vector<8x256xf32>
    tpu.vector_store %arg16[%84, %c0_28], %83 {strides = array<i32>} : memref<64x256xf32, #tpu.memory_space<vmem>>, vector<8x256xf32>,
    %c2_i32 = arith.constant 2 : i32
    %c8_i32_29 = arith.constant 8 : i32
    %86 = arith.muli %c2_i32, %c8_i32_29 : i32
    %87 = tpu.assume_multiple %86, 8 : i32
    %88 = arith.index_cast %87 : i32 to index
    %c0_30 = arith.constant 0 : index
    %89 = vector.load %arg14[%88, %c0_30] : memref<64x768xf32, #tpu.memory_space<vmem>>, vector<8x768xf32>
    %90 = arith.truncf %83 : vector<8x256xf32> to vector<8x256xbf16>
    %cst_31 = arith.constant dense<0.000000e+00> : vector<8x768xf32>
    %91 = tpu.matmul %90, %0, %cst_31 {dimension_numbers = #tpu.dot_dimension_numbers<[1], [0], [0], [1], [0, 0, 1, 1], [], []>} : vector<8x256xbf16>, vector<256x768xbf16>, vector<8x768xf32> -> vector<8x768xf32>
    %92 = arith.addf %91, %4 : vector<8x768xf32>
    %93 = vector.extract_strided_slice %89 {offsets = [0, 0], sizes = [8, 256], strides = [1, 1]} : vector<8x768xf32> to vector<8x256xf32>
    %94 = vector.extract_strided_slice %89 {offsets = [0, 256], sizes = [8, 256], strides = [1, 1]} : vector<8x768xf32> to vector<8x256xf32>
    %95 = vector.extract_strided_slice %89 {offsets = [0, 512], sizes = [8, 256], strides = [1, 1]} : vector<8x768xf32> to vector<8x256xf32>
    %96 = vector.extract_strided_slice %92 {offsets = [0, 0], sizes = [8, 256], strides = [1, 1]} : vector<8x768xf32> to vector<8x256xf32>
    %97 = vector.extract_strided_slice %92 {offsets = [0, 256], sizes = [8, 256], strides = [1, 1]} : vector<8x768xf32> to vector<8x256xf32>
    %98 = vector.extract_strided_slice %92 {offsets = [0, 512], sizes = [8, 256], strides = [1, 1]} : vector<8x768xf32> to vector<8x256xf32>
    %99 = arith.addf %93, %96 : vector<8x256xf32>
    %100 = arith.negf %99 : vector<8x256xf32>
    %101 = math.exp %100 : vector<8x256xf32>
    %cst_32 = arith.constant 1.000000e+00 : f32
    %102 = vector.broadcast %cst_32 : f32 to vector<8x256xf32>
    %103 = arith.addf %102, %101 : vector<8x256xf32>
    %104 = arith.divf %102, %103 : vector<8x256xf32>
    %105 = arith.addf %94, %97 : vector<8x256xf32>
    %106 = arith.negf %105 : vector<8x256xf32>
    %107 = math.exp %106 : vector<8x256xf32>
    %cst_33 = arith.constant 1.000000e+00 : f32
    %108 = vector.broadcast %cst_33 : f32 to vector<8x256xf32>
    %109 = arith.addf %108, %107 : vector<8x256xf32>
    %110 = arith.divf %108, %109 : vector<8x256xf32>
    %111 = arith.mulf %104, %98 : vector<8x256xf32>
    %112 = arith.addf %95, %111 : vector<8x256xf32>
    %113 = math.tanh %112 : vector<8x256xf32>
    %cst_34 = arith.constant 1.000000e+00 : f32
    %114 = vector.broadcast %cst_34 : f32 to vector<8x256xf32>
    %115 = arith.subf %114, %110 : vector<8x256xf32>
    %116 = arith.mulf %115, %113 : vector<8x256xf32>
    %117 = arith.mulf %110, %83 : vector<8x256xf32>
    %118 = arith.addf %116, %117 : vector<8x256xf32>
    %119 = arith.index_cast %87 : i32 to index
    %c0_35 = arith.constant 0 : index
    %120 = vector.load %arg16[%119, %c0_35] : memref<64x256xf32, #tpu.memory_space<vmem>>, vector<8x256xf32>
    tpu.vector_store %arg16[%119, %c0_35], %118 {strides = array<i32>} : memref<64x256xf32, #tpu.memory_space<vmem>>, vector<8x256xf32>,
    %c3_i32 = arith.constant 3 : i32
    %c8_i32_36 = arith.constant 8 : i32
    %121 = arith.muli %c3_i32, %c8_i32_36 : i32
    %122 = tpu.assume_multiple %121, 8 : i32
    %123 = arith.index_cast %122 : i32 to index
    %c0_37 = arith.constant 0 : index
    %124 = vector.load %arg14[%123, %c0_37] : memref<64x768xf32, #tpu.memory_space<vmem>>, vector<8x768xf32>
    %125 = arith.truncf %118 : vector<8x256xf32> to vector<8x256xbf16>
    %cst_38 = arith.constant dense<0.000000e+00> : vector<8x768xf32>
    %126 = tpu.matmul %125, %0, %cst_38 {dimension_numbers = #tpu.dot_dimension_numbers<[1], [0], [0], [1], [0, 0, 1, 1], [], []>} : vector<8x256xbf16>, vector<256x768xbf16>, vector<8x768xf32> -> vector<8x768xf32>
    %127 = arith.addf %126, %4 : vector<8x768xf32>
    %128 = vector.extract_strided_slice %124 {offsets = [0, 0], sizes = [8, 256], strides = [1, 1]} : vector<8x768xf32> to vector<8x256xf32>
    %129 = vector.extract_strided_slice %124 {offsets = [0, 256], sizes = [8, 256], strides = [1, 1]} : vector<8x768xf32> to vector<8x256xf32>
    %130 = vector.extract_strided_slice %124 {offsets = [0, 512], sizes = [8, 256], strides = [1, 1]} : vector<8x768xf32> to vector<8x256xf32>
    %131 = vector.extract_strided_slice %127 {offsets = [0, 0], sizes = [8, 256], strides = [1, 1]} : vector<8x768xf32> to vector<8x256xf32>
    %132 = vector.extract_strided_slice %127 {offsets = [0, 256], sizes = [8, 256], strides = [1, 1]} : vector<8x768xf32> to vector<8x256xf32>
    %133 = vector.extract_strided_slice %127 {offsets = [0, 512], sizes = [8, 256], strides = [1, 1]} : vector<8x768xf32> to vector<8x256xf32>
    %134 = arith.addf %128, %131 : vector<8x256xf32>
    %135 = arith.negf %134 : vector<8x256xf32>
    %136 = math.exp %135 : vector<8x256xf32>
    %cst_39 = arith.constant 1.000000e+00 : f32
    %137 = vector.broadcast %cst_39 : f32 to vector<8x256xf32>
    %138 = arith.addf %137, %136 : vector<8x256xf32>
    %139 = arith.divf %137, %138 : vector<8x256xf32>
    %140 = arith.addf %129, %132 : vector<8x256xf32>
    %141 = arith.negf %140 : vector<8x256xf32>
    %142 = math.exp %141 : vector<8x256xf32>
    %cst_40 = arith.constant 1.000000e+00 : f32
    %143 = vector.broadcast %cst_40 : f32 to vector<8x256xf32>
    %144 = arith.addf %143, %142 : vector<8x256xf32>
    %145 = arith.divf %143, %144 : vector<8x256xf32>
    %146 = arith.mulf %139, %133 : vector<8x256xf32>
    %147 = arith.addf %130, %146 : vector<8x256xf32>
    %148 = math.tanh %147 : vector<8x256xf32>
    %cst_41 = arith.constant 1.000000e+00 : f32
    %149 = vector.broadcast %cst_41 : f32 to vector<8x256xf32>
    %150 = arith.subf %149, %145 : vector<8x256xf32>
    %151 = arith.mulf %150, %148 : vector<8x256xf32>
    %152 = arith.mulf %145, %118 : vector<8x256xf32>
    %153 = arith.addf %151, %152 : vector<8x256xf32>
    %154 = arith.index_cast %122 : i32 to index
    %c0_42 = arith.constant 0 : index
    %155 = vector.load %arg16[%154, %c0_42] : memref<64x256xf32, #tpu.memory_space<vmem>>, vector<8x256xf32>
    tpu.vector_store %arg16[%154, %c0_42], %153 {strides = array<i32>} : memref<64x256xf32, #tpu.memory_space<vmem>>, vector<8x256xf32>,
    %c4_i32 = arith.constant 4 : i32
    %c8_i32_43 = arith.constant 8 : i32
    %156 = arith.muli %c4_i32, %c8_i32_43 : i32
    %157 = tpu.assume_multiple %156, 8 : i32
    %158 = arith.index_cast %157 : i32 to index
    %c0_44 = arith.constant 0 : index
    %159 = vector.load %arg14[%158, %c0_44] : memref<64x768xf32, #tpu.memory_space<vmem>>, vector<8x768xf32>
    %160 = arith.truncf %153 : vector<8x256xf32> to vector<8x256xbf16>
    %cst_45 = arith.constant dense<0.000000e+00> : vector<8x768xf32>
    %161 = tpu.matmul %160, %0, %cst_45 {dimension_numbers = #tpu.dot_dimension_numbers<[1], [0], [0], [1], [0, 0, 1, 1], [], []>} : vector<8x256xbf16>, vector<256x768xbf16>, vector<8x768xf32> -> vector<8x768xf32>
    %162 = arith.addf %161, %4 : vector<8x768xf32>
    %163 = vector.extract_strided_slice %159 {offsets = [0, 0], sizes = [8, 256], strides = [1, 1]} : vector<8x768xf32> to vector<8x256xf32>
    %164 = vector.extract_strided_slice %159 {offsets = [0, 256], sizes = [8, 256], strides = [1, 1]} : vector<8x768xf32> to vector<8x256xf32>
    %165 = vector.extract_strided_slice %159 {offsets = [0, 512], sizes = [8, 256], strides = [1, 1]} : vector<8x768xf32> to vector<8x256xf32>
    %166 = vector.extract_strided_slice %162 {offsets = [0, 0], sizes = [8, 256], strides = [1, 1]} : vector<8x768xf32> to vector<8x256xf32>
    %167 = vector.extract_strided_slice %162 {offsets = [0, 256], sizes = [8, 256], strides = [1, 1]} : vector<8x768xf32> to vector<8x256xf32>
    %168 = vector.extract_strided_slice %162 {offsets = [0, 512], sizes = [8, 256], strides = [1, 1]} : vector<8x768xf32> to vector<8x256xf32>
    %169 = arith.addf %163, %166 : vector<8x256xf32>
    %170 = arith.negf %169 : vector<8x256xf32>
    %171 = math.exp %170 : vector<8x256xf32>
    %cst_46 = arith.constant 1.000000e+00 : f32
    %172 = vector.broadcast %cst_46 : f32 to vector<8x256xf32>
    %173 = arith.addf %172, %171 : vector<8x256xf32>
    %174 = arith.divf %172, %173 : vector<8x256xf32>
    %175 = arith.addf %164, %167 : vector<8x256xf32>
    %176 = arith.negf %175 : vector<8x256xf32>
    %177 = math.exp %176 : vector<8x256xf32>
    %cst_47 = arith.constant 1.000000e+00 : f32
    %178 = vector.broadcast %cst_47 : f32 to vector<8x256xf32>
    %179 = arith.addf %178, %177 : vector<8x256xf32>
    %180 = arith.divf %178, %179 : vector<8x256xf32>
    %181 = arith.mulf %174, %168 : vector<8x256xf32>
    %182 = arith.addf %165, %181 : vector<8x256xf32>
    %183 = math.tanh %182 : vector<8x256xf32>
    %cst_48 = arith.constant 1.000000e+00 : f32
    %184 = vector.broadcast %cst_48 : f32 to vector<8x256xf32>
    %185 = arith.subf %184, %180 : vector<8x256xf32>
    %186 = arith.mulf %185, %183 : vector<8x256xf32>
    %187 = arith.mulf %180, %153 : vector<8x256xf32>
    %188 = arith.addf %186, %187 : vector<8x256xf32>
    %189 = arith.index_cast %157 : i32 to index
    %c0_49 = arith.constant 0 : index
    %190 = vector.load %arg16[%189, %c0_49] : memref<64x256xf32, #tpu.memory_space<vmem>>, vector<8x256xf32>
    tpu.vector_store %arg16[%189, %c0_49], %188 {strides = array<i32>} : memref<64x256xf32, #tpu.memory_space<vmem>>, vector<8x256xf32>,
    %c5_i32 = arith.constant 5 : i32
    %c8_i32_50 = arith.constant 8 : i32
    %191 = arith.muli %c5_i32, %c8_i32_50 : i32
    %192 = tpu.assume_multiple %191, 8 : i32
    %193 = arith.index_cast %192 : i32 to index
    %c0_51 = arith.constant 0 : index
    %194 = vector.load %arg14[%193, %c0_51] : memref<64x768xf32, #tpu.memory_space<vmem>>, vector<8x768xf32>
    %195 = arith.truncf %188 : vector<8x256xf32> to vector<8x256xbf16>
    %cst_52 = arith.constant dense<0.000000e+00> : vector<8x768xf32>
    %196 = tpu.matmul %195, %0, %cst_52 {dimension_numbers = #tpu.dot_dimension_numbers<[1], [0], [0], [1], [0, 0, 1, 1], [], []>} : vector<8x256xbf16>, vector<256x768xbf16>, vector<8x768xf32> -> vector<8x768xf32>
    %197 = arith.addf %196, %4 : vector<8x768xf32>
    %198 = vector.extract_strided_slice %194 {offsets = [0, 0], sizes = [8, 256], strides = [1, 1]} : vector<8x768xf32> to vector<8x256xf32>
    %199 = vector.extract_strided_slice %194 {offsets = [0, 256], sizes = [8, 256], strides = [1, 1]} : vector<8x768xf32> to vector<8x256xf32>
    %200 = vector.extract_strided_slice %194 {offsets = [0, 512], sizes = [8, 256], strides = [1, 1]} : vector<8x768xf32> to vector<8x256xf32>
    %201 = vector.extract_strided_slice %197 {offsets = [0, 0], sizes = [8, 256], strides = [1, 1]} : vector<8x768xf32> to vector<8x256xf32>
    %202 = vector.extract_strided_slice %197 {offsets = [0, 256], sizes = [8, 256], strides = [1, 1]} : vector<8x768xf32> to vector<8x256xf32>
    %203 = vector.extract_strided_slice %197 {offsets = [0, 512], sizes = [8, 256], strides = [1, 1]} : vector<8x768xf32> to vector<8x256xf32>
    %204 = arith.addf %198, %201 : vector<8x256xf32>
    %205 = arith.negf %204 : vector<8x256xf32>
    %206 = math.exp %205 : vector<8x256xf32>
    %cst_53 = arith.constant 1.000000e+00 : f32
    %207 = vector.broadcast %cst_53 : f32 to vector<8x256xf32>
    %208 = arith.addf %207, %206 : vector<8x256xf32>
    %209 = arith.divf %207, %208 : vector<8x256xf32>
    %210 = arith.addf %199, %202 : vector<8x256xf32>
    %211 = arith.negf %210 : vector<8x256xf32>
    %212 = math.exp %211 : vector<8x256xf32>
    %cst_54 = arith.constant 1.000000e+00 : f32
    %213 = vector.broadcast %cst_54 : f32 to vector<8x256xf32>
    %214 = arith.addf %213, %212 : vector<8x256xf32>
    %215 = arith.divf %213, %214 : vector<8x256xf32>
    %216 = arith.mulf %209, %203 : vector<8x256xf32>
    %217 = arith.addf %200, %216 : vector<8x256xf32>
    %218 = math.tanh %217 : vector<8x256xf32>
    %cst_55 = arith.constant 1.000000e+00 : f32
    %219 = vector.broadcast %cst_55 : f32 to vector<8x256xf32>
    %220 = arith.subf %219, %215 : vector<8x256xf32>
    %221 = arith.mulf %220, %218 : vector<8x256xf32>
    %222 = arith.mulf %215, %188 : vector<8x256xf32>
    %223 = arith.addf %221, %222 : vector<8x256xf32>
    %224 = arith.index_cast %192 : i32 to index
    %c0_56 = arith.constant 0 : index
    %225 = vector.load %arg16[%224, %c0_56] : memref<64x256xf32, #tpu.memory_space<vmem>>, vector<8x256xf32>
    tpu.vector_store %arg16[%224, %c0_56], %223 {strides = array<i32>} : memref<64x256xf32, #tpu.memory_space<vmem>>, vector<8x256xf32>,
    %c6_i32 = arith.constant 6 : i32
    %c8_i32_57 = arith.constant 8 : i32
    %226 = arith.muli %c6_i32, %c8_i32_57 : i32
    %227 = tpu.assume_multiple %226, 8 : i32
    %228 = arith.index_cast %227 : i32 to index
    %c0_58 = arith.constant 0 : index
    %229 = vector.load %arg14[%228, %c0_58] : memref<64x768xf32, #tpu.memory_space<vmem>>, vector<8x768xf32>
    %230 = arith.truncf %223 : vector<8x256xf32> to vector<8x256xbf16>
    %cst_59 = arith.constant dense<0.000000e+00> : vector<8x768xf32>
    %231 = tpu.matmul %230, %0, %cst_59 {dimension_numbers = #tpu.dot_dimension_numbers<[1], [0], [0], [1], [0, 0, 1, 1], [], []>} : vector<8x256xbf16>, vector<256x768xbf16>, vector<8x768xf32> -> vector<8x768xf32>
    %232 = arith.addf %231, %4 : vector<8x768xf32>
    %233 = vector.extract_strided_slice %229 {offsets = [0, 0], sizes = [8, 256], strides = [1, 1]} : vector<8x768xf32> to vector<8x256xf32>
    %234 = vector.extract_strided_slice %229 {offsets = [0, 256], sizes = [8, 256], strides = [1, 1]} : vector<8x768xf32> to vector<8x256xf32>
    %235 = vector.extract_strided_slice %229 {offsets = [0, 512], sizes = [8, 256], strides = [1, 1]} : vector<8x768xf32> to vector<8x256xf32>
    %236 = vector.extract_strided_slice %232 {offsets = [0, 0], sizes = [8, 256], strides = [1, 1]} : vector<8x768xf32> to vector<8x256xf32>
    %237 = vector.extract_strided_slice %232 {offsets = [0, 256], sizes = [8, 256], strides = [1, 1]} : vector<8x768xf32> to vector<8x256xf32>
    %238 = vector.extract_strided_slice %232 {offsets = [0, 512], sizes = [8, 256], strides = [1, 1]} : vector<8x768xf32> to vector<8x256xf32>
    %239 = arith.addf %233, %236 : vector<8x256xf32>
    %240 = arith.negf %239 : vector<8x256xf32>
    %241 = math.exp %240 : vector<8x256xf32>
    %cst_60 = arith.constant 1.000000e+00 : f32
    %242 = vector.broadcast %cst_60 : f32 to vector<8x256xf32>
    %243 = arith.addf %242, %241 : vector<8x256xf32>
    %244 = arith.divf %242, %243 : vector<8x256xf32>
    %245 = arith.addf %234, %237 : vector<8x256xf32>
    %246 = arith.negf %245 : vector<8x256xf32>
    %247 = math.exp %246 : vector<8x256xf32>
    %cst_61 = arith.constant 1.000000e+00 : f32
    %248 = vector.broadcast %cst_61 : f32 to vector<8x256xf32>
    %249 = arith.addf %248, %247 : vector<8x256xf32>
    %250 = arith.divf %248, %249 : vector<8x256xf32>
    %251 = arith.mulf %244, %238 : vector<8x256xf32>
    %252 = arith.addf %235, %251 : vector<8x256xf32>
    %253 = math.tanh %252 : vector<8x256xf32>
    %cst_62 = arith.constant 1.000000e+00 : f32
    %254 = vector.broadcast %cst_62 : f32 to vector<8x256xf32>
    %255 = arith.subf %254, %250 : vector<8x256xf32>
    %256 = arith.mulf %255, %253 : vector<8x256xf32>
    %257 = arith.mulf %250, %223 : vector<8x256xf32>
    %258 = arith.addf %256, %257 : vector<8x256xf32>
    %259 = arith.index_cast %227 : i32 to index
    %c0_63 = arith.constant 0 : index
    %260 = vector.load %arg16[%259, %c0_63] : memref<64x256xf32, #tpu.memory_space<vmem>>, vector<8x256xf32>
    tpu.vector_store %arg16[%259, %c0_63], %258 {strides = array<i32>} : memref<64x256xf32, #tpu.memory_space<vmem>>, vector<8x256xf32>,
    %c7_i32 = arith.constant 7 : i32
    %c8_i32_64 = arith.constant 8 : i32
    %261 = arith.muli %c7_i32, %c8_i32_64 : i32
    %262 = tpu.assume_multiple %261, 8 : i32
    %263 = arith.index_cast %262 : i32 to index
    %c0_65 = arith.constant 0 : index
    %264 = vector.load %arg14[%263, %c0_65] : memref<64x768xf32, #tpu.memory_space<vmem>>, vector<8x768xf32>
    %265 = arith.truncf %258 : vector<8x256xf32> to vector<8x256xbf16>
    %cst_66 = arith.constant dense<0.000000e+00> : vector<8x768xf32>
    %266 = tpu.matmul %265, %0, %cst_66 {dimension_numbers = #tpu.dot_dimension_numbers<[1], [0], [0], [1], [0, 0, 1, 1], [], []>} : vector<8x256xbf16>, vector<256x768xbf16>, vector<8x768xf32> -> vector<8x768xf32>
    %267 = arith.addf %266, %4 : vector<8x768xf32>
    %268 = vector.extract_strided_slice %264 {offsets = [0, 0], sizes = [8, 256], strides = [1, 1]} : vector<8x768xf32> to vector<8x256xf32>
    %269 = vector.extract_strided_slice %264 {offsets = [0, 256], sizes = [8, 256], strides = [1, 1]} : vector<8x768xf32> to vector<8x256xf32>
    %270 = vector.extract_strided_slice %264 {offsets = [0, 512], sizes = [8, 256], strides = [1, 1]} : vector<8x768xf32> to vector<8x256xf32>
    %271 = vector.extract_strided_slice %267 {offsets = [0, 0], sizes = [8, 256], strides = [1, 1]} : vector<8x768xf32> to vector<8x256xf32>
    %272 = vector.extract_strided_slice %267 {offsets = [0, 256], sizes = [8, 256], strides = [1, 1]} : vector<8x768xf32> to vector<8x256xf32>
    %273 = vector.extract_strided_slice %267 {offsets = [0, 512], sizes = [8, 256], strides = [1, 1]} : vector<8x768xf32> to vector<8x256xf32>
    %274 = arith.addf %268, %271 : vector<8x256xf32>
    %275 = arith.negf %274 : vector<8x256xf32>
    %276 = math.exp %275 : vector<8x256xf32>
    %cst_67 = arith.constant 1.000000e+00 : f32
    %277 = vector.broadcast %cst_67 : f32 to vector<8x256xf32>
    %278 = arith.addf %277, %276 : vector<8x256xf32>
    %279 = arith.divf %277, %278 : vector<8x256xf32>
    %280 = arith.addf %269, %272 : vector<8x256xf32>
    %281 = arith.negf %280 : vector<8x256xf32>
    %282 = math.exp %281 : vector<8x256xf32>
    %cst_68 = arith.constant 1.000000e+00 : f32
    %283 = vector.broadcast %cst_68 : f32 to vector<8x256xf32>
    %284 = arith.addf %283, %282 : vector<8x256xf32>
    %285 = arith.divf %283, %284 : vector<8x256xf32>
    %286 = arith.mulf %279, %273 : vector<8x256xf32>
    %287 = arith.addf %270, %286 : vector<8x256xf32>
    %288 = math.tanh %287 : vector<8x256xf32>
    %cst_69 = arith.constant 1.000000e+00 : f32
    %289 = vector.broadcast %cst_69 : f32 to vector<8x256xf32>
    %290 = arith.subf %289, %285 : vector<8x256xf32>
    %291 = arith.mulf %290, %288 : vector<8x256xf32>
    %292 = arith.mulf %285, %258 : vector<8x256xf32>
    %293 = arith.addf %291, %292 : vector<8x256xf32>
    %294 = arith.index_cast %262 : i32 to index
    %c0_70 = arith.constant 0 : index
    %295 = vector.load %arg16[%294, %c0_70] : memref<64x256xf32, #tpu.memory_space<vmem>>, vector<8x256xf32>
    tpu.vector_store %arg16[%294, %c0_70], %293 {strides = array<i32>} : memref<64x256xf32, #tpu.memory_space<vmem>>, vector<8x256xf32>,
    %c8_i32_71 = arith.constant 8 : i32
    %c0_72 = arith.constant 0 : index
    %c0_73 = arith.constant 0 : index
    %296 = vector.load %arg16[%c0_72, %c0_73] : memref<64x256xf32, #tpu.memory_space<vmem>>, vector<64x256xf32>
    %297 = arith.truncf %296 : vector<64x256xf32> to vector<64x256xbf16>
    %c0_74 = arith.constant 0 : index
    %c0_75 = arith.constant 0 : index
    %298 = vector.load %arg5[%c0_74, %c0_75] : memref<256x768xbf16, #tpu.memory_space<vmem>>, vector<256x768xbf16>
    %cst_76 = arith.constant dense<0.000000e+00> : vector<64x768xf32>
    %299 = tpu.matmul %297, %298, %cst_76 {dimension_numbers = #tpu.dot_dimension_numbers<[1], [0], [0], [1], [0, 0, 1, 1], [], []>} : vector<64x256xbf16>, vector<256x768xbf16>, vector<64x768xf32> -> vector<64x768xf32>
    %c0_77 = arith.constant 0 : index
    %c0_78 = arith.constant 0 : index
    %300 = vector.load %arg7[%c0_77, %c0_78] : memref<1x768xf32, #tpu.memory_space<vmem>>, vector<1x768xf32>
    %301 = vector.broadcast %300 : vector<1x768xf32> to vector<64x768xf32>
    %302 = arith.addf %299, %301 : vector<64x768xf32>
    %c0_79 = arith.constant 0 : index
    %c0_80 = arith.constant 0 : index
    %303 = vector.load %arg15[%c0_79, %c0_80] : memref<64x768xf32, #tpu.memory_space<vmem>>, vector<64x768xf32>
    tpu.vector_store %arg15[%c0_79, %c0_80], %302 {strides = array<i32>} : memref<64x768xf32, #tpu.memory_space<vmem>>, vector<64x768xf32>,
    %cst_81 = arith.constant 0.000000e+00 : f32
    %304 = vector.broadcast %cst_81 : f32 to vector<8x256xf32>
    %c0_i32_82 = arith.constant 0 : i32
    %c8_i32_83 = arith.constant 8 : i32
    %305 = arith.muli %c0_i32_82, %c8_i32_83 : i32
    %306 = tpu.assume_multiple %305, 8 : i32
    %307 = arith.index_cast %306 : i32 to index
    %c0_84 = arith.constant 0 : index
    %308 = vector.load %arg15[%307, %c0_84] : memref<64x768xf32, #tpu.memory_space<vmem>>, vector<8x768xf32>
    %309 = arith.truncf %8 : vector<8x256xf32> to vector<8x256xbf16>
    %cst_85 = arith.constant dense<0.000000e+00> : vector<8x768xf32>
    %310 = tpu.matmul %309, %1, %cst_85 {dimension_numbers = #tpu.dot_dimension_numbers<[1], [0], [0], [1], [0, 0, 1, 1], [], []>} : vector<8x256xbf16>, vector<256x768xbf16>, vector<8x768xf32> -> vector<8x768xf32>
    %311 = arith.addf %310, %7 : vector<8x768xf32>
    %312 = vector.extract_strided_slice %308 {offsets = [0, 0], sizes = [8, 256], strides = [1, 1]} : vector<8x768xf32> to vector<8x256xf32>
    %313 = vector.extract_strided_slice %308 {offsets = [0, 256], sizes = [8, 256], strides = [1, 1]} : vector<8x768xf32> to vector<8x256xf32>
    %314 = vector.extract_strided_slice %308 {offsets = [0, 512], sizes = [8, 256], strides = [1, 1]} : vector<8x768xf32> to vector<8x256xf32>
    %315 = vector.extract_strided_slice %311 {offsets = [0, 0], sizes = [8, 256], strides = [1, 1]} : vector<8x768xf32> to vector<8x256xf32>
    %316 = vector.extract_strided_slice %311 {offsets = [0, 256], sizes = [8, 256], strides = [1, 1]} : vector<8x768xf32> to vector<8x256xf32>
    %317 = vector.extract_strided_slice %311 {offsets = [0, 512], sizes = [8, 256], strides = [1, 1]} : vector<8x768xf32> to vector<8x256xf32>
    %318 = arith.addf %312, %315 : vector<8x256xf32>
    %319 = arith.negf %318 : vector<8x256xf32>
    %320 = math.exp %319 : vector<8x256xf32>
    %cst_86 = arith.constant 1.000000e+00 : f32
    %321 = vector.broadcast %cst_86 : f32 to vector<8x256xf32>
    %322 = arith.addf %321, %320 : vector<8x256xf32>
    %323 = arith.divf %321, %322 : vector<8x256xf32>
    %324 = arith.addf %313, %316 : vector<8x256xf32>
    %325 = arith.negf %324 : vector<8x256xf32>
    %326 = math.exp %325 : vector<8x256xf32>
    %cst_87 = arith.constant 1.000000e+00 : f32
    %327 = vector.broadcast %cst_87 : f32 to vector<8x256xf32>
    %328 = arith.addf %327, %326 : vector<8x256xf32>
    %329 = arith.divf %327, %328 : vector<8x256xf32>
    %330 = arith.mulf %323, %317 : vector<8x256xf32>
    %331 = arith.addf %314, %330 : vector<8x256xf32>
    %332 = math.tanh %331 : vector<8x256xf32>
    %cst_88 = arith.constant 1.000000e+00 : f32
    %333 = vector.broadcast %cst_88 : f32 to vector<8x256xf32>
    %334 = arith.subf %333, %329 : vector<8x256xf32>
    %335 = arith.mulf %334, %332 : vector<8x256xf32>
    %336 = arith.mulf %329, %8 : vector<8x256xf32>
    %337 = arith.addf %335, %336 : vector<8x256xf32>
    %338 = arith.addf %304, %337 : vector<8x256xf32>
    %c1_i32_89 = arith.constant 1 : i32
    %c8_i32_90 = arith.constant 8 : i32
    %339 = arith.muli %c1_i32_89, %c8_i32_90 : i32
    %340 = tpu.assume_multiple %339, 8 : i32
    %341 = arith.index_cast %340 : i32 to index
    %c0_91 = arith.constant 0 : index
    %342 = vector.load %arg15[%341, %c0_91] : memref<64x768xf32, #tpu.memory_space<vmem>>, vector<8x768xf32>
    %343 = arith.truncf %337 : vector<8x256xf32> to vector<8x256xbf16>
    %cst_92 = arith.constant dense<0.000000e+00> : vector<8x768xf32>
    %344 = tpu.matmul %343, %1, %cst_92 {dimension_numbers = #tpu.dot_dimension_numbers<[1], [0], [0], [1], [0, 0, 1, 1], [], []>} : vector<8x256xbf16>, vector<256x768xbf16>, vector<8x768xf32> -> vector<8x768xf32>
    %345 = arith.addf %344, %7 : vector<8x768xf32>
    %346 = vector.extract_strided_slice %342 {offsets = [0, 0], sizes = [8, 256], strides = [1, 1]} : vector<8x768xf32> to vector<8x256xf32>
    %347 = vector.extract_strided_slice %342 {offsets = [0, 256], sizes = [8, 256], strides = [1, 1]} : vector<8x768xf32> to vector<8x256xf32>
    %348 = vector.extract_strided_slice %342 {offsets = [0, 512], sizes = [8, 256], strides = [1, 1]} : vector<8x768xf32> to vector<8x256xf32>
    %349 = vector.extract_strided_slice %345 {offsets = [0, 0], sizes = [8, 256], strides = [1, 1]} : vector<8x768xf32> to vector<8x256xf32>
    %350 = vector.extract_strided_slice %345 {offsets = [0, 256], sizes = [8, 256], strides = [1, 1]} : vector<8x768xf32> to vector<8x256xf32>
    %351 = vector.extract_strided_slice %345 {offsets = [0, 512], sizes = [8, 256], strides = [1, 1]} : vector<8x768xf32> to vector<8x256xf32>
    %352 = arith.addf %346, %349 : vector<8x256xf32>
    %353 = arith.negf %352 : vector<8x256xf32>
    %354 = math.exp %353 : vector<8x256xf32>
    %cst_93 = arith.constant 1.000000e+00 : f32
    %355 = vector.broadcast %cst_93 : f32 to vector<8x256xf32>
    %356 = arith.addf %355, %354 : vector<8x256xf32>
    %357 = arith.divf %355, %356 : vector<8x256xf32>
    %358 = arith.addf %347, %350 : vector<8x256xf32>
    %359 = arith.negf %358 : vector<8x256xf32>
    %360 = math.exp %359 : vector<8x256xf32>
    %cst_94 = arith.constant 1.000000e+00 : f32
    %361 = vector.broadcast %cst_94 : f32 to vector<8x256xf32>
    %362 = arith.addf %361, %360 : vector<8x256xf32>
    %363 = arith.divf %361, %362 : vector<8x256xf32>
    %364 = arith.mulf %357, %351 : vector<8x256xf32>
    %365 = arith.addf %348, %364 : vector<8x256xf32>
    %366 = math.tanh %365 : vector<8x256xf32>
    %cst_95 = arith.constant 1.000000e+00 : f32
    %367 = vector.broadcast %cst_95 : f32 to vector<8x256xf32>
    %368 = arith.subf %367, %363 : vector<8x256xf32>
    %369 = arith.mulf %368, %366 : vector<8x256xf32>
    %370 = arith.mulf %363, %337 : vector<8x256xf32>
    %371 = arith.addf %369, %370 : vector<8x256xf32>
    %372 = arith.addf %338, %371 : vector<8x256xf32>
    %c2_i32_96 = arith.constant 2 : i32
    %c8_i32_97 = arith.constant 8 : i32
    %373 = arith.muli %c2_i32_96, %c8_i32_97 : i32
    %374 = tpu.assume_multiple %373, 8 : i32
    %375 = arith.index_cast %374 : i32 to index
    %c0_98 = arith.constant 0 : index
    %376 = vector.load %arg15[%375, %c0_98] : memref<64x768xf32, #tpu.memory_space<vmem>>, vector<8x768xf32>
    %377 = arith.truncf %371 : vector<8x256xf32> to vector<8x256xbf16>
    %cst_99 = arith.constant dense<0.000000e+00> : vector<8x768xf32>
    %378 = tpu.matmul %377, %1, %cst_99 {dimension_numbers = #tpu.dot_dimension_numbers<[1], [0], [0], [1], [0, 0, 1, 1], [], []>} : vector<8x256xbf16>, vector<256x768xbf16>, vector<8x768xf32> -> vector<8x768xf32>
    %379 = arith.addf %378, %7 : vector<8x768xf32>
    %380 = vector.extract_strided_slice %376 {offsets = [0, 0], sizes = [8, 256], strides = [1, 1]} : vector<8x768xf32> to vector<8x256xf32>
    %381 = vector.extract_strided_slice %376 {offsets = [0, 256], sizes = [8, 256], strides = [1, 1]} : vector<8x768xf32> to vector<8x256xf32>
    %382 = vector.extract_strided_slice %376 {offsets = [0, 512], sizes = [8, 256], strides = [1, 1]} : vector<8x768xf32> to vector<8x256xf32>
    %383 = vector.extract_strided_slice %379 {offsets = [0, 0], sizes = [8, 256], strides = [1, 1]} : vector<8x768xf32> to vector<8x256xf32>
    %384 = vector.extract_strided_slice %379 {offsets = [0, 256], sizes = [8, 256], strides = [1, 1]} : vector<8x768xf32> to vector<8x256xf32>
    %385 = vector.extract_strided_slice %379 {offsets = [0, 512], sizes = [8, 256], strides = [1, 1]} : vector<8x768xf32> to vector<8x256xf32>
    %386 = arith.addf %380, %383 : vector<8x256xf32>
    %387 = arith.negf %386 : vector<8x256xf32>
    %388 = math.exp %387 : vector<8x256xf32>
    %cst_100 = arith.constant 1.000000e+00 : f32
    %389 = vector.broadcast %cst_100 : f32 to vector<8x256xf32>
    %390 = arith.addf %389, %388 : vector<8x256xf32>
    %391 = arith.divf %389, %390 : vector<8x256xf32>
    %392 = arith.addf %381, %384 : vector<8x256xf32>
    %393 = arith.negf %392 : vector<8x256xf32>
    %394 = math.exp %393 : vector<8x256xf32>
    %cst_101 = arith.constant 1.000000e+00 : f32
    %395 = vector.broadcast %cst_101 : f32 to vector<8x256xf32>
    %396 = arith.addf %395, %394 : vector<8x256xf32>
    %397 = arith.divf %395, %396 : vector<8x256xf32>
    %398 = arith.mulf %391, %385 : vector<8x256xf32>
    %399 = arith.addf %382, %398 : vector<8x256xf32>
    %400 = math.tanh %399 : vector<8x256xf32>
    %cst_102 = arith.constant 1.000000e+00 : f32
    %401 = vector.broadcast %cst_102 : f32 to vector<8x256xf32>
    %402 = arith.subf %401, %397 : vector<8x256xf32>
    %403 = arith.mulf %402, %400 : vector<8x256xf32>
    %404 = arith.mulf %397, %371 : vector<8x256xf32>
    %405 = arith.addf %403, %404 : vector<8x256xf32>
    %406 = arith.addf %372, %405 : vector<8x256xf32>
    %c3_i32_103 = arith.constant 3 : i32
    %c8_i32_104 = arith.constant 8 : i32
    %407 = arith.muli %c3_i32_103, %c8_i32_104 : i32
    %408 = tpu.assume_multiple %407, 8 : i32
    %409 = arith.index_cast %408 : i32 to index
    %c0_105 = arith.constant 0 : index
    %410 = vector.load %arg15[%409, %c0_105] : memref<64x768xf32, #tpu.memory_space<vmem>>, vector<8x768xf32>
    %411 = arith.truncf %405 : vector<8x256xf32> to vector<8x256xbf16>
    %cst_106 = arith.constant dense<0.000000e+00> : vector<8x768xf32>
    %412 = tpu.matmul %411, %1, %cst_106 {dimension_numbers = #tpu.dot_dimension_numbers<[1], [0], [0], [1], [0, 0, 1, 1], [], []>} : vector<8x256xbf16>, vector<256x768xbf16>, vector<8x768xf32> -> vector<8x768xf32>
    %413 = arith.addf %412, %7 : vector<8x768xf32>
    %414 = vector.extract_strided_slice %410 {offsets = [0, 0], sizes = [8, 256], strides = [1, 1]} : vector<8x768xf32> to vector<8x256xf32>
    %415 = vector.extract_strided_slice %410 {offsets = [0, 256], sizes = [8, 256], strides = [1, 1]} : vector<8x768xf32> to vector<8x256xf32>
    %416 = vector.extract_strided_slice %410 {offsets = [0, 512], sizes = [8, 256], strides = [1, 1]} : vector<8x768xf32> to vector<8x256xf32>
    %417 = vector.extract_strided_slice %413 {offsets = [0, 0], sizes = [8, 256], strides = [1, 1]} : vector<8x768xf32> to vector<8x256xf32>
    %418 = vector.extract_strided_slice %413 {offsets = [0, 256], sizes = [8, 256], strides = [1, 1]} : vector<8x768xf32> to vector<8x256xf32>
    %419 = vector.extract_strided_slice %413 {offsets = [0, 512], sizes = [8, 256], strides = [1, 1]} : vector<8x768xf32> to vector<8x256xf32>
    %420 = arith.addf %414, %417 : vector<8x256xf32>
    %421 = arith.negf %420 : vector<8x256xf32>
    %422 = math.exp %421 : vector<8x256xf32>
    %cst_107 = arith.constant 1.000000e+00 : f32
    %423 = vector.broadcast %cst_107 : f32 to vector<8x256xf32>
    %424 = arith.addf %423, %422 : vector<8x256xf32>
    %425 = arith.divf %423, %424 : vector<8x256xf32>
    %426 = arith.addf %415, %418 : vector<8x256xf32>
    %427 = arith.negf %426 : vector<8x256xf32>
    %428 = math.exp %427 : vector<8x256xf32>
    %cst_108 = arith.constant 1.000000e+00 : f32
    %429 = vector.broadcast %cst_108 : f32 to vector<8x256xf32>
    %430 = arith.addf %429, %428 : vector<8x256xf32>
    %431 = arith.divf %429, %430 : vector<8x256xf32>
    %432 = arith.mulf %425, %419 : vector<8x256xf32>
    %433 = arith.addf %416, %432 : vector<8x256xf32>
    %434 = math.tanh %433 : vector<8x256xf32>
    %cst_109 = arith.constant 1.000000e+00 : f32
    %435 = vector.broadcast %cst_109 : f32 to vector<8x256xf32>
    %436 = arith.subf %435, %431 : vector<8x256xf32>
    %437 = arith.mulf %436, %434 : vector<8x256xf32>
    %438 = arith.mulf %431, %405 : vector<8x256xf32>
    %439 = arith.addf %437, %438 : vector<8x256xf32>
    %440 = arith.addf %406, %439 : vector<8x256xf32>
    %c4_i32_110 = arith.constant 4 : i32
    %c8_i32_111 = arith.constant 8 : i32
    %441 = arith.muli %c4_i32_110, %c8_i32_111 : i32
    %442 = tpu.assume_multiple %441, 8 : i32
    %443 = arith.index_cast %442 : i32 to index
    %c0_112 = arith.constant 0 : index
    %444 = vector.load %arg15[%443, %c0_112] : memref<64x768xf32, #tpu.memory_space<vmem>>, vector<8x768xf32>
    %445 = arith.truncf %439 : vector<8x256xf32> to vector<8x256xbf16>
    %cst_113 = arith.constant dense<0.000000e+00> : vector<8x768xf32>
    %446 = tpu.matmul %445, %1, %cst_113 {dimension_numbers = #tpu.dot_dimension_numbers<[1], [0], [0], [1], [0, 0, 1, 1], [], []>} : vector<8x256xbf16>, vector<256x768xbf16>, vector<8x768xf32> -> vector<8x768xf32>
    %447 = arith.addf %446, %7 : vector<8x768xf32>
    %448 = vector.extract_strided_slice %444 {offsets = [0, 0], sizes = [8, 256], strides = [1, 1]} : vector<8x768xf32> to vector<8x256xf32>
    %449 = vector.extract_strided_slice %444 {offsets = [0, 256], sizes = [8, 256], strides = [1, 1]} : vector<8x768xf32> to vector<8x256xf32>
    %450 = vector.extract_strided_slice %444 {offsets = [0, 512], sizes = [8, 256], strides = [1, 1]} : vector<8x768xf32> to vector<8x256xf32>
    %451 = vector.extract_strided_slice %447 {offsets = [0, 0], sizes = [8, 256], strides = [1, 1]} : vector<8x768xf32> to vector<8x256xf32>
    %452 = vector.extract_strided_slice %447 {offsets = [0, 256], sizes = [8, 256], strides = [1, 1]} : vector<8x768xf32> to vector<8x256xf32>
    %453 = vector.extract_strided_slice %447 {offsets = [0, 512], sizes = [8, 256], strides = [1, 1]} : vector<8x768xf32> to vector<8x256xf32>
    %454 = arith.addf %448, %451 : vector<8x256xf32>
    %455 = arith.negf %454 : vector<8x256xf32>
    %456 = math.exp %455 : vector<8x256xf32>
    %cst_114 = arith.constant 1.000000e+00 : f32
    %457 = vector.broadcast %cst_114 : f32 to vector<8x256xf32>
    %458 = arith.addf %457, %456 : vector<8x256xf32>
    %459 = arith.divf %457, %458 : vector<8x256xf32>
    %460 = arith.addf %449, %452 : vector<8x256xf32>
    %461 = arith.negf %460 : vector<8x256xf32>
    %462 = math.exp %461 : vector<8x256xf32>
    %cst_115 = arith.constant 1.000000e+00 : f32
    %463 = vector.broadcast %cst_115 : f32 to vector<8x256xf32>
    %464 = arith.addf %463, %462 : vector<8x256xf32>
    %465 = arith.divf %463, %464 : vector<8x256xf32>
    %466 = arith.mulf %459, %453 : vector<8x256xf32>
    %467 = arith.addf %450, %466 : vector<8x256xf32>
    %468 = math.tanh %467 : vector<8x256xf32>
    %cst_116 = arith.constant 1.000000e+00 : f32
    %469 = vector.broadcast %cst_116 : f32 to vector<8x256xf32>
    %470 = arith.subf %469, %465 : vector<8x256xf32>
    %471 = arith.mulf %470, %468 : vector<8x256xf32>
    %472 = arith.mulf %465, %439 : vector<8x256xf32>
    %473 = arith.addf %471, %472 : vector<8x256xf32>
    %474 = arith.addf %440, %473 : vector<8x256xf32>
    %c5_i32_117 = arith.constant 5 : i32
    %c8_i32_118 = arith.constant 8 : i32
    %475 = arith.muli %c5_i32_117, %c8_i32_118 : i32
    %476 = tpu.assume_multiple %475, 8 : i32
    %477 = arith.index_cast %476 : i32 to index
    %c0_119 = arith.constant 0 : index
    %478 = vector.load %arg15[%477, %c0_119] : memref<64x768xf32, #tpu.memory_space<vmem>>, vector<8x768xf32>
    %479 = arith.truncf %473 : vector<8x256xf32> to vector<8x256xbf16>
    %cst_120 = arith.constant dense<0.000000e+00> : vector<8x768xf32>
    %480 = tpu.matmul %479, %1, %cst_120 {dimension_numbers = #tpu.dot_dimension_numbers<[1], [0], [0], [1], [0, 0, 1, 1], [], []>} : vector<8x256xbf16>, vector<256x768xbf16>, vector<8x768xf32> -> vector<8x768xf32>
    %481 = arith.addf %480, %7 : vector<8x768xf32>
    %482 = vector.extract_strided_slice %478 {offsets = [0, 0], sizes = [8, 256], strides = [1, 1]} : vector<8x768xf32> to vector<8x256xf32>
    %483 = vector.extract_strided_slice %478 {offsets = [0, 256], sizes = [8, 256], strides = [1, 1]} : vector<8x768xf32> to vector<8x256xf32>
    %484 = vector.extract_strided_slice %478 {offsets = [0, 512], sizes = [8, 256], strides = [1, 1]} : vector<8x768xf32> to vector<8x256xf32>
    %485 = vector.extract_strided_slice %481 {offsets = [0, 0], sizes = [8, 256], strides = [1, 1]} : vector<8x768xf32> to vector<8x256xf32>
    %486 = vector.extract_strided_slice %481 {offsets = [0, 256], sizes = [8, 256], strides = [1, 1]} : vector<8x768xf32> to vector<8x256xf32>
    %487 = vector.extract_strided_slice %481 {offsets = [0, 512], sizes = [8, 256], strides = [1, 1]} : vector<8x768xf32> to vector<8x256xf32>
    %488 = arith.addf %482, %485 : vector<8x256xf32>
    %489 = arith.negf %488 : vector<8x256xf32>
    %490 = math.exp %489 : vector<8x256xf32>
    %cst_121 = arith.constant 1.000000e+00 : f32
    %491 = vector.broadcast %cst_121 : f32 to vector<8x256xf32>
    %492 = arith.addf %491, %490 : vector<8x256xf32>
    %493 = arith.divf %491, %492 : vector<8x256xf32>
    %494 = arith.addf %483, %486 : vector<8x256xf32>
    %495 = arith.negf %494 : vector<8x256xf32>
    %496 = math.exp %495 : vector<8x256xf32>
    %cst_122 = arith.constant 1.000000e+00 : f32
    %497 = vector.broadcast %cst_122 : f32 to vector<8x256xf32>
    %498 = arith.addf %497, %496 : vector<8x256xf32>
    %499 = arith.divf %497, %498 : vector<8x256xf32>
    %500 = arith.mulf %493, %487 : vector<8x256xf32>
    %501 = arith.addf %484, %500 : vector<8x256xf32>
    %502 = math.tanh %501 : vector<8x256xf32>
    %cst_123 = arith.constant 1.000000e+00 : f32
    %503 = vector.broadcast %cst_123 : f32 to vector<8x256xf32>
    %504 = arith.subf %503, %499 : vector<8x256xf32>
    %505 = arith.mulf %504, %502 : vector<8x256xf32>
    %506 = arith.mulf %499, %473 : vector<8x256xf32>
    %507 = arith.addf %505, %506 : vector<8x256xf32>
    %508 = arith.addf %474, %507 : vector<8x256xf32>
    %c6_i32_124 = arith.constant 6 : i32
    %c8_i32_125 = arith.constant 8 : i32
    %509 = arith.muli %c6_i32_124, %c8_i32_125 : i32
    %510 = tpu.assume_multiple %509, 8 : i32
    %511 = arith.index_cast %510 : i32 to index
    %c0_126 = arith.constant 0 : index
    %512 = vector.load %arg15[%511, %c0_126] : memref<64x768xf32, #tpu.memory_space<vmem>>, vector<8x768xf32>
    %513 = arith.truncf %507 : vector<8x256xf32> to vector<8x256xbf16>
    %cst_127 = arith.constant dense<0.000000e+00> : vector<8x768xf32>
    %514 = tpu.matmul %513, %1, %cst_127 {dimension_numbers = #tpu.dot_dimension_numbers<[1], [0], [0], [1], [0, 0, 1, 1], [], []>} : vector<8x256xbf16>, vector<256x768xbf16>, vector<8x768xf32> -> vector<8x768xf32>
    %515 = arith.addf %514, %7 : vector<8x768xf32>
    %516 = vector.extract_strided_slice %512 {offsets = [0, 0], sizes = [8, 256], strides = [1, 1]} : vector<8x768xf32> to vector<8x256xf32>
    %517 = vector.extract_strided_slice %512 {offsets = [0, 256], sizes = [8, 256], strides = [1, 1]} : vector<8x768xf32> to vector<8x256xf32>
    %518 = vector.extract_strided_slice %512 {offsets = [0, 512], sizes = [8, 256], strides = [1, 1]} : vector<8x768xf32> to vector<8x256xf32>
    %519 = vector.extract_strided_slice %515 {offsets = [0, 0], sizes = [8, 256], strides = [1, 1]} : vector<8x768xf32> to vector<8x256xf32>
    %520 = vector.extract_strided_slice %515 {offsets = [0, 256], sizes = [8, 256], strides = [1, 1]} : vector<8x768xf32> to vector<8x256xf32>
    %521 = vector.extract_strided_slice %515 {offsets = [0, 512], sizes = [8, 256], strides = [1, 1]} : vector<8x768xf32> to vector<8x256xf32>
    %522 = arith.addf %516, %519 : vector<8x256xf32>
    %523 = arith.negf %522 : vector<8x256xf32>
    %524 = math.exp %523 : vector<8x256xf32>
    %cst_128 = arith.constant 1.000000e+00 : f32
    %525 = vector.broadcast %cst_128 : f32 to vector<8x256xf32>
    %526 = arith.addf %525, %524 : vector<8x256xf32>
    %527 = arith.divf %525, %526 : vector<8x256xf32>
    %528 = arith.addf %517, %520 : vector<8x256xf32>
    %529 = arith.negf %528 : vector<8x256xf32>
    %530 = math.exp %529 : vector<8x256xf32>
    %cst_129 = arith.constant 1.000000e+00 : f32
    %531 = vector.broadcast %cst_129 : f32 to vector<8x256xf32>
    %532 = arith.addf %531, %530 : vector<8x256xf32>
    %533 = arith.divf %531, %532 : vector<8x256xf32>
    %534 = arith.mulf %527, %521 : vector<8x256xf32>
    %535 = arith.addf %518, %534 : vector<8x256xf32>
    %536 = math.tanh %535 : vector<8x256xf32>
    %cst_130 = arith.constant 1.000000e+00 : f32
    %537 = vector.broadcast %cst_130 : f32 to vector<8x256xf32>
    %538 = arith.subf %537, %533 : vector<8x256xf32>
    %539 = arith.mulf %538, %536 : vector<8x256xf32>
    %540 = arith.mulf %533, %507 : vector<8x256xf32>
    %541 = arith.addf %539, %540 : vector<8x256xf32>
    %542 = arith.addf %508, %541 : vector<8x256xf32>
    %c7_i32_131 = arith.constant 7 : i32
    %c8_i32_132 = arith.constant 8 : i32
    %543 = arith.muli %c7_i32_131, %c8_i32_132 : i32
    %544 = tpu.assume_multiple %543, 8 : i32
    %545 = arith.index_cast %544 : i32 to index
    %c0_133 = arith.constant 0 : index
    %546 = vector.load %arg15[%545, %c0_133] : memref<64x768xf32, #tpu.memory_space<vmem>>, vector<8x768xf32>
    %547 = arith.truncf %541 : vector<8x256xf32> to vector<8x256xbf16>
    %cst_134 = arith.constant dense<0.000000e+00> : vector<8x768xf32>
    %548 = tpu.matmul %547, %1, %cst_134 {dimension_numbers = #tpu.dot_dimension_numbers<[1], [0], [0], [1], [0, 0, 1, 1], [], []>} : vector<8x256xbf16>, vector<256x768xbf16>, vector<8x768xf32> -> vector<8x768xf32>
    %549 = arith.addf %548, %7 : vector<8x768xf32>
    %550 = vector.extract_strided_slice %546 {offsets = [0, 0], sizes = [8, 256], strides = [1, 1]} : vector<8x768xf32> to vector<8x256xf32>
    %551 = vector.extract_strided_slice %546 {offsets = [0, 256], sizes = [8, 256], strides = [1, 1]} : vector<8x768xf32> to vector<8x256xf32>
    %552 = vector.extract_strided_slice %546 {offsets = [0, 512], sizes = [8, 256], strides = [1, 1]} : vector<8x768xf32> to vector<8x256xf32>
    %553 = vector.extract_strided_slice %549 {offsets = [0, 0], sizes = [8, 256], strides = [1, 1]} : vector<8x768xf32> to vector<8x256xf32>
    %554 = vector.extract_strided_slice %549 {offsets = [0, 256], sizes = [8, 256], strides = [1, 1]} : vector<8x768xf32> to vector<8x256xf32>
    %555 = vector.extract_strided_slice %549 {offsets = [0, 512], sizes = [8, 256], strides = [1, 1]} : vector<8x768xf32> to vector<8x256xf32>
    %556 = arith.addf %550, %553 : vector<8x256xf32>
    %557 = arith.negf %556 : vector<8x256xf32>
    %558 = math.exp %557 : vector<8x256xf32>
    %cst_135 = arith.constant 1.000000e+00 : f32
    %559 = vector.broadcast %cst_135 : f32 to vector<8x256xf32>
    %560 = arith.addf %559, %558 : vector<8x256xf32>
    %561 = arith.divf %559, %560 : vector<8x256xf32>
    %562 = arith.addf %551, %554 : vector<8x256xf32>
    %563 = arith.negf %562 : vector<8x256xf32>
    %564 = math.exp %563 : vector<8x256xf32>
    %cst_136 = arith.constant 1.000000e+00 : f32
    %565 = vector.broadcast %cst_136 : f32 to vector<8x256xf32>
    %566 = arith.addf %565, %564 : vector<8x256xf32>
    %567 = arith.divf %565, %566 : vector<8x256xf32>
    %568 = arith.mulf %561, %555 : vector<8x256xf32>
    %569 = arith.addf %552, %568 : vector<8x256xf32>
    %570 = math.tanh %569 : vector<8x256xf32>
    %cst_137 = arith.constant 1.000000e+00 : f32
    %571 = vector.broadcast %cst_137 : f32 to vector<8x256xf32>
    %572 = arith.subf %571, %567 : vector<8x256xf32>
    %573 = arith.mulf %572, %570 : vector<8x256xf32>
    %574 = arith.mulf %567, %541 : vector<8x256xf32>
    %575 = arith.addf %573, %574 : vector<8x256xf32>
    %576 = arith.addf %542, %575 : vector<8x256xf32>
    %c8_i32_138 = arith.constant 8 : i32
    %577 = arith.truncf %576 : vector<8x256xf32> to vector<8x256xbf16>
    %c0_139 = arith.constant 0 : index
    %c0_140 = arith.constant 0 : index
    %578 = vector.load %arg9[%c0_139, %c0_140] : memref<256x256xbf16, #tpu.memory_space<vmem>>, vector<256x256xbf16>
    %cst_141 = arith.constant dense<0.000000e+00> : vector<8x256xf32>
    %579 = tpu.matmul %577, %578, %cst_141 {dimension_numbers = #tpu.dot_dimension_numbers<[1], [0], [0], [1], [0, 0, 1, 1], [], []>} : vector<8x256xbf16>, vector<256x256xbf16>, vector<8x256xf32> -> vector<8x256xf32>
    %c0_142 = arith.constant 0 : index
    %c0_143 = arith.constant 0 : index
    %580 = vector.load %arg10[%c0_142, %c0_143] : memref<1x256xf32, #tpu.memory_space<vmem>>, vector<1x256xf32>
    %581 = vector.broadcast %580 : vector<1x256xf32> to vector<8x256xf32>
    %582 = arith.addf %579, %581 : vector<8x256xf32>
    %cst_144 = arith.constant 0.000000e+00 : f32
    %583 = vector.broadcast %cst_144 : f32 to vector<8x256xf32>
    %584 = arith.maximumf %582, %583 : vector<8x256xf32>
    %585 = arith.truncf %584 : vector<8x256xf32> to vector<8x256xbf16>
    %c0_145 = arith.constant 0 : index
    %c0_146 = arith.constant 0 : index
    %586 = vector.load %arg11[%c0_145, %c0_146] : memref<256x1xbf16, #tpu.memory_space<vmem>>, vector<256x1xbf16>
    %cst_147 = arith.constant dense<0.000000e+00> : vector<8x1xf32>
    %587 = tpu.matmul %585, %586, %cst_147 {dimension_numbers = #tpu.dot_dimension_numbers<[1], [0], [0], [1], [0, 0, 1, 1], [], []>} : vector<8x256xbf16>, vector<256x1xbf16>, vector<8x1xf32> -> vector<8x1xf32>
    %c0_148 = arith.constant 0 : index
    %c0_149 = arith.constant 0 : index
    %588 = vector.load %arg12[%c0_148, %c0_149] : memref<1x1xf32, #tpu.memory_space<vmem>>, vector<1x1xf32>
    %589 = vector.broadcast %588 : vector<1x1xf32> to vector<8x1xf32>
    %590 = arith.addf %587, %589 : vector<8x1xf32>
    %cst_150 = arith.constant 0.000000e+00 : f32
    %591 = vector.broadcast %cst_150 : f32 to vector<8x1xf32>
    %592 = arith.maximumf %590, %591 : vector<8x1xf32>
    %c0_151 = arith.constant 0 : index
    %c0_152 = arith.constant 0 : index
    %593 = vector.load %arg13[%c0_151, %c0_152] : memref<8x1xf32, #tpu.memory_space<vmem>>, vector<8x1xf32>
    tpu.vector_store %arg13[%c0_151, %c0_152], %592 {strides = array<i32>} : memref<8x1xf32, #tpu.memory_space<vmem>>, vector<8x1xf32>,
    return
  }
}

</mosaic_0001>

<bundles_post_ra>
// kernel: tpu_custom_call.1
= control target key start
LH: loop header
LB: loop body
LE: loop exit
PB: predicated region body
PF: predicated region fallthrough
CT: control target
= control target key end

     0   :  { %s11959_s0 = inlined_call_operand.vmem [shape: bf16[64,256], index: 0, kind: input, shape index: {}]   ;;  %s11960_s1 = inlined_call_operand.hbm [shape: bf16[256,768], index: 1, kind: input, shape index: {}]   ;;  %s11961_s2 = inlined_call_operand.hbm [shape: bf16[256,768], index: 2, kind: input, shape index: {}]   ;;  %s11962_s3 = inlined_call_operand.vmem [shape: f32[1,768], index: 3, kind: input, shape index: {}]   ;;  %s11963_s4 = inlined_call_operand.vmem [shape: f32[1,768], index: 4, kind: input, shape index: {}]   ;;  %s11964_s5 = inlined_call_operand.hbm [shape: bf16[256,768], index: 5, kind: input, shape index: {}]   ;;  %s11965_s6 = inlined_call_operand.hbm [shape: bf16[256,768], index: 6, kind: input, shape index: {}]   ;;  %s11966_s7 = inlined_call_operand.vmem [shape: f32[1,768], index: 7, kind: input, shape index: {}]   ;;  %s11967_s8 = inlined_call_operand.vmem [shape: f32[1,768], index: 8, kind: input, shape index: {}]   ;;  %s11968_s9 = inlined_call_operand.hbm [shape: bf16[256,256], index: 9, kind: input, shape index: {}]   ;;  %s11969_s10 = inlined_call_operand.vmem [shape: f32[1,256], index: 10, kind: input, shape index: {}]   ;;  %s11970_s11 = inlined_call_operand.vmem [shape: bf16[256,1], index: 11, kind: input, shape index: {}]   ;;  %s11971_s12 = inlined_call_operand.<no memory space> [shape: f32[1,1], index: 12, kind: input, shape index: {}]   ;;  %s11972_s13 = inlined_call_operand.vmem [shape: f32[8,1], index: 13, kind: output, shape index: {}]  }
   0x1   :  { %v18_v0 = vstv %s11971_s12 }
   0x2   :  { %19 = vst [vmem:[#allocation5] sm:$0x1] %v18_v0 }
   0x3   :  { %20 = vsyncpa [#allocation7], 0 }
   0x4   :  { %21 = vsyncpa [#allocation9], 0 }
   0x5   :  { %22 = vsyncpa [#allocation12], 0  ;;  %s8466_s27 = smov [#allocation8]   ;;  %s8467_s29 = smov [#allocation11]  }
   0x6   :  { %s42_s28 = sshll.u32 %s8466_s27, 4  ;;  %s70_s30 = sshll.u32 %s8467_s29, 4  ;;  %s43_s28 = int_to_ptr.vmem [resolvable:$true] %s42_s28  ;;  %s8549_s30 = int_to_ptr.vmem [resolvable:$true] %s70_s30 }
   0x7   :  { %s8350_s16 = scalar_lea.hbm %s11961_s2, 12288 }
   0x8   :  { %p8351_p0 = scmp.ne.s32.totalorder %s11961_s2, %s8350_s16  ;;  %p8354_p1 = scmp.lt.u32.totalorder %s8350_s16, %s11961_s2 }
   0xa   :  { %p8356_p2 = pnand %p8354_p1, %p8351_p0 }
   0xc   :  { %8359 = shalt.err (!%p8356_p2)
}
   0xd   :  { %s8360_s20 = scalar_lea.vmem %s43_s28, 12288  ;;  %p8365_p4 = scmp.lt.s32.totalorder %s43_s28, %s43_s28 }
   0xe   :  { %p8361_p3 = scmp.ne.s32.totalorder %s43_s28, %s8360_s20  ;;  %p8366_p5 = scmp.lt.s32.totalorder %s8360_s20, %s8360_s20 }
  0x10   :  { %p8367_p6 = por %p8366_p5, %p8365_p4 }
  0x12   :  { %p8368_p7 = pnand %p8367_p6, %p8361_p3 }
  0x14   :  { %8371 = shalt.err (!%p8368_p7)
}
  0x15   :  { %s8468_s21 = smov 384   ;;  %s8469_s22 = smov 24  }
  0x16   :  { %48 = dma.hbm_to_vmem [thread:$0]  %s11961_s2, 12288, %s43_s28, [#allocation9], %s8468_s21, %s8468_s21, %s8469_s22  }
  0x17   :  { %s8372_s27 = scalar_lea.hbm %s11965_s6, 12288 }
  0x18   :  { %p8373_p8 = scmp.ne.s32.totalorder %s11965_s6, %s8372_s27  ;;  %p8376_p9 = scmp.lt.u32.totalorder %s8372_s27, %s11965_s6 }
  0x1a   :  { %p8378_p10 = pnand %p8376_p9, %p8373_p8 }
  0x1c   :  { %8381 = shalt.err (!%p8378_p10)
}
  0x1d   :  { %s8382_s17 = scalar_lea.vmem %s8549_s30, 12288  ;;  %p8387_p12 = scmp.lt.s32.totalorder %s8549_s30, %s8549_s30 }
  0x1e   :  { %p8383_p11 = scmp.ne.s32.totalorder %s8549_s30, %s8382_s17  ;;  %p8388_p13 = scmp.lt.s32.totalorder %s8382_s17, %s8382_s17 }
  0x20   :  { %p8389_p0 = por %p8388_p13, %p8387_p12 }
  0x22   :  { %p8390_p1 = pnand %p8389_p0, %p8383_p11 }
  0x24   :  { %8393 = shalt.err (!%p8390_p1)
}
  0x25   :  { %76 = dma.hbm_to_vmem [thread:$0]  %s11965_s6, 12288, %s8549_s30, [#allocation12], %s8468_s21, %s8468_s21, %s8469_s22  }
  0x26   :  { %s8470_s18 = smov [#allocation6]   ;;  %s8471_s19 = smov [#allocation10]  }
  0x27   :  { %s30_s12 = sshll.u32 %s8470_s18, 4  ;;  %s58_s20 = sshll.u32 %s8471_s19, 4  ;;  %s31_s12 = int_to_ptr.vmem [resolvable:$true] %s30_s12  ;;  %s8586_s20 = int_to_ptr.vmem [resolvable:$true] %s58_s20 }
  0x28   :  { %s8394_s25 = scalar_lea.hbm %s11960_s1, 12288 }
  0x29   :  { %p8395_p2 = scmp.ne.s32.totalorder %s11960_s1, %s8394_s25  ;;  %p8398_p3 = scmp.lt.u32.totalorder %s8394_s25, %s11960_s1 }
  0x2b   :  { %p8400_p4 = pnand %p8398_p3, %p8395_p2 }
  0x2d   :  { %8403 = shalt.err (!%p8400_p4)
}
  0x2e   :  { %s8404_s6 = scalar_lea.vmem %s31_s12, 12288  ;;  %p8409_p6 = scmp.lt.s32.totalorder %s31_s12, %s31_s12 }
  0x2f   :  { %p8405_p5 = scmp.ne.s32.totalorder %s31_s12, %s8404_s6  ;;  %p8410_p7 = scmp.lt.s32.totalorder %s8404_s6, %s8404_s6 }
  0x31   :  { %p8411_p8 = por %p8410_p7, %p8409_p6 }
  0x33   :  { %p8412_p9 = pnand %p8411_p8, %p8405_p5 }
  0x35   :  { %8415 = shalt.err (!%p8412_p9)
}
  0x36   :  { %36 = dma.hbm_to_vmem [thread:$0]  %s11960_s1, 12288, %s31_s12, [#allocation7], %s8468_s21, %s8468_s21, %s8469_s22  }
  0x37   :  { %s8416_s2 = scalar_lea.hbm %s11964_s5, 12288 }
  0x38   :  { %p8417_p10 = scmp.ne.s32.totalorder %s11964_s5, %s8416_s2  ;;  %p8420_p11 = scmp.lt.u32.totalorder %s8416_s2, %s11964_s5 }
  0x3a   :  { %p8422_p12 = pnand %p8420_p11, %p8417_p10 }
  0x3c   :  { %8425 = shalt.err (!%p8422_p12)
}
  0x3d   :  { %s8426_s24 = scalar_lea.vmem %s8586_s20, 12288  ;;  %p8431_p0 = scmp.lt.s32.totalorder %s8586_s20, %s8586_s20 }
  0x3e   :  { %p8427_p13 = scmp.ne.s32.totalorder %s8586_s20, %s8426_s24  ;;  %p8432_p1 = scmp.lt.s32.totalorder %s8426_s24, %s8426_s24 }
  0x40   :  { %p8433_p2 = por %p8432_p1, %p8431_p0 }
  0x42   :  { %p8434_p3 = pnand %p8433_p2, %p8427_p13 }
  0x44   :  { %8437 = shalt.err (!%p8434_p3)
}
  0x45   :  { %64 = dma.hbm_to_vmem [thread:$0]  %s11964_s5, 12288, %s8586_s20, [#allocation9], %s8468_s21, %s8468_s21, %s8469_s22  }
  0x46   :  { %s8472_s25 = smov [#allocation13]   ;;  %s8438_s14 = scalar_lea.hbm %s11968_s9, 4096 }
  0x47   :  { %s86_s26 = sshll.u32 %s8472_s25, 4  ;;  %p8439_p4 = scmp.ne.s32.totalorder %s11968_s9, %s8438_s14  ;;  %s87_s26 = int_to_ptr.vmem [resolvable:$true] %s86_s26 }
  0x48   :  { %p8442_p5 = scmp.lt.u32.totalorder %s8438_s14, %s11968_s9 }
  0x4a   :  { %p8444_p6 = pnand %p8442_p5, %p8439_p4 }
  0x4c   :  { %8447 = shalt.err (!%p8444_p6)
}
  0x4d   :  { %s8448_s17 = scalar_lea.vmem %s87_s26, 4096  ;;  %p8453_p8 = scmp.lt.s32.totalorder %s87_s26, %s87_s26 }
  0x4e   :  { %p8449_p7 = scmp.ne.s32.totalorder %s87_s26, %s8448_s17  ;;  %p8454_p9 = scmp.lt.s32.totalorder %s8448_s17, %s8448_s17 }
  0x50   :  { %p8455_p10 = por %p8454_p9, %p8453_p8 }
  0x52   :  { %p8456_p11 = pnand %p8455_p10, %p8449_p7 }
  0x54   :  { %8459 = shalt.err (!%p8456_p11)
}
  0x55   :  { %s8473_s5 = smov 128   ;;  %s8474_s21 = smov 8  }
  0x56   :  { %92 = dma.hbm_to_vmem [thread:$0]  %s11968_s9, 4096, %s87_s26, [#allocation12], %s8473_s5, %s8473_s5, %s8474_s21  }
  0x57   :  { %8460 = dma.done.wait [#allocation7], 12288  }
  0x58   :  { %8461 = vsyncadd [#allocation7], 4294955008 }
  0x59   :  { %8462 = dma.done.wait [#allocation9], 24576  }
  0x5a   :  { %8463 = vsyncadd [#allocation9], 4294942720 }
  0x5b   :  { %8464 = dma.done.wait [#allocation12], 16384  }
  0x5c   :  { %8465 = vsyncadd [#allocation12], 4294950912  ;;  %v7007_v1 = vld [vmem:[#allocation6 + $0x4] ss:$24 sps:$4 sm:$0xff]   ;;  %v7011_v3 = vld [vmem:[#allocation6] ss:$24 sps:$4 sm:$0xff]  }
  0x5d   :  { %v7009_v2 = vld [vmem:[#allocation6 + $0xc] ss:$24 sps:$4 sm:$0xff]   ;;  %1027 = vmatprep.subr.bf16.mxu0 %v7007_v1  ;;  %v7012_v4 = vld [vmem:[#allocation6 + $0x8] ss:$24 sps:$4 sm:$0xff]   ;;  %v7015_v6 = vld [vmem:[#allocation6 + $0x3c] ss:$24 sps:$4 sm:$0xff]  }
  0x5e   :  { %1100 = vmatprep.subr.bf16.mxu1 %v7009_v2  ;;  %v7013_v5 = vld [vmem:[#allocation6 + $0x34] ss:$24 sps:$4 sm:$0xff]   ;;  %1028 = vmatpush1.bf16.msra.mxu0 %v7011_v3  ;;  %v7017_v7 = vld [vmem:[#allocation6 + $0x30] ss:$24 sps:$4 sm:$0xff]   ;;  %v7019_v9 = vld [vmem:[#allocation6 + $0x64] ss:$24 sps:$4 sm:$0xff]  }
  0x5f   :  { %1101 = vmatpush1.bf16.msra.mxu1 %v7012_v4  ;;  %1029 = vmatprep.subr.bf16.mxu0 %v7013_v5  ;;  %v7018_v8 = vld [vmem:[#allocation6 + $0x38] ss:$24 sps:$4 sm:$0xff]   ;;  %v7021_v10 = vld [vmem:[#allocation6 + $0x6c] ss:$24 sps:$4 sm:$0xff]   ;;  %v7024_v12 = vld [vmem:[#allocation6 + $0x68] ss:$24 sps:$4 sm:$0xff]  }
  0x60   :  { %1102 = vmatprep.subr.bf16.mxu1 %v7015_v6  ;;  %v7023_v11 = vld [vmem:[#allocation6 + $0x60] ss:$24 sps:$4 sm:$0xff]   ;;  %v7025_v13 = vld [vmem:[#allocation6 + $0x94] ss:$24 sps:$4 sm:$0xff]   ;;  %v7029_v15 = vld [vmem:[#allocation6 + $0x90] ss:$24 sps:$4 sm:$0xff]  }
  0x61   :  { %v7027_v14 = vld [vmem:[#allocation6 + $0x9c] ss:$24 sps:$4 sm:$0xff]   ;;  %v7030_v16 = vld [vmem:[#allocation6 + $0x98] ss:$24 sps:$4 sm:$0xff]   ;;  %v7033_v18 = vld [vmem:[#allocation6 + $0xcc] ss:$24 sps:$4 sm:$0xff]  }
  0x62   :  { %1030 = vmatpush1.bf16.msra.mxu0 %v7017_v7  ;;  %v7031_v17 = vld [vmem:[#allocation6 + $0xc4] ss:$24 sps:$4 sm:$0xff]   ;;  %v7035_v19 = vld [vmem:[#allocation6 + $0xc0] ss:$24 sps:$4 sm:$0xff]   ;;  %v7037_v21 = vld [vmem:[#allocation6 + $0xf4] ss:$24 sps:$4 sm:$0xff]  }
  0x63   :  { %1103 = vmatpush1.bf16.msra.mxu1 %v7018_v8  ;;  %1031 = vmatprep.subr.bf16.mxu0 %v7019_v9  ;;  %v7036_v20 = vld [vmem:[#allocation6 + $0xc8] ss:$24 sps:$4 sm:$0xff]   ;;  %v7039_v22 = vld [vmem:[#allocation6 + $0xfc] ss:$24 sps:$4 sm:$0xff]   ;;  %v7042_v24 = vld [vmem:[#allocation6 + $0xf8] ss:$24 sps:$4 sm:$0xff]  }
  0x64   :  { %1104 = vmatprep.subr.bf16.mxu1 %v7021_v10  ;;  %v7041_v23 = vld [vmem:[#allocation6 + $0xf0] ss:$24 sps:$4 sm:$0xff]   ;;  %v7043_v25 = vld [vmem:[#allocation6 + $0x124] ss:$24 sps:$4 sm:$0xff]   ;;  %v7047_v27 = vld [vmem:[#allocation6 + $0x120] ss:$24 sps:$4 sm:$0xff]  }
  0x65   :  { %v7045_v26 = vld [vmem:[#allocation6 + $0x12c] ss:$24 sps:$4 sm:$0xff]   ;;  %v7048_v28 = vld [vmem:[#allocation6 + $0x128] ss:$24 sps:$4 sm:$0xff]   ;;  %v7051_v30 = vld [vmem:[#allocation6 + $0x15c] ss:$24 sps:$4 sm:$0xff]  }
  0x66   :  { %1032 = vmatpush1.bf16.msra.mxu0 %v7023_v11  ;;  %v7049_v29 = vld [vmem:[#allocation6 + $0x154] ss:$24 sps:$4 sm:$0xff]   ;;  %v7053_v31 = vld [vmem:[#allocation6 + $0x150] ss:$24 sps:$4 sm:$0xff]   ;;  %v7055_v33 = vld [vmem:[#allocation6 + $0x184] ss:$24 sps:$4 sm:$0xff]  }
  0x67   :  { %1105 = vmatpush1.bf16.msra.mxu1 %v7024_v12  ;;  %1033 = vmatprep.subr.bf16.mxu0 %v7025_v13  ;;  %v7054_v32 = vld [vmem:[#allocation6 + $0x158] ss:$24 sps:$4 sm:$0xff]   ;;  %v7057_v34 = vld [vmem:[#allocation6 + $0x18c] ss:$24 sps:$4 sm:$0xff]   ;;  %v7060_v36 = vld [vmem:[#allocation6 + $0x188] ss:$24 sps:$4 sm:$0xff]  }
  0x68   :  { %1106 = vmatprep.subr.bf16.mxu1 %v7027_v14  ;;  %v7059_v35 = vld [vmem:[#allocation6 + $0x180] ss:$24 sps:$4 sm:$0xff]   ;;  %v7061_v37 = vld [vmem:[#allocation6 + $0x1b4] ss:$24 sps:$4 sm:$0xff]   ;;  %v7065_v39 = vld [vmem:[#allocation6 + $0x1b0] ss:$24 sps:$4 sm:$0xff]  }
  0x69   :  { %v7063_v38 = vld [vmem:[#allocation6 + $0x1bc] ss:$24 sps:$4 sm:$0xff]   ;;  %v7066_v40 = vld [vmem:[#allocation6 + $0x1b8] ss:$24 sps:$4 sm:$0xff]   ;;  %v7069_v42 = vld [vmem:[#allocation6 + $0x1ec] ss:$24 sps:$4 sm:$0xff]  }
  0x6a   :  { %1034 = vmatpush1.bf16.msra.mxu0 %v7029_v15  ;;  %v7067_v41 = vld [vmem:[#allocation6 + $0x1e4] ss:$24 sps:$4 sm:$0xff]   ;;  %v7071_v43 = vld [vmem:[#allocation6 + $0x1e0] ss:$24 sps:$4 sm:$0xff]   ;;  %v7073_v45 = vld [vmem:[#allocation6 + $0x214] ss:$24 sps:$4 sm:$0xff]  }
  0x6b   :  { %1107 = vmatpush1.bf16.msra.mxu1 %v7030_v16  ;;  %1035 = vmatprep.subr.bf16.mxu0 %v7031_v17  ;;  %v7072_v44 = vld [vmem:[#allocation6 + $0x1e8] ss:$24 sps:$4 sm:$0xff]   ;;  %v7075_v46 = vld [vmem:[#allocation6 + $0x21c] ss:$24 sps:$4 sm:$0xff]   ;;  %v7078_v48 = vld [vmem:[#allocation6 + $0x218] ss:$24 sps:$4 sm:$0xff]  }
  0x6c   :  { %1108 = vmatprep.subr.bf16.mxu1 %v7033_v18  ;;  %v7077_v47 = vld [vmem:[#allocation6 + $0x210] ss:$24 sps:$4 sm:$0xff]   ;;  %v7079_v50 = vld [vmem:[#allocation6 + $0x244] ss:$24 sps:$4 sm:$0xff]   ;;  %v7083_v52 = vld [vmem:[#allocation6 + $0x240] ss:$24 sps:$4 sm:$0xff]  }
  0x6d   :  { %v8638_v49 = vld [vmem:[%s11959_s0 + $0x4] ss:$8 sps:$4 sm:$0xff]   ;;  %v7087_v55 = vld [vmem:[#allocation6 + $0x27c] ss:$24 sps:$4 sm:$0xff]   ;;  %v7090_v57 = vld [vmem:[#allocation6 + $0x278] ss:$24 sps:$4 sm:$0xff]  }
  0x6e   :  { %1036 = vmatpush1.bf16.msra.mxu0 %v7035_v19  ;;  %v7081_v51 = vld [vmem:[#allocation6 + $0x24c] ss:$24 sps:$4 sm:$0xff]   ;;  %1059 = vmatprep.mubr.bf16.mxu0 %v8638_v49  ;;  %v7084_v53 = vld [vmem:[#allocation6 + $0x248] ss:$24 sps:$4 sm:$0xff]   ;;  %v7099_v63 = vld [vmem:[#allocation6 + $0x2dc] ss:$24 sps:$4 sm:$0xff]  }
  0x6f   :  { %1109 = vmatpush1.bf16.msra.mxu1 %v7036_v20  ;;  %1037 = vmatprep.subr.bf16.mxu0 %v7037_v21  ;;  %v7085_v54 = vld [vmem:[#allocation6 + $0x274] ss:$24 sps:$4 sm:$0xff]   ;;  %v7089_v56 = vld [vmem:[#allocation6 + $0x270] ss:$24 sps:$4 sm:$0xff]   ;;  %v7091_v58 = vld [vmem:[#allocation6 + $0x2a4] ss:$24 sps:$4 sm:$0xff]  }
  0x70   :  { %1110 = vmatprep.subr.bf16.mxu1 %v7039_v22  ;;  %1132 = vmatprep.mubr.bf16.mxu1 %v8638_v49  ;;  %v7093_v59 = vld [vmem:[#allocation6 + $0x2ac] ss:$24 sps:$4 sm:$0xff]   ;;  %v7095_v60 = vld [vmem:[#allocation6 + $0x2a0] ss:$24 sps:$4 sm:$0xff]   ;;  %v7101_v0 = vld [vmem:[#allocation6 + $0x2d0] ss:$24 sps:$4 sm:$0xff]  }
  0x71   :  { %v7096_v61 = vld [vmem:[#allocation6 + $0x2a8] ss:$24 sps:$4 sm:$0xff]   ;;  %v7097_v62 = vld [vmem:[#allocation6 + $0x2d4] ss:$24 sps:$4 sm:$0xff]   ;;  %v7102_v1 = vld [vmem:[#allocation6 + $0x2d8] ss:$24 sps:$4 sm:$0xff]  }
  0x72   :  { %1038 = vmatpush1.bf16.msra.mxu0 %v7041_v23  ;;  %v7108_v2 = vld [vmem:[#allocation6 + $0x14] ss:$24 sps:$4 sm:$0xff]   ;;  %v7109_v3 = vld [vmem:[#allocation8 + $0x4] ss:$24 sps:$4 sm:$0xff]   ;;  %v7106_v5 = vld [vmem:[#allocation6 + $0x10] ss:$24 sps:$4 sm:$0xff]  }
  0x73   :  { %1111 = vmatpush1.bf16.msra.mxu1 %v7042_v24  ;;  %1039 = vmatprep.subr.bf16.mxu0 %v7043_v25  ;;  %v8645_v4 = vld [vmem:[%s11959_s0] ss:$8 sps:$4 sm:$0xff]   ;;  %v7115_v8 = vld [vmem:[#allocation8 + $0x34] ss:$24 sps:$4 sm:$0xff]   ;;  %vm6440_vm0 = vcmask 7168  }
  0x74   :  { %1112 = vmatprep.subr.bf16.mxu1 %v7045_v26  ;;  %v7111_v6 = vld [vmem:[#allocation8] ss:$24 sps:$4 sm:$0xff]   ;;  %v7114_v7 = vld [vmem:[#allocation6 + $0x44] ss:$24 sps:$4 sm:$0xff]   ;;  %v7117_v10 = vld [vmem:[#allocation8 + $0x30] ss:$24 sps:$4 sm:$0xff]  }
  0x75   :  { %v7112_v9 = vld [vmem:[#allocation6 + $0x40] ss:$24 sps:$4 sm:$0xff]   ;;  %v7120_v11 = vld [vmem:[#allocation6 + $0x74] ss:$24 sps:$4 sm:$0xff]   ;;  %v7121_v12 = vld [vmem:[#allocation8 + $0x64] ss:$24 sps:$4 sm:$0xff]  }
  0x76   :  { %1040 = vmatpush1.bf16.msra.mxu0 %v7047_v27  ;;  %v7118_v13 = vld [vmem:[#allocation6 + $0x70] ss:$24 sps:$4 sm:$0xff]   ;;  %v7123_v14 = vld [vmem:[#allocation8 + $0x60] ss:$24 sps:$4 sm:$0xff]   ;;  %v7126_v17 = vld [vmem:[#allocation6 + $0xa4] ss:$24 sps:$4 sm:$0xff]  }
  0x77   :  { %1113 = vmatpush1.bf16.msra.mxu1 %v7048_v28  ;;  %1041 = vmatprep.subr.bf16.mxu0 %v7049_v29  ;;  %v8652_v15 = vld [vmem:[%s11959_s0 + $0x14] ss:$8 sps:$4 sm:$0xff]   ;;  %v8657_v16 = vld [vmem:[%s11959_s0 + $0x10] ss:$8 sps:$4 sm:$0xff]   ;;  %v8666_v23 = vld [vmem:[%s11959_s0 + $0x24] ss:$8 sps:$4 sm:$0xff]  }
  0x78   :  { %1114 = vmatprep.subr.bf16.mxu1 %v7051_v30  ;;  %v7127_v18 = vld [vmem:[#allocation8 + $0x94] ss:$24 sps:$4 sm:$0xff]   ;;  %v7124_v19 = vld [vmem:[#allocation6 + $0xa0] ss:$24 sps:$4 sm:$0xff]   ;;  %v7129_v20 = vld [vmem:[#allocation8 + $0x90] ss:$24 sps:$4 sm:$0xff]  }
  0x79   :  { %v7132_v21 = vld [vmem:[#allocation6 + $0xd4] ss:$24 sps:$4 sm:$0xff]   ;;  %v7133_v22 = vld [vmem:[#allocation8 + $0xc4] ss:$24 sps:$4 sm:$0xff]   ;;  %v7130_v24 = vld [vmem:[#allocation6 + $0xd0] ss:$24 sps:$4 sm:$0xff]  }
  0x7a   :  { %1042 = vmatpush1.bf16.msra.mxu0 %v7053_v31  ;;  %v7135_v25 = vld [vmem:[#allocation8 + $0xc0] ss:$24 sps:$4 sm:$0xff]   ;;  %v7138_v27 = vld [vmem:[#allocation6 + $0x104] ss:$24 sps:$4 sm:$0xff]   ;;  %v7139_v28 = vld [vmem:[#allocation8 + $0xf4] ss:$24 sps:$4 sm:$0xff]  }
  0x7b   :  { %1115 = vmatpush1.bf16.msra.mxu1 %v7054_v32  ;;  %1043 = vmatprep.subr.bf16.mxu0 %v7055_v33  ;;  %v8672_v26 = vld [vmem:[%s11959_s0 + $0x20] ss:$8 sps:$4 sm:$0xff]   ;;  %v7144_v31 = vld [vmem:[#allocation6 + $0x134] ss:$24 sps:$4 sm:$0xff]  }
  0x7c   :  { %1116 = vmatprep.subr.bf16.mxu1 %v7057_v34  ;;  %v7136_v29 = vld [vmem:[#allocation6 + $0x100] ss:$24 sps:$4 sm:$0xff]   ;;  %v7141_v30 = vld [vmem:[#allocation8 + $0xf0] ss:$24 sps:$4 sm:$0xff]   ;;  %v7145_v33 = vld [vmem:[#allocation8 + $0x124] ss:$24 sps:$4 sm:$0xff]  }
  0x7d   :  { %v8680_v32 = vld [vmem:[%s11959_s0 + $0x34] ss:$8 sps:$4 sm:$0xff]  }
  0x7e   :  { %1044 = vmatpush1.bf16.msra.mxu0 %v7059_v35  ;;  %v7142_v34 = vld [vmem:[#allocation6 + $0x130] ss:$24 sps:$4 sm:$0xff]   ;;  %v7147_v35 = vld [vmem:[#allocation8 + $0x120] ss:$24 sps:$4 sm:$0xff]  }
  0x7f   :  { %1117 = vmatpush1.bf16.msra.mxu1 %v7060_v36  ;;  %1045 = vmatprep.subr.bf16.mxu0 %v7061_v37  ;;  %v8687_v36 = vld [vmem:[%s11959_s0 + $0x30] ss:$8 sps:$4 sm:$0xff]   ;;  %v7150_v37 = vld [vmem:[#allocation6 + $0x164] ss:$24 sps:$4 sm:$0xff]  }
  0x80   :  { %1118 = vmatprep.subr.bf16.mxu1 %v7063_v38  ;;  %v7151_v38 = vld [vmem:[#allocation8 + $0x154] ss:$24 sps:$4 sm:$0xff]  }
  0x82   :  { %1046 = vmatpush1.bf16.msra.mxu0 %v7065_v39  ;;  %v7148_v39 = vld [vmem:[#allocation6 + $0x160] ss:$24 sps:$4 sm:$0xff]  }
  0x83   :  { %1119 = vmatpush1.bf16.msra.mxu1 %v7066_v40  ;;  %1047 = vmatprep.subr.bf16.mxu0 %v7067_v41  ;;  %v7153_v40 = vld [vmem:[#allocation8 + $0x150] ss:$24 sps:$4 sm:$0xff]   ;;  %v7156_v41 = vld [vmem:[#allocation6 + $0x194] ss:$24 sps:$4 sm:$0xff]  }
  0x84   :  { %1120 = vmatprep.subr.bf16.mxu1 %v7069_v42  ;;  %v7157_v42 = vld [vmem:[#allocation8 + $0x184] ss:$24 sps:$4 sm:$0xff]  }
  0x86   :  { %1048 = vmatpush1.bf16.msra.mxu0 %v7071_v43  ;;  %v11973_v43 = vmov 0  }
  0x87   :  { %1121 = vmatpush1.bf16.msra.mxu1 %v7072_v44  ;;  %1049 = vmatprep.subr.bf16.mxu0 %v7073_v45  ;;  %v7154_v44 = vld [vmem:[#allocation6 + $0x190] ss:$24 sps:$4 sm:$0xff]   ;;  %v7159_v45 = vld [vmem:[#allocation8 + $0x180] ss:$24 sps:$4 sm:$0xff]  }
  0x88   :  { %1122 = vmatprep.subr.bf16.mxu1 %v7075_v46  ;;  %v7162_v46 = vld [vmem:[#allocation6 + $0x1c4] ss:$24 sps:$4 sm:$0xff]  }
  0x8a   :  { %1050 = vmatpush1.bf16.msra.mxu0 %v7077_v47  ;;  %v7163_v47 = vld [vmem:[#allocation8 + $0x1b4] ss:$24 sps:$4 sm:$0xff]  }
  0x8b   :  { %1123 = vmatpush1.bf16.msra.mxu1 %v7078_v48  ;;  %1051 = vmatprep.subr.bf16.mxu0 %v7079_v50  ;;  %v7160_v48 = vld [vmem:[#allocation6 + $0x1c0] ss:$24 sps:$4 sm:$0xff]   ;;  %v7167_v50 = vld [vmem:[#allocation8 + $0x1b0] ss:$24 sps:$4 sm:$0xff]  }
  0x8c   :  { %1124 = vmatprep.subr.bf16.mxu1 %v7081_v51  ;;  %v7171_v51 = vld [vmem:[#allocation6 + $0x1f4] ss:$24 sps:$4 sm:$0xff]  }
  0x8e   :  { %1052 = vmatpush1.bf16.msra.mxu0 %v7083_v52  ;;  %v7172_v52 = vld [vmem:[#allocation8 + $0x1e4] ss:$24 sps:$4 sm:$0xff]  }
  0x8f   :  { %1125 = vmatpush1.bf16.msra.mxu1 %v7084_v53  ;;  %1053 = vmatprep.subr.bf16.mxu0 %v7085_v54  ;;  %v7174_v53 = vld [vmem:[#allocation8 + $0x1e0] ss:$24 sps:$4 sm:$0xff]   ;;  %v7177_v54 = vld [vmem:[#allocation6 + $0x224] ss:$24 sps:$4 sm:$0xff]  }
  0x90   :  { %1126 = vmatprep.subr.bf16.mxu1 %v7087_v55  ;;  %v7178_v55 = vld [vmem:[#allocation8 + $0x214] ss:$24 sps:$4 sm:$0xff]  }
  0x92   :  { %1054 = vmatpush1.bf16.msra.mxu0 %v7089_v56  ;;  %v7175_v56 = vld [vmem:[#allocation6 + $0x220] ss:$24 sps:$4 sm:$0xff]  }
  0x93   :  { %1127 = vmatpush1.bf16.msra.mxu1 %v7090_v57  ;;  %1055 = vmatprep.subr.bf16.mxu0 %v7091_v58  ;;  %v7182_v57 = vld [vmem:[#allocation8 + $0x210] ss:$24 sps:$4 sm:$0xff]   ;;  %v7186_v58 = vld [vmem:[#allocation6 + $0x254] ss:$24 sps:$4 sm:$0xff]  }
  0x94   :  { %1128 = vmatprep.subr.bf16.mxu1 %v7093_v59  ;;  %v7187_v59 = vld [vmem:[#allocation8 + $0x244] ss:$24 sps:$4 sm:$0xff]  }
  0x96   :  { %1056 = vmatpush1.bf16.msra.mxu0 %v7095_v60  ;;  %v7184_v60 = vld [vmem:[#allocation6 + $0x250] ss:$24 sps:$4 sm:$0xff]  }
  0x97   :  { %1129 = vmatpush1.bf16.msra.mxu1 %v7096_v61  ;;  %1057 = vmatprep.subr.bf16.mxu0 %v7097_v62  ;;  %v8693_v61 = vld [vmem:[#allocation8 + $0x240] ss:$24 sps:$4 sm:$0xff]   ;;  %v7192_v62 = vld [vmem:[#allocation6 + $0x284] ss:$24 sps:$4 sm:$0xff]  }
  0x98   :  { %1130 = vmatprep.subr.bf16.mxu1 %v7099_v63  ;;  %v8695_v63 = vld [vmem:[#allocation8 + $0x274] ss:$24 sps:$4 sm:$0xff]  }
  0x9a   :  { %1058 = vmatpush1.bf16.msra.mxu0 %v7101_v0  ;;  %v7190_v0 = vld [vmem:[#allocation6 + $0x280] ss:$24 sps:$4 sm:$0xff]  }
  0x9b   :  { %1131 = vmatpush1.bf16.msra.mxu1 %v7102_v1  ;;  %1173 = vmatprep.subr.bf16.mxu0 %v7108_v2  ;;  %v8698_v1 = vld [vmem:[#allocation8 + $0x270] ss:$24 sps:$4 sm:$0xff]   ;;  %v7201_v2 = vld [vmem:[#allocation6 + $0x2b4] ss:$24 sps:$4 sm:$0xff]  }
  0x9c   :  { %1783 = vmatprep.subr.bf16.mxu1 %v7109_v3  ;;  %v8701_v3 = vld [vmem:[#allocation8 + $0x2a4] ss:$24 sps:$4 sm:$0xff]  }
  0x9d   :  { %1060 = vmatmul.mubr.bf16.vlgmr.msra.gmra.mrb[0].mxu0 %v8645_v4 }
  0x9e   :  { %1133 = vmatmul.mubr.bf16.vlgmr.msra.gmra.mrb[0].mxu1 %v8645_v4  ;;  %1174 = vmatpush1.bf16.msra.mxu0 %v7106_v5  ;;  %v7199_v5 = vld [vmem:[#allocation6 + $0x2b0] ss:$24 sps:$4 sm:$0xff]  }
  0x9f   :  { %1784 = vmatpush1.bf16.msra.mxu1 %v7111_v6  ;;  %1175 = vmatprep.subr.bf16.mxu0 %v7114_v7  ;;  %v8703_v6 = vld [vmem:[#allocation8 + $0x2a0] ss:$24 sps:$4 sm:$0xff]   ;;  %v7207_v7 = vld [vmem:[#allocation6 + $0x2e4] ss:$24 sps:$4 sm:$0xff]  }
  0xa0   :  { %1785 = vmatprep.subr.bf16.mxu1 %v7115_v8  ;;  %1069 = vmatprep.mubr.bf16.mxu0 %v8652_v15  ;;  %v8707_v8 = vld [vmem:[#allocation8 + $0x2d4] ss:$24 sps:$4 sm:$0xff]  }
  0xa1   :  { %1142 = vmatprep.mubr.bf16.mxu1 %v8652_v15 }
  0xa2   :  { %1176 = vmatpush1.bf16.msra.mxu0 %v7112_v9  ;;  %v7205_v9 = vld [vmem:[#allocation6 + $0x2e0] ss:$24 sps:$4 sm:$0xff]  }
  0xa3   :  { %1786 = vmatpush1.bf16.msra.mxu1 %v7117_v10  ;;  %1177 = vmatprep.subr.bf16.mxu0 %v7120_v11  ;;  %v8710_v10 = vld [vmem:[#allocation8 + $0x2d0] ss:$24 sps:$4 sm:$0xff]   ;;  %v8712_v11 = vld [vmem:[#allocation8 + $0xc] ss:$24 sps:$4 sm:$0xff]  }
  0xa4   :  { %1787 = vmatprep.subr.bf16.mxu1 %v7121_v12  ;;  %v8715_v12 = vld [vmem:[#allocation8 + $0x14] ss:$24 sps:$4 sm:$0xff]  }
  0xa5   :  { %1070 = vmatmul.mubr.bf16.gmra.mrb[4].mxu0 %v8657_v16 }
  0xa6   :  { %1143 = vmatmul.mubr.bf16.gmra.mrb[4].mxu1 %v8657_v16  ;;  %1178 = vmatpush1.bf16.msra.mxu0 %v7118_v13  ;;  %v8717_v13 = vld [vmem:[#allocation8 + $0x8] ss:$24 sps:$4 sm:$0xff]  }
  0xa7   :  { %1788 = vmatpush1.bf16.msra.mxu1 %v7123_v14  ;;  %1179 = vmatprep.subr.bf16.mxu0 %v7126_v17  ;;  %v7216_v14 = vld [vmem:[#allocation8 + $0x10] ss:$24 sps:$4 sm:$0xff]   ;;  %v8720_v17 = vld [vmem:[#allocation8 + $0x3c] ss:$24 sps:$4 sm:$0xff]  }
  0xa8   :  { %1789 = vmatprep.subr.bf16.mxu1 %v7127_v18  ;;  %1079 = vmatprep.mubr.bf16.mxu0 %v8666_v23  ;;  %v7219_v18 = vld [vmem:[#allocation8 + $0x44] ss:$24 sps:$4 sm:$0xff]  }
  0xa9   :  { %1152 = vmatprep.mubr.bf16.mxu1 %v8666_v23 }
  0xaa   :  { %1180 = vmatpush1.bf16.msra.mxu0 %v7124_v19  ;;  %v8727_v19 = vld [vmem:[#allocation8 + $0x38] ss:$24 sps:$4 sm:$0xff]  }
  0xab   :  { %1790 = vmatpush1.bf16.msra.mxu1 %v7129_v20  ;;  %1181 = vmatprep.subr.bf16.mxu0 %v7132_v21  ;;  %v7222_v20 = vld [vmem:[#allocation8 + $0x40] ss:$24 sps:$4 sm:$0xff]   ;;  %v8730_v21 = vld [vmem:[#allocation8 + $0x6c] ss:$24 sps:$4 sm:$0xff]  }
  0xac   :  { %1791 = vmatprep.subr.bf16.mxu1 %v7133_v22  ;;  %v7225_v22 = vld [vmem:[#allocation8 + $0x74] ss:$24 sps:$4 sm:$0xff]  }
  0xad   :  { %1080 = vmatmul.mubr.bf16.gmra.mrb[8].mxu0 %v8672_v26 }
  0xae   :  { %1153 = vmatmul.mubr.bf16.gmra.mrb[8].mxu1 %v8672_v26  ;;  %1182 = vmatpush1.bf16.msra.mxu0 %v7130_v24  ;;  %v8732_v24 = vld [vmem:[#allocation8 + $0x68] ss:$24 sps:$4 sm:$0xff]  }
  0xaf   :  { %1792 = vmatpush1.bf16.msra.mxu1 %v7135_v25  ;;  %1183 = vmatprep.subr.bf16.mxu0 %v7138_v27  ;;  %v7228_v25 = vld [vmem:[#allocation8 + $0x70] ss:$24 sps:$4 sm:$0xff]   ;;  %v7231_v27 = vld [vmem:[#allocation8 + $0xa4] ss:$24 sps:$4 sm:$0xff]  }
  0xb0   :  { %1793 = vmatprep.subr.bf16.mxu1 %v7139_v28  ;;  %1089 = vmatprep.mubr.bf16.mxu0 %v8680_v32  ;;  %v8740_v28 = vld [vmem:[#allocation8 + $0x98] ss:$24 sps:$4 sm:$0xff]  }
  0xb1   :  { %1162 = vmatprep.mubr.bf16.mxu1 %v8680_v32 }
  0xb2   :  { %1184 = vmatpush1.bf16.msra.mxu0 %v7136_v29  ;;  %v7234_v29 = vld [vmem:[#allocation8 + $0xa0] ss:$24 sps:$4 sm:$0xff]  }
  0xb3   :  { %1794 = vmatpush1.bf16.msra.mxu1 %v7141_v30  ;;  %1185 = vmatprep.subr.bf16.mxu0 %v7144_v31  ;;  %v8742_v30 = vld [vmem:[#allocation8 + $0xcc] ss:$24 sps:$4 sm:$0xff]  }
  0xb4   :  { %1795 = vmatprep.subr.bf16.mxu1 %v7145_v33  ;;  %v7237_v31 = vld [vmem:[#allocation8 + $0xd4] ss:$24 sps:$4 sm:$0xff]   ;;  %v7240_v33 = vld [vmem:[#allocation8 + $0xd0] ss:$24 sps:$4 sm:$0xff]  }
  0xb5   :  { %1090 = vmatmul.mubr.bf16.gmra.mrb[12].mxu0 %v8687_v36 }
  0xb6   :  { %1163 = vmatmul.mubr.bf16.gmra.mrb[12].mxu1 %v8687_v36  ;;  %1186 = vmatpush1.bf16.msra.mxu0 %v7142_v34  ;;  %v8750_v34 = vld [vmem:[#allocation8 + $0xfc] ss:$24 sps:$4 sm:$0xff]  }
  0xb7   :  { %1796 = vmatpush1.bf16.msra.mxu1 %v7147_v35  ;;  %1187 = vmatprep.subr.bf16.mxu0 %v7150_v37  ;;  %v7243_v35 = vld [vmem:[#allocation8 + $0x104] ss:$24 sps:$4 sm:$0xff]   ;;  %v7246_v37 = vld [vmem:[#allocation8 + $0x100] ss:$24 sps:$4 sm:$0xff]  }
  0xb8   :  { %1797 = vmatprep.subr.bf16.mxu1 %v7151_v38  ;;  %1205 = vmatprep.mubr.bf16.mxu0 %v8638_v49  ;;  %v7169_v49 = vld [vmem:[#allocation6 + $0x1f0] ss:$24 sps:$4 sm:$0xff]   ;;  %v8756_v38 = vld [vmem:[#allocation8 + $0x12c] ss:$24 sps:$4 sm:$0xff]  }
  0xb9   :  { %1815 = vmatprep.mubr.bf16.mxu1 %v11973_v43 }
  0xba   :  { %1188 = vmatpush1.bf16.msra.mxu0 %v7148_v39  ;;  %v7249_v39 = vld [vmem:[#allocation8 + $0x134] ss:$24 sps:$4 sm:$0xff]  }
  0xbb   :  { %1798 = vmatpush1.bf16.msra.mxu1 %v7153_v40  ;;  %1189 = vmatprep.subr.bf16.mxu0 %v7156_v41  ;;  %v7252_v40 = vld [vmem:[#allocation8 + $0x130] ss:$24 sps:$4 sm:$0xff]   ;;  %v8764_v41 = vld [vmem:[#allocation8 + $0x15c] ss:$24 sps:$4 sm:$0xff]  }
  0xbc   :  { %1799 = vmatprep.subr.bf16.mxu1 %v7157_v42  ;;  %v7255_v42 = vld [vmem:[#allocation8 + $0x164] ss:$24 sps:$4 sm:$0xff]  }
  0xbe   :  { %1190 = vmatpush1.bf16.msra.mxu0 %v7154_v44  ;;  %v7258_v44 = vld [vmem:[#allocation8 + $0x160] ss:$24 sps:$4 sm:$0xff]  }
  0xbf   :  { %1800 = vmatpush1.bf16.msra.mxu1 %v7159_v45  ;;  %1191 = vmatprep.subr.bf16.mxu0 %v7162_v46  ;;  %v8770_v45 = vld [vmem:[#allocation8 + $0x18c] ss:$24 sps:$4 sm:$0xff]  }
  0xc0   :  { %1801 = vmatprep.subr.bf16.mxu1 %v7163_v47  ;;  %v7261_v46 = vld [vmem:[#allocation8 + $0x194] ss:$24 sps:$4 sm:$0xff]   ;;  %v7264_v47 = vld [vmem:[#allocation8 + $0x190] ss:$24 sps:$4 sm:$0xff]  }
  0xc2   :  { %1192 = vmatpush1.bf16.msra.mxu0 %v7160_v48  ;;  %v8778_v48 = vld [vmem:[#allocation8 + $0x1bc] ss:$24 sps:$4 sm:$0xff]  }
  0xc3   :  { %1802 = vmatpush1.bf16.msra.mxu1 %v7167_v50  ;;  %1193 = vmatprep.subr.bf16.mxu0 %v7171_v51  ;;  %v7267_v50 = vld [vmem:[#allocation8 + $0x1c4] ss:$24 sps:$4 sm:$0xff]   ;;  %v7270_v51 = vld [vmem:[#allocation8 + $0x1c0] ss:$24 sps:$4 sm:$0xff]  }
  0xc4   :  { %1803 = vmatprep.subr.bf16.mxu1 %v7172_v52  ;;  %v8784_v52 = vld [vmem:[#allocation8 + $0x1ec] ss:$24 sps:$4 sm:$0xff]  }
  0xc6   :  { %1194 = vmatpush1.bf16.msra.mxu0 %v7169_v49  ;;  %v7273_v49 = vld [vmem:[#allocation8 + $0x1f4] ss:$24 sps:$4 sm:$0xff]  }
  0xc7   :  { %1804 = vmatpush1.bf16.msra.mxu1 %v7174_v53  ;;  %1195 = vmatprep.subr.bf16.mxu0 %v7177_v54  ;;  %v8788_v53 = vld [vmem:[#allocation8 + $0x1e8] ss:$24 sps:$4 sm:$0xff]  }
  0xc8   :  { %1805 = vmatprep.subr.bf16.mxu1 %v7178_v55  ;;  %v8790_v54 = vld [vmem:[#allocation8 + $0x1f0] ss:$24 sps:$4 sm:$0xff]   ;;  %v8792_v55 = vld [vmem:[#allocation8 + $0x21c] ss:$24 sps:$4 sm:$0xff]  }
  0xca   :  { %1196 = vmatpush1.bf16.msra.mxu0 %v7175_v56  ;;  %v8794_v56 = vld [vmem:[#allocation8 + $0x224] ss:$24 sps:$4 sm:$0xff]  }
  0xcb   :  { %1806 = vmatpush1.bf16.msra.mxu1 %v7182_v57  ;;  %1197 = vmatprep.subr.bf16.mxu0 %v7186_v58  ;;  %v8798_v57 = vld [vmem:[#allocation8 + $0x218] ss:$24 sps:$4 sm:$0xff]  }
  0xcc   :  { %1807 = vmatprep.subr.bf16.mxu1 %v7187_v59  ;;  %v8800_v58 = vld [vmem:[#allocation8 + $0x220] ss:$24 sps:$4 sm:$0xff]   ;;  %v8802_v59 = vld [vmem:[#allocation8 + $0x24c] ss:$24 sps:$4 sm:$0xff]  }
  0xce   :  { %1198 = vmatpush1.bf16.msra.mxu0 %v7184_v60  ;;  %v8804_v60 = vld [vmem:[#allocation8 + $0x254] ss:$24 sps:$4 sm:$0xff]  }
  0xcf   :  { %1808 = vmatpush1.bf16.msra.mxu1 %v8693_v61  ;;  %1199 = vmatprep.subr.bf16.mxu0 %v7192_v62  ;;  %v8810_v62 = vld [vmem:[#allocation8 + $0x248] ss:$24 sps:$4 sm:$0xff]  }
  0xd0   :  { %1809 = vmatprep.subr.bf16.mxu1 %v8695_v63  ;;  %12455 = vst [vmem:[#allocation17_spill] sm:$0xff] %v8810_v62 }
  0xd2   :  { %1200 = vmatpush1.bf16.msra.mxu0 %v7190_v0  ;;  %v8812_v0 = vld [vmem:[#allocation8 + $0x250] ss:$24 sps:$4 sm:$0xff]  }
  0xd3   :  { %1810 = vmatpush1.bf16.msra.mxu1 %v8698_v1  ;;  %1201 = vmatprep.subr.bf16.mxu0 %v7201_v2  ;;  %v8814_v2 = vld [vmem:[#allocation8 + $0x27c] ss:$24 sps:$4 sm:$0xff]  }
  0xd4   :  { %1811 = vmatprep.subr.bf16.mxu1 %v8701_v3  ;;  %12456 = vst [vmem:[#allocation18_spill] sm:$0xff] %v8814_v2 }
  0xd6   :  { %1202 = vmatpush1.bf16.msra.mxu0 %v7199_v5  ;;  %v8816_v5 = vld [vmem:[#allocation8 + $0x284] ss:$24 sps:$4 sm:$0xff]  }
  0xd7   :  { %1812 = vmatpush1.bf16.msra.mxu1 %v8703_v6  ;;  %1203 = vmatprep.subr.bf16.mxu0 %v7207_v7  ;;  %v8822_v7 = vld [vmem:[#allocation8 + $0x278] ss:$24 sps:$4 sm:$0xff]  }
  0xd8   :  { %1813 = vmatprep.subr.bf16.mxu1 %v8707_v8  ;;  %12457 = vst [vmem:[#allocation19_spill] sm:$0xff] %v8822_v7 }
  0xda   :  { %1204 = vmatpush1.bf16.msra.mxu0 %v7205_v9  ;;  %v8824_v9 = vld [vmem:[#allocation8 + $0x280] ss:$24 sps:$4 sm:$0xff]  }
  0xdb   :  { %1814 = vmatpush1.bf16.msra.mxu1 %v8710_v10  ;;  %1824 = vmatprep.subr.bf16.mxu0 %v8712_v11 }
  0xdc   :  { %1865 = vmatprep.subr.bf16.mxu1 %v8715_v12 }
  0xdd   :  { %1206 = vmatmul.mubr.bf16.vlgmr.msra.gmra.mrb[16].mxu0 %v8645_v4  ;;  %v8736_v4 = vld [vmem:[#allocation8 + $0x9c] ss:$24 sps:$4 sm:$0xff]  }
  0xde   :  { %1816 = vmatmul.mubr.bf16.vlgmr.msra.gmra.mrb[16].mxu1 %v11973_v43  ;;  %1825 = vmatpush1.bf16.msra.mxu0 %v8717_v13 }
  0xdf   :  { %1866 = vmatpush1.bf16.msra.mxu1 %v7216_v14  ;;  %1826 = vmatprep.subr.bf16.mxu0 %v8720_v17  ;;  %v8826_v14 = vld [vmem:[#allocation8 + $0x2ac] ss:$24 sps:$4 sm:$0xff]  }
  0xe0   :  { %1867 = vmatprep.subr.bf16.mxu1 %v7219_v18  ;;  %1215 = vmatprep.mubr.bf16.mxu0 %v8652_v15  ;;  %v8747_v15 = vld [vmem:[#allocation8 + $0xc8] ss:$24 sps:$4 sm:$0xff]   ;;  %12458 = vst [vmem:[#allocation20_spill] sm:$0xff] %v8826_v14  ;;  %v8828_v18 = vld [vmem:[#allocation8 + $0x2b4] ss:$24 sps:$4 sm:$0xff]  }
  0xe1   :  { %1897 = vmatprep.mubr.bf16.mxu1 %v11973_v43 }
  0xe2   :  { %1827 = vmatpush1.bf16.msra.mxu0 %v8727_v19 }
  0xe3   :  { %1868 = vmatpush1.bf16.msra.mxu1 %v7222_v20  ;;  %1828 = vmatprep.subr.bf16.mxu0 %v8730_v21  ;;  %v8834_v20 = vld [vmem:[#allocation8 + $0x2a8] ss:$24 sps:$4 sm:$0xff]  }
  0xe4   :  { %1869 = vmatprep.subr.bf16.mxu1 %v7225_v22  ;;  %12459 = vst [vmem:[#allocation21_spill] sm:$0xff] %v8834_v20  ;;  %v8836_v22 = vld [vmem:[#allocation8 + $0x2b0] ss:$24 sps:$4 sm:$0xff]  }
  0xe5   :  { %1216 = vmatmul.mubr.bf16.gmra.mrb[20].mxu0 %v8657_v16  ;;  %v8754_v16 = vld [vmem:[#allocation8 + $0xf8] ss:$24 sps:$4 sm:$0xff]  }
  0xe6   :  { %1829 = vmatpush1.bf16.msra.mxu0 %v8732_v24  ;;  %1225 = vmatprep.mubr.bf16.mxu0 %v8666_v23  ;;  %v8761_v23 = vld [vmem:[#allocation8 + $0x128] ss:$24 sps:$4 sm:$0xff]  }
  0xe7   :  { %1870 = vmatpush1.bf16.msra.mxu1 %v7228_v25  ;;  %1830 = vmatprep.subr.bf16.mxu0 %v8736_v4  ;;  %v8838_v25 = vld [vmem:[#allocation8 + $0x2dc] ss:$24 sps:$4 sm:$0xff]  }
  0xe8   :  { %1871 = vmatprep.subr.bf16.mxu1 %v7231_v27  ;;  %12460 = vst [vmem:[#allocation22_spill] sm:$0xff] %v8838_v25  ;;  %v8840_v27 = vld [vmem:[#allocation8 + $0x2e4] ss:$24 sps:$4 sm:$0xff]  }
  0xe9   :  { %12461 = vst [vmem:[#allocation23_spill] sm:$0xff] %v8840_v27 }
  0xea   :  { %1831 = vmatpush1.bf16.msra.mxu0 %v8740_v28 }
  0xeb   :  { %1872 = vmatpush1.bf16.msra.mxu1 %v7234_v29  ;;  %1832 = vmatprep.subr.bf16.mxu0 %v8742_v30  ;;  %v8846_v29 = vld [vmem:[#allocation8 + $0x2d8] ss:$24 sps:$4 sm:$0xff]  }
  0xec   :  { %1873 = vmatprep.subr.bf16.mxu1 %v7237_v31  ;;  %12462 = vst [vmem:[#allocation24_spill] sm:$0xff] %v8846_v29  ;;  %v8848_v31 = vld [vmem:[#allocation8 + $0x2e0] ss:$24 sps:$4 sm:$0xff]  }
  0xed   :  { %1226 = vmatmul.mubr.bf16.gmra.mrb[24].mxu0 %v8672_v26  ;;  %v8768_v26 = vld [vmem:[#allocation8 + $0x158] ss:$24 sps:$4 sm:$0xff]   ;;  %12463 = vst [vmem:[#allocation25_spill] sm:$0xff] %v8848_v31 }
  0xee   :  { %1833 = vmatpush1.bf16.msra.mxu0 %v8747_v15  ;;  %1235 = vmatprep.mubr.bf16.mxu0 %v8680_v32  ;;  %v8775_v32 = vld [vmem:[#allocation8 + $0x188] ss:$24 sps:$4 sm:$0xff]  }
  0xef   :  { %1874 = vmatpush1.bf16.msra.mxu1 %v7240_v33  ;;  %1834 = vmatprep.subr.bf16.mxu0 %v8750_v34  ;;  %v8856_v33 = vld [vmem:[#allocation8 + $0x4] ss:$24 sps:$4 sm:$0xff]  }
  0xf0   :  { %1875 = vmatprep.subr.bf16.mxu1 %v7243_v35  ;;  %12464 = vst [vmem:[#allocation26_spill] sm:$0xff] %v8856_v33  ;;  %v8862_v35 = vld [vmem:[#allocation8] ss:$24 sps:$4 sm:$0xff]  }
  0xf2   :  { %1835 = vmatpush1.bf16.msra.mxu0 %v8754_v16 }
  0xf3   :  { %1876 = vmatpush1.bf16.msra.mxu1 %v7246_v37  ;;  %1836 = vmatprep.subr.bf16.mxu0 %v8756_v38  ;;  %v8866_v37 = vld [vmem:[#allocation8 + $0x34] ss:$24 sps:$4 sm:$0xff]  }
  0xf4   :  { %1877 = vmatprep.subr.bf16.mxu1 %v7249_v39  ;;  %v8870_v39 = vld [vmem:[#allocation8 + $0x30] ss:$24 sps:$4 sm:$0xff]  }
  0xf5   :  { %1236 = vmatmul.mubr.bf16.gmra.mrb[28].mxu0 %v8687_v36  ;;  %v8782_v36 = vld [vmem:[#allocation8 + $0x1b8] ss:$24 sps:$4 sm:$0xff]  }
  0xf6   :  { %1837 = vmatpush1.bf16.msra.mxu0 %v8761_v23  ;;  %1856 = vmatprep.mubr.bf16.mxu0 %v11973_v43 }
  0xf7   :  { %1878 = vmatpush1.bf16.msra.mxu1 %v7252_v40  ;;  %1838 = vmatprep.subr.bf16.mxu0 %v8764_v41  ;;  %v8878_v40 = vld [vmem:[#allocation8 + $0x60] ss:$24 sps:$4 sm:$0xff]  }
  0xf8   :  { %1879 = vmatprep.subr.bf16.mxu1 %v7255_v42  ;;  %v8938_v42 = vld [vmem:[#allocation8 + $0x1e4] ss:$24 sps:$4 sm:$0xff]  }
  0xf9   :  { %12466 = vst [vmem:[#allocation28_spill] sm:$0xff] %v8938_v42 }
  0xfa   :  { %1839 = vmatpush1.bf16.msra.mxu0 %v8768_v26 }
  0xfb   :  { %1880 = vmatpush1.bf16.msra.mxu1 %v7258_v44  ;;  %1840 = vmatprep.subr.bf16.mxu0 %v8770_v45  ;;  %v8946_v44 = vld [vmem:[#allocation8 + $0x214] ss:$24 sps:$4 sm:$0xff]  }
  0xfc   :  { %1881 = vmatprep.subr.bf16.mxu1 %v7261_v46  ;;  %12468 = vst [vmem:[#allocation30_spill] sm:$0xff] %v8946_v44  ;;  %v8954_v46 = vld [vmem:[#allocation8 + $0x244] ss:$24 sps:$4 sm:$0xff]  }
  0xfd   :  { %12470 = vst [vmem:[#allocation32_spill] sm:$0xff] %v8954_v46 }
  0xfe   :  { %1841 = vmatpush1.bf16.msra.mxu0 %v8775_v32 }
  0xff   :  { %1882 = vmatpush1.bf16.msra.mxu1 %v7264_v47  ;;  %1842 = vmatprep.subr.bf16.mxu0 %v8778_v48 }
 0x100   :  { %1883 = vmatprep.subr.bf16.mxu1 %v7267_v50 }
 0x102   :  { %1843 = vmatpush1.bf16.msra.mxu0 %v8782_v36 }
 0x103   :  { %1884 = vmatpush1.bf16.msra.mxu1 %v7270_v51  ;;  %1844 = vmatprep.subr.bf16.mxu0 %v8784_v52 }
 0x104   :  { %1885 = vmatprep.subr.bf16.mxu1 %v7273_v49 }
 0x106   :  { %1845 = vmatpush1.bf16.msra.mxu0 %v8788_v53 }
 0x107   :  { %1886 = vmatpush1.bf16.msra.mxu1 %v8790_v54  ;;  %1846 = vmatprep.subr.bf16.mxu0 %v8792_v55 }
 0x108   :  { %1887 = vmatprep.subr.bf16.mxu1 %v8794_v56 }
 0x10a   :  { %1847 = vmatpush1.bf16.msra.mxu0 %v8798_v57 }
 0x10b   :  { %1888 = vmatpush1.bf16.msra.mxu1 %v8800_v58  ;;  %1848 = vmatprep.subr.bf16.mxu0 %v8802_v59 }
 0x10c   :  { %1889 = vmatprep.subr.bf16.mxu1 %v8804_v60 }
 0x10e   :  { %1849 = vmatpush1.bf16.msra.mxu0 %v8810_v62 }
 0x10f   :  { %1890 = vmatpush1.bf16.msra.mxu1 %v8812_v0  ;;  %1850 = vmatprep.subr.bf16.mxu0 %v8814_v2 }
 0x110   :  { %1891 = vmatprep.subr.bf16.mxu1 %v8816_v5 }
 0x112   :  { %1851 = vmatpush1.bf16.msra.mxu0 %v8822_v7 }
 0x113   :  { %1892 = vmatpush1.bf16.msra.mxu1 %v8824_v9  ;;  %1852 = vmatprep.subr.bf16.mxu0 %v8826_v14 }
 0x114   :  { %1893 = vmatprep.subr.bf16.mxu1 %v8828_v18 }
 0x116   :  { %1853 = vmatpush1.bf16.msra.mxu0 %v8834_v20 }
 0x117   :  { %1894 = vmatpush1.bf16.msra.mxu1 %v8836_v22  ;;  %1854 = vmatprep.subr.bf16.mxu0 %v8838_v25 }
 0x118   :  { %1895 = vmatprep.subr.bf16.mxu1 %v8840_v27 }
 0x11a   :  { %1855 = vmatpush1.bf16.msra.mxu0 %v8846_v29 }
 0x11b   :  { %1896 = vmatpush1.bf16.msra.mxu1 %v8848_v31  ;;  %1964 = vmatprep.subr.bf16.mxu0 %v8856_v33 }
 0x11c   :  { %2005 = vmatprep.subr.bf16.mxu1 %v8712_v11  ;;  %v8874_v11 = vld [vmem:[#allocation8 + $0x64] ss:$24 sps:$4 sm:$0xff]  }
 0x11d   :  { %1857 = vmatmul.mubr.bf16.vlgmr.msra.gmra.mrb[32].mxu0 %v11973_v43 }
 0x11e   :  { %1898 = vmatmul.mubr.bf16.vlgmr.msra.gmra.mrb[20].mxu1 %v11973_v43  ;;  %1965 = vmatpush1.bf16.msra.mxu0 %v8862_v35 }
 0x11f   :  { %2006 = vmatpush1.bf16.msra.mxu1 %v8717_v13  ;;  %1966 = vmatprep.subr.bf16.mxu0 %v8866_v37  ;;  %v8882_v13 = vld [vmem:[#allocation8 + $0x94] ss:$24 sps:$4 sm:$0xff]  }
 0x120   :  { %2007 = vmatprep.subr.bf16.mxu1 %v8720_v17  ;;  %v8886_v17 = vld [vmem:[#allocation8 + $0x90] ss:$24 sps:$4 sm:$0xff]  }
 0x122   :  { %1967 = vmatpush1.bf16.msra.mxu0 %v8870_v39 }
 0x123   :  { %2008 = vmatpush1.bf16.msra.mxu1 %v8727_v19  ;;  %1968 = vmatprep.subr.bf16.mxu0 %v8874_v11  ;;  %v8890_v19 = vld [vmem:[#allocation8 + $0xc4] ss:$24 sps:$4 sm:$0xff]  }
 0x124   :  { %2009 = vmatprep.subr.bf16.mxu1 %v8730_v21  ;;  %v8894_v21 = vld [vmem:[#allocation8 + $0xc0] ss:$24 sps:$4 sm:$0xff]  }
 0x126   :  { %1969 = vmatpush1.bf16.msra.mxu0 %v8878_v40 }
 0x127   :  { %2010 = vmatpush1.bf16.msra.mxu1 %v8732_v24  ;;  %1970 = vmatprep.subr.bf16.mxu0 %v8882_v13  ;;  %v8898_v24 = vld [vmem:[#allocation8 + $0xf4] ss:$24 sps:$4 sm:$0xff]  }
 0x128   :  { %2011 = vmatprep.subr.bf16.mxu1 %v8736_v4  ;;  %v8902_v4 = vld [vmem:[#allocation8 + $0xf0] ss:$24 sps:$4 sm:$0xff]  }
 0x12a   :  { %1971 = vmatpush1.bf16.msra.mxu0 %v8886_v17 }
 0x12b   :  { %2012 = vmatpush1.bf16.msra.mxu1 %v8740_v28  ;;  %1972 = vmatprep.subr.bf16.mxu0 %v8890_v19  ;;  %v8906_v28 = vld [vmem:[#allocation8 + $0x124] ss:$24 sps:$4 sm:$0xff]  }
 0x12c   :  { %2013 = vmatprep.subr.bf16.mxu1 %v8742_v30  ;;  %v8910_v30 = vld [vmem:[#allocation8 + $0x120] ss:$24 sps:$4 sm:$0xff]  }
 0x12e   :  { %1973 = vmatpush1.bf16.msra.mxu0 %v8894_v21 }
 0x12f   :  { %2014 = vmatpush1.bf16.msra.mxu1 %v8747_v15  ;;  %1974 = vmatprep.subr.bf16.mxu0 %v8898_v24  ;;  %v8914_v15 = vld [vmem:[#allocation8 + $0x154] ss:$24 sps:$4 sm:$0xff]  }
 0x130   :  { %2015 = vmatprep.subr.bf16.mxu1 %v8750_v34  ;;  %v8918_v34 = vld [vmem:[#allocation8 + $0x150] ss:$24 sps:$4 sm:$0xff]  }
 0x132   :  { %1975 = vmatpush1.bf16.msra.mxu0 %v8902_v4 }
 0x133   :  { %2016 = vmatpush1.bf16.msra.mxu1 %v8754_v16  ;;  %1976 = vmatprep.subr.bf16.mxu0 %v8906_v28  ;;  %v8922_v16 = vld [vmem:[#allocation8 + $0x184] ss:$24 sps:$4 sm:$0xff]  }
 0x134   :  { %2017 = vmatprep.subr.bf16.mxu1 %v8756_v38  ;;  %v8926_v38 = vld [vmem:[#allocation8 + $0x180] ss:$24 sps:$4 sm:$0xff]  }
 0x136   :  { %1977 = vmatpush1.bf16.msra.mxu0 %v8910_v30 }
 0x137   :  { %2018 = vmatpush1.bf16.msra.mxu1 %v8761_v23  ;;  %1978 = vmatprep.subr.bf16.mxu0 %v8914_v15  ;;  %v8930_v23 = vld [vmem:[#allocation8 + $0x1b4] ss:$24 sps:$4 sm:$0xff]  }
 0x138   :  { %2019 = vmatprep.subr.bf16.mxu1 %v8764_v41  ;;  %v8934_v41 = vld [vmem:[#allocation8 + $0x1b0] ss:$24 sps:$4 sm:$0xff]  }
 0x139   :  { %12465 = vst [vmem:[#allocation27_spill] sm:$0xff] %v8934_v41 }
 0x13a   :  { %1979 = vmatpush1.bf16.msra.mxu0 %v8918_v34 }
 0x13b   :  { %2020 = vmatpush1.bf16.msra.mxu1 %v8768_v26  ;;  %1980 = vmatprep.subr.bf16.mxu0 %v8922_v16  ;;  %v8942_v26 = vld [vmem:[#allocation8 + $0x1e0] ss:$24 sps:$4 sm:$0xff]  }
 0x13c   :  { %2021 = vmatprep.subr.bf16.mxu1 %v8770_v45  ;;  %12467 = vst [vmem:[#allocation29_spill] sm:$0xff] %v8942_v26  ;;  %v8950_v45 = vld [vmem:[#allocation8 + $0x210] ss:$24 sps:$4 sm:$0xff]  }
 0x13d   :  { %12469 = vst [vmem:[#allocation31_spill] sm:$0xff] %v8950_v45 }
 0x13e   :  { %1981 = vmatpush1.bf16.msra.mxu0 %v8926_v38 }
 0x13f   :  { %2022 = vmatpush1.bf16.msra.mxu1 %v8775_v32  ;;  %1982 = vmatprep.subr.bf16.mxu0 %v8930_v23 }
 0x140   :  { %2023 = vmatprep.subr.bf16.mxu1 %v8778_v48 }
 0x142   :  { %1983 = vmatpush1.bf16.msra.mxu0 %v8934_v41 }
 0x143   :  { %2024 = vmatpush1.bf16.msra.mxu1 %v8782_v36  ;;  %1984 = vmatprep.subr.bf16.mxu0 %v8938_v42 }
 0x144   :  { %2025 = vmatprep.subr.bf16.mxu1 %v8784_v52 }
 0x146   :  { %1985 = vmatpush1.bf16.msra.mxu0 %v8942_v26 }
 0x147   :  { %2026 = vmatpush1.bf16.msra.mxu1 %v8788_v53  ;;  %1986 = vmatprep.subr.bf16.mxu0 %v8946_v44 }
 0x148   :  { %2027 = vmatprep.subr.bf16.mxu1 %v8792_v55 }
 0x14a   :  { %1987 = vmatpush1.bf16.msra.mxu0 %v8950_v45 }
 0x14b   :  { %2028 = vmatpush1.bf16.msra.mxu1 %v8798_v57  ;;  %1988 = vmatprep.subr.bf16.mxu0 %v8954_v46 }
 0x14c   :  { %2029 = vmatprep.subr.bf16.mxu1 %v8802_v59 }
 0x14e   :  { %1989 = vmatpush1.bf16.msra.mxu0 %v8693_v61  ;;  %v309_v61 = vlaneseq }
 0x14f   :  { %2030 = vmatpush1.bf16.msra.mxu1 %v8810_v62  ;;  %1990 = vmatprep.subr.bf16.mxu0 %v8695_v63 }
 0x150   :  { %2031 = vmatprep.subr.bf16.mxu1 %v8814_v2  ;;  %v8974_v63 = vshrl.u32 %v309_v61, 7 }
 0x152   :  { %1991 = vmatpush1.bf16.msra.mxu0 %v8698_v1  ;;  %v8977_v1 = vsub.s32 0, %v8974_v63 }
 0x153   :  { %2032 = vmatpush1.bf16.msra.mxu1 %v8822_v7  ;;  %1992 = vmatprep.subr.bf16.mxu0 %v8701_v3  ;;  %v8980_v3 = vsub.s32 2, %v8974_v63 }
 0x154   :  { %2033 = vmatprep.subr.bf16.mxu1 %v8826_v14  ;;  %12471 = vst [vmem:[#allocation33_spill] sm:$0xff] %v8977_v1 }
 0x155   :  { %12472 = vst [vmem:[#allocation34_spill] sm:$0xff] %v8980_v3 }
 0x156   :  { %1993 = vmatpush1.bf16.msra.mxu0 %v8703_v6  ;;  %v8985_v6 = vld [vmem:[%s11962_s3] sm:$0x3f] }
 0x157   :  { %2034 = vmatpush1.bf16.msra.mxu1 %v8834_v20  ;;  %1994 = vmatprep.subr.bf16.mxu0 %v8707_v8  ;;  %v8988_v8 = vsub.s32 3, %v8974_v63  ;;  %v8999_v32 = vrot.slane %v8985_v6, %v8980_v3 }
 0x158   :  { %2035 = vmatprep.subr.bf16.mxu1 %v8838_v25 }
 0x159   :  { %12473 = vst [vmem:[#allocation35_spill] sm:$0xff] %v8988_v8  ;;  %v9007_v50 = vrot.slane %v8985_v6, %v8988_v8 }
 0x15a   :  { %1995 = vmatpush1.bf16.msra.mxu0 %v8710_v10  ;;  %v8991_v10 = vsub.s32 1, %v8974_v63 }
 0x15b   :  { %2036 = vmatpush1.bf16.msra.mxu1 %v8846_v29  ;;  %2046 = vmatprep.subr.bf16.mxu0 %v8715_v12  ;;  %v8995_v12 = vrot.slane %v8985_v6, %v8977_v1 }
 0x15c   :  { %2145 = vmatprep.subr.bf16.mxu1 %v8856_v33  ;;  %12474 = vst [vmem:[#allocation36_spill] sm:$0xff] %v8991_v10  ;;  %v9015_v52 = vrot.slane %v8985_v6, %v8991_v10 }
 0x170   :  { %v9001_v47 = vpop.f32.mrb[0].mxu0 }
 0x171   :  { %v9003_v48 = vpop.f32.mrb[0].mxu1  ;;  %v9009_v36 = vpop.f32.mrb[1].mxu0 }
 0x172   :  { %v9011_v51 = vpop.f32.mrb[1].mxu1  ;;  %v1065_v49 = vpop.f32.mrb[2].mxu0 }
 0x173   :  { %v1138_v53 = vpop.f32.mrb[2].mxu1  ;;  %v9018_v55 = vadd.f32 %v1065_v49, %v8995_v12  ;;  %v1067_v57 = vpop.f32.mrb[3].mxu0 }
 0x174   :  { %v9021_v59 = vadd.f32 %v1138_v53, %v8999_v32  ;;  %v1140_v61 = vpop.f32.mrb[3].mxu1  ;;  %v9024_v43 = vadd.f32 %v1067_v57, %v9015_v52 }
 0x175   :  { %12475 = vst [vmem:[#allocation37_spill] sm:$0xff] %v9018_v55  ;;  %v9027_v33 = vadd.f32 %v1140_v61, %v9007_v50 }
 0x176   :  { %12476 = vst [vmem:[#allocation38_spill] sm:$0xff] %v9021_v59  ;;  %12477 = vst [vmem:[#allocation39_spill] sm:$0xff] %v9024_v43 }
 0x177   :  { %12478 = vst [vmem:[#allocation40_spill] sm:$0xff] %v9027_v33 }
 0x178   :  { %v1071_v29 = vpop.f32.mrb[4].mxu0 }
 0x179   :  { %v1144_v25 = vpop.f32.mrb[4].mxu1  ;;  %v9030_v20 = vadd.f32 %v1071_v29, %v8995_v12  ;;  %v1073_v14 = vpop.f32.mrb[5].mxu0 }
 0x17a   :  { %v9033_v49 = vadd.f32 %v1144_v25, %v8999_v32  ;;  %v1146_v55 = vpop.f32.mrb[5].mxu1  ;;  %v9036_v53 = vadd.f32 %v1073_v14, %v9015_v52  ;;  %v1075_v59 = vpop.f32.mrb[6].mxu0 }
 0x17b   :  { %12479 = vst [vmem:[#allocation41_spill] sm:$0xff] %v9030_v20  ;;  %v9039_v57 = vadd.f32 %v1146_v55, %v9007_v50  ;;  %v1148_v43 = vpop.f32.mrb[6].mxu1  ;;  %v9042_v61 = vadd.f32 %v1075_v59, %v8995_v12  ;;  %v1077_v33 = vpop.f32.mrb[7].mxu0 }
 0x17c   :  { %12480 = vst [vmem:[#allocation42_spill] sm:$0xff] %v9033_v49  ;;  %12481 = vst [vmem:[#allocation43_spill] sm:$0xff] %v9036_v53  ;;  %v9045_v29 = vadd.f32 %v1148_v43, %v8999_v32  ;;  %v1150_v20 = vpop.f32.mrb[7].mxu1  ;;  %v9048_v25 = vadd.f32 %v1077_v33, %v9015_v52 }
 0x17d   :  { %12482 = vst [vmem:[#allocation44_spill] sm:$0xff] %v9039_v57  ;;  %12483 = vst [vmem:[#allocation45_spill] sm:$0xff] %v9042_v61  ;;  %v9051_v49 = vadd.f32 %v1150_v20, %v9007_v50 }
 0x17e   :  { %12484 = vst [vmem:[#allocation46_spill] sm:$0xff] %v9045_v29  ;;  %12485 = vst [vmem:[#allocation47_spill] sm:$0xff] %v9048_v25 }
 0x17f   :  { %12486 = vst [vmem:[#allocation48_spill] sm:$0xff] %v9051_v49 }
 0x180   :  { %v1081_v14 = vpop.f32.mrb[8].mxu0 }
 0x181   :  { %v1154_v53 = vpop.f32.mrb[8].mxu1  ;;  %v9054_v55 = vadd.f32 %v1081_v14, %v8995_v12  ;;  %v1083_v57 = vpop.f32.mrb[9].mxu0 }
 0x182   :  { %v9057_v59 = vadd.f32 %v1154_v53, %v8999_v32  ;;  %v1156_v61 = vpop.f32.mrb[9].mxu1  ;;  %v9060_v43 = vadd.f32 %v1083_v57, %v9015_v52  ;;  %v1085_v29 = vpop.f32.mrb[10].mxu0 }
 0x183   :  { %12487 = vst [vmem:[#allocation49_spill] sm:$0xff] %v9054_v55  ;;  %v9063_v33 = vadd.f32 %v1156_v61, %v9007_v50  ;;  %v1158_v25 = vpop.f32.mrb[10].mxu1  ;;  %v9066_v20 = vadd.f32 %v1085_v29, %v8995_v12  ;;  %v1087_v49 = vpop.f32.mrb[11].mxu0 }
 0x184   :  { %12488 = vst [vmem:[#allocation50_spill] sm:$0xff] %v9057_v59  ;;  %12489 = vst [vmem:[#allocation51_spill] sm:$0xff] %v9060_v43  ;;  %v9069_v14 = vadd.f32 %v1158_v25, %v8999_v32  ;;  %v1160_v55 = vpop.f32.mrb[11].mxu1  ;;  %v9072_v53 = vadd.f32 %v1087_v49, %v9015_v52 }
 0x185   :  { %12490 = vst [vmem:[#allocation52_spill] sm:$0xff] %v9063_v33  ;;  %12491 = vst [vmem:[#allocation53_spill] sm:$0xff] %v9066_v20  ;;  %v9075_v59 = vadd.f32 %v1160_v55, %v9007_v50 }
 0x186   :  { %12492 = vst [vmem:[#allocation54_spill] sm:$0xff] %v9069_v14  ;;  %12493 = vst [vmem:[#allocation55_spill] sm:$0xff] %v9072_v53 }
 0x187   :  { %12494 = vst [vmem:[#allocation56_spill] sm:$0xff] %v9075_v59 }
 0x188   :  { %v1091_v57 = vpop.f32.mrb[12].mxu0 }
 0x189   :  { %v1164_v43 = vpop.f32.mrb[12].mxu1  ;;  %v9078_v61 = vadd.f32 %v1091_v57, %v8995_v12  ;;  %v1093_v33 = vpop.f32.mrb[13].mxu0 }
 0x18a   :  { %v9081_v29 = vadd.f32 %v1164_v43, %v8999_v32  ;;  %v1166_v20 = vpop.f32.mrb[13].mxu1  ;;  %v9084_v25 = vadd.f32 %v1093_v33, %v9015_v52  ;;  %v1095_v14 = vpop.f32.mrb[14].mxu0  ;;  %v307_v33 = vld [vmem:[%s11963_s4] sm:$0x3f] }
 0x18b   :  { %12495 = vst [vmem:[#allocation57_spill] sm:$0xff] %v9078_v61  ;;  %v9087_v49 = vadd.f32 %v1166_v20, %v9007_v50  ;;  %v1168_v53 = vpop.f32.mrb[14].mxu1  ;;  %v9090_v55 = vadd.f32 %v1095_v14, %v8995_v12  ;;  %v1097_v59 = vpop.f32.mrb[15].mxu0  ;;  %v9105_v20 = vsub.s32 4, %v8974_v63  ;;  %v9108_v14 = vrot.slane %v307_v33, %v8977_v1 }
 0x18c   :  { %12496 = vst [vmem:[#allocation58_spill] sm:$0xff] %v9081_v29  ;;  %12497 = vst [vmem:[#allocation59_spill] sm:$0xff] %v9084_v25  ;;  %v9093_v57 = vadd.f32 %v1168_v53, %v8999_v32  ;;  %v1170_v61 = vpop.f32.mrb[15].mxu1  ;;  %v9096_v43 = vadd.f32 %v1097_v59, %v9015_v52  ;;  %v9111_v53 = vsub.s32 5, %v8974_v63  ;;  %v1064_v63 = vadd.f32 %v9009_v36, %v9015_v52 }
 0x18d   :  { %12498 = vst [vmem:[#allocation60_spill] sm:$0xff] %v9087_v49  ;;  %12499 = vst [vmem:[#allocation61_spill] sm:$0xff] %v9090_v55  ;;  %v9099_v29 = vadd.f32 %v1170_v61, %v9007_v50  ;;  %v9118_v59 = vrot.slane %v8985_v6, %v9105_v20 }
 0x18e   :  { %12500 = vst [vmem:[#allocation62_spill] sm:$0xff] %v9093_v57  ;;  %12501 = vst [vmem:[#allocation63_spill] sm:$0xff] %v9096_v43  ;;  %v9114_v57 = vrot.slane %v307_v33, %v8991_v10  ;;  %v1062_v43 = vadd.f32 %v9001_v47, %v8995_v12  ;;  %v9131_v10 = vrot.slane %v8985_v6, %v9111_v53 }
 0x18f   :  { %12502 = vst [vmem:[#allocation64_spill] sm:$0xff] %v9099_v29  ;;  %12503 = vst [vmem:[#allocation65_spill] sm:$0xff] %v9105_v20 }
 0x190   :  { %12504 = vst [vmem:[#allocation66_spill] sm:$0xff] %v9108_v14  ;;  %12505 = vst [vmem:[#allocation67_spill] sm:$0xff] %v9111_v53 }
 0x191   :  { %12506 = vst [vmem:[#allocation68_spill] sm:$0xff] %v9114_v57 }
 0x1b0   :  { %v9120_v61 = vpop.f32.mrb[16].mxu0 }
 0x1b1   :  { %v1817_v29 = vpop.f32.mrb[16].mxu1  ;;  %v9125_v1 = vpop.f32.mrb[17].mxu0 }
 0x1b2   :  { %v1818_v55 = vadd.f32 %v1817_v29, %v9108_v14  ;;  %v1819_v49 = vpop.f32.mrb[17].mxu1  ;;  %v1211_v7 = vpop.f32.mrb[18].mxu0 }
 0x1b3   :  { %v1820_v25 = vadd.f32 %v1819_v49, %v9114_v57  ;;  %v1821_v2 = vpop.f32.mrb[18].mxu1  ;;  %v9135_v31 = vadd.f32 %v1211_v7, %v9118_v59  ;;  %v1213_v12 = vpop.f32.mrb[19].mxu0 }
 0x1b4   :  { %v1906_v62 = vadd.f32 %v1818_v55, %v1062_v43  ;;  %v1822_v47 = vpop.f32.mrb[19].mxu1  ;;  %v9138_v14 = vadd.f32 %v1213_v12, %v9131_v10 }
 0x1b5   :  { %12507 = vst [vmem:[#allocation69_spill] sm:$0xff] %v9135_v31  ;;  %v1907_v29 = vadd.f32 %v1820_v25, %v1064_v63 }
 0x1b6   :  { %12508 = vst [vmem:[#allocation70_spill] sm:$0xff] %v9138_v14 }
 0x1b8   :  { %v1217_v27 = vpop.f32.mrb[20].mxu0 }
 0x1b9   :  { %v9141_v36 = vadd.f32 %v1217_v27, %v9118_v59  ;;  %v1219_v6 = vpop.f32.mrb[21].mxu0 }
 0x1ba   :  { %v9144_v52 = vadd.f32 %v1219_v6, %v9131_v10  ;;  %v1221_v49 = vpop.f32.mrb[22].mxu0 }
 0x1bb   :  { %12509 = vst [vmem:[#allocation71_spill] sm:$0xff] %v9141_v36  ;;  %v9147_v2 = vadd.f32 %v1221_v49, %v9118_v59  ;;  %v1223_v7 = vpop.f32.mrb[23].mxu0  ;;  %v1210_v36 = vadd.f32 %v9125_v1, %v9131_v10 }
 0x1bc   :  { %12510 = vst [vmem:[#allocation72_spill] sm:$0xff] %v9144_v52  ;;  %v9150_v55 = vadd.f32 %v1223_v7, %v9131_v10  ;;  %v6671_v52 = vmul.f32 -1.442695, %v1907_v29 }
 0x1bd   :  { %12511 = vst [vmem:[#allocation73_spill] sm:$0xff] %v9147_v2 }
 0x1be   :  { %12512 = vst [vmem:[#allocation74_spill] sm:$0xff] %v9150_v55 }
 0x1c0   :  { %v1227_v25 = vpop.f32.mrb[24].mxu0 }
 0x1c1   :  { %v9153_v43 = vadd.f32 %v1227_v25, %v9118_v59  ;;  %v1229_v63 = vpop.f32.mrb[25].mxu0 }
 0x1c2   :  { %v9156_v27 = vadd.f32 %v1229_v63, %v9131_v10  ;;  %v1231_v12 = vpop.f32.mrb[26].mxu0 }
 0x1c3   :  { %12513 = vst [vmem:[#allocation75_spill] sm:$0xff] %v9153_v43  ;;  %v9159_v47 = vadd.f32 %v1231_v12, %v9118_v59  ;;  %v1233_v6 = vpop.f32.mrb[27].mxu0 }
 0x1c4   :  { %12514 = vst [vmem:[#allocation76_spill] sm:$0xff] %v9156_v27  ;;  %v9162_v49 = vadd.f32 %v1233_v6, %v9131_v10 }
 0x1c5   :  { %12515 = vst [vmem:[#allocation77_spill] sm:$0xff] %v9159_v47  ;;  %v6670_v47 = vmul.f32 -1.442695, %v1906_v62  ;;  %v9186_v62 = vrot.slane %v307_v33, %v9111_v53 }
 0x1c6   :  { %12516 = vst [vmem:[#allocation78_spill] sm:$0xff] %v9162_v49 }
 0x1c7   :  { %7659 = vpow2.f32 %v6670_v47 }
 0x1c8   :  { %v1237_v2 = vpop.f32.mrb[28].mxu0  ;;  %7661 = vpow2.f32 %v6671_v52 }
 0x1c9   :  { %v9165_v7 = vadd.f32 %v1237_v2, %v9118_v59  ;;  %v1239_v55 = vpop.f32.mrb[29].mxu0 }
 0x1ca   :  { %v9168_v25 = vadd.f32 %v1239_v55, %v9131_v10  ;;  %v1241_v43 = vpop.f32.mrb[30].mxu0  ;;  %v9177_v55 = vrot.slane %v307_v33, %v8980_v3  ;;  %v1137_v3 = vadd.f32 %v9011_v51, %v9007_v50 }
 0x1cb   :  { %12517 = vst [vmem:[#allocation79_spill] sm:$0xff] %v9165_v7  ;;  %v9171_v63 = vadd.f32 %v1241_v43, %v9118_v59  ;;  %v1243_v27 = vpop.f32.mrb[31].mxu0  ;;  %v9180_v43 = vrot.slane %v307_v33, %v9105_v20 }
 0x1cc   :  { %12518 = vst [vmem:[#allocation80_spill] sm:$0xff] %v9168_v25  ;;  %v9174_v12 = vadd.f32 %v1243_v27, %v9131_v10  ;;  %12521 = vst [vmem:[#allocation83_spill] sm:$0xff] %v9177_v55  ;;  %v1135_v27 = vadd.f32 %v9003_v48, %v8999_v32  ;;  %v1208_v32 = vadd.f32 %v9120_v61, %v9118_v59 }
 0x1cd   :  { %12519 = vst [vmem:[#allocation81_spill] sm:$0xff] %v9171_v63  ;;  %12522 = vst [vmem:[#allocation84_spill] sm:$0xff] %v9180_v43  ;;  %v9183_v63 = vrot.slane %v307_v33, %v8988_v8 }
 0x1ce   :  { %12520 = vst [vmem:[#allocation82_spill] sm:$0xff] %v9174_v12 }
 0x1d1   :  { %v7660_v6 = vpop.eup %7659 }
 0x1d2   :  { %v7662_v49 = vpop.eup %7661  ;;  %v1914_v2 = vadd.f32 1.0, %v7660_v6 }
 0x1d3   :  { %v1915_v7 = vadd.f32 1.0, %v7662_v49 }
 0x1d4   :  { %7663 = vrcp.f32 %v1914_v2 }
 0x1d5   :  { %7665 = vrcp.f32 %v1915_v7 }
 0x1de   :  { %v7664_v2 = vpop.eup %7663 }
 0x1df   :  { %v7666_v12 = vpop.eup %7665 }
 0x1f0   :  { %v1858_v29 = vpop.f32.mrb[32].mxu0 }
 0x1f1   :  { %v1899_v52 = vpop.f32.mrb[20].mxu1  ;;  %v1859_v47 = vadd.f32 %v1858_v29, %v9177_v55  ;;  %v1860_v7 = vpop.f32.mrb[33].mxu0 }
 0x1f2   :  { %v1900_v49 = vadd.f32 %v1899_v52, %v9180_v43  ;;  %v1901_v6 = vpop.f32.mrb[21].mxu1  ;;  %v1861_v8 = vadd.f32 %v1860_v7, %v9183_v63  ;;  %v1862_v53 = vpop.f32.mrb[34].mxu0 }
 0x1f3   :  { %v1902_v33 = vadd.f32 %v1901_v6, %v9186_v62  ;;  %v1903_v20 = vpop.f32.mrb[22].mxu1  ;;  %v1920_v48 = vadd.f32 %v1859_v47, %v1135_v27  ;;  %v1863_v25 = vpop.f32.mrb[35].mxu0 }
 0x1f4   :  { %v1934_v29 = vmul.f32 %v7664_v2, %v1900_v49  ;;  %v1904_v52 = vpop.f32.mrb[23].mxu1  ;;  %v1921_v14 = vadd.f32 %v1861_v8, %v1137_v3  ;;  %v9212_v2 = vld [vmem:[#allocation8 + $0x10] ss:$24 sps:$4 sm:$0xff]  }
 0x1f5   :  { %v1935_v31 = vmul.f32 %v7666_v12, %v1902_v33  ;;  %v6672_v50 = vmul.f32 -1.442695, %v1920_v48  ;;  %v9215_v33 = vld [vmem:[#allocation8 + $0x44] ss:$24 sps:$4 sm:$0xff]   ;;  %v9223_v48 = vld [vmem:[#allocation8 + $0x74] ss:$24 sps:$4 sm:$0xff]  }
 0x1f6   :  { %v1936_v51 = vadd.f32 %v1934_v29, %v1208_v32  ;;  %v6673_v7 = vmul.f32 -1.442695, %v1921_v14  ;;  %v9220_v32 = vld [vmem:[#allocation8 + $0x40] ss:$24 sps:$4 sm:$0xff]   ;;  %v9228_v29 = vld [vmem:[#allocation8 + $0x70] ss:$24 sps:$4 sm:$0xff]  }
 0x1f7   :  { %v1937_v43 = vadd.f32 %v1935_v31, %v1210_v36  ;;  %7667 = vpow2.f32 %v6672_v50  ;;  %v9231_v52 = vld [vmem:[#allocation8 + $0xa4] ss:$24 sps:$4 sm:$0xff]   ;;  %v9236_v50 = vld [vmem:[#allocation8 + $0xa0] ss:$24 sps:$4 sm:$0xff]  }
 0x1f8   :  { %7669 = vpow2.f32 %v6673_v7  ;;  %v9244_v7 = vld [vmem:[#allocation8 + $0xd0] ss:$24 sps:$4 sm:$0xff]  }
 0x201   :  { %v7668_v20 = vpop.eup %7667 }
 0x202   :  { %v1928_v53 = vadd.f32 1.0, %v7668_v20  ;;  %v7670_v6 = vpop.eup %7669  ;;  %v9247_v20 = vld [vmem:[#allocation8 + $0x104] ss:$24 sps:$4 sm:$0xff]  }
 0x203   :  { %v1929_v59 = vadd.f32 1.0, %v7670_v6  ;;  %v9255_v6 = vld [vmem:[#allocation8 + $0x134] ss:$24 sps:$4 sm:$0xff]  }
 0x204   :  { %7671 = vrcp.f32 %v1928_v53  ;;  %v9252_v53 = vld [vmem:[#allocation8 + $0x100] ss:$24 sps:$4 sm:$0xff]  }
 0x205   :  { %7673 = vtanh.f32 %v1936_v51  ;;  %v9239_v51 = vld [vmem:[#allocation8 + $0xd4] ss:$24 sps:$4 sm:$0xff]  }
 0x206   :  { %7675 = vrcp.f32 %v1929_v59  ;;  %v9260_v59 = vld [vmem:[#allocation8 + $0x130] ss:$24 sps:$4 sm:$0xff]  }
 0x207   :  { %7677 = vtanh.f32 %v1937_v43 }
 0x20e   :  { %v7672_v61 = vpop.eup %7671 }
 0x20f   :  { %v7674_v25 = vpop.eup %7673  ;;  %v1940_v27 = vsub.f32 1.0, %v7672_v61  ;;  %v1944_v10 = vmul.f32 0.0, %v7672_v61  ;;  %v9263_v61 = vld [vmem:[#allocation8 + $0x164] ss:$24 sps:$4 sm:$0xff]  }
 0x210   :  { %v7676_v1 = vpop.eup %7675 }
 0x211   :  { %v1941_v3 = vsub.f32 1.0, %v7676_v1  ;;  %v1942_v8 = vmul.f32 %v7674_v25, %v1940_v27  ;;  %v7678_v12 = vpop.eup %7677  ;;  %v1945_v31 = vmul.f32 0.0, %v7676_v1  ;;  %v9268_v25 = vld [vmem:[#allocation8 + $0x160] ss:$24 sps:$4 sm:$0xff]   ;;  %v9271_v27 = vld [vmem:[#allocation8 + $0x194] ss:$24 sps:$4 sm:$0xff]  }
 0x212   :  { %v9276_v1 = vld [vmem:[#allocation8 + $0x190] ss:$24 sps:$4 sm:$0xff]  }
 0x213   :  { %v1943_v14 = vmul.f32 %v7678_v12, %v1941_v3  ;;  %v9200_v36 = vadd.f32 %v1944_v10, %v1942_v8  ;;  %v9279_v3 = vld [vmem:[#allocation8 + $0x1c4] ss:$24 sps:$4 sm:$0xff]   ;;  %v9284_v8 = vld [vmem:[#allocation8 + $0x1c0] ss:$24 sps:$4 sm:$0xff]   ;;  %v9287_v10 = vld [vmem:[#allocation8 + $0x1f4] ss:$24 sps:$4 sm:$0xff]  }
 0x214   :  { %v9302_v12 = vld [vmem:[#allocation8 + $0x240] ss:$24 sps:$4 sm:$0xff]  }
 0x215   :  { %12523 = vst [vmem:[#allocation85_spill] sm:$0xff] %v9200_v36  ;;  %v9202_v47 = vadd.f32 %v1945_v31, %v1943_v14  ;;  %v9208_v43 = vpack.c.bf16 %v9200_v36, %v9200_v36  ;;  %12525 = vst [vmem:[#allocation87_spill] sm:$0xff] %v9302_v12  ;;  %v9328_v14 = vld [vmem:[#allocation8 + $0x2d0] ss:$24 sps:$4 sm:$0xff]  }
 0x216   :  { %12534 = vst [vmem:[#allocation92_spill] sm:$0xff] %v9328_v14  ;;  %v9335_v31 = vld [vmem:[#allocation8 + $0x8] ss:$24 sps:$4 sm:$0xff]  }
 0x217   :  { %12524 = vst [vmem:[#allocation86_spill] sm:$0xff] %v9202_v47  ;;  %v1963_v49 = vpack.c.bf16 %v9202_v47, %v9202_v47  ;;  %12536 = vst [vmem:[#allocation94_spill] sm:$0xff] %v9335_v31 }
 0x219   :  { %1996 = vmatprep.mubr.bf16.mxu0 %v1963_v49  ;;  %2037 = vmatprep.mubr.bf16.mxu1 %v1963_v49 }
 0x21a   :  { %1997 = vmatmul.mubr.bf16.vlgmr.msra.gmra.mrb[36].mxu0 %v9208_v43  ;;  %2038 = vmatmul.mubr.bf16.vlgmr.msra.gmra.mrb[24].mxu1 %v9208_v43 }
 0x21b   :  { %2047 = vmatpush1.bf16.msra.mxu0 %v9212_v2  ;;  %2078 = vmatprep.mubr.bf16.mxu0 %v1963_v49  ;;  %v9338_v49 = vld [vmem:[#allocation8 + $0x3c] ss:$24 sps:$4 sm:$0xff]  }
 0x21c   :  { %2048 = vmatprep.subr.bf16.mxu0 %v9215_v33  ;;  %2146 = vmatpush1.bf16.msra.mxu1 %v8862_v35  ;;  %12537 = vst [vmem:[#allocation95_spill] sm:$0xff] %v9338_v49 }
 0x21d   :  { %2147 = vmatprep.subr.bf16.mxu1 %v8866_v37 }
 0x21f   :  { %2049 = vmatpush1.bf16.msra.mxu0 %v9220_v32 }
 0x220   :  { %2050 = vmatprep.subr.bf16.mxu0 %v9223_v48  ;;  %2148 = vmatpush1.bf16.msra.mxu1 %v8870_v39 }
 0x221   :  { %2149 = vmatprep.subr.bf16.mxu1 %v8874_v11 }
 0x223   :  { %2051 = vmatpush1.bf16.msra.mxu0 %v9228_v29 }
 0x224   :  { %2052 = vmatprep.subr.bf16.mxu0 %v9231_v52  ;;  %2150 = vmatpush1.bf16.msra.mxu1 %v8878_v40 }
 0x225   :  { %2151 = vmatprep.subr.bf16.mxu1 %v8882_v13 }
 0x227   :  { %2053 = vmatpush1.bf16.msra.mxu0 %v9236_v50 }
 0x228   :  { %2054 = vmatprep.subr.bf16.mxu0 %v9239_v51  ;;  %2152 = vmatpush1.bf16.msra.mxu1 %v8886_v17 }
 0x229   :  { %2153 = vmatprep.subr.bf16.mxu1 %v8890_v19 }
 0x22b   :  { %2055 = vmatpush1.bf16.msra.mxu0 %v9244_v7 }
 0x22c   :  { %2056 = vmatprep.subr.bf16.mxu0 %v9247_v20  ;;  %2154 = vmatpush1.bf16.msra.mxu1 %v8894_v21 }
 0x22d   :  { %2155 = vmatprep.subr.bf16.mxu1 %v8898_v24 }
 0x22f   :  { %2057 = vmatpush1.bf16.msra.mxu0 %v9252_v53 }
 0x230   :  { %2058 = vmatprep.subr.bf16.mxu0 %v9255_v6  ;;  %2156 = vmatpush1.bf16.msra.mxu1 %v8902_v4 }
 0x231   :  { %2157 = vmatprep.subr.bf16.mxu1 %v8906_v28 }
 0x233   :  { %2059 = vmatpush1.bf16.msra.mxu0 %v9260_v59 }
 0x234   :  { %2060 = vmatprep.subr.bf16.mxu0 %v9263_v61  ;;  %2158 = vmatpush1.bf16.msra.mxu1 %v8910_v30 }
 0x235   :  { %2159 = vmatprep.subr.bf16.mxu1 %v8914_v15 }
 0x237   :  { %2061 = vmatpush1.bf16.msra.mxu0 %v9268_v25 }
 0x238   :  { %2062 = vmatprep.subr.bf16.mxu0 %v9271_v27  ;;  %2160 = vmatpush1.bf16.msra.mxu1 %v8918_v34 }
 0x239   :  { %2161 = vmatprep.subr.bf16.mxu1 %v8922_v16 }
 0x23b   :  { %2063 = vmatpush1.bf16.msra.mxu0 %v9276_v1 }
 0x23c   :  { %2064 = vmatprep.subr.bf16.mxu0 %v9279_v3  ;;  %2162 = vmatpush1.bf16.msra.mxu1 %v8926_v38 }
 0x23d   :  { %2163 = vmatprep.subr.bf16.mxu1 %v8930_v23 }
 0x23f   :  { %2065 = vmatpush1.bf16.msra.mxu0 %v9284_v8 }
 0x240   :  { %2066 = vmatprep.subr.bf16.mxu0 %v9287_v10  ;;  %2164 = vmatpush1.bf16.msra.mxu1 %v8934_v41  ;;  %v12572_v41 = vld [vmem:[#allocation40_spill] sm:$0xff] }
 0x241   :  { %2165 = vmatprep.subr.bf16.mxu1 %v8938_v42 }
 0x243   :  { %2067 = vmatpush1.bf16.msra.mxu0 %v8790_v54  ;;  %v9305_v54 = vld [vmem:[#allocation8 + $0x274] ss:$24 sps:$4 sm:$0xff]  }
 0x244   :  { %2068 = vmatprep.subr.bf16.mxu0 %v8794_v56  ;;  %2166 = vmatpush1.bf16.msra.mxu1 %v8942_v26  ;;  %12526 = vst [vmem:[#allocation88_spill] sm:$0xff] %v9305_v54  ;;  %v9310_v56 = vld [vmem:[#allocation8 + $0x270] ss:$24 sps:$4 sm:$0xff]  }
 0x245   :  { %2167 = vmatprep.subr.bf16.mxu1 %v8946_v44  ;;  %12527 = vst [vmem:[#allocation89_spill] sm:$0xff] %v9310_v56  ;;  %v12571_v26 = vld [vmem:[#allocation39_spill] sm:$0xff] }
 0x247   :  { %2069 = vmatpush1.bf16.msra.mxu0 %v8800_v58  ;;  %v9313_v58 = vld [vmem:[#allocation8 + $0x2a4] ss:$24 sps:$4 sm:$0xff]  }
 0x248   :  { %2070 = vmatprep.subr.bf16.mxu0 %v8804_v60  ;;  %2168 = vmatpush1.bf16.msra.mxu1 %v8950_v45  ;;  %12528 = vst [vmem:[#allocation90_spill] sm:$0xff] %v9313_v58  ;;  %v12529_v60 = vld [vmem:[#allocation23_spill] sm:$0xff]  ;;  %v12570_v45 = vld [vmem:[#allocation38_spill] sm:$0xff] }
 0x249   :  { %2169 = vmatprep.subr.bf16.mxu1 %v8954_v46  ;;  %v12569_v46 = vld [vmem:[#allocation37_spill] sm:$0xff] }
 0x24b   :  { %2071 = vmatpush1.bf16.msra.mxu0 %v8812_v0  ;;  %v9318_v0 = vld [vmem:[#allocation8 + $0x2a0] ss:$24 sps:$4 sm:$0xff]  }
 0x24c   :  { %2072 = vmatprep.subr.bf16.mxu0 %v8816_v5  ;;  %2170 = vmatpush1.bf16.msra.mxu1 %v9302_v12  ;;  %12530 = vst [vmem:[#allocation23_spill] sm:$0xff] %v9318_v0  ;;  %v9321_v5 = vld [vmem:[#allocation8 + $0x2d4] ss:$24 sps:$4 sm:$0xff]  }
 0x24d   :  { %2171 = vmatprep.subr.bf16.mxu1 %v9305_v54  ;;  %12531 = vst [vmem:[#allocation91_spill] sm:$0xff] %v9321_v5 }
 0x24f   :  { %2073 = vmatpush1.bf16.msra.mxu0 %v8824_v9  ;;  %v12532_v9 = vld [vmem:[#allocation25_spill] sm:$0xff] }
 0x250   :  { %2074 = vmatprep.subr.bf16.mxu0 %v8828_v18  ;;  %2172 = vmatpush1.bf16.msra.mxu1 %v9310_v56  ;;  %v9325_v18 = vld [vmem:[#allocation8 + $0xc] ss:$24 sps:$4 sm:$0xff]  }
 0x251   :  { %2173 = vmatprep.subr.bf16.mxu1 %v9313_v58  ;;  %12533 = vst [vmem:[#allocation25_spill] sm:$0xff] %v9325_v18  ;;  %v12568_v56 = vld [vmem:[#allocation66_spill] sm:$0xff] }
 0x253   :  { %2075 = vmatpush1.bf16.msra.mxu0 %v8836_v22  ;;  %v9331_v22 = vld [vmem:[#allocation8 + $0x14] ss:$24 sps:$4 sm:$0xff]  }
 0x254   :  { %2076 = vmatprep.subr.bf16.mxu0 %v12529_v60  ;;  %2174 = vmatpush1.bf16.msra.mxu1 %v9318_v0  ;;  %12535 = vst [vmem:[#allocation93_spill] sm:$0xff] %v9331_v22  ;;  %v9341_v60 = vld [vmem:[#allocation8 + $0x38] ss:$24 sps:$4 sm:$0xff]   ;;  %v12567_v0 = vld [vmem:[#allocation26_spill] sm:$0xff] }
 0x255   :  { %2175 = vmatprep.subr.bf16.mxu1 %v9321_v5  ;;  %12538 = vst [vmem:[#allocation96_spill] sm:$0xff] %v9341_v60  ;;  %v12565_v5 = vld [vmem:[#allocation22_spill] sm:$0xff] }
 0x257   :  { %2077 = vmatpush1.bf16.msra.mxu0 %v12532_v9  ;;  %v9344_v9 = vld [vmem:[#allocation8 + $0x6c] ss:$24 sps:$4 sm:$0xff]  }
 0x258   :  { %2186 = vmatprep.subr.bf16.mxu0 %v9325_v18  ;;  %2176 = vmatpush1.bf16.msra.mxu1 %v9328_v14  ;;  %12539 = vst [vmem:[#allocation97_spill] sm:$0xff] %v9344_v9  ;;  %v9347_v14 = vld [vmem:[#allocation8 + $0x68] ss:$24 sps:$4 sm:$0xff]   ;;  %v12563_v18 = vld [vmem:[#allocation20_spill] sm:$0xff] }
 0x259   :  { %2227 = vmatprep.subr.bf16.mxu1 %v9331_v22  ;;  %12540 = vst [vmem:[#allocation98_spill] sm:$0xff] %v9347_v14  ;;  %v12561_v22 = vld [vmem:[#allocation18_spill] sm:$0xff] }
 0x25a   :  { %2079 = vmatmul.mubr.bf16.vlgmr.msra.gmra.mrb[40].mxu0 %v9208_v43  ;;  %v9350_v43 = vld [vmem:[#allocation8 + $0x9c] ss:$24 sps:$4 sm:$0xff]  }
 0x25b   :  { %2187 = vmatpush1.bf16.msra.mxu0 %v9335_v31  ;;  %12541 = vst [vmem:[#allocation99_spill] sm:$0xff] %v9350_v43  ;;  %v9353_v31 = vld [vmem:[#allocation8 + $0x98] ss:$24 sps:$4 sm:$0xff]  }
 0x25c   :  { %2188 = vmatprep.subr.bf16.mxu0 %v9338_v49  ;;  %12542 = vst [vmem:[#allocation100_spill] sm:$0xff] %v9353_v31  ;;  %v9356_v49 = vld [vmem:[#allocation8 + $0xcc] ss:$24 sps:$4 sm:$0xff]  }
 0x25d   :  { %12543 = vst [vmem:[#allocation101_spill] sm:$0xff] %v9356_v49 }
 0x25f   :  { %2189 = vmatpush1.bf16.msra.mxu0 %v9341_v60  ;;  %v9359_v60 = vld [vmem:[#allocation8 + $0xc8] ss:$24 sps:$4 sm:$0xff]  }
 0x260   :  { %2190 = vmatprep.subr.bf16.mxu0 %v9344_v9  ;;  %12544 = vst [vmem:[#allocation102_spill] sm:$0xff] %v9359_v60  ;;  %v9362_v9 = vld [vmem:[#allocation8 + $0xfc] ss:$24 sps:$4 sm:$0xff]  }
 0x261   :  { %12545 = vst [vmem:[#allocation103_spill] sm:$0xff] %v9362_v9 }
 0x263   :  { %2191 = vmatpush1.bf16.msra.mxu0 %v9347_v14  ;;  %v9365_v14 = vld [vmem:[#allocation8 + $0xf8] ss:$24 sps:$4 sm:$0xff]  }
 0x264   :  { %2192 = vmatprep.subr.bf16.mxu0 %v9350_v43  ;;  %12546 = vst [vmem:[#allocation104_spill] sm:$0xff] %v9365_v14  ;;  %v9368_v43 = vld [vmem:[#allocation8 + $0x12c] ss:$24 sps:$4 sm:$0xff]  }
 0x265   :  { %12547 = vst [vmem:[#allocation105_spill] sm:$0xff] %v9368_v43 }
 0x267   :  { %2193 = vmatpush1.bf16.msra.mxu0 %v9353_v31  ;;  %v9371_v31 = vld [vmem:[#allocation8 + $0x128] ss:$24 sps:$4 sm:$0xff]  }
 0x268   :  { %2194 = vmatprep.subr.bf16.mxu0 %v9356_v49  ;;  %12548 = vst [vmem:[#allocation106_spill] sm:$0xff] %v9371_v31  ;;  %v9374_v49 = vld [vmem:[#allocation8 + $0x15c] ss:$24 sps:$4 sm:$0xff]  }
 0x269   :  { %12549 = vst [vmem:[#allocation107_spill] sm:$0xff] %v9374_v49 }
 0x26b   :  { %2195 = vmatpush1.bf16.msra.mxu0 %v9359_v60  ;;  %v9377_v60 = vld [vmem:[#allocation8 + $0x158] ss:$24 sps:$4 sm:$0xff]  }
 0x26c   :  { %2196 = vmatprep.subr.bf16.mxu0 %v9362_v9  ;;  %12550 = vst [vmem:[#allocation108_spill] sm:$0xff] %v9377_v60  ;;  %v9380_v9 = vld [vmem:[#allocation8 + $0x18c] ss:$24 sps:$4 sm:$0xff]  }
 0x26d   :  { %12551 = vst [vmem:[#allocation109_spill] sm:$0xff] %v9380_v9 }
 0x26f   :  { %2197 = vmatpush1.bf16.msra.mxu0 %v9365_v14  ;;  %v9383_v14 = vld [vmem:[#allocation8 + $0x188] ss:$24 sps:$4 sm:$0xff]  }
 0x270   :  { %2198 = vmatprep.subr.bf16.mxu0 %v9368_v43  ;;  %12552 = vst [vmem:[#allocation110_spill] sm:$0xff] %v9383_v14  ;;  %v9386_v43 = vld [vmem:[#allocation8 + $0x1bc] ss:$24 sps:$4 sm:$0xff]  }
 0x271   :  { %12553 = vst [vmem:[#allocation111_spill] sm:$0xff] %v9386_v43 }
 0x273   :  { %2199 = vmatpush1.bf16.msra.mxu0 %v9371_v31  ;;  %v9389_v31 = vld [vmem:[#allocation8 + $0x1b8] ss:$24 sps:$4 sm:$0xff]  }
 0x274   :  { %2200 = vmatprep.subr.bf16.mxu0 %v9374_v49  ;;  %12554 = vst [vmem:[#allocation112_spill] sm:$0xff] %v9389_v31  ;;  %v9392_v49 = vld [vmem:[#allocation8 + $0x1ec] ss:$24 sps:$4 sm:$0xff]  }
 0x275   :  { %12555 = vst [vmem:[#allocation113_spill] sm:$0xff] %v9392_v49 }
 0x277   :  { %2201 = vmatpush1.bf16.msra.mxu0 %v9377_v60  ;;  %v9395_v60 = vld [vmem:[#allocation8 + $0x1e8] ss:$24 sps:$4 sm:$0xff]  }
 0x278   :  { %2202 = vmatprep.subr.bf16.mxu0 %v9380_v9  ;;  %12556 = vst [vmem:[#allocation114_spill] sm:$0xff] %v9395_v60  ;;  %v9398_v9 = vld [vmem:[#allocation8 + $0x21c] ss:$24 sps:$4 sm:$0xff]  }
 0x279   :  { %12557 = vst [vmem:[#allocation115_spill] sm:$0xff] %v9398_v9 }
 0x27b   :  { %2203 = vmatpush1.bf16.msra.mxu0 %v9383_v14  ;;  %v9401_v14 = vld [vmem:[#allocation8 + $0x218] ss:$24 sps:$4 sm:$0xff]  }
 0x27c   :  { %2204 = vmatprep.subr.bf16.mxu0 %v9386_v43  ;;  %12558 = vst [vmem:[#allocation116_spill] sm:$0xff] %v9401_v14  ;;  %v9404_v43 = vld [vmem:[#allocation8 + $0x24c] ss:$24 sps:$4 sm:$0xff]  }
 0x27d   :  { %12559 = vst [vmem:[#allocation117_spill] sm:$0xff] %v9404_v43 }
 0x27f   :  { %2205 = vmatpush1.bf16.msra.mxu0 %v9389_v31  ;;  %v12560_v31 = vld [vmem:[#allocation17_spill] sm:$0xff] }
 0x280   :  { %2206 = vmatprep.subr.bf16.mxu0 %v9392_v49  ;;  %v12562_v49 = vld [vmem:[#allocation19_spill] sm:$0xff] }
 0x283   :  { %2207 = vmatpush1.bf16.msra.mxu0 %v9395_v60  ;;  %v12564_v60 = vld [vmem:[#allocation21_spill] sm:$0xff] }
 0x284   :  { %2208 = vmatprep.subr.bf16.mxu0 %v9398_v9  ;;  %v12566_v9 = vld [vmem:[#allocation24_spill] sm:$0xff] }
 0x287   :  { %2209 = vmatpush1.bf16.msra.mxu0 %v9401_v14 }
 0x288   :  { %2210 = vmatprep.subr.bf16.mxu0 %v9404_v43 }
 0x28b   :  { %2211 = vmatpush1.bf16.msra.mxu0 %v12560_v31 }
 0x28c   :  { %2212 = vmatprep.subr.bf16.mxu0 %v12561_v22 }
 0x28f   :  { %2213 = vmatpush1.bf16.msra.mxu0 %v12562_v49 }
 0x290   :  { %2214 = vmatprep.subr.bf16.mxu0 %v12563_v18 }
 0x293   :  { %2215 = vmatpush1.bf16.msra.mxu0 %v12564_v60 }
 0x294   :  { %2216 = vmatprep.subr.bf16.mxu0 %v12565_v5 }
 0x297   :  { %2217 = vmatpush1.bf16.msra.mxu0 %v12566_v9 }
 0x298   :  { %2326 = vmatprep.subr.bf16.mxu0 %v12567_v0 }
 0x2ed   :  { %v1998_v14 = vpop.f32.mrb[36].mxu0  ;;  %v2039_v58 = vpop.f32.mrb[24].mxu1 }
 0x2ee   :  { %v1999_v43 = vadd.f32 %v1998_v14, %v12568_v56  ;;  %v2040_v31 = vadd.f32 %v2039_v58, %v9177_v55  ;;  %v2000_v54 = vpop.f32.mrb[37].mxu0  ;;  %v2041_v22 = vpop.f32.mrb[25].mxu1 }
 0x2ef   :  { %v2001_v49 = vadd.f32 %v2000_v54, %v9114_v57  ;;  %v2042_v18 = vadd.f32 %v2041_v22, %v9183_v63  ;;  %v2002_v12 = vpop.f32.mrb[38].mxu0  ;;  %v2043_v60 = vpop.f32.mrb[26].mxu1 }
 0x2f0   :  { %v2087_v5 = vadd.f32 %v1999_v43, %v12569_v46  ;;  %v2101_v9 = vadd.f32 %v2040_v31, %v12570_v45  ;;  %v2003_v44 = vpop.f32.mrb[39].mxu0  ;;  %v2044_v0 = vpop.f32.mrb[27].mxu1 }
 0x2f1   :  { %v2088_v42 = vadd.f32 %v2001_v49, %v12571_v26  ;;  %v2102_v14 = vadd.f32 %v2042_v18, %v12572_v41  ;;  %v12573_v41 = vld [vmem:[#allocation84_spill] sm:$0xff]  ;;  %v12574_v0 = vld [vmem:[#allocation69_spill] sm:$0xff] }
 0x2f2   :  { %v6674_v56 = vmul.f32 -1.442695, %v2087_v5  ;;  %v6676_v55 = vmul.f32 -1.442695, %v2101_v9 }
 0x2f3   :  { %v6675_v58 = vmul.f32 -1.442695, %v2088_v42  ;;  %v6677_v54 = vmul.f32 -1.442695, %v2102_v14 }
 0x2f4   :  { %7679 = vpow2.f32 %v6674_v56 }
 0x2f5   :  { %7681 = vpow2.f32 %v6675_v58  ;;  %v12575_v58 = vld [vmem:[#allocation70_spill] sm:$0xff] }
 0x2f6   :  { %7683 = vpow2.f32 %v6676_v55 }
 0x2f7   :  { %7685 = vpow2.f32 %v6677_v54 }
 0x2fe   :  { %v7680_v57 = vpop.eup %7679 }
 0x2ff   :  { %v7682_v22 = vpop.eup %7681  ;;  %v2095_v12 = vadd.f32 1.0, %v7680_v57 }
 0x300   :  { %v2096_v46 = vadd.f32 1.0, %v7682_v22  ;;  %v7684_v44 = vpop.eup %7683 }
 0x301   :  { %7687 = vrcp.f32 %v2095_v12  ;;  %v7686_v45 = vpop.eup %7685  ;;  %v2109_v43 = vadd.f32 1.0, %v7684_v44 }
 0x302   :  { %7689 = vrcp.f32 %v2096_v46  ;;  %v2110_v26 = vadd.f32 1.0, %v7686_v45 }
 0x303   :  { %7691 = vrcp.f32 %v2109_v43 }
 0x304   :  { %7693 = vrcp.f32 %v2110_v26 }
 0x30b   :  { %v7688_v56 = vpop.eup %7687 }
 0x30c   :  { %v7690_v5 = vpop.eup %7689 }
 0x30d   :  { %v7692_v22 = vpop.eup %7691 }
 0x30e   :  { %v7694_v12 = vpop.eup %7693  ;;  %v2121_v46 = vsub.f32 1.0, %v7692_v22 }
 0x30f   :  { %v2122_v45 = vsub.f32 1.0, %v7694_v12 }
 0x32d   :  { %v2080_v31 = vpop.f32.mrb[40].mxu0 }
 0x32e   :  { %v2081_v49 = vadd.f32 %v2080_v31, %v12573_v41  ;;  %v2082_v42 = vpop.f32.mrb[41].mxu0 }
 0x32f   :  { %v2083_v18 = vadd.f32 %v2082_v42, %v9186_v62  ;;  %v2084_v60 = vpop.f32.mrb[42].mxu0 }
 0x330   :  { %v2115_v55 = vmul.f32 %v7688_v56, %v2081_v49  ;;  %v2085_v9 = vpop.f32.mrb[43].mxu0  ;;  %v2125_v60 = vmul.f32 %v7692_v22, %v9200_v36  ;;  %v2126_v49 = vmul.f32 %v7694_v12, %v9202_v47  ;;  %v12603_v22 = vld [vmem:[#allocation93_spill] sm:$0xff]  ;;  %v12604_v12 = vld [vmem:[#allocation94_spill] sm:$0xff]  ;;  %v12621_v36 = vld [vmem:[#allocation111_spill] sm:$0xff] }
 0x331   :  { %v2116_v57 = vmul.f32 %v7690_v5, %v2083_v18  ;;  %v9516_v9 = vld [vmem:[#allocation8 + $0x2e4] ss:$24 sps:$4 sm:$0xff]  }
 0x332   :  { %v2117_v14 = vadd.f32 %v2115_v55, %v12574_v0  ;;  %v9513_v55 = vld [vmem:[#allocation8 + $0x2b0] ss:$24 sps:$4 sm:$0xff]   ;;  %12597 = vst [vmem:[#allocation40_spill] sm:$0xff] %v9516_v9  ;;  %v12622_v47 = vld [vmem:[#allocation112_spill] sm:$0xff] }
 0x333   :  { %v2118_v54 = vadd.f32 %v2116_v57, %v12575_v58  ;;  %12596 = vst [vmem:[#allocation39_spill] sm:$0xff] %v9513_v55  ;;  %v12598_v57 = vld [vmem:[#allocation23_spill] sm:$0xff]  ;;  %v12601_v58 = vld [vmem:[#allocation25_spill] sm:$0xff] }
 0x334   :  { %7695 = vtanh.f32 %v2117_v14  ;;  %v12599_v0 = vld [vmem:[#allocation91_spill] sm:$0xff]  ;;  %v9521_v14 = vld [vmem:[#allocation8 + $0x2e0] ss:$24 sps:$4 sm:$0xff]  }
 0x335   :  { %7697 = vtanh.f32 %v2118_v54  ;;  %12600 = vst [vmem:[#allocation84_spill] sm:$0xff] %v9521_v14  ;;  %v12602_v54 = vld [vmem:[#allocation92_spill] sm:$0xff] }
 0x33e   :  { %v7696_v44 = vpop.eup %7695 }
 0x33f   :  { %v7698_v31 = vpop.eup %7697  ;;  %v2123_v42 = vmul.f32 %v7696_v44, %v2121_v46  ;;  %v12605_v46 = vld [vmem:[#allocation95_spill] sm:$0xff]  ;;  %v12606_v44 = vld [vmem:[#allocation96_spill] sm:$0xff] }
 0x340   :  { %v2124_v43 = vmul.f32 %v7698_v31, %v2122_v45  ;;  %v12607_v45 = vld [vmem:[#allocation97_spill] sm:$0xff]  ;;  %v12608_v31 = vld [vmem:[#allocation98_spill] sm:$0xff] }
 0x341   :  { %v9429_v26 = vadd.f32 %v2125_v60, %v2123_v42  ;;  %v12609_v42 = vld [vmem:[#allocation99_spill] sm:$0xff]  ;;  %v12610_v60 = vld [vmem:[#allocation100_spill] sm:$0xff] }
 0x342   :  { %v9431_v56 = vadd.f32 %v2126_v49, %v2124_v43  ;;  %v12611_v43 = vld [vmem:[#allocation101_spill] sm:$0xff]  ;;  %v12612_v49 = vld [vmem:[#allocation102_spill] sm:$0xff] }
 0x343   :  { %12576 = vst [vmem:[#allocation17_spill] sm:$0xff] %v9429_v26  ;;  %v9437_v5 = vpack.c.bf16 %v9429_v26, %v9429_v26 }
 0x344   :  { %12577 = vst [vmem:[#allocation18_spill] sm:$0xff] %v9431_v56  ;;  %v2144_v18 = vpack.c.bf16 %v9431_v56, %v9431_v56 }
 0x346   :  { %2177 = vmatprep.mubr.bf16.mxu1 %v2144_v18  ;;  %2218 = vmatprep.mubr.bf16.mxu0 %v2144_v18 }
 0x347   :  { %2178 = vmatmul.mubr.bf16.vlgmr.msra.gmra.mrb[28].mxu1 %v9437_v5  ;;  %2219 = vmatmul.mubr.bf16.vlgmr.msra.gmra.mrb[44].mxu0 %v9437_v5 }
 0x348   :  { %2228 = vmatpush1.bf16.msra.mxu1 %v9212_v2  ;;  %2259 = vmatprep.mubr.bf16.mxu1 %v2144_v18  ;;  %v12613_v18 = vld [vmem:[#allocation103_spill] sm:$0xff] }
 0x349   :  { %2229 = vmatprep.subr.bf16.mxu1 %v9215_v33  ;;  %2327 = vmatpush1.bf16.msra.mxu0 %v8862_v35  ;;  %v12578_v35 = vld [vmem:[#allocation27_spill] sm:$0xff] }
 0x34a   :  { %2328 = vmatprep.subr.bf16.mxu0 %v8866_v37  ;;  %v12579_v37 = vld [vmem:[#allocation28_spill] sm:$0xff] }
 0x34c   :  { %2230 = vmatpush1.bf16.msra.mxu1 %v9220_v32 }
 0x34d   :  { %2231 = vmatprep.subr.bf16.mxu1 %v9223_v48  ;;  %2329 = vmatpush1.bf16.msra.mxu0 %v8870_v39  ;;  %v9481_v39 = vld [vmem:[#allocation8 + $0x1f0] ss:$24 sps:$4 sm:$0xff]  }
 0x34e   :  { %2330 = vmatprep.subr.bf16.mxu0 %v8874_v11  ;;  %12580 = vst [vmem:[#allocation19_spill] sm:$0xff] %v9481_v39  ;;  %v9484_v11 = vld [vmem:[#allocation8 + $0x224] ss:$24 sps:$4 sm:$0xff]  }
 0x34f   :  { %12581 = vst [vmem:[#allocation20_spill] sm:$0xff] %v9484_v11 }
 0x350   :  { %2232 = vmatpush1.bf16.msra.mxu1 %v9228_v29 }
 0x351   :  { %2233 = vmatprep.subr.bf16.mxu1 %v9231_v52  ;;  %2331 = vmatpush1.bf16.msra.mxu0 %v8878_v40  ;;  %v12582_v40 = vld [vmem:[#allocation29_spill] sm:$0xff] }
 0x352   :  { %2332 = vmatprep.subr.bf16.mxu0 %v8882_v13  ;;  %v12583_v13 = vld [vmem:[#allocation30_spill] sm:$0xff] }
 0x354   :  { %2234 = vmatpush1.bf16.msra.mxu1 %v9236_v50 }
 0x355   :  { %2235 = vmatprep.subr.bf16.mxu1 %v9239_v51  ;;  %2333 = vmatpush1.bf16.msra.mxu0 %v8886_v17  ;;  %v9489_v17 = vld [vmem:[#allocation8 + $0x220] ss:$24 sps:$4 sm:$0xff]  }
 0x356   :  { %2334 = vmatprep.subr.bf16.mxu0 %v8890_v19  ;;  %12584 = vst [vmem:[#allocation21_spill] sm:$0xff] %v9489_v17  ;;  %v9492_v19 = vld [vmem:[#allocation8 + $0x254] ss:$24 sps:$4 sm:$0xff]  }
 0x357   :  { %12585 = vst [vmem:[#allocation22_spill] sm:$0xff] %v9492_v19 }
 0x358   :  { %2236 = vmatpush1.bf16.msra.mxu1 %v9244_v7 }
 0x359   :  { %2237 = vmatprep.subr.bf16.mxu1 %v9247_v20  ;;  %2335 = vmatpush1.bf16.msra.mxu0 %v8894_v21  ;;  %v12586_v21 = vld [vmem:[#allocation31_spill] sm:$0xff] }
 0x35a   :  { %2336 = vmatprep.subr.bf16.mxu0 %v8898_v24  ;;  %v12587_v24 = vld [vmem:[#allocation32_spill] sm:$0xff] }
 0x35c   :  { %2238 = vmatpush1.bf16.msra.mxu1 %v9252_v53 }
 0x35d   :  { %2239 = vmatprep.subr.bf16.mxu1 %v9255_v6  ;;  %2337 = vmatpush1.bf16.msra.mxu0 %v8902_v4  ;;  %v9497_v4 = vld [vmem:[#allocation8 + $0x250] ss:$24 sps:$4 sm:$0xff]  }
 0x35e   :  { %2338 = vmatprep.subr.bf16.mxu0 %v8906_v28  ;;  %12588 = vst [vmem:[#allocation24_spill] sm:$0xff] %v9497_v4  ;;  %v9500_v28 = vld [vmem:[#allocation8 + $0x284] ss:$24 sps:$4 sm:$0xff]  }
 0x35f   :  { %12589 = vst [vmem:[#allocation26_spill] sm:$0xff] %v9500_v28 }
 0x360   :  { %2240 = vmatpush1.bf16.msra.mxu1 %v9260_v59 }
 0x361   :  { %2241 = vmatprep.subr.bf16.mxu1 %v9263_v61  ;;  %2339 = vmatpush1.bf16.msra.mxu0 %v8910_v30  ;;  %v12590_v30 = vld [vmem:[#allocation87_spill] sm:$0xff] }
 0x362   :  { %2340 = vmatprep.subr.bf16.mxu0 %v8914_v15  ;;  %v12591_v15 = vld [vmem:[#allocation88_spill] sm:$0xff] }
 0x364   :  { %2242 = vmatpush1.bf16.msra.mxu1 %v9268_v25 }
 0x365   :  { %2243 = vmatprep.subr.bf16.mxu1 %v9271_v27  ;;  %2341 = vmatpush1.bf16.msra.mxu0 %v8918_v34  ;;  %v9505_v34 = vld [vmem:[#allocation8 + $0x280] ss:$24 sps:$4 sm:$0xff]  }
 0x366   :  { %2342 = vmatprep.subr.bf16.mxu0 %v8922_v16  ;;  %12592 = vst [vmem:[#allocation37_spill] sm:$0xff] %v9505_v34  ;;  %v9508_v16 = vld [vmem:[#allocation8 + $0x2b4] ss:$24 sps:$4 sm:$0xff]  }
 0x367   :  { %12593 = vst [vmem:[#allocation38_spill] sm:$0xff] %v9508_v16 }
 0x368   :  { %2244 = vmatpush1.bf16.msra.mxu1 %v9276_v1 }
 0x369   :  { %2245 = vmatprep.subr.bf16.mxu1 %v9279_v3  ;;  %2343 = vmatpush1.bf16.msra.mxu0 %v8926_v38  ;;  %v12594_v38 = vld [vmem:[#allocation89_spill] sm:$0xff] }
 0x36a   :  { %2344 = vmatprep.subr.bf16.mxu0 %v8930_v23  ;;  %v12595_v23 = vld [vmem:[#allocation90_spill] sm:$0xff] }
 0x36c   :  { %2246 = vmatpush1.bf16.msra.mxu1 %v9284_v8 }
 0x36d   :  { %2247 = vmatprep.subr.bf16.mxu1 %v9287_v10  ;;  %2345 = vmatpush1.bf16.msra.mxu0 %v12578_v35  ;;  %v12615_v35 = vld [vmem:[#allocation105_spill] sm:$0xff] }
 0x36e   :  { %2346 = vmatprep.subr.bf16.mxu0 %v12579_v37  ;;  %v12616_v37 = vld [vmem:[#allocation106_spill] sm:$0xff] }
 0x370   :  { %2248 = vmatpush1.bf16.msra.mxu1 %v9481_v39 }
 0x371   :  { %2249 = vmatprep.subr.bf16.mxu1 %v9484_v11  ;;  %2347 = vmatpush1.bf16.msra.mxu0 %v12582_v40  ;;  %v12617_v40 = vld [vmem:[#allocation107_spill] sm:$0xff] }
 0x372   :  { %2348 = vmatprep.subr.bf16.mxu0 %v12583_v13  ;;  %v12618_v13 = vld [vmem:[#allocation108_spill] sm:$0xff] }
 0x374   :  { %2250 = vmatpush1.bf16.msra.mxu1 %v9489_v17 }
 0x375   :  { %2251 = vmatprep.subr.bf16.mxu1 %v9492_v19  ;;  %2349 = vmatpush1.bf16.msra.mxu0 %v12586_v21  ;;  %v12619_v21 = vld [vmem:[#allocation109_spill] sm:$0xff] }
 0x376   :  { %2350 = vmatprep.subr.bf16.mxu0 %v12587_v24  ;;  %v12620_v24 = vld [vmem:[#allocation110_spill] sm:$0xff] }
 0x378   :  { %2252 = vmatpush1.bf16.msra.mxu1 %v9497_v4 }
 0x379   :  { %2253 = vmatprep.subr.bf16.mxu1 %v9500_v28  ;;  %2351 = vmatpush1.bf16.msra.mxu0 %v12590_v30 }
 0x37a   :  { %2352 = vmatprep.subr.bf16.mxu0 %v12591_v15 }
 0x37c   :  { %2254 = vmatpush1.bf16.msra.mxu1 %v9505_v34 }
 0x37d   :  { %2255 = vmatprep.subr.bf16.mxu1 %v9508_v16  ;;  %2353 = vmatpush1.bf16.msra.mxu0 %v12594_v38 }
 0x37e   :  { %2354 = vmatprep.subr.bf16.mxu0 %v12595_v23 }
 0x380   :  { %2256 = vmatpush1.bf16.msra.mxu1 %v9513_v55 }
 0x381   :  { %2257 = vmatprep.subr.bf16.mxu1 %v9516_v9  ;;  %2355 = vmatpush1.bf16.msra.mxu0 %v12598_v57 }
 0x382   :  { %2356 = vmatprep.subr.bf16.mxu0 %v12599_v0 }
 0x384   :  { %2258 = vmatpush1.bf16.msra.mxu1 %v9521_v14 }
 0x385   :  { %2367 = vmatprep.subr.bf16.mxu1 %v12601_v58  ;;  %2357 = vmatpush1.bf16.msra.mxu0 %v12602_v54  ;;  %v12642_v58 = vld [vmem:[#allocation44_spill] sm:$0xff] }
 0x386   :  { %2408 = vmatprep.subr.bf16.mxu0 %v12603_v22  ;;  %v12641_v22 = vld [vmem:[#allocation43_spill] sm:$0xff] }
 0x387   :  { %2260 = vmatmul.mubr.bf16.vlgmr.msra.gmra.mrb[32].mxu1 %v9437_v5  ;;  %v12614_v5 = vld [vmem:[#allocation104_spill] sm:$0xff] }
 0x388   :  { %2368 = vmatpush1.bf16.msra.mxu1 %v12604_v12 }
 0x389   :  { %2369 = vmatprep.subr.bf16.mxu1 %v12605_v46 }
 0x38c   :  { %2370 = vmatpush1.bf16.msra.mxu1 %v12606_v44  ;;  %v12640_v44 = vld [vmem:[#allocation42_spill] sm:$0xff] }
 0x38d   :  { %2371 = vmatprep.subr.bf16.mxu1 %v12607_v45  ;;  %v12639_v45 = vld [vmem:[#allocation41_spill] sm:$0xff] }
 0x390   :  { %2372 = vmatpush1.bf16.msra.mxu1 %v12608_v31 }
 0x391   :  { %2373 = vmatprep.subr.bf16.mxu1 %v12609_v42 }
 0x394   :  { %2374 = vmatpush1.bf16.msra.mxu1 %v12610_v60 }
 0x395   :  { %2375 = vmatprep.subr.bf16.mxu1 %v12611_v43  ;;  %v12638_v43 = vld [vmem:[#allocation68_spill] sm:$0xff] }
 0x398   :  { %2376 = vmatpush1.bf16.msra.mxu1 %v12612_v49  ;;  %v12623_v49 = vld [vmem:[#allocation113_spill] sm:$0xff] }
 0x399   :  { %2377 = vmatprep.subr.bf16.mxu1 %v12613_v18  ;;  %v12624_v18 = vld [vmem:[#allocation114_spill] sm:$0xff] }
 0x39c   :  { %2378 = vmatpush1.bf16.msra.mxu1 %v12614_v5  ;;  %v12625_v5 = vld [vmem:[#allocation115_spill] sm:$0xff] }
 0x39d   :  { %2379 = vmatprep.subr.bf16.mxu1 %v12615_v35  ;;  %v12626_v35 = vld [vmem:[#allocation116_spill] sm:$0xff] }
 0x3a0   :  { %2380 = vmatpush1.bf16.msra.mxu1 %v12616_v37  ;;  %v12627_v37 = vld [vmem:[#allocation117_spill] sm:$0xff] }
 0x3a1   :  { %2381 = vmatprep.subr.bf16.mxu1 %v12617_v40  ;;  %v9552_v40 = vld [vmem:[#allocation8 + $0x248] ss:$24 sps:$4 sm:$0xff]  }
 0x3a2   :  { %12628 = vst [vmem:[#allocation69_spill] sm:$0xff] %v9552_v40 }
 0x3a4   :  { %2382 = vmatpush1.bf16.msra.mxu1 %v12618_v13 }
 0x3a5   :  { %2383 = vmatprep.subr.bf16.mxu1 %v12619_v21  ;;  %v9555_v21 = vld [vmem:[#allocation8 + $0x27c] ss:$24 sps:$4 sm:$0xff]  }
 0x3a6   :  { %12629 = vst [vmem:[#allocation70_spill] sm:$0xff] %v9555_v21 }
 0x3a8   :  { %2384 = vmatpush1.bf16.msra.mxu1 %v12620_v24 }
 0x3a9   :  { %2385 = vmatprep.subr.bf16.mxu1 %v12621_v36  ;;  %v9558_v36 = vld [vmem:[#allocation8 + $0x278] ss:$24 sps:$4 sm:$0xff]  }
 0x3aa   :  { %12630 = vst [vmem:[#allocation27_spill] sm:$0xff] %v9558_v36 }
 0x3ac   :  { %2386 = vmatpush1.bf16.msra.mxu1 %v12622_v47  ;;  %v12637_v47 = vld [vmem:[#allocation83_spill] sm:$0xff] }
 0x3ad   :  { %2387 = vmatprep.subr.bf16.mxu1 %v12623_v49  ;;  %v9561_v49 = vld [vmem:[#allocation8 + $0x2ac] ss:$24 sps:$4 sm:$0xff]  }
 0x3ae   :  { %12631 = vst [vmem:[#allocation28_spill] sm:$0xff] %v9561_v49 }
 0x3b0   :  { %2388 = vmatpush1.bf16.msra.mxu1 %v12624_v18  ;;  %v12636_v18 = vld [vmem:[#allocation66_spill] sm:$0xff] }
 0x3b1   :  { %2389 = vmatprep.subr.bf16.mxu1 %v12625_v5  ;;  %v9564_v5 = vld [vmem:[#allocation8 + $0x2a8] ss:$24 sps:$4 sm:$0xff]  }
 0x3b2   :  { %12632 = vst [vmem:[#allocation29_spill] sm:$0xff] %v9564_v5 }
 0x3b4   :  { %2390 = vmatpush1.bf16.msra.mxu1 %v12626_v35 }
 0x3b5   :  { %2391 = vmatprep.subr.bf16.mxu1 %v12627_v37  ;;  %v9567_v37 = vld [vmem:[#allocation8 + $0x2dc] ss:$24 sps:$4 sm:$0xff]  }
 0x3b6   :  { %12633 = vst [vmem:[#allocation30_spill] sm:$0xff] %v9567_v37 }
 0x3b8   :  { %2392 = vmatpush1.bf16.msra.mxu1 %v9552_v40  ;;  %v9570_v40 = vld [vmem:[#allocation8 + $0x2d8] ss:$24 sps:$4 sm:$0xff]  }
 0x3b9   :  { %2393 = vmatprep.subr.bf16.mxu1 %v9555_v21  ;;  %12634 = vst [vmem:[#allocation31_spill] sm:$0xff] %v9570_v40  ;;  %v9573_v21 = vld [vmem:[#allocation8 + $0x4] ss:$24 sps:$4 sm:$0xff]  }
 0x3ba   :  { %12635 = vst [vmem:[#allocation32_spill] sm:$0xff] %v9573_v21 }
 0x3bc   :  { %2394 = vmatpush1.bf16.msra.mxu1 %v9558_v36 }
 0x3bd   :  { %2395 = vmatprep.subr.bf16.mxu1 %v9561_v49 }
 0x3c0   :  { %2396 = vmatpush1.bf16.msra.mxu1 %v9564_v5 }
 0x3c1   :  { %2397 = vmatprep.subr.bf16.mxu1 %v9567_v37 }
 0x3c4   :  { %2398 = vmatpush1.bf16.msra.mxu1 %v9570_v40 }
 0x3c5   :  { %2507 = vmatprep.subr.bf16.mxu1 %v9573_v21 }
 0x41a   :  { %v2179_v36 = vpop.f32.mrb[28].mxu1  ;;  %v2220_v35 = vpop.f32.mrb[44].mxu0 }
 0x41b   :  { %v2180_v49 = vadd.f32 %v2179_v36, %v12636_v18  ;;  %v2221_v24 = vadd.f32 %v2220_v35, %v12637_v47  ;;  %v2181_v13 = vpop.f32.mrb[29].mxu1  ;;  %v2222_v5 = vpop.f32.mrb[45].mxu0 }
 0x41c   :  { %v2182_v60 = vadd.f32 %v2181_v13, %v12638_v43  ;;  %v2223_v37 = vadd.f32 %v2222_v5, %v9183_v63  ;;  %v2183_v42 = vpop.f32.mrb[30].mxu1  ;;  %v2224_v31 = vpop.f32.mrb[46].mxu0 }
 0x41d   :  { %v2268_v40 = vadd.f32 %v2180_v49, %v12639_v45  ;;  %v2282_v46 = vadd.f32 %v2221_v24, %v12640_v44  ;;  %v2184_v12 = vpop.f32.mrb[31].mxu1  ;;  %v2225_v21 = vpop.f32.mrb[47].mxu0 }
 0x41e   :  { %v2269_v54 = vadd.f32 %v2182_v60, %v12641_v22  ;;  %v2283_v36 = vadd.f32 %v2223_v37, %v12642_v58  ;;  %v12643_v21 = vld [vmem:[#allocation71_spill] sm:$0xff] }
 0x41f   :  { %v6678_v18 = vmul.f32 -1.442695, %v2268_v40  ;;  %v6680_v47 = vmul.f32 -1.442695, %v2282_v46 }
 0x420   :  { %v6679_v35 = vmul.f32 -1.442695, %v2269_v54  ;;  %v6681_v13 = vmul.f32 -1.442695, %v2283_v36  ;;  %v12644_v36 = vld [vmem:[#allocation72_spill] sm:$0xff] }
 0x421   :  { %7699 = vpow2.f32 %v6678_v18 }
 0x422   :  { %7701 = vpow2.f32 %v6679_v35 }
 0x423   :  { %7703 = vpow2.f32 %v6680_v47 }
 0x424   :  { %7705 = vpow2.f32 %v6681_v13 }
 0x42b   :  { %v7700_v43 = vpop.eup %7699 }
 0x42c   :  { %v7702_v5 = vpop.eup %7701  ;;  %v2276_v31 = vadd.f32 1.0, %v7700_v43 }
 0x42d   :  { %v2277_v45 = vadd.f32 1.0, %v7702_v5  ;;  %v7704_v12 = vpop.eup %7703 }
 0x42e   :  { %7707 = vrcp.f32 %v2276_v31  ;;  %v7706_v44 = vpop.eup %7705  ;;  %v2290_v42 = vadd.f32 1.0, %v7704_v12 }
 0x42f   :  { %7709 = vrcp.f32 %v2277_v45  ;;  %v2291_v22 = vadd.f32 1.0, %v7706_v44 }
 0x430   :  { %7711 = vrcp.f32 %v2290_v42 }
 0x431   :  { %7713 = vrcp.f32 %v2291_v22 }
 0x438   :  { %v7708_v49 = vpop.eup %7707 }
 0x439   :  { %v7710_v37 = vpop.eup %7709 }
 0x43a   :  { %v7712_v13 = vpop.eup %7711 }
 0x43b   :  { %v7714_v5 = vpop.eup %7713  ;;  %v2302_v31 = vsub.f32 1.0, %v7712_v13 }
 0x43c   :  { %v2303_v12 = vsub.f32 1.0, %v7714_v5 }
 0x45a   :  { %v2261_v60 = vpop.f32.mrb[32].mxu1 }
 0x45b   :  { %v2262_v58 = vadd.f32 %v2261_v60, %v12573_v41  ;;  %v2263_v54 = vpop.f32.mrb[33].mxu1 }
 0x45c   :  { %v2264_v46 = vadd.f32 %v2263_v54, %v9186_v62  ;;  %v2265_v18 = vpop.f32.mrb[34].mxu1  ;;  %v2306_v54 = vmul.f32 %v7712_v13, %v9429_v26  ;;  %v9636_v13 = vld [vmem:[#allocation8 + $0xc0] ss:$24 sps:$4 sm:$0xff]   ;;  %v9679_v26 = vld [vmem:[#allocation8 + $0x1e4] ss:$24 sps:$4 sm:$0xff]  }
 0x45d   :  { %v2296_v47 = vmul.f32 %v7708_v49, %v2262_v58  ;;  %v2266_v40 = vpop.f32.mrb[35].mxu1  ;;  %v2307_v58 = vmul.f32 %v7714_v5, %v9431_v56  ;;  %v9639_v5 = vld [vmem:[#allocation8 + $0xf4] ss:$24 sps:$4 sm:$0xff]   ;;  %12649 = vst [vmem:[#allocation71_spill] sm:$0xff] %v9679_v26  ;;  %v9684_v56 = vld [vmem:[#allocation8 + $0x1e0] ss:$24 sps:$4 sm:$0xff]  }
 0x45e   :  { %v2297_v43 = vmul.f32 %v7710_v37, %v2264_v46  ;;  %v9604_v37 = vld [vmem:[#allocation8] ss:$24 sps:$4 sm:$0xff]   ;;  %v9612_v40 = vld [vmem:[#allocation8 + $0x30] ss:$24 sps:$4 sm:$0xff]   ;;  %12650 = vst [vmem:[#allocation72_spill] sm:$0xff] %v9684_v56 }
 0x45f   :  { %v2298_v24 = vadd.f32 %v2296_v47, %v12643_v21  ;;  %v9607_v47 = vld [vmem:[#allocation8 + $0x34] ss:$24 sps:$4 sm:$0xff]   ;;  %v9620_v21 = vld [vmem:[#allocation8 + $0x60] ss:$24 sps:$4 sm:$0xff]  }
 0x460   :  { %v2299_v35 = vadd.f32 %v2297_v43, %v12644_v36  ;;  %v9615_v43 = vld [vmem:[#allocation8 + $0x64] ss:$24 sps:$4 sm:$0xff]   ;;  %v9628_v36 = vld [vmem:[#allocation8 + $0x90] ss:$24 sps:$4 sm:$0xff]  }
 0x461   :  { %7715 = vtanh.f32 %v2298_v24  ;;  %v9623_v24 = vld [vmem:[#allocation8 + $0x94] ss:$24 sps:$4 sm:$0xff]  }
 0x462   :  { %7717 = vtanh.f32 %v2299_v35  ;;  %v9631_v35 = vld [vmem:[#allocation8 + $0xc4] ss:$24 sps:$4 sm:$0xff]  }
 0x46b   :  { %v7716_v45 = vpop.eup %7715 }
 0x46c   :  { %v7718_v44 = vpop.eup %7717  ;;  %v2304_v60 = vmul.f32 %v7716_v45, %v2302_v31  ;;  %v9644_v31 = vld [vmem:[#allocation8 + $0xf0] ss:$24 sps:$4 sm:$0xff]   ;;  %v9647_v45 = vld [vmem:[#allocation8 + $0x124] ss:$24 sps:$4 sm:$0xff]  }
 0x46d   :  { %v2305_v42 = vmul.f32 %v7718_v44, %v2303_v12  ;;  %v9652_v12 = vld [vmem:[#allocation8 + $0x120] ss:$24 sps:$4 sm:$0xff]   ;;  %v9655_v44 = vld [vmem:[#allocation8 + $0x154] ss:$24 sps:$4 sm:$0xff]  }
 0x46e   :  { %v9590_v22 = vadd.f32 %v2306_v54, %v2304_v60  ;;  %v9660_v60 = vld [vmem:[#allocation8 + $0x150] ss:$24 sps:$4 sm:$0xff]   ;;  %v9663_v54 = vld [vmem:[#allocation8 + $0x184] ss:$24 sps:$4 sm:$0xff]  }
 0x46f   :  { %v9592_v49 = vadd.f32 %v2307_v58, %v2305_v42  ;;  %v9668_v42 = vld [vmem:[#allocation8 + $0x180] ss:$24 sps:$4 sm:$0xff]   ;;  %v9671_v58 = vld [vmem:[#allocation8 + $0x1b4] ss:$24 sps:$4 sm:$0xff]  }
 0x470   :  { %12645 = vst [vmem:[#allocation41_spill] sm:$0xff] %v9590_v22  ;;  %v9598_v18 = vpack.c.bf16 %v9590_v22, %v9590_v22  ;;  %12647 = vst [vmem:[#allocation43_spill] sm:$0xff] %v9671_v58 }
 0x471   :  { %12646 = vst [vmem:[#allocation42_spill] sm:$0xff] %v9592_v49  ;;  %v2325_v46 = vpack.c.bf16 %v9592_v49, %v9592_v49 }
 0x473   :  { %2358 = vmatprep.mubr.bf16.mxu0 %v2325_v46  ;;  %2399 = vmatprep.mubr.bf16.mxu1 %v2325_v46 }
 0x474   :  { %2359 = vmatmul.mubr.bf16.vlgmr.msra.gmra.mrb[48].mxu0 %v9598_v18  ;;  %2400 = vmatmul.mubr.bf16.vlgmr.msra.gmra.mrb[36].mxu1 %v9598_v18 }
 0x475   :  { %2409 = vmatpush1.bf16.msra.mxu0 %v9212_v2  ;;  %2440 = vmatprep.mubr.bf16.mxu0 %v2325_v46  ;;  %v9676_v46 = vld [vmem:[#allocation8 + $0x1b0] ss:$24 sps:$4 sm:$0xff]  }
 0x476   :  { %2410 = vmatprep.subr.bf16.mxu0 %v9215_v33  ;;  %2508 = vmatpush1.bf16.msra.mxu1 %v9604_v37  ;;  %12648 = vst [vmem:[#allocation44_spill] sm:$0xff] %v9676_v46 }
 0x477   :  { %2509 = vmatprep.subr.bf16.mxu1 %v9607_v47 }
 0x479   :  { %2411 = vmatpush1.bf16.msra.mxu0 %v9220_v32 }
 0x47a   :  { %2412 = vmatprep.subr.bf16.mxu0 %v9223_v48  ;;  %2510 = vmatpush1.bf16.msra.mxu1 %v9612_v40 }
 0x47b   :  { %2511 = vmatprep.subr.bf16.mxu1 %v9615_v43 }
 0x47d   :  { %2413 = vmatpush1.bf16.msra.mxu0 %v9228_v29 }
 0x47e   :  { %2414 = vmatprep.subr.bf16.mxu0 %v9231_v52  ;;  %2512 = vmatpush1.bf16.msra.mxu1 %v9620_v21 }
 0x47f   :  { %2513 = vmatprep.subr.bf16.mxu1 %v9623_v24 }
 0x481   :  { %2415 = vmatpush1.bf16.msra.mxu0 %v9236_v50 }
 0x482   :  { %2416 = vmatprep.subr.bf16.mxu0 %v9239_v51  ;;  %2514 = vmatpush1.bf16.msra.mxu1 %v9628_v36 }
 0x483   :  { %2515 = vmatprep.subr.bf16.mxu1 %v9631_v35 }
 0x485   :  { %2417 = vmatpush1.bf16.msra.mxu0 %v9244_v7 }
 0x486   :  { %2418 = vmatprep.subr.bf16.mxu0 %v9247_v20  ;;  %2516 = vmatpush1.bf16.msra.mxu1 %v9636_v13 }
 0x487   :  { %2517 = vmatprep.subr.bf16.mxu1 %v9639_v5 }
 0x489   :  { %2419 = vmatpush1.bf16.msra.mxu0 %v9252_v53 }
 0x48a   :  { %2420 = vmatprep.subr.bf16.mxu0 %v9255_v6  ;;  %2518 = vmatpush1.bf16.msra.mxu1 %v9644_v31 }
 0x48b   :  { %2519 = vmatprep.subr.bf16.mxu1 %v9647_v45 }
 0x48d   :  { %2421 = vmatpush1.bf16.msra.mxu0 %v9260_v59 }
 0x48e   :  { %2422 = vmatprep.subr.bf16.mxu0 %v9263_v61  ;;  %2520 = vmatpush1.bf16.msra.mxu1 %v9652_v12 }
 0x48f   :  { %2521 = vmatprep.subr.bf16.mxu1 %v9655_v44 }
 0x491   :  { %2423 = vmatpush1.bf16.msra.mxu0 %v9268_v25 }
 0x492   :  { %2424 = vmatprep.subr.bf16.mxu0 %v9271_v27  ;;  %2522 = vmatpush1.bf16.msra.mxu1 %v9660_v60 }
 0x493   :  { %2523 = vmatprep.subr.bf16.mxu1 %v9663_v54 }
 0x495   :  { %2425 = vmatpush1.bf16.msra.mxu0 %v9276_v1 }
 0x496   :  { %2426 = vmatprep.subr.bf16.mxu0 %v9279_v3  ;;  %2524 = vmatpush1.bf16.msra.mxu1 %v9668_v42 }
 0x497   :  { %2525 = vmatprep.subr.bf16.mxu1 %v9671_v58  ;;  %v9687_v58 = vld [vmem:[#allocation8 + $0x214] ss:$24 sps:$4 sm:$0xff]  }
 0x498   :  { %12651 = vst [vmem:[#allocation118_spill] sm:$0xff] %v9687_v58 }
 0x499   :  { %2427 = vmatpush1.bf16.msra.mxu0 %v9284_v8 }
 0x49a   :  { %2428 = vmatprep.subr.bf16.mxu0 %v9287_v10  ;;  %2526 = vmatpush1.bf16.msra.mxu1 %v9676_v46  ;;  %v9692_v46 = vld [vmem:[#allocation8 + $0x210] ss:$24 sps:$4 sm:$0xff]  }
 0x49b   :  { %2527 = vmatprep.subr.bf16.mxu1 %v9679_v26  ;;  %12652 = vst [vmem:[#allocation119_spill] sm:$0xff] %v9692_v46  ;;  %v9695_v26 = vld [vmem:[#allocation8 + $0x244] ss:$24 sps:$4 sm:$0xff]  }
 0x49c   :  { %12653 = vst [vmem:[#allocation120_spill] sm:$0xff] %v9695_v26 }
 0x49d   :  { %2429 = vmatpush1.bf16.msra.mxu0 %v9481_v39  ;;  %v12695_v39 = vld [vmem:[#allocation48_spill] sm:$0xff] }
 0x49e   :  { %2430 = vmatprep.subr.bf16.mxu0 %v9484_v11  ;;  %2528 = vmatpush1.bf16.msra.mxu1 %v9684_v56  ;;  %v12694_v56 = vld [vmem:[#allocation47_spill] sm:$0xff] }
 0x49f   :  { %2529 = vmatprep.subr.bf16.mxu1 %v9687_v58 }
 0x4a1   :  { %2431 = vmatpush1.bf16.msra.mxu0 %v9489_v17  ;;  %v12693_v17 = vld [vmem:[#allocation46_spill] sm:$0xff] }
 0x4a2   :  { %2432 = vmatprep.subr.bf16.mxu0 %v9492_v19  ;;  %2530 = vmatpush1.bf16.msra.mxu1 %v9692_v46  ;;  %v12692_v19 = vld [vmem:[#allocation45_spill] sm:$0xff] }
 0x4a3   :  { %2531 = vmatprep.subr.bf16.mxu1 %v9695_v26  ;;  %v12691_v26 = vld [vmem:[#allocation68_spill] sm:$0xff] }
 0x4a5   :  { %2433 = vmatpush1.bf16.msra.mxu0 %v9497_v4 }
 0x4a6   :  { %2434 = vmatprep.subr.bf16.mxu0 %v9500_v28  ;;  %2532 = vmatpush1.bf16.msra.mxu1 %v12590_v30  ;;  %v12654_v30 = vld [vmem:[#allocation25_spill] sm:$0xff]  ;;  %v12690_v28 = vld [vmem:[#allocation83_spill] sm:$0xff] }
 0x4a7   :  { %2533 = vmatprep.subr.bf16.mxu1 %v12591_v15  ;;  %v12655_v15 = vld [vmem:[#allocation92_spill] sm:$0xff] }
 0x4a9   :  { %2435 = vmatpush1.bf16.msra.mxu0 %v9505_v34  ;;  %v12656_v34 = vld [vmem:[#allocation93_spill] sm:$0xff] }
 0x4aa   :  { %2436 = vmatprep.subr.bf16.mxu0 %v9508_v16  ;;  %2534 = vmatpush1.bf16.msra.mxu1 %v12594_v38  ;;  %v12657_v38 = vld [vmem:[#allocation94_spill] sm:$0xff] }
 0x4ab   :  { %2535 = vmatprep.subr.bf16.mxu1 %v12595_v23  ;;  %v12658_v23 = vld [vmem:[#allocation95_spill] sm:$0xff]  ;;  %v12689_v16 = vld [vmem:[#allocation66_spill] sm:$0xff] }
 0x4ad   :  { %2437 = vmatpush1.bf16.msra.mxu0 %v9513_v55  ;;  %v12659_v55 = vld [vmem:[#allocation96_spill] sm:$0xff] }
 0x4ae   :  { %2438 = vmatprep.subr.bf16.mxu0 %v9516_v9  ;;  %2536 = vmatpush1.bf16.msra.mxu1 %v12598_v57  ;;  %v12660_v9 = vld [vmem:[#allocation97_spill] sm:$0xff]  ;;  %v12661_v57 = vld [vmem:[#allocation98_spill] sm:$0xff] }
 0x4af   :  { %2537 = vmatprep.subr.bf16.mxu1 %v12599_v0  ;;  %v12662_v0 = vld [vmem:[#allocation99_spill] sm:$0xff] }
 0x4b1   :  { %2439 = vmatpush1.bf16.msra.mxu0 %v9521_v14  ;;  %v12663_v14 = vld [vmem:[#allocation100_spill] sm:$0xff] }
 0x4b2   :  { %2548 = vmatprep.subr.bf16.mxu0 %v12654_v30  ;;  %2538 = vmatpush1.bf16.msra.mxu1 %v12655_v15  ;;  %v12664_v30 = vld [vmem:[#allocation101_spill] sm:$0xff]  ;;  %v12665_v15 = vld [vmem:[#allocation102_spill] sm:$0xff] }
 0x4b3   :  { %2589 = vmatprep.subr.bf16.mxu1 %v12656_v34  ;;  %v12666_v34 = vld [vmem:[#allocation103_spill] sm:$0xff] }
 0x4b4   :  { %2441 = vmatmul.mubr.bf16.vlgmr.msra.gmra.mrb[52].mxu0 %v9598_v18  ;;  %v12667_v18 = vld [vmem:[#allocation104_spill] sm:$0xff] }
 0x4b5   :  { %2549 = vmatpush1.bf16.msra.mxu0 %v12657_v38  ;;  %v12668_v38 = vld [vmem:[#allocation105_spill] sm:$0xff] }
 0x4b6   :  { %2550 = vmatprep.subr.bf16.mxu0 %v12658_v23  ;;  %v12669_v23 = vld [vmem:[#allocation106_spill] sm:$0xff] }
 0x4b9   :  { %2551 = vmatpush1.bf16.msra.mxu0 %v12659_v55  ;;  %v12670_v55 = vld [vmem:[#allocation107_spill] sm:$0xff] }
 0x4ba   :  { %2552 = vmatprep.subr.bf16.mxu0 %v12660_v9  ;;  %v12671_v9 = vld [vmem:[#allocation108_spill] sm:$0xff] }
 0x4bd   :  { %2553 = vmatpush1.bf16.msra.mxu0 %v12661_v57  ;;  %v12672_v57 = vld [vmem:[#allocation109_spill] sm:$0xff] }
 0x4be   :  { %2554 = vmatprep.subr.bf16.mxu0 %v12662_v0  ;;  %v12673_v0 = vld [vmem:[#allocation110_spill] sm:$0xff] }
 0x4c1   :  { %2555 = vmatpush1.bf16.msra.mxu0 %v12663_v14  ;;  %v12674_v14 = vld [vmem:[#allocation111_spill] sm:$0xff] }
 0x4c2   :  { %2556 = vmatprep.subr.bf16.mxu0 %v12664_v30  ;;  %v12675_v30 = vld [vmem:[#allocation112_spill] sm:$0xff] }
 0x4c5   :  { %2557 = vmatpush1.bf16.msra.mxu0 %v12665_v15  ;;  %v12676_v15 = vld [vmem:[#allocation113_spill] sm:$0xff] }
 0x4c6   :  { %2558 = vmatprep.subr.bf16.mxu0 %v12666_v34  ;;  %v12677_v34 = vld [vmem:[#allocation114_spill] sm:$0xff] }
 0x4c9   :  { %2559 = vmatpush1.bf16.msra.mxu0 %v12667_v18  ;;  %v12678_v18 = vld [vmem:[#allocation115_spill] sm:$0xff] }
 0x4ca   :  { %2560 = vmatprep.subr.bf16.mxu0 %v12668_v38  ;;  %v12679_v38 = vld [vmem:[#allocation116_spill] sm:$0xff] }
 0x4cd   :  { %2561 = vmatpush1.bf16.msra.mxu0 %v12669_v23  ;;  %v12680_v23 = vld [vmem:[#allocation117_spill] sm:$0xff] }
 0x4ce   :  { %2562 = vmatprep.subr.bf16.mxu0 %v12670_v55  ;;  %v12681_v55 = vld [vmem:[#allocation69_spill] sm:$0xff] }
 0x4d1   :  { %2563 = vmatpush1.bf16.msra.mxu0 %v12671_v9  ;;  %v12682_v9 = vld [vmem:[#allocation70_spill] sm:$0xff] }
 0x4d2   :  { %2564 = vmatprep.subr.bf16.mxu0 %v12672_v57  ;;  %v12683_v57 = vld [vmem:[#allocation27_spill] sm:$0xff] }
 0x4d5   :  { %2565 = vmatpush1.bf16.msra.mxu0 %v12673_v0  ;;  %v12684_v0 = vld [vmem:[#allocation28_spill] sm:$0xff] }
 0x4d6   :  { %2566 = vmatprep.subr.bf16.mxu0 %v12674_v14  ;;  %v12685_v14 = vld [vmem:[#allocation29_spill] sm:$0xff] }
 0x4d9   :  { %2567 = vmatpush1.bf16.msra.mxu0 %v12675_v30  ;;  %v12686_v30 = vld [vmem:[#allocation30_spill] sm:$0xff] }
 0x4da   :  { %2568 = vmatprep.subr.bf16.mxu0 %v12676_v15  ;;  %v12687_v15 = vld [vmem:[#allocation31_spill] sm:$0xff] }
 0x4dd   :  { %2569 = vmatpush1.bf16.msra.mxu0 %v12677_v34  ;;  %v12688_v34 = vld [vmem:[#allocation32_spill] sm:$0xff] }
 0x4de   :  { %2570 = vmatprep.subr.bf16.mxu0 %v12678_v18 }
 0x4e1   :  { %2571 = vmatpush1.bf16.msra.mxu0 %v12679_v38 }
 0x4e2   :  { %2572 = vmatprep.subr.bf16.mxu0 %v12680_v23 }
 0x4e5   :  { %2573 = vmatpush1.bf16.msra.mxu0 %v12681_v55 }
 0x4e6   :  { %2574 = vmatprep.subr.bf16.mxu0 %v12682_v9 }
 0x4e9   :  { %2575 = vmatpush1.bf16.msra.mxu0 %v12683_v57 }
 0x4ea   :  { %2576 = vmatprep.subr.bf16.mxu0 %v12684_v0 }
 0x4ed   :  { %2577 = vmatpush1.bf16.msra.mxu0 %v12685_v14 }
 0x4ee   :  { %2578 = vmatprep.subr.bf16.mxu0 %v12686_v30 }
 0x4f1   :  { %2579 = vmatpush1.bf16.msra.mxu0 %v12687_v15 }
 0x4f2   :  { %2688 = vmatprep.subr.bf16.mxu0 %v12688_v34 }
 0x547   :  { %v2360_v18 = vpop.f32.mrb[48].mxu0  ;;  %v2401_v38 = vpop.f32.mrb[36].mxu1 }
 0x548   :  { %v2361_v23 = vadd.f32 %v2360_v18, %v12689_v16  ;;  %v2402_v55 = vadd.f32 %v2401_v38, %v12690_v28  ;;  %v2362_v4 = vpop.f32.mrb[49].mxu0  ;;  %v2403_v9 = vpop.f32.mrb[37].mxu1 }
 0x549   :  { %v2363_v57 = vadd.f32 %v2362_v4, %v12691_v26  ;;  %v2404_v0 = vadd.f32 %v2403_v9, %v9183_v63  ;;  %v2364_v46 = vpop.f32.mrb[50].mxu0  ;;  %v2405_v14 = vpop.f32.mrb[38].mxu1 }
 0x54a   :  { %v2449_v30 = vadd.f32 %v2361_v23, %v12692_v19  ;;  %v2463_v15 = vadd.f32 %v2402_v55, %v12693_v17  ;;  %v2365_v58 = vpop.f32.mrb[51].mxu0  ;;  %v2406_v34 = vpop.f32.mrb[39].mxu1 }
 0x54b   :  { %v2450_v11 = vadd.f32 %v2363_v57, %v12694_v56  ;;  %v2464_v18 = vadd.f32 %v2404_v0, %v12695_v39  ;;  %v12696_v58 = vld [vmem:[#allocation73_spill] sm:$0xff] }
 0x54c   :  { %v6682_v16 = vmul.f32 -1.442695, %v2449_v30  ;;  %v6684_v28 = vmul.f32 -1.442695, %v2463_v15 }
 0x54d   :  { %v6683_v38 = vmul.f32 -1.442695, %v2450_v11  ;;  %v6685_v4 = vmul.f32 -1.442695, %v2464_v18  ;;  %v12697_v18 = vld [vmem:[#allocation74_spill] sm:$0xff] }
 0x54e   :  { %7719 = vpow2.f32 %v6682_v16 }
 0x54f   :  { %7721 = vpow2.f32 %v6683_v38 }
 0x550   :  { %7723 = vpow2.f32 %v6684_v28 }
 0x551   :  { %7725 = vpow2.f32 %v6685_v4 }
 0x558   :  { %v7720_v26 = vpop.eup %7719 }
 0x559   :  { %v7722_v9 = vpop.eup %7721  ;;  %v2457_v14 = vadd.f32 1.0, %v7720_v26 }
 0x55a   :  { %v2458_v19 = vadd.f32 1.0, %v7722_v9  ;;  %v7724_v17 = vpop.eup %7723 }
 0x55b   :  { %7727 = vrcp.f32 %v2457_v14  ;;  %v7726_v34 = vpop.eup %7725  ;;  %v2471_v23 = vadd.f32 1.0, %v7724_v17 }
 0x55c   :  { %7729 = vrcp.f32 %v2458_v19  ;;  %v2472_v56 = vadd.f32 1.0, %v7726_v34 }
 0x55d   :  { %7731 = vrcp.f32 %v2471_v23 }
 0x55e   :  { %7733 = vrcp.f32 %v2472_v56 }
 0x565   :  { %v7728_v30 = vpop.eup %7727 }
 0x566   :  { %v7730_v57 = vpop.eup %7729 }
 0x567   :  { %v7732_v4 = vpop.eup %7731 }
 0x568   :  { %v7734_v9 = vpop.eup %7733  ;;  %v2483_v14 = vsub.f32 1.0, %v7732_v4 }
 0x569   :  { %v2484_v17 = vsub.f32 1.0, %v7734_v9 }
 0x587   :  { %v2442_v55 = vpop.f32.mrb[52].mxu0 }
 0x588   :  { %v2443_v39 = vadd.f32 %v2442_v55, %v12573_v41  ;;  %v2444_v11 = vpop.f32.mrb[53].mxu0 }
 0x589   :  { %v2445_v15 = vadd.f32 %v2444_v11, %v9186_v62  ;;  %v2446_v16 = vpop.f32.mrb[54].mxu0  ;;  %v2487_v11 = vmul.f32 %v7732_v4, %v9590_v22  ;;  %v12728_v4 = vld [vmem:[#allocation95_spill] sm:$0xff] }
 0x58a   :  { %v2477_v28 = vmul.f32 %v7728_v30, %v2443_v39  ;;  %v2447_v0 = vpop.f32.mrb[55].mxu0  ;;  %v2488_v39 = vmul.f32 %v7734_v9, %v9592_v49  ;;  %v12729_v9 = vld [vmem:[#allocation96_spill] sm:$0xff]  ;;  %v12763_v49 = vld [vmem:[#allocation50_spill] sm:$0xff] }
 0x58b   :  { %v2478_v26 = vmul.f32 %v7730_v57, %v2445_v15  ;;  %v12720_v57 = vld [vmem:[#allocation40_spill] sm:$0xff]  ;;  %v12722_v0 = vld [vmem:[#allocation91_spill] sm:$0xff] }
 0x58c   :  { %v2479_v46 = vadd.f32 %v2477_v28, %v12696_v58  ;;  %v12721_v28 = vld [vmem:[#allocation23_spill] sm:$0xff]  ;;  %v12724_v58 = vld [vmem:[#allocation25_spill] sm:$0xff] }
 0x58d   :  { %v2480_v38 = vadd.f32 %v2478_v26, %v12697_v18  ;;  %v12723_v26 = vld [vmem:[#allocation84_spill] sm:$0xff]  ;;  %v12726_v18 = vld [vmem:[#allocation93_spill] sm:$0xff] }
 0x58e   :  { %7735 = vtanh.f32 %v2479_v46  ;;  %v12725_v46 = vld [vmem:[#allocation92_spill] sm:$0xff] }
 0x58f   :  { %7737 = vtanh.f32 %v2480_v38  ;;  %v12727_v38 = vld [vmem:[#allocation94_spill] sm:$0xff] }
 0x598   :  { %v7736_v19 = vpop.eup %7735 }
 0x599   :  { %v7738_v34 = vpop.eup %7737  ;;  %v2485_v55 = vmul.f32 %v7736_v19, %v2483_v14  ;;  %v12730_v14 = vld [vmem:[#allocation97_spill] sm:$0xff]  ;;  %v12731_v19 = vld [vmem:[#allocation98_spill] sm:$0xff] }
 0x59a   :  { %v2486_v23 = vmul.f32 %v7738_v34, %v2484_v17  ;;  %v12732_v17 = vld [vmem:[#allocation99_spill] sm:$0xff]  ;;  %v12733_v34 = vld [vmem:[#allocation100_spill] sm:$0xff] }
 0x59b   :  { %v9761_v56 = vadd.f32 %v2487_v11, %v2485_v55  ;;  %v12734_v55 = vld [vmem:[#allocation101_spill] sm:$0xff]  ;;  %v12735_v11 = vld [vmem:[#allocation102_spill] sm:$0xff] }
 0x59c   :  { %v9763_v30 = vadd.f32 %v2488_v39, %v2486_v23  ;;  %v12736_v23 = vld [vmem:[#allocation103_spill] sm:$0xff]  ;;  %v12737_v39 = vld [vmem:[#allocation104_spill] sm:$0xff] }
 0x59d   :  { %12698 = vst [vmem:[#allocation45_spill] sm:$0xff] %v9761_v56  ;;  %v9769_v16 = vpack.c.bf16 %v9761_v56, %v9761_v56 }
 0x59e   :  { %12699 = vst [vmem:[#allocation46_spill] sm:$0xff] %v9763_v30  ;;  %v2506_v15 = vpack.c.bf16 %v9763_v30, %v9763_v30 }
 0x5a0   :  { %2539 = vmatprep.mubr.bf16.mxu1 %v2506_v15  ;;  %2580 = vmatprep.mubr.bf16.mxu0 %v2506_v15 }
 0x5a1   :  { %2540 = vmatmul.mubr.bf16.vlgmr.msra.gmra.mrb[40].mxu1 %v9769_v16  ;;  %2581 = vmatmul.mubr.bf16.vlgmr.msra.gmra.mrb[56].mxu0 %v9769_v16 }
 0x5a2   :  { %2590 = vmatpush1.bf16.msra.mxu1 %v9212_v2  ;;  %2621 = vmatprep.mubr.bf16.mxu1 %v2506_v15  ;;  %v12700_v2 = vld [vmem:[#allocation43_spill] sm:$0xff]  ;;  %v12738_v15 = vld [vmem:[#allocation105_spill] sm:$0xff] }
 0x5a3   :  { %2591 = vmatprep.subr.bf16.mxu1 %v9215_v33  ;;  %2689 = vmatpush1.bf16.msra.mxu0 %v9604_v37  ;;  %v12701_v33 = vld [vmem:[#allocation44_spill] sm:$0xff] }
 0x5a4   :  { %2690 = vmatprep.subr.bf16.mxu0 %v9607_v47 }
 0x5a6   :  { %2592 = vmatpush1.bf16.msra.mxu1 %v9220_v32  ;;  %v12702_v32 = vld [vmem:[#allocation71_spill] sm:$0xff] }
 0x5a7   :  { %2593 = vmatprep.subr.bf16.mxu1 %v9223_v48  ;;  %2691 = vmatpush1.bf16.msra.mxu0 %v9612_v40  ;;  %v12703_v48 = vld [vmem:[#allocation19_spill] sm:$0xff] }
 0x5a8   :  { %2692 = vmatprep.subr.bf16.mxu0 %v9615_v43 }
 0x5aa   :  { %2594 = vmatpush1.bf16.msra.mxu1 %v9228_v29  ;;  %v12704_v29 = vld [vmem:[#allocation20_spill] sm:$0xff] }
 0x5ab   :  { %2595 = vmatprep.subr.bf16.mxu1 %v9231_v52  ;;  %2693 = vmatpush1.bf16.msra.mxu0 %v9620_v21  ;;  %v12705_v52 = vld [vmem:[#allocation72_spill] sm:$0xff] }
 0x5ac   :  { %2694 = vmatprep.subr.bf16.mxu0 %v9623_v24 }
 0x5ae   :  { %2596 = vmatpush1.bf16.msra.mxu1 %v9236_v50  ;;  %v12706_v50 = vld [vmem:[#allocation118_spill] sm:$0xff] }
 0x5af   :  { %2597 = vmatprep.subr.bf16.mxu1 %v9239_v51  ;;  %2695 = vmatpush1.bf16.msra.mxu0 %v9628_v36  ;;  %v12707_v51 = vld [vmem:[#allocation21_spill] sm:$0xff] }
 0x5b0   :  { %2696 = vmatprep.subr.bf16.mxu0 %v9631_v35 }
 0x5b2   :  { %2598 = vmatpush1.bf16.msra.mxu1 %v9244_v7  ;;  %v12708_v7 = vld [vmem:[#allocation22_spill] sm:$0xff] }
 0x5b3   :  { %2599 = vmatprep.subr.bf16.mxu1 %v9247_v20  ;;  %2697 = vmatpush1.bf16.msra.mxu0 %v9636_v13  ;;  %v12709_v20 = vld [vmem:[#allocation119_spill] sm:$0xff] }
 0x5b4   :  { %2698 = vmatprep.subr.bf16.mxu0 %v9639_v5 }
 0x5b6   :  { %2600 = vmatpush1.bf16.msra.mxu1 %v9252_v53  ;;  %v12710_v53 = vld [vmem:[#allocation120_spill] sm:$0xff] }
 0x5b7   :  { %2601 = vmatprep.subr.bf16.mxu1 %v9255_v6  ;;  %2699 = vmatpush1.bf16.msra.mxu0 %v9644_v31  ;;  %v12711_v6 = vld [vmem:[#allocation24_spill] sm:$0xff] }
 0x5b8   :  { %2700 = vmatprep.subr.bf16.mxu0 %v9647_v45 }
 0x5ba   :  { %2602 = vmatpush1.bf16.msra.mxu1 %v9260_v59  ;;  %v12712_v59 = vld [vmem:[#allocation26_spill] sm:$0xff] }
 0x5bb   :  { %2603 = vmatprep.subr.bf16.mxu1 %v9263_v61  ;;  %2701 = vmatpush1.bf16.msra.mxu0 %v9652_v12  ;;  %v12713_v61 = vld [vmem:[#allocation87_spill] sm:$0xff] }
 0x5bc   :  { %2702 = vmatprep.subr.bf16.mxu0 %v9655_v44 }
 0x5be   :  { %2604 = vmatpush1.bf16.msra.mxu1 %v9268_v25  ;;  %v12714_v25 = vld [vmem:[#allocation88_spill] sm:$0xff] }
 0x5bf   :  { %2605 = vmatprep.subr.bf16.mxu1 %v9271_v27  ;;  %2703 = vmatpush1.bf16.msra.mxu0 %v9660_v60  ;;  %v12715_v27 = vld [vmem:[#allocation37_spill] sm:$0xff] }
 0x5c0   :  { %2704 = vmatprep.subr.bf16.mxu0 %v9663_v54 }
 0x5c2   :  { %2606 = vmatpush1.bf16.msra.mxu1 %v9276_v1  ;;  %v12716_v1 = vld [vmem:[#allocation38_spill] sm:$0xff] }
 0x5c3   :  { %2607 = vmatprep.subr.bf16.mxu1 %v9279_v3  ;;  %2705 = vmatpush1.bf16.msra.mxu0 %v9668_v42  ;;  %v12717_v3 = vld [vmem:[#allocation89_spill] sm:$0xff] }
 0x5c4   :  { %2706 = vmatprep.subr.bf16.mxu0 %v12700_v2 }
 0x5c6   :  { %2608 = vmatpush1.bf16.msra.mxu1 %v9284_v8  ;;  %v12718_v8 = vld [vmem:[#allocation90_spill] sm:$0xff] }
 0x5c7   :  { %2609 = vmatprep.subr.bf16.mxu1 %v9287_v10  ;;  %2707 = vmatpush1.bf16.msra.mxu0 %v12701_v33  ;;  %v12719_v10 = vld [vmem:[#allocation39_spill] sm:$0xff] }
 0x5c8   :  { %2708 = vmatprep.subr.bf16.mxu0 %v12702_v32 }
 0x5ca   :  { %2610 = vmatpush1.bf16.msra.mxu1 %v12703_v48 }
 0x5cb   :  { %2611 = vmatprep.subr.bf16.mxu1 %v12704_v29  ;;  %2709 = vmatpush1.bf16.msra.mxu0 %v12705_v52 }
 0x5cc   :  { %2710 = vmatprep.subr.bf16.mxu0 %v12706_v50 }
 0x5ce   :  { %2612 = vmatpush1.bf16.msra.mxu1 %v12707_v51 }
 0x5cf   :  { %2613 = vmatprep.subr.bf16.mxu1 %v12708_v7  ;;  %2711 = vmatpush1.bf16.msra.mxu0 %v12709_v20 }
 0x5d0   :  { %2712 = vmatprep.subr.bf16.mxu0 %v12710_v53 }
 0x5d2   :  { %2614 = vmatpush1.bf16.msra.mxu1 %v12711_v6 }
 0x5d3   :  { %2615 = vmatprep.subr.bf16.mxu1 %v12712_v59  ;;  %2713 = vmatpush1.bf16.msra.mxu0 %v12713_v61  ;;  %v12740_v61 = vld [vmem:[#allocation107_spill] sm:$0xff] }
 0x5d4   :  { %2714 = vmatprep.subr.bf16.mxu0 %v12714_v25  ;;  %v12741_v25 = vld [vmem:[#allocation108_spill] sm:$0xff] }
 0x5d6   :  { %2616 = vmatpush1.bf16.msra.mxu1 %v12715_v27 }
 0x5d7   :  { %2617 = vmatprep.subr.bf16.mxu1 %v12716_v1  ;;  %2715 = vmatpush1.bf16.msra.mxu0 %v12717_v3  ;;  %v12742_v3 = vld [vmem:[#allocation109_spill] sm:$0xff] }
 0x5d8   :  { %2716 = vmatprep.subr.bf16.mxu0 %v12718_v8  ;;  %v12743_v8 = vld [vmem:[#allocation110_spill] sm:$0xff] }
 0x5da   :  { %2618 = vmatpush1.bf16.msra.mxu1 %v12719_v10 }
 0x5db   :  { %2619 = vmatprep.subr.bf16.mxu1 %v12720_v57  ;;  %2717 = vmatpush1.bf16.msra.mxu0 %v12721_v28  ;;  %v12744_v28 = vld [vmem:[#allocation111_spill] sm:$0xff] }
 0x5dc   :  { %2718 = vmatprep.subr.bf16.mxu0 %v12722_v0  ;;  %v12745_v0 = vld [vmem:[#allocation112_spill] sm:$0xff] }
 0x5de   :  { %2620 = vmatpush1.bf16.msra.mxu1 %v12723_v26 }
 0x5df   :  { %2729 = vmatprep.subr.bf16.mxu1 %v12724_v58  ;;  %2719 = vmatpush1.bf16.msra.mxu0 %v12725_v46  ;;  %v12746_v58 = vld [vmem:[#allocation113_spill] sm:$0xff]  ;;  %v12747_v46 = vld [vmem:[#allocation114_spill] sm:$0xff] }
 0x5e0   :  { %2770 = vmatprep.subr.bf16.mxu0 %v12726_v18  ;;  %v12748_v18 = vld [vmem:[#allocation115_spill] sm:$0xff] }
 0x5e1   :  { %2622 = vmatmul.mubr.bf16.vlgmr.msra.gmra.mrb[44].mxu1 %v9769_v16  ;;  %v12739_v16 = vld [vmem:[#allocation106_spill] sm:$0xff] }
 0x5e2   :  { %2730 = vmatpush1.bf16.msra.mxu1 %v12727_v38  ;;  %v12749_v38 = vld [vmem:[#allocation116_spill] sm:$0xff] }
 0x5e3   :  { %2731 = vmatprep.subr.bf16.mxu1 %v12728_v4  ;;  %v12750_v4 = vld [vmem:[#allocation117_spill] sm:$0xff] }
 0x5e6   :  { %2732 = vmatpush1.bf16.msra.mxu1 %v12729_v9  ;;  %v12751_v9 = vld [vmem:[#allocation69_spill] sm:$0xff] }
 0x5e7   :  { %2733 = vmatprep.subr.bf16.mxu1 %v12730_v14  ;;  %v12752_v14 = vld [vmem:[#allocation70_spill] sm:$0xff] }
 0x5ea   :  { %2734 = vmatpush1.bf16.msra.mxu1 %v12731_v19  ;;  %v12753_v19 = vld [vmem:[#allocation27_spill] sm:$0xff] }
 0x5eb   :  { %2735 = vmatprep.subr.bf16.mxu1 %v12732_v17  ;;  %v12754_v17 = vld [vmem:[#allocation28_spill] sm:$0xff] }
 0x5ee   :  { %2736 = vmatpush1.bf16.msra.mxu1 %v12733_v34  ;;  %v12755_v34 = vld [vmem:[#allocation29_spill] sm:$0xff] }
 0x5ef   :  { %2737 = vmatprep.subr.bf16.mxu1 %v12734_v55  ;;  %v12756_v55 = vld [vmem:[#allocation30_spill] sm:$0xff] }
 0x5f2   :  { %2738 = vmatpush1.bf16.msra.mxu1 %v12735_v11  ;;  %v12757_v11 = vld [vmem:[#allocation31_spill] sm:$0xff] }
 0x5f3   :  { %2739 = vmatprep.subr.bf16.mxu1 %v12736_v23  ;;  %v12758_v23 = vld [vmem:[#allocation32_spill] sm:$0xff] }
 0x5f6   :  { %2740 = vmatpush1.bf16.msra.mxu1 %v12737_v39 }
 0x5f7   :  { %2741 = vmatprep.subr.bf16.mxu1 %v12738_v15 }
 0x5fa   :  { %2742 = vmatpush1.bf16.msra.mxu1 %v12739_v16  ;;  %v12759_v16 = vld [vmem:[#allocation66_spill] sm:$0xff] }
 0x5fb   :  { %2743 = vmatprep.subr.bf16.mxu1 %v12740_v61 }
 0x5fe   :  { %2744 = vmatpush1.bf16.msra.mxu1 %v12741_v25  ;;  %v12760_v25 = vld [vmem:[#allocation83_spill] sm:$0xff] }
 0x5ff   :  { %2745 = vmatprep.subr.bf16.mxu1 %v12742_v3 }
 0x602   :  { %2746 = vmatpush1.bf16.msra.mxu1 %v12743_v8 }
 0x603   :  { %2747 = vmatprep.subr.bf16.mxu1 %v12744_v28 }
 0x606   :  { %2748 = vmatpush1.bf16.msra.mxu1 %v12745_v0  ;;  %v12761_v0 = vld [vmem:[#allocation68_spill] sm:$0xff] }
 0x607   :  { %2749 = vmatprep.subr.bf16.mxu1 %v12746_v58 }
 0x60a   :  { %2750 = vmatpush1.bf16.msra.mxu1 %v12747_v46 }
 0x60b   :  { %2751 = vmatprep.subr.bf16.mxu1 %v12748_v18 }
 0x60e   :  { %2752 = vmatpush1.bf16.msra.mxu1 %v12749_v38 }
 0x60f   :  { %2753 = vmatprep.subr.bf16.mxu1 %v12750_v4  ;;  %v12762_v4 = vld [vmem:[#allocation49_spill] sm:$0xff] }
 0x612   :  { %2754 = vmatpush1.bf16.msra.mxu1 %v12751_v9 }
 0x613   :  { %2755 = vmatprep.subr.bf16.mxu1 %v12752_v14 }
 0x616   :  { %2756 = vmatpush1.bf16.msra.mxu1 %v12753_v19  ;;  %v12765_v19 = vld [vmem:[#allocation52_spill] sm:$0xff] }
 0x617   :  { %2757 = vmatprep.subr.bf16.mxu1 %v12754_v17 }
 0x61a   :  { %2758 = vmatpush1.bf16.msra.mxu1 %v12755_v34  ;;  %v12764_v34 = vld [vmem:[#allocation51_spill] sm:$0xff] }
 0x61b   :  { %2759 = vmatprep.subr.bf16.mxu1 %v12756_v55 }
 0x61e   :  { %2760 = vmatpush1.bf16.msra.mxu1 %v12757_v11 }
 0x61f   :  { %2869 = vmatprep.subr.bf16.mxu1 %v12758_v23 }
 0x674   :  { %v2541_v39 = vpop.f32.mrb[40].mxu1  ;;  %v2582_v15 = vpop.f32.mrb[56].mxu0 }
 0x675   :  { %v2542_v61 = vadd.f32 %v2541_v39, %v12759_v16  ;;  %v2583_v3 = vadd.f32 %v2582_v15, %v12760_v25  ;;  %v2543_v8 = vpop.f32.mrb[41].mxu1  ;;  %v2584_v28 = vpop.f32.mrb[57].mxu0 }
 0x676   :  { %v2544_v58 = vadd.f32 %v2543_v8, %v12761_v0  ;;  %v2585_v46 = vadd.f32 %v2584_v28, %v9183_v63  ;;  %v2545_v18 = vpop.f32.mrb[42].mxu1  ;;  %v2586_v38 = vpop.f32.mrb[58].mxu0 }
 0x677   :  { %v2630_v22 = vadd.f32 %v2542_v61, %v12762_v4  ;;  %v2644_v11 = vadd.f32 %v2583_v3, %v12763_v49  ;;  %v2546_v55 = vpop.f32.mrb[43].mxu1  ;;  %v2587_v23 = vpop.f32.mrb[59].mxu0  ;;  %v12766_v38 = vld [vmem:[#allocation75_spill] sm:$0xff] }
 0x678   :  { %v2631_v17 = vadd.f32 %v2544_v58, %v12764_v34  ;;  %v2645_v39 = vadd.f32 %v2585_v46, %v12765_v19 }
 0x679   :  { %v6686_v16 = vmul.f32 -1.442695, %v2630_v22  ;;  %v6688_v25 = vmul.f32 -1.442695, %v2644_v11 }
 0x67a   :  { %v6687_v15 = vmul.f32 -1.442695, %v2631_v17  ;;  %v6689_v8 = vmul.f32 -1.442695, %v2645_v39  ;;  %v12767_v39 = vld [vmem:[#allocation76_spill] sm:$0xff] }
 0x67b   :  { %7739 = vpow2.f32 %v6686_v16 }
 0x67c   :  { %7741 = vpow2.f32 %v6687_v15 }
 0x67d   :  { %7743 = vpow2.f32 %v6688_v25 }
 0x67e   :  { %7745 = vpow2.f32 %v6689_v8 }
 0x685   :  { %v7740_v0 = vpop.eup %7739 }
 0x686   :  { %v7742_v28 = vpop.eup %7741  ;;  %v2638_v18 = vadd.f32 1.0, %v7740_v0 }
 0x687   :  { %v2639_v61 = vadd.f32 1.0, %v7742_v28  ;;  %v7744_v49 = vpop.eup %7743 }
 0x688   :  { %7747 = vrcp.f32 %v2638_v18  ;;  %v7746_v55 = vpop.eup %7745  ;;  %v2652_v23 = vadd.f32 1.0, %v7744_v49 }
 0x689   :  { %7749 = vrcp.f32 %v2639_v61  ;;  %v2653_v34 = vadd.f32 1.0, %v7746_v55 }
 0x68a   :  { %7751 = vrcp.f32 %v2652_v23 }
 0x68b   :  { %7753 = vrcp.f32 %v2653_v34 }
 0x692   :  { %v7748_v17 = vpop.eup %7747 }
 0x693   :  { %v7750_v58 = vpop.eup %7749 }
 0x694   :  { %v7752_v8 = vpop.eup %7751 }
 0x695   :  { %v7754_v28 = vpop.eup %7753  ;;  %v2664_v18 = vsub.f32 1.0, %v7752_v8 }
 0x696   :  { %v2665_v49 = vsub.f32 1.0, %v7754_v28 }
 0x6b4   :  { %v2623_v3 = vpop.f32.mrb[44].mxu1 }
 0x6b5   :  { %v2624_v22 = vadd.f32 %v2623_v3, %v12573_v41  ;;  %v2625_v19 = vpop.f32.mrb[45].mxu1 }
 0x6b6   :  { %v2626_v11 = vadd.f32 %v2625_v19, %v9186_v62  ;;  %v2627_v16 = vpop.f32.mrb[46].mxu1  ;;  %v2668_v19 = vmul.f32 %v7752_v8, %v9761_v56  ;;  %v9928_v8 = vld [vmem:[#allocation8 + $0xd0] ss:$24 sps:$4 sm:$0xff]   ;;  %v9971_v56 = vld [vmem:[#allocation8 + $0x1f4] ss:$24 sps:$4 sm:$0xff]  }
 0x6b7   :  { %v2658_v25 = vmul.f32 %v7748_v17, %v2624_v22  ;;  %v2628_v46 = vpop.f32.mrb[47].mxu1  ;;  %v2669_v22 = vmul.f32 %v7754_v28, %v9763_v30  ;;  %v9931_v28 = vld [vmem:[#allocation8 + $0x104] ss:$24 sps:$4 sm:$0xff]   ;;  %12768 = vst [vmem:[#allocation47_spill] sm:$0xff] %v9971_v56  ;;  %v9986_v30 = vld [vmem:[#allocation8 + $0x240] ss:$24 sps:$4 sm:$0xff]  }
 0x6b8   :  { %v2659_v0 = vmul.f32 %v7750_v58, %v2626_v11  ;;  %v9896_v58 = vld [vmem:[#allocation8 + $0x10] ss:$24 sps:$4 sm:$0xff]   ;;  %v9904_v46 = vld [vmem:[#allocation8 + $0x40] ss:$24 sps:$4 sm:$0xff]   ;;  %12769 = vst [vmem:[#allocation48_spill] sm:$0xff] %v9986_v30 }
 0x6b9   :  { %v2660_v4 = vadd.f32 %v2658_v25, %v12766_v38  ;;  %v9899_v25 = vld [vmem:[#allocation8 + $0x44] ss:$24 sps:$4 sm:$0xff]   ;;  %v9912_v38 = vld [vmem:[#allocation8 + $0x70] ss:$24 sps:$4 sm:$0xff]  }
 0x6ba   :  { %v2661_v15 = vadd.f32 %v2659_v0, %v12767_v39  ;;  %v9907_v0 = vld [vmem:[#allocation8 + $0x74] ss:$24 sps:$4 sm:$0xff]   ;;  %v9920_v39 = vld [vmem:[#allocation8 + $0xa0] ss:$24 sps:$4 sm:$0xff]  }
 0x6bb   :  { %7755 = vtanh.f32 %v2660_v4  ;;  %v9915_v4 = vld [vmem:[#allocation8 + $0xa4] ss:$24 sps:$4 sm:$0xff]  }
 0x6bc   :  { %7757 = vtanh.f32 %v2661_v15  ;;  %v9923_v15 = vld [vmem:[#allocation8 + $0xd4] ss:$24 sps:$4 sm:$0xff]  }
 0x6c5   :  { %v7756_v61 = vpop.eup %7755 }
 0x6c6   :  { %v7758_v55 = vpop.eup %7757  ;;  %v2666_v3 = vmul.f32 %v7756_v61, %v2664_v18  ;;  %v9936_v18 = vld [vmem:[#allocation8 + $0x100] ss:$24 sps:$4 sm:$0xff]   ;;  %v9939_v61 = vld [vmem:[#allocation8 + $0x134] ss:$24 sps:$4 sm:$0xff]  }
 0x6c7   :  { %v2667_v23 = vmul.f32 %v7758_v55, %v2665_v49  ;;  %v9944_v49 = vld [vmem:[#allocation8 + $0x130] ss:$24 sps:$4 sm:$0xff]   ;;  %v9947_v55 = vld [vmem:[#allocation8 + $0x164] ss:$24 sps:$4 sm:$0xff]  }
 0x6c8   :  { %v9884_v34 = vadd.f32 %v2668_v19, %v2666_v3  ;;  %v9952_v3 = vld [vmem:[#allocation8 + $0x160] ss:$24 sps:$4 sm:$0xff]   ;;  %v9955_v19 = vld [vmem:[#allocation8 + $0x194] ss:$24 sps:$4 sm:$0xff]  }
 0x6c9   :  { %v9886_v17 = vadd.f32 %v2669_v22, %v2667_v23  ;;  %v9960_v23 = vld [vmem:[#allocation8 + $0x190] ss:$24 sps:$4 sm:$0xff]   ;;  %v9963_v22 = vld [vmem:[#allocation8 + $0x1c4] ss:$24 sps:$4 sm:$0xff]  }
 0x6ca   :  { %v9892_v16 = vpack.c.bf16 %v9884_v34, %v9884_v34 }
 0x6cb   :  { %v2687_v11 = vpack.c.bf16 %v9886_v17, %v9886_v17 }
 0x6cd   :  { %2720 = vmatprep.mubr.bf16.mxu0 %v2687_v11  ;;  %2761 = vmatprep.mubr.bf16.mxu1 %v2687_v11 }
 0x6ce   :  { %2721 = vmatmul.mubr.bf16.vlgmr.msra.gmra.mrb[60].mxu0 %v9892_v16  ;;  %2762 = vmatmul.mubr.bf16.vlgmr.msra.gmra.mrb[48].mxu1 %v9892_v16 }
 0x6cf   :  { %2771 = vmatpush1.bf16.msra.mxu0 %v9896_v58  ;;  %2802 = vmatprep.mubr.bf16.mxu0 %v2687_v11  ;;  %v9968_v11 = vld [vmem:[#allocation8 + $0x1c0] ss:$24 sps:$4 sm:$0xff]  }
 0x6d0   :  { %2772 = vmatprep.subr.bf16.mxu0 %v9899_v25  ;;  %2870 = vmatpush1.bf16.msra.mxu1 %v9604_v37 }
 0x6d1   :  { %2871 = vmatprep.subr.bf16.mxu1 %v9607_v47 }
 0x6d3   :  { %2773 = vmatpush1.bf16.msra.mxu0 %v9904_v46 }
 0x6d4   :  { %2774 = vmatprep.subr.bf16.mxu0 %v9907_v0  ;;  %2872 = vmatpush1.bf16.msra.mxu1 %v9612_v40 }
 0x6d5   :  { %2873 = vmatprep.subr.bf16.mxu1 %v9615_v43 }
 0x6d7   :  { %2775 = vmatpush1.bf16.msra.mxu0 %v9912_v38 }
 0x6d8   :  { %2776 = vmatprep.subr.bf16.mxu0 %v9915_v4  ;;  %2874 = vmatpush1.bf16.msra.mxu1 %v9620_v21 }
 0x6d9   :  { %2875 = vmatprep.subr.bf16.mxu1 %v9623_v24 }
 0x6db   :  { %2777 = vmatpush1.bf16.msra.mxu0 %v9920_v39 }
 0x6dc   :  { %2778 = vmatprep.subr.bf16.mxu0 %v9923_v15  ;;  %2876 = vmatpush1.bf16.msra.mxu1 %v9628_v36 }
 0x6dd   :  { %2877 = vmatprep.subr.bf16.mxu1 %v9631_v35 }
 0x6df   :  { %2779 = vmatpush1.bf16.msra.mxu0 %v9928_v8 }
 0x6e0   :  { %2780 = vmatprep.subr.bf16.mxu0 %v9931_v28  ;;  %2878 = vmatpush1.bf16.msra.mxu1 %v9636_v13 }
 0x6e1   :  { %2879 = vmatprep.subr.bf16.mxu1 %v9639_v5 }
 0x6e3   :  { %2781 = vmatpush1.bf16.msra.mxu0 %v9936_v18 }
 0x6e4   :  { %2782 = vmatprep.subr.bf16.mxu0 %v9939_v61  ;;  %2880 = vmatpush1.bf16.msra.mxu1 %v9644_v31 }
 0x6e5   :  { %2881 = vmatprep.subr.bf16.mxu1 %v9647_v45 }
 0x6e7   :  { %2783 = vmatpush1.bf16.msra.mxu0 %v9944_v49 }
 0x6e8   :  { %2784 = vmatprep.subr.bf16.mxu0 %v9947_v55  ;;  %2882 = vmatpush1.bf16.msra.mxu1 %v9652_v12 }
 0x6e9   :  { %2883 = vmatprep.subr.bf16.mxu1 %v9655_v44 }
 0x6eb   :  { %2785 = vmatpush1.bf16.msra.mxu0 %v9952_v3 }
 0x6ec   :  { %2786 = vmatprep.subr.bf16.mxu0 %v9955_v19  ;;  %2884 = vmatpush1.bf16.msra.mxu1 %v9660_v60 }
 0x6ed   :  { %2885 = vmatprep.subr.bf16.mxu1 %v9663_v54 }
 0x6ef   :  { %2787 = vmatpush1.bf16.msra.mxu0 %v9960_v23 }
 0x6f0   :  { %2788 = vmatprep.subr.bf16.mxu0 %v9963_v22  ;;  %2886 = vmatpush1.bf16.msra.mxu1 %v9668_v42 }
 0x6f1   :  { %2887 = vmatprep.subr.bf16.mxu1 %v12700_v2 }
 0x6f3   :  { %2789 = vmatpush1.bf16.msra.mxu0 %v9968_v11 }
 0x6f4   :  { %2790 = vmatprep.subr.bf16.mxu0 %v9971_v56  ;;  %2888 = vmatpush1.bf16.msra.mxu1 %v12701_v33  ;;  %v12814_v56 = vld [vmem:[#allocation56_spill] sm:$0xff] }
 0x6f5   :  { %2889 = vmatprep.subr.bf16.mxu1 %v12702_v32  ;;  %v12813_v32 = vld [vmem:[#allocation55_spill] sm:$0xff] }
 0x6f7   :  { %2791 = vmatpush1.bf16.msra.mxu0 %v12703_v48  ;;  %v9989_v48 = vld [vmem:[#allocation8 + $0x274] ss:$24 sps:$4 sm:$0xff]  }
 0x6f8   :  { %2792 = vmatprep.subr.bf16.mxu0 %v12704_v29  ;;  %2890 = vmatpush1.bf16.msra.mxu1 %v12705_v52  ;;  %12770 = vst [vmem:[#allocation73_spill] sm:$0xff] %v9989_v48  ;;  %v9994_v29 = vld [vmem:[#allocation8 + $0x270] ss:$24 sps:$4 sm:$0xff]  }
 0x6f9   :  { %2891 = vmatprep.subr.bf16.mxu1 %v12706_v50  ;;  %12771 = vst [vmem:[#allocation74_spill] sm:$0xff] %v9994_v29  ;;  %v12812_v50 = vld [vmem:[#allocation54_spill] sm:$0xff] }
 0x6fb   :  { %2793 = vmatpush1.bf16.msra.mxu0 %v12707_v51  ;;  %v9997_v51 = vld [vmem:[#allocation8 + $0x2a4] ss:$24 sps:$4 sm:$0xff]  }
 0x6fc   :  { %2794 = vmatprep.subr.bf16.mxu0 %v12708_v7  ;;  %2892 = vmatpush1.bf16.msra.mxu1 %v12709_v20  ;;  %12772 = vst [vmem:[#allocation43_spill] sm:$0xff] %v9997_v51  ;;  %v10002_v7 = vld [vmem:[#allocation8 + $0x2a0] ss:$24 sps:$4 sm:$0xff]  }
 0x6fd   :  { %2893 = vmatprep.subr.bf16.mxu1 %v12710_v53  ;;  %12773 = vst [vmem:[#allocation19_spill] sm:$0xff] %v10002_v7  ;;  %v12811_v20 = vld [vmem:[#allocation53_spill] sm:$0xff] }
 0x6ff   :  { %2795 = vmatpush1.bf16.msra.mxu0 %v12711_v6  ;;  %v10005_v6 = vld [vmem:[#allocation8 + $0x2d4] ss:$24 sps:$4 sm:$0xff]  }
 0x700   :  { %2796 = vmatprep.subr.bf16.mxu0 %v12712_v59  ;;  %2894 = vmatpush1.bf16.msra.mxu1 %v9986_v30  ;;  %12774 = vst [vmem:[#allocation20_spill] sm:$0xff] %v10005_v6  ;;  %v10009_v59 = vld [vmem:[#allocation8 + $0xc] ss:$24 sps:$4 sm:$0xff]   ;;  %v12810_v30 = vld [vmem:[#allocation68_spill] sm:$0xff] }
 0x701   :  { %2895 = vmatprep.subr.bf16.mxu1 %v9989_v48  ;;  %12775 = vst [vmem:[#allocation21_spill] sm:$0xff] %v10009_v59 }
 0x703   :  { %2797 = vmatpush1.bf16.msra.mxu0 %v12715_v27  ;;  %v10012_v27 = vld [vmem:[#allocation8 + $0x2d0] ss:$24 sps:$4 sm:$0xff]  }
 0x704   :  { %2798 = vmatprep.subr.bf16.mxu0 %v12716_v1  ;;  %2896 = vmatpush1.bf16.msra.mxu1 %v9994_v29  ;;  %12776 = vst [vmem:[#allocation22_spill] sm:$0xff] %v10012_v27  ;;  %v10015_v1 = vld [vmem:[#allocation8 + $0x14] ss:$24 sps:$4 sm:$0xff]  }
 0x705   :  { %2897 = vmatprep.subr.bf16.mxu1 %v9997_v51  ;;  %12777 = vst [vmem:[#allocation24_spill] sm:$0xff] %v10015_v1  ;;  %v12808_v51 = vld [vmem:[#allocation66_spill] sm:$0xff]  ;;  %v12809_v29 = vld [vmem:[#allocation83_spill] sm:$0xff] }
 0x707   :  { %2799 = vmatpush1.bf16.msra.mxu0 %v12719_v10  ;;  %v10019_v10 = vld [vmem:[#allocation8 + $0x8] ss:$24 sps:$4 sm:$0xff]  }
 0x708   :  { %2800 = vmatprep.subr.bf16.mxu0 %v12720_v57  ;;  %2898 = vmatpush1.bf16.msra.mxu1 %v10002_v7  ;;  %12778 = vst [vmem:[#allocation26_spill] sm:$0xff] %v10019_v10  ;;  %v10022_v57 = vld [vmem:[#allocation8 + $0x3c] ss:$24 sps:$4 sm:$0xff]  }
 0x709   :  { %2899 = vmatprep.subr.bf16.mxu1 %v10005_v6  ;;  %12779 = vst [vmem:[#allocation87_spill] sm:$0xff] %v10022_v57  ;;  %v12807_v6 = vld [vmem:[#allocation32_spill] sm:$0xff] }
 0x70b   :  { %2801 = vmatpush1.bf16.msra.mxu0 %v12723_v26  ;;  %v10025_v26 = vld [vmem:[#allocation8 + $0x38] ss:$24 sps:$4 sm:$0xff]  }
 0x70c   :  { %2910 = vmatprep.subr.bf16.mxu0 %v10009_v59  ;;  %2900 = vmatpush1.bf16.msra.mxu1 %v10012_v27  ;;  %12780 = vst [vmem:[#allocation88_spill] sm:$0xff] %v10025_v26  ;;  %v10028_v59 = vld [vmem:[#allocation8 + $0x6c] ss:$24 sps:$4 sm:$0xff]   ;;  %v10031_v27 = vld [vmem:[#allocation8 + $0x68] ss:$24 sps:$4 sm:$0xff]  }
 0x70d   :  { %2951 = vmatprep.subr.bf16.mxu1 %v10015_v1  ;;  %12781 = vst [vmem:[#allocation37_spill] sm:$0xff] %v10028_v59  ;;  %12782 = vst [vmem:[#allocation38_spill] sm:$0xff] %v10031_v27  ;;  %v12805_v1 = vld [vmem:[#allocation30_spill] sm:$0xff] }
 0x70e   :  { %2803 = vmatmul.mubr.bf16.vlgmr.msra.gmra.mrb[64].mxu0 %v9892_v16  ;;  %v10034_v16 = vld [vmem:[#allocation8 + $0x9c] ss:$24 sps:$4 sm:$0xff]  }
 0x70f   :  { %2911 = vmatpush1.bf16.msra.mxu0 %v10019_v10  ;;  %12783 = vst [vmem:[#allocation89_spill] sm:$0xff] %v10034_v16  ;;  %v10037_v10 = vld [vmem:[#allocation8 + $0x98] ss:$24 sps:$4 sm:$0xff]  }
 0x710   :  { %2912 = vmatprep.subr.bf16.mxu0 %v10022_v57  ;;  %12784 = vst [vmem:[#allocation90_spill] sm:$0xff] %v10037_v10  ;;  %v10040_v57 = vld [vmem:[#allocation8 + $0xcc] ss:$24 sps:$4 sm:$0xff]  }
 0x711   :  { %12785 = vst [vmem:[#allocation39_spill] sm:$0xff] %v10040_v57 }
 0x713   :  { %2913 = vmatpush1.bf16.msra.mxu0 %v10025_v26  ;;  %v10043_v26 = vld [vmem:[#allocation8 + $0xc8] ss:$24 sps:$4 sm:$0xff]  }
 0x714   :  { %2914 = vmatprep.subr.bf16.mxu0 %v10028_v59  ;;  %12786 = vst [vmem:[#allocation40_spill] sm:$0xff] %v10043_v26  ;;  %v10046_v59 = vld [vmem:[#allocation8 + $0xfc] ss:$24 sps:$4 sm:$0xff]  }
 0x715   :  { %12787 = vst [vmem:[#allocation23_spill] sm:$0xff] %v10046_v59 }
 0x717   :  { %2915 = vmatpush1.bf16.msra.mxu0 %v10031_v27  ;;  %v10049_v27 = vld [vmem:[#allocation8 + $0xf8] ss:$24 sps:$4 sm:$0xff]  }
 0x718   :  { %2916 = vmatprep.subr.bf16.mxu0 %v10034_v16  ;;  %12788 = vst [vmem:[#allocation91_spill] sm:$0xff] %v10049_v27  ;;  %v10052_v16 = vld [vmem:[#allocation8 + $0x12c] ss:$24 sps:$4 sm:$0xff]  }
 0x719   :  { %12789 = vst [vmem:[#allocation84_spill] sm:$0xff] %v10052_v16 }
 0x71b   :  { %2917 = vmatpush1.bf16.msra.mxu0 %v10037_v10  ;;  %v10055_v10 = vld [vmem:[#allocation8 + $0x128] ss:$24 sps:$4 sm:$0xff]  }
 0x71c   :  { %2918 = vmatprep.subr.bf16.mxu0 %v10040_v57  ;;  %12790 = vst [vmem:[#allocation25_spill] sm:$0xff] %v10055_v10  ;;  %v10058_v57 = vld [vmem:[#allocation8 + $0x15c] ss:$24 sps:$4 sm:$0xff]  }
 0x71d   :  { %12791 = vst [vmem:[#allocation92_spill] sm:$0xff] %v10058_v57 }
 0x71f   :  { %2919 = vmatpush1.bf16.msra.mxu0 %v10043_v26  ;;  %v10061_v26 = vld [vmem:[#allocation8 + $0x158] ss:$24 sps:$4 sm:$0xff]  }
 0x720   :  { %2920 = vmatprep.subr.bf16.mxu0 %v10046_v59  ;;  %12792 = vst [vmem:[#allocation93_spill] sm:$0xff] %v10061_v26  ;;  %v10064_v59 = vld [vmem:[#allocation8 + $0x18c] ss:$24 sps:$4 sm:$0xff]  }
 0x721   :  { %12793 = vst [vmem:[#allocation94_spill] sm:$0xff] %v10064_v59 }
 0x723   :  { %2921 = vmatpush1.bf16.msra.mxu0 %v10049_v27  ;;  %v10067_v27 = vld [vmem:[#allocation8 + $0x188] ss:$24 sps:$4 sm:$0xff]  }
 0x724   :  { %2922 = vmatprep.subr.bf16.mxu0 %v10052_v16  ;;  %12794 = vst [vmem:[#allocation95_spill] sm:$0xff] %v10067_v27  ;;  %v10070_v16 = vld [vmem:[#allocation8 + $0x1bc] ss:$24 sps:$4 sm:$0xff]  }
 0x725   :  { %12795 = vst [vmem:[#allocation96_spill] sm:$0xff] %v10070_v16 }
 0x727   :  { %2923 = vmatpush1.bf16.msra.mxu0 %v10055_v10  ;;  %v10073_v10 = vld [vmem:[#allocation8 + $0x1b8] ss:$24 sps:$4 sm:$0xff]  }
 0x728   :  { %2924 = vmatprep.subr.bf16.mxu0 %v10058_v57  ;;  %12796 = vst [vmem:[#allocation97_spill] sm:$0xff] %v10073_v10  ;;  %v10076_v57 = vld [vmem:[#allocation8 + $0x1ec] ss:$24 sps:$4 sm:$0xff]  }
 0x729   :  { %12797 = vst [vmem:[#allocation98_spill] sm:$0xff] %v10076_v57 }
 0x72b   :  { %2925 = vmatpush1.bf16.msra.mxu0 %v10061_v26  ;;  %v10079_v26 = vld [vmem:[#allocation8 + $0x1e8] ss:$24 sps:$4 sm:$0xff]  }
 0x72c   :  { %2926 = vmatprep.subr.bf16.mxu0 %v10064_v59  ;;  %12798 = vst [vmem:[#allocation99_spill] sm:$0xff] %v10079_v26  ;;  %v10082_v59 = vld [vmem:[#allocation8 + $0x21c] ss:$24 sps:$4 sm:$0xff]  }
 0x72d   :  { %12799 = vst [vmem:[#allocation100_spill] sm:$0xff] %v10082_v59 }
 0x72f   :  { %2927 = vmatpush1.bf16.msra.mxu0 %v10067_v27  ;;  %v10085_v27 = vld [vmem:[#allocation8 + $0x218] ss:$24 sps:$4 sm:$0xff]  }
 0x730   :  { %2928 = vmatprep.subr.bf16.mxu0 %v10070_v16  ;;  %12800 = vst [vmem:[#allocation101_spill] sm:$0xff] %v10085_v27  ;;  %v10088_v16 = vld [vmem:[#allocation8 + $0x24c] ss:$24 sps:$4 sm:$0xff]  }
 0x731   :  { %12801 = vst [vmem:[#allocation102_spill] sm:$0xff] %v10088_v16 }
 0x733   :  { %2929 = vmatpush1.bf16.msra.mxu0 %v10073_v10  ;;  %v12803_v10 = vld [vmem:[#allocation28_spill] sm:$0xff] }
 0x734   :  { %2930 = vmatprep.subr.bf16.mxu0 %v10076_v57  ;;  %v12802_v57 = vld [vmem:[#allocation27_spill] sm:$0xff] }
 0x737   :  { %2931 = vmatpush1.bf16.msra.mxu0 %v10079_v26  ;;  %v12804_v26 = vld [vmem:[#allocation29_spill] sm:$0xff] }
 0x738   :  { %2932 = vmatprep.subr.bf16.mxu0 %v10082_v59  ;;  %v12806_v59 = vld [vmem:[#allocation31_spill] sm:$0xff] }
 0x73b   :  { %2933 = vmatpush1.bf16.msra.mxu0 %v10085_v27 }
 0x73c   :  { %2934 = vmatprep.subr.bf16.mxu0 %v10088_v16 }
 0x73f   :  { %2935 = vmatpush1.bf16.msra.mxu0 %v12751_v9 }
 0x740   :  { %2936 = vmatprep.subr.bf16.mxu0 %v12752_v14 }
 0x743   :  { %2937 = vmatpush1.bf16.msra.mxu0 %v12802_v57 }
 0x744   :  { %2938 = vmatprep.subr.bf16.mxu0 %v12803_v10 }
 0x747   :  { %2939 = vmatpush1.bf16.msra.mxu0 %v12804_v26 }
 0x748   :  { %2940 = vmatprep.subr.bf16.mxu0 %v12805_v1 }
 0x74b   :  { %2941 = vmatpush1.bf16.msra.mxu0 %v12806_v59 }
 0x74c   :  { %3050 = vmatprep.subr.bf16.mxu0 %v12807_v6 }
 0x7a1   :  { %v2722_v27 = vpop.f32.mrb[60].mxu0  ;;  %v2763_v7 = vpop.f32.mrb[48].mxu1 }
 0x7a2   :  { %v2723_v16 = vadd.f32 %v2722_v27, %v12808_v51  ;;  %v2764_v9 = vadd.f32 %v2763_v7, %v12809_v29  ;;  %v2724_v48 = vpop.f32.mrb[61].mxu0  ;;  %v2765_v14 = vpop.f32.mrb[49].mxu1 }
 0x7a3   :  { %v2725_v57 = vadd.f32 %v2724_v48, %v12810_v30  ;;  %v2766_v10 = vadd.f32 %v2765_v14, %v9183_v63  ;;  %v2726_v53 = vpop.f32.mrb[62].mxu0  ;;  %v2767_v26 = vpop.f32.mrb[50].mxu1 }
 0x7a4   :  { %v2811_v1 = vadd.f32 %v2723_v16, %v12811_v20  ;;  %v2825_v59 = vadd.f32 %v2764_v9, %v12812_v50  ;;  %v2727_v52 = vpop.f32.mrb[63].mxu0  ;;  %v2768_v6 = vpop.f32.mrb[51].mxu1 }
 0x7a5   :  { %v2812_v33 = vadd.f32 %v2725_v57, %v12813_v32  ;;  %v2826_v27 = vadd.f32 %v2766_v10, %v12814_v56 }
 0x7a6   :  { %v6690_v51 = vmul.f32 -1.442695, %v2811_v1  ;;  %v6692_v29 = vmul.f32 -1.442695, %v2825_v59  ;;  %v12815_v59 = vld [vmem:[#allocation77_spill] sm:$0xff] }
 0x7a7   :  { %v6691_v7 = vmul.f32 -1.442695, %v2812_v33  ;;  %v6693_v48 = vmul.f32 -1.442695, %v2826_v27  ;;  %v12816_v27 = vld [vmem:[#allocation78_spill] sm:$0xff] }
 0x7a8   :  { %7759 = vpow2.f32 %v6690_v51 }
 0x7a9   :  { %7761 = vpow2.f32 %v6691_v7 }
 0x7aa   :  { %7763 = vpow2.f32 %v6692_v29 }
 0x7ab   :  { %7765 = vpow2.f32 %v6693_v48 }
 0x7b2   :  { %v7760_v30 = vpop.eup %7759 }
 0x7b3   :  { %v7762_v14 = vpop.eup %7761  ;;  %v2819_v53 = vadd.f32 1.0, %v7760_v30 }
 0x7b4   :  { %v2820_v20 = vadd.f32 1.0, %v7762_v14  ;;  %v7764_v52 = vpop.eup %7763 }
 0x7b5   :  { %7767 = vrcp.f32 %v2819_v53  ;;  %v7766_v50 = vpop.eup %7765  ;;  %v2833_v16 = vadd.f32 1.0, %v7764_v52 }
 0x7b6   :  { %7769 = vrcp.f32 %v2820_v20  ;;  %v2834_v32 = vadd.f32 1.0, %v7766_v50 }
 0x7b7   :  { %7771 = vrcp.f32 %v2833_v16 }
 0x7b8   :  { %7773 = vrcp.f32 %v2834_v32 }
 0x7bf   :  { %v7768_v51 = vpop.eup %7767 }
 0x7c0   :  { %v7770_v26 = vpop.eup %7769 }
 0x7c1   :  { %v7772_v48 = vpop.eup %7771 }
 0x7c2   :  { %v7774_v14 = vpop.eup %7773  ;;  %v2845_v53 = vsub.f32 1.0, %v7772_v48 }
 0x7c3   :  { %v2846_v52 = vsub.f32 1.0, %v7774_v14 }
 0x7e1   :  { %v2804_v9 = vpop.f32.mrb[64].mxu0 }
 0x7e2   :  { %v2805_v56 = vadd.f32 %v2804_v9, %v12573_v41  ;;  %v2806_v33 = vpop.f32.mrb[65].mxu0 }
 0x7e3   :  { %v2807_v57 = vadd.f32 %v2806_v33, %v9186_v62  ;;  %v2808_v10 = vpop.f32.mrb[66].mxu0  ;;  %v2849_v33 = vmul.f32 %v7772_v48, %v9884_v34  ;;  %v12832_v48 = vld [vmem:[#allocation24_spill] sm:$0xff] }
 0x7e4   :  { %v2839_v29 = vmul.f32 %v7768_v51, %v2805_v56  ;;  %v2809_v1 = vpop.f32.mrb[67].mxu0  ;;  %v2850_v56 = vmul.f32 %v7774_v14, %v9886_v17  ;;  %v12833_v14 = vld [vmem:[#allocation26_spill] sm:$0xff] }
 0x7e5   :  { %v2840_v30 = vmul.f32 %v7770_v26, %v2807_v57  ;;  %v12827_v26 = vld [vmem:[#allocation43_spill] sm:$0xff]  ;;  %v10200_v1 = vld [vmem:[#allocation8 + $0x2e4] ss:$24 sps:$4 sm:$0xff]  }
 0x7e6   :  { %v2841_v6 = vadd.f32 %v2839_v29, %v12815_v59  ;;  %v10197_v29 = vld [vmem:[#allocation8 + $0x2b0] ss:$24 sps:$4 sm:$0xff]   ;;  %v12829_v59 = vld [vmem:[#allocation20_spill] sm:$0xff] }
 0x7e7   :  { %v2842_v7 = vadd.f32 %v2840_v30, %v12816_v27  ;;  %v12828_v30 = vld [vmem:[#allocation19_spill] sm:$0xff]  ;;  %v12830_v27 = vld [vmem:[#allocation21_spill] sm:$0xff] }
 0x7e8   :  { %7775 = vtanh.f32 %v2841_v6  ;;  %v10205_v6 = vld [vmem:[#allocation8 + $0x2e0] ss:$24 sps:$4 sm:$0xff]  }
 0x7e9   :  { %7777 = vtanh.f32 %v2842_v7  ;;  %v12831_v7 = vld [vmem:[#allocation22_spill] sm:$0xff] }
 0x7f2   :  { %v7776_v20 = vpop.eup %7775 }
 0x7f3   :  { %v7778_v50 = vpop.eup %7777  ;;  %v2847_v9 = vmul.f32 %v7776_v20, %v2845_v53  ;;  %v12834_v53 = vld [vmem:[#allocation87_spill] sm:$0xff]  ;;  %v12835_v20 = vld [vmem:[#allocation88_spill] sm:$0xff] }
 0x7f4   :  { %v2848_v16 = vmul.f32 %v7778_v50, %v2846_v52  ;;  %v12836_v52 = vld [vmem:[#allocation37_spill] sm:$0xff]  ;;  %v12837_v50 = vld [vmem:[#allocation38_spill] sm:$0xff] }
 0x7f5   :  { %v10113_v32 = vadd.f32 %v2849_v33, %v2847_v9  ;;  %v12838_v9 = vld [vmem:[#allocation89_spill] sm:$0xff]  ;;  %v12839_v33 = vld [vmem:[#allocation90_spill] sm:$0xff] }
 0x7f6   :  { %v10115_v51 = vadd.f32 %v2850_v56, %v2848_v16  ;;  %v12840_v16 = vld [vmem:[#allocation39_spill] sm:$0xff]  ;;  %v12841_v56 = vld [vmem:[#allocation40_spill] sm:$0xff] }
 0x7f7   :  { %v10121_v10 = vpack.c.bf16 %v10113_v32, %v10113_v32 }
 0x7f8   :  { %v2868_v57 = vpack.c.bf16 %v10115_v51, %v10115_v51 }
 0x7fa   :  { %2901 = vmatprep.mubr.bf16.mxu1 %v2868_v57  ;;  %2942 = vmatprep.mubr.bf16.mxu0 %v2868_v57 }
 0x7fb   :  { %2902 = vmatmul.mubr.bf16.vlgmr.msra.gmra.mrb[52].mxu1 %v10121_v10  ;;  %2943 = vmatmul.mubr.bf16.vlgmr.msra.gmra.mrb[68].mxu0 %v10121_v10 }
 0x7fc   :  { %2952 = vmatpush1.bf16.msra.mxu1 %v9896_v58  ;;  %2983 = vmatprep.mubr.bf16.mxu1 %v2868_v57  ;;  %v12842_v57 = vld [vmem:[#allocation23_spill] sm:$0xff] }
 0x7fd   :  { %2953 = vmatprep.subr.bf16.mxu1 %v9899_v25  ;;  %3051 = vmatpush1.bf16.msra.mxu0 %v9604_v37  ;;  %v12817_v37 = vld [vmem:[#allocation47_spill] sm:$0xff] }
 0x7fe   :  { %3052 = vmatprep.subr.bf16.mxu0 %v9607_v47  ;;  %v12818_v47 = vld [vmem:[#allocation44_spill] sm:$0xff] }
 0x800   :  { %2954 = vmatpush1.bf16.msra.mxu1 %v9904_v46 }
 0x801   :  { %2955 = vmatprep.subr.bf16.mxu1 %v9907_v0  ;;  %3053 = vmatpush1.bf16.msra.mxu0 %v9612_v40  ;;  %v12819_v40 = vld [vmem:[#allocation71_spill] sm:$0xff] }
 0x802   :  { %3054 = vmatprep.subr.bf16.mxu0 %v9615_v43  ;;  %v10165_v43 = vld [vmem:[#allocation8 + $0x1f0] ss:$24 sps:$4 sm:$0xff]  }
 0x804   :  { %2956 = vmatpush1.bf16.msra.mxu1 %v9912_v38 }
 0x805   :  { %2957 = vmatprep.subr.bf16.mxu1 %v9915_v4  ;;  %3055 = vmatpush1.bf16.msra.mxu0 %v9620_v21  ;;  %v10168_v21 = vld [vmem:[#allocation8 + $0x224] ss:$24 sps:$4 sm:$0xff]  }
 0x806   :  { %3056 = vmatprep.subr.bf16.mxu0 %v9623_v24  ;;  %v12820_v24 = vld [vmem:[#allocation72_spill] sm:$0xff] }
 0x808   :  { %2958 = vmatpush1.bf16.msra.mxu1 %v9920_v39 }
 0x809   :  { %2959 = vmatprep.subr.bf16.mxu1 %v9923_v15  ;;  %3057 = vmatpush1.bf16.msra.mxu0 %v9628_v36  ;;  %v12821_v36 = vld [vmem:[#allocation118_spill] sm:$0xff] }
 0x80a   :  { %3058 = vmatprep.subr.bf16.mxu0 %v9631_v35  ;;  %v10173_v35 = vld [vmem:[#allocation8 + $0x220] ss:$24 sps:$4 sm:$0xff]  }
 0x80c   :  { %2960 = vmatpush1.bf16.msra.mxu1 %v9928_v8 }
 0x80d   :  { %2961 = vmatprep.subr.bf16.mxu1 %v9931_v28  ;;  %3059 = vmatpush1.bf16.msra.mxu0 %v9636_v13  ;;  %v10176_v13 = vld [vmem:[#allocation8 + $0x254] ss:$24 sps:$4 sm:$0xff]  }
 0x80e   :  { %3060 = vmatprep.subr.bf16.mxu0 %v9639_v5  ;;  %v12822_v5 = vld [vmem:[#allocation119_spill] sm:$0xff] }
 0x810   :  { %2962 = vmatpush1.bf16.msra.mxu1 %v9936_v18 }
 0x811   :  { %2963 = vmatprep.subr.bf16.mxu1 %v9939_v61  ;;  %3061 = vmatpush1.bf16.msra.mxu0 %v9644_v31  ;;  %v12823_v31 = vld [vmem:[#allocation120_spill] sm:$0xff] }
 0x812   :  { %3062 = vmatprep.subr.bf16.mxu0 %v9647_v45  ;;  %v10181_v45 = vld [vmem:[#allocation8 + $0x250] ss:$24 sps:$4 sm:$0xff]  }
 0x814   :  { %2964 = vmatpush1.bf16.msra.mxu1 %v9944_v49 }
 0x815   :  { %2965 = vmatprep.subr.bf16.mxu1 %v9947_v55  ;;  %3063 = vmatpush1.bf16.msra.mxu0 %v9652_v12  ;;  %v10184_v12 = vld [vmem:[#allocation8 + $0x284] ss:$24 sps:$4 sm:$0xff]  }
 0x816   :  { %3064 = vmatprep.subr.bf16.mxu0 %v9655_v44  ;;  %v12824_v44 = vld [vmem:[#allocation48_spill] sm:$0xff] }
 0x818   :  { %2966 = vmatpush1.bf16.msra.mxu1 %v9952_v3 }
 0x819   :  { %2967 = vmatprep.subr.bf16.mxu1 %v9955_v19  ;;  %3065 = vmatpush1.bf16.msra.mxu0 %v9660_v60  ;;  %v12825_v60 = vld [vmem:[#allocation73_spill] sm:$0xff] }
 0x81a   :  { %3066 = vmatprep.subr.bf16.mxu0 %v9663_v54  ;;  %v10189_v54 = vld [vmem:[#allocation8 + $0x280] ss:$24 sps:$4 sm:$0xff]  }
 0x81c   :  { %2968 = vmatpush1.bf16.msra.mxu1 %v9960_v23 }
 0x81d   :  { %2969 = vmatprep.subr.bf16.mxu1 %v9963_v22  ;;  %3067 = vmatpush1.bf16.msra.mxu0 %v9668_v42  ;;  %v10192_v42 = vld [vmem:[#allocation8 + $0x2b4] ss:$24 sps:$4 sm:$0xff]  }
 0x81e   :  { %3068 = vmatprep.subr.bf16.mxu0 %v12700_v2  ;;  %v12826_v2 = vld [vmem:[#allocation74_spill] sm:$0xff] }
 0x820   :  { %2970 = vmatpush1.bf16.msra.mxu1 %v9968_v11 }
 0x821   :  { %2971 = vmatprep.subr.bf16.mxu1 %v12817_v37  ;;  %3069 = vmatpush1.bf16.msra.mxu0 %v12818_v47  ;;  %v12844_v47 = vld [vmem:[#allocation84_spill] sm:$0xff] }
 0x822   :  { %3070 = vmatprep.subr.bf16.mxu0 %v12819_v40  ;;  %v12845_v40 = vld [vmem:[#allocation25_spill] sm:$0xff] }
 0x824   :  { %2972 = vmatpush1.bf16.msra.mxu1 %v10165_v43 }
 0x825   :  { %2973 = vmatprep.subr.bf16.mxu1 %v10168_v21  ;;  %3071 = vmatpush1.bf16.msra.mxu0 %v12820_v24  ;;  %v12846_v24 = vld [vmem:[#allocation92_spill] sm:$0xff] }
 0x826   :  { %3072 = vmatprep.subr.bf16.mxu0 %v12821_v36  ;;  %v12847_v36 = vld [vmem:[#allocation93_spill] sm:$0xff] }
 0x828   :  { %2974 = vmatpush1.bf16.msra.mxu1 %v10173_v35 }
 0x829   :  { %2975 = vmatprep.subr.bf16.mxu1 %v10176_v13  ;;  %3073 = vmatpush1.bf16.msra.mxu0 %v12822_v5  ;;  %v12848_v5 = vld [vmem:[#allocation94_spill] sm:$0xff] }
 0x82a   :  { %3074 = vmatprep.subr.bf16.mxu0 %v12823_v31  ;;  %v12849_v31 = vld [vmem:[#allocation95_spill] sm:$0xff] }
 0x82c   :  { %2976 = vmatpush1.bf16.msra.mxu1 %v10181_v45 }
 0x82d   :  { %2977 = vmatprep.subr.bf16.mxu1 %v10184_v12  ;;  %3075 = vmatpush1.bf16.msra.mxu0 %v12824_v44  ;;  %v12850_v44 = vld [vmem:[#allocation96_spill] sm:$0xff] }
 0x82e   :  { %3076 = vmatprep.subr.bf16.mxu0 %v12825_v60  ;;  %v12851_v60 = vld [vmem:[#allocation97_spill] sm:$0xff] }
 0x830   :  { %2978 = vmatpush1.bf16.msra.mxu1 %v10189_v54 }
 0x831   :  { %2979 = vmatprep.subr.bf16.mxu1 %v10192_v42  ;;  %3077 = vmatpush1.bf16.msra.mxu0 %v12826_v2  ;;  %v12852_v2 = vld [vmem:[#allocation98_spill] sm:$0xff] }
 0x832   :  { %3078 = vmatprep.subr.bf16.mxu0 %v12827_v26  ;;  %v12853_v26 = vld [vmem:[#allocation99_spill] sm:$0xff] }
 0x834   :  { %2980 = vmatpush1.bf16.msra.mxu1 %v10197_v29 }
 0x835   :  { %2981 = vmatprep.subr.bf16.mxu1 %v10200_v1  ;;  %3079 = vmatpush1.bf16.msra.mxu0 %v12828_v30  ;;  %v12854_v30 = vld [vmem:[#allocation100_spill] sm:$0xff] }
 0x836   :  { %3080 = vmatprep.subr.bf16.mxu0 %v12829_v59  ;;  %v12855_v59 = vld [vmem:[#allocation101_spill] sm:$0xff] }
 0x838   :  { %2982 = vmatpush1.bf16.msra.mxu1 %v10205_v6 }
 0x839   :  { %3091 = vmatprep.subr.bf16.mxu1 %v12830_v27  ;;  %3081 = vmatpush1.bf16.msra.mxu0 %v12831_v7  ;;  %v12856_v27 = vld [vmem:[#allocation102_spill] sm:$0xff] }
 0x83a   :  { %3132 = vmatprep.subr.bf16.mxu0 %v12832_v48  ;;  %v8164_v7 = vld [vmem:[#allocation8 + $0x248] ss:$24 sps:$4 sm:$0xff]   ;;  %v8165_v48 = vld [vmem:[#allocation8 + $0x27c] ss:$24 sps:$4 sm:$0xff]  }
 0x83b   :  { %2984 = vmatmul.mubr.bf16.vlgmr.msra.gmra.mrb[56].mxu1 %v10121_v10  ;;  %v12843_v10 = vld [vmem:[#allocation91_spill] sm:$0xff] }
 0x83c   :  { %3092 = vmatpush1.bf16.msra.mxu1 %v12833_v14  ;;  %v8166_v14 = vld [vmem:[#allocation8 + $0x278] ss:$24 sps:$4 sm:$0xff]  }
 0x83d   :  { %3093 = vmatprep.subr.bf16.mxu1 %v12834_v53  ;;  %v8167_v53 = vld [vmem:[#allocation8 + $0x2ac] ss:$24 sps:$4 sm:$0xff]  }
 0x840   :  { %3094 = vmatpush1.bf16.msra.mxu1 %v12835_v20  ;;  %v8168_v20 = vld [vmem:[#allocation8 + $0x2a8] ss:$24 sps:$4 sm:$0xff]  }
 0x841   :  { %3095 = vmatprep.subr.bf16.mxu1 %v12836_v52  ;;  %v8169_v52 = vld [vmem:[#allocation8 + $0x2dc] ss:$24 sps:$4 sm:$0xff]  }
 0x844   :  { %3096 = vmatpush1.bf16.msra.mxu1 %v12837_v50  ;;  %v8170_v50 = vld [vmem:[#allocation8 + $0x2d8] ss:$24 sps:$4 sm:$0xff]  }
 0x845   :  { %3097 = vmatprep.subr.bf16.mxu1 %v12838_v9  ;;  %v7309_v9 = vld [vmem:[#allocation10 + $0x4] ss:$24 sps:$4 sm:$0xff]  }
 0x848   :  { %3098 = vmatpush1.bf16.msra.mxu1 %v12839_v33 }
 0x849   :  { %3099 = vmatprep.subr.bf16.mxu1 %v12840_v16 }
 0x84c   :  { %3100 = vmatpush1.bf16.msra.mxu1 %v12841_v56  ;;  %v12857_v56 = vld [vmem:[#allocation66_spill] sm:$0xff] }
 0x84d   :  { %3101 = vmatprep.subr.bf16.mxu1 %v12842_v57 }
 0x850   :  { %3102 = vmatpush1.bf16.msra.mxu1 %v12843_v10  ;;  %v12858_v10 = vld [vmem:[#allocation83_spill] sm:$0xff] }
 0x851   :  { %3103 = vmatprep.subr.bf16.mxu1 %v12844_v47 }
 0x854   :  { %3104 = vmatpush1.bf16.msra.mxu1 %v12845_v40 }
 0x855   :  { %3105 = vmatprep.subr.bf16.mxu1 %v12846_v24 }
 0x858   :  { %3106 = vmatpush1.bf16.msra.mxu1 %v12847_v36  ;;  %v12859_v36 = vld [vmem:[#allocation68_spill] sm:$0xff] }
 0x859   :  { %3107 = vmatprep.subr.bf16.mxu1 %v12848_v5 }
 0x85c   :  { %3108 = vmatpush1.bf16.msra.mxu1 %v12849_v31 }
 0x85d   :  { %3109 = vmatprep.subr.bf16.mxu1 %v12850_v44 }
 0x860   :  { %3110 = vmatpush1.bf16.msra.mxu1 %v12851_v60 }
 0x861   :  { %3111 = vmatprep.subr.bf16.mxu1 %v12852_v2  ;;  %v12860_v2 = vld [vmem:[#allocation57_spill] sm:$0xff] }
 0x864   :  { %3112 = vmatpush1.bf16.msra.mxu1 %v12853_v26 }
 0x865   :  { %3113 = vmatprep.subr.bf16.mxu1 %v12854_v30  ;;  %v12861_v30 = vld [vmem:[#allocation58_spill] sm:$0xff] }
 0x868   :  { %3114 = vmatpush1.bf16.msra.mxu1 %v12855_v59 }
 0x869   :  { %3115 = vmatprep.subr.bf16.mxu1 %v12856_v27 }
 0x86c   :  { %3116 = vmatpush1.bf16.msra.mxu1 %v8164_v7 }
 0x86d   :  { %3117 = vmatprep.subr.bf16.mxu1 %v8165_v48  ;;  %v12862_v48 = vld [vmem:[#allocation59_spill] sm:$0xff] }
 0x870   :  { %3118 = vmatpush1.bf16.msra.mxu1 %v8166_v14 }
 0x871   :  { %3119 = vmatprep.subr.bf16.mxu1 %v8167_v53  ;;  %v12863_v53 = vld [vmem:[#allocation60_spill] sm:$0xff] }
 0x874   :  { %3120 = vmatpush1.bf16.msra.mxu1 %v8168_v20 }
 0x875   :  { %3121 = vmatprep.subr.bf16.mxu1 %v8169_v52 }
 0x878   :  { %3122 = vmatpush1.bf16.msra.mxu1 %v8170_v50 }
 0x879   :  { %3852 = vmatprep.subr.bf16.mxu1 %v7309_v9 }
 0x8ce   :  { %v2903_v33 = vpop.f32.mrb[52].mxu1  ;;  %v2944_v16 = vpop.f32.mrb[68].mxu0 }
 0x8cf   :  { %v2904_v57 = vadd.f32 %v2903_v33, %v12857_v56  ;;  %v2945_v47 = vadd.f32 %v2944_v16, %v12858_v10  ;;  %v2905_v40 = vpop.f32.mrb[53].mxu1  ;;  %v2946_v24 = vpop.f32.mrb[69].mxu0 }
 0x8d0   :  { %v2906_v5 = vadd.f32 %v2905_v40, %v12859_v36  ;;  %v2947_v31 = vadd.f32 %v2946_v24, %v9183_v63  ;;  %v2907_v44 = vpop.f32.mrb[54].mxu1  ;;  %v2948_v60 = vpop.f32.mrb[70].mxu0 }
 0x8d1   :  { %v2992_v26 = vadd.f32 %v2904_v57, %v12860_v2  ;;  %v3006_v59 = vadd.f32 %v2945_v47, %v12861_v30  ;;  %v2908_v27 = vpop.f32.mrb[55].mxu1  ;;  %v2949_v7 = vpop.f32.mrb[71].mxu0 }
 0x8d2   :  { %v2993_v14 = vadd.f32 %v2906_v5, %v12862_v48  ;;  %v3007_v20 = vadd.f32 %v2947_v31, %v12863_v53 }
 0x8d3   :  { %v6694_v52 = vmul.f32 -1.442695, %v2992_v26  ;;  %v6696_v9 = vmul.f32 -1.442695, %v3006_v59 }
 0x8d4   :  { %v6695_v50 = vmul.f32 -1.442695, %v2993_v14  ;;  %v6697_v33 = vmul.f32 -1.442695, %v3007_v20  ;;  %v12864_v20 = vld [vmem:[#allocation79_spill] sm:$0xff] }
 0x8d5   :  { %7779 = vpow2.f32 %v6694_v52 }
 0x8d6   :  { %7781 = vpow2.f32 %v6695_v50  ;;  %v12865_v50 = vld [vmem:[#allocation80_spill] sm:$0xff] }
 0x8d7   :  { %7783 = vpow2.f32 %v6696_v9 }
 0x8d8   :  { %7785 = vpow2.f32 %v6697_v33 }
 0x8df   :  { %v7780_v16 = vpop.eup %7779 }
 0x8e0   :  { %v7782_v40 = vpop.eup %7781  ;;  %v3000_v24 = vadd.f32 1.0, %v7780_v16 }
 0x8e1   :  { %v3001_v57 = vadd.f32 1.0, %v7782_v40  ;;  %v7784_v47 = vpop.eup %7783 }
 0x8e2   :  { %7787 = vrcp.f32 %v3000_v24  ;;  %v7786_v44 = vpop.eup %7785  ;;  %v3014_v60 = vadd.f32 1.0, %v7784_v47 }
 0x8e3   :  { %7789 = vrcp.f32 %v3001_v57  ;;  %v3015_v5 = vadd.f32 1.0, %v7786_v44 }
 0x8e4   :  { %7791 = vrcp.f32 %v3014_v60 }
 0x8e5   :  { %7793 = vrcp.f32 %v3015_v5 }
 0x8ec   :  { %v7788_v30 = vpop.eup %7787 }
 0x8ed   :  { %v7790_v7 = vpop.eup %7789 }
 0x8ee   :  { %v7792_v33 = vpop.eup %7791 }
 0x8ef   :  { %v7794_v16 = vpop.eup %7793  ;;  %v3026_v40 = vsub.f32 1.0, %v7792_v33 }
 0x8f0   :  { %v3027_v57 = vsub.f32 1.0, %v7794_v16 }
 0x90e   :  { %v2985_v2 = vpop.f32.mrb[56].mxu1 }
 0x90f   :  { %v2986_v31 = vadd.f32 %v2985_v2, %v12573_v41  ;;  %v2987_v26 = vpop.f32.mrb[57].mxu1  ;;  %v3030_v2 = vmul.f32 %v7792_v33, %v10113_v32  ;;  %v7321_v33 = vld [vmem:[#allocation10 + $0xc4] ss:$24 sps:$4 sm:$0xff]  }
 0x910   :  { %v2988_v59 = vadd.f32 %v2987_v26, %v9186_v62  ;;  %v2989_v27 = vpop.f32.mrb[58].mxu1 }
 0x911   :  { %v3020_v48 = vmul.f32 %v7788_v30, %v2986_v31  ;;  %v2990_v14 = vpop.f32.mrb[59].mxu1  ;;  %v3031_v31 = vmul.f32 %v7794_v16, %v10115_v51  ;;  %v12868_v16 = vld [vmem:[#allocation85_spill] sm:$0xff] }
 0x912   :  { %v3021_v53 = vmul.f32 %v7790_v7, %v2988_v59  ;;  %v7307_v59 = vld [vmem:[#allocation10] ss:$24 sps:$4 sm:$0xff]   ;;  %v7312_v7 = vld [vmem:[#allocation10 + $0x34] ss:$24 sps:$4 sm:$0xff]  }
 0x913   :  { %v3022_v52 = vadd.f32 %v3020_v48, %v12864_v20  ;;  %v12866_v48 = vld [vmem:[#allocation86_spill] sm:$0xff] }
 0x914   :  { %v3023_v9 = vadd.f32 %v3021_v53, %v12865_v50  ;;  %v12867_v14 = vld [vmem:[#allocation18_spill] sm:$0xff]  ;;  %v7313_v50 = vld [vmem:[#allocation10 + $0x60] ss:$24 sps:$4 sm:$0xff]  }
 0x915   :  { %7795 = vtanh.f32 %v3022_v52  ;;  %v10264_v53 = vpack.c.bf16 %v12867_v14, %v12866_v48  ;;  %v7310_v20 = vld [vmem:[#allocation10 + $0x30] ss:$24 sps:$4 sm:$0xff]   ;;  %v7315_v52 = vld [vmem:[#allocation10 + $0x64] ss:$24 sps:$4 sm:$0xff]   ;;  %v10322_v48 = vpack.c.bf16 %v10113_v32, %v9884_v34 }
 0x916   :  { %7797 = vtanh.f32 %v3023_v9  ;;  %v7318_v9 = vld [vmem:[#allocation10 + $0x94] ss:$24 sps:$4 sm:$0xff]   ;;  %v7382_v32 = vld [vmem:[#allocation10 + $0x1b8] ss:$24 sps:$4 sm:$0xff]  }
 0x917   :  { %v7372_v14 = vld [vmem:[#allocation10 + $0xfc] ss:$24 sps:$4 sm:$0xff]  }
 0x918   :  { %v7384_v34 = vld [vmem:[#allocation10 + $0x1bc] ss:$24 sps:$4 sm:$0xff]  }
 0x91f   :  { %v7796_v24 = vpop.eup %7795 }
 0x920   :  { %v7798_v47 = vpop.eup %7797  ;;  %v3028_v44 = vmul.f32 %v7796_v24, %v3026_v40  ;;  %v12870_v24 = vld [vmem:[#allocation42_spill] sm:$0xff] }
 0x921   :  { %v3029_v60 = vmul.f32 %v7798_v47, %v3027_v57  ;;  %v12871_v57 = vld [vmem:[#allocation46_spill] sm:$0xff] }
 0x922   :  { %v10250_v5 = vadd.f32 %v3030_v2, %v3028_v44  ;;  %v10304_v47 = vpack.c.bf16 %v12871_v57, %v12870_v24  ;;  %v12872_v44 = vld [vmem:[#allocation41_spill] sm:$0xff]  ;;  %v7439_v57 = vld [vmem:[#allocation10 + $0x130] ss:$24 sps:$4 sm:$0xff]  }
 0x923   :  { %v10252_v26 = vadd.f32 %v3031_v31, %v3029_v60  ;;  %v12873_v2 = vld [vmem:[#allocation45_spill] sm:$0xff]  ;;  %v7366_v31 = vld [vmem:[#allocation10 + $0x9c] ss:$24 sps:$4 sm:$0xff]  }
 0x924   :  { %v10258_v27 = vpack.c.bf16 %v10250_v5, %v10250_v5  ;;  %v10312_v60 = vpack.c.bf16 %v12873_v2, %v12872_v44  ;;  %v10338_v24 = vld [vmem:[#allocation11 + $0x64] ss:$24 sps:$4 sm:$0xff]   ;;  %v7445_v44 = vld [vmem:[#allocation10 + $0x160] ss:$24 sps:$4 sm:$0xff]   ;;  %v10349_v2 = vld [vmem:[#allocation11 + $0x90] ss:$24 sps:$4 sm:$0xff]  }
 0x925   :  { %v3049_v30 = vpack.c.bf16 %v10252_v26, %v10252_v26 }
 0x927   :  { %3082 = vmatprep.mubr.bf16.mxu0 %v3049_v30  ;;  %3123 = vmatprep.mubr.bf16.mxu1 %v3049_v30 }
 0x928   :  { %3083 = vmatmul.mubr.bf16.vlgmr.msra.gmra.mrb[72].mxu0 %v10258_v27  ;;  %3124 = vmatmul.mubr.bf16.vlgmr.msra.gmra.mrb[60].mxu1 %v10258_v27 }
 0x929   :  { %3133 = vmatpush1.bf16.msra.mxu0 %v9896_v58  ;;  %3853 = vmatpush1.bf16.msra.mxu1 %v7307_v59  ;;  %v7316_v58 = vld [vmem:[#allocation10 + $0x90] ss:$24 sps:$4 sm:$0xff]  }
 0x92a   :  { %3164 = vmatprep.mubr.bf16.mxu0 %v3049_v30  ;;  %3884 = vmatprep.mubr.bf16.mxu1 %v10264_v53  ;;  %v10316_v30 = vpack.c.bf16 %v10115_v51, %v9886_v17  ;;  %v7364_v59 = vld [vmem:[#allocation10 + $0x98] ss:$24 sps:$4 sm:$0xff]   ;;  %v7375_v51 = vld [vmem:[#allocation10 + $0x12c] ss:$24 sps:$4 sm:$0xff]  }
 0x92b   :  { %3134 = vmatprep.subr.bf16.mxu0 %v9899_v25  ;;  %3854 = vmatprep.subr.bf16.mxu1 %v7312_v7  ;;  %v7319_v25 = vld [vmem:[#allocation10 + $0xc0] ss:$24 sps:$4 sm:$0xff]  }
 0x92c   :  { %v7367_v7 = vld [vmem:[#allocation10 + $0xc8] ss:$24 sps:$4 sm:$0xff]   ;;  %v7370_v17 = vld [vmem:[#allocation10 + $0xf8] ss:$24 sps:$4 sm:$0xff]  }
 0x92d   :  { %3135 = vmatpush1.bf16.msra.mxu0 %v9904_v46  ;;  %3855 = vmatpush1.bf16.msra.mxu1 %v7310_v20  ;;  %v7324_v46 = vld [vmem:[#allocation10 + $0xf4] ss:$24 sps:$4 sm:$0xff]   ;;  %v7373_v20 = vld [vmem:[#allocation10 + $0x128] ss:$24 sps:$4 sm:$0xff]  }
 0x92e   :  { %3136 = vmatprep.subr.bf16.mxu0 %v9907_v0  ;;  %3856 = vmatprep.subr.bf16.mxu1 %v7315_v52  ;;  %v7322_v0 = vld [vmem:[#allocation10 + $0xf0] ss:$24 sps:$4 sm:$0xff]   ;;  %v7378_v52 = vld [vmem:[#allocation10 + $0x15c] ss:$24 sps:$4 sm:$0xff]  }
 0x931   :  { %3137 = vmatpush1.bf16.msra.mxu0 %v9912_v38  ;;  %3857 = vmatpush1.bf16.msra.mxu1 %v7313_v50  ;;  %v7327_v38 = vld [vmem:[#allocation10 + $0x124] ss:$24 sps:$4 sm:$0xff]   ;;  %v7376_v50 = vld [vmem:[#allocation10 + $0x158] ss:$24 sps:$4 sm:$0xff]  }
 0x932   :  { %3138 = vmatprep.subr.bf16.mxu0 %v9915_v4  ;;  %3858 = vmatprep.subr.bf16.mxu1 %v7318_v9  ;;  %v7325_v4 = vld [vmem:[#allocation10 + $0x120] ss:$24 sps:$4 sm:$0xff]   ;;  %v7381_v9 = vld [vmem:[#allocation10 + $0x18c] ss:$24 sps:$4 sm:$0xff]  }
 0x935   :  { %3139 = vmatpush1.bf16.msra.mxu0 %v9920_v39  ;;  %3859 = vmatpush1.bf16.msra.mxu1 %v7316_v58  ;;  %v7330_v39 = vld [vmem:[#allocation10 + $0x154] ss:$24 sps:$4 sm:$0xff]   ;;  %v7379_v58 = vld [vmem:[#allocation10 + $0x188] ss:$24 sps:$4 sm:$0xff]  }
 0x936   :  { %3140 = vmatprep.subr.bf16.mxu0 %v9923_v15  ;;  %3860 = vmatprep.subr.bf16.mxu1 %v7321_v33  ;;  %v7328_v15 = vld [vmem:[#allocation10 + $0x150] ss:$24 sps:$4 sm:$0xff]   ;;  %v7387_v33 = vld [vmem:[#allocation10 + $0x1ec] ss:$24 sps:$4 sm:$0xff]  }
 0x939   :  { %3141 = vmatpush1.bf16.msra.mxu0 %v9928_v8  ;;  %3861 = vmatpush1.bf16.msra.mxu1 %v7319_v25  ;;  %v7333_v8 = vld [vmem:[#allocation10 + $0x184] ss:$24 sps:$4 sm:$0xff]   ;;  %v7385_v25 = vld [vmem:[#allocation10 + $0x1e8] ss:$24 sps:$4 sm:$0xff]  }
 0x93a   :  { %3142 = vmatprep.subr.bf16.mxu0 %v9931_v28  ;;  %3862 = vmatprep.subr.bf16.mxu1 %v7324_v46  ;;  %v7331_v28 = vld [vmem:[#allocation10 + $0x180] ss:$24 sps:$4 sm:$0xff]   ;;  %v7390_v46 = vld [vmem:[#allocation10 + $0x21c] ss:$24 sps:$4 sm:$0xff]  }
 0x93d   :  { %3143 = vmatpush1.bf16.msra.mxu0 %v9936_v18  ;;  %3863 = vmatpush1.bf16.msra.mxu1 %v7322_v0  ;;  %v7336_v18 = vld [vmem:[#allocation10 + $0x1b4] ss:$24 sps:$4 sm:$0xff]   ;;  %v7388_v0 = vld [vmem:[#allocation10 + $0x218] ss:$24 sps:$4 sm:$0xff]  }
 0x93e   :  { %3144 = vmatprep.subr.bf16.mxu0 %v9939_v61  ;;  %3864 = vmatprep.subr.bf16.mxu1 %v7327_v38  ;;  %v7334_v61 = vld [vmem:[#allocation10 + $0x1b0] ss:$24 sps:$4 sm:$0xff]   ;;  %v7393_v38 = vld [vmem:[#allocation10 + $0x24c] ss:$24 sps:$4 sm:$0xff]  }
 0x941   :  { %3145 = vmatpush1.bf16.msra.mxu0 %v9944_v49  ;;  %3865 = vmatpush1.bf16.msra.mxu1 %v7325_v4  ;;  %v7339_v49 = vld [vmem:[#allocation10 + $0x1e4] ss:$24 sps:$4 sm:$0xff]   ;;  %v7403_v4 = vld [vmem:[#allocation10 + $0x10] ss:$24 sps:$4 sm:$0xff]  }
 0x942   :  { %3146 = vmatprep.subr.bf16.mxu0 %v9947_v55  ;;  %3866 = vmatprep.subr.bf16.mxu1 %v7330_v39  ;;  %v7337_v55 = vld [vmem:[#allocation10 + $0x1e0] ss:$24 sps:$4 sm:$0xff]   ;;  %v7405_v39 = vld [vmem:[#allocation10 + $0x14] ss:$24 sps:$4 sm:$0xff]  }
 0x945   :  { %3147 = vmatpush1.bf16.msra.mxu0 %v9952_v3  ;;  %3867 = vmatpush1.bf16.msra.mxu1 %v7328_v15  ;;  %v7342_v3 = vld [vmem:[#allocation10 + $0x214] ss:$24 sps:$4 sm:$0xff]   ;;  %v7411_v15 = vld [vmem:[#allocation10 + $0x44] ss:$24 sps:$4 sm:$0xff]  }
 0x946   :  { %3148 = vmatprep.subr.bf16.mxu0 %v9955_v19  ;;  %3868 = vmatprep.subr.bf16.mxu1 %v7333_v8  ;;  %v7340_v19 = vld [vmem:[#allocation10 + $0x210] ss:$24 sps:$4 sm:$0xff]  }
 0x947   :  { %v7391_v8 = vld [vmem:[#allocation10 + $0x248] ss:$24 sps:$4 sm:$0xff]  }
 0x949   :  { %3149 = vmatpush1.bf16.msra.mxu0 %v9960_v23  ;;  %3869 = vmatpush1.bf16.msra.mxu1 %v7331_v28  ;;  %v7345_v23 = vld [vmem:[#allocation10 + $0x244] ss:$24 sps:$4 sm:$0xff]   ;;  %v7409_v28 = vld [vmem:[#allocation10 + $0x40] ss:$24 sps:$4 sm:$0xff]  }
 0x94a   :  { %3150 = vmatprep.subr.bf16.mxu0 %v9963_v22  ;;  %3870 = vmatprep.subr.bf16.mxu1 %v7336_v18  ;;  %v7343_v22 = vld [vmem:[#allocation10 + $0x240] ss:$24 sps:$4 sm:$0xff]   ;;  %v7396_v18 = vld [vmem:[#allocation10 + $0x27c] ss:$24 sps:$4 sm:$0xff]  }
 0x94d   :  { %3151 = vmatpush1.bf16.msra.mxu0 %v9968_v11  ;;  %3871 = vmatpush1.bf16.msra.mxu1 %v7334_v61  ;;  %v7348_v11 = vld [vmem:[#allocation10 + $0x274] ss:$24 sps:$4 sm:$0xff]  }
 0x94e   :  { %3152 = vmatprep.subr.bf16.mxu0 %v12817_v37  ;;  %3872 = vmatprep.subr.bf16.mxu1 %v7339_v49  ;;  %v7346_v37 = vld [vmem:[#allocation10 + $0x270] ss:$24 sps:$4 sm:$0xff]   ;;  %v7417_v61 = vld [vmem:[#allocation10 + $0x74] ss:$24 sps:$4 sm:$0xff]  }
 0x94f   :  { %v7394_v49 = vld [vmem:[#allocation10 + $0x278] ss:$24 sps:$4 sm:$0xff]  }
 0x951   :  { %3153 = vmatpush1.bf16.msra.mxu0 %v10165_v43  ;;  %3873 = vmatpush1.bf16.msra.mxu1 %v7337_v55  ;;  %v7351_v43 = vld [vmem:[#allocation10 + $0x2a4] ss:$24 sps:$4 sm:$0xff]   ;;  %v7415_v55 = vld [vmem:[#allocation10 + $0x70] ss:$24 sps:$4 sm:$0xff]  }
 0x952   :  { %3154 = vmatprep.subr.bf16.mxu0 %v10168_v21  ;;  %3874 = vmatprep.subr.bf16.mxu1 %v7342_v3  ;;  %v7349_v21 = vld [vmem:[#allocation10 + $0x2a0] ss:$24 sps:$4 sm:$0xff]   ;;  %v7399_v3 = vld [vmem:[#allocation10 + $0x2ac] ss:$24 sps:$4 sm:$0xff]  }
 0x955   :  { %3155 = vmatpush1.bf16.msra.mxu0 %v10173_v35  ;;  %3875 = vmatpush1.bf16.msra.mxu1 %v7340_v19  ;;  %v7354_v35 = vld [vmem:[#allocation10 + $0x2d4] ss:$24 sps:$4 sm:$0xff]   ;;  %v7423_v19 = vld [vmem:[#allocation10 + $0xa4] ss:$24 sps:$4 sm:$0xff]  }
 0x956   :  { %3156 = vmatprep.subr.bf16.mxu0 %v10176_v13  ;;  %3876 = vmatprep.subr.bf16.mxu1 %v7345_v23  ;;  %v7352_v13 = vld [vmem:[#allocation10 + $0x2d0] ss:$24 sps:$4 sm:$0xff]  }
 0x957   :  { %v7397_v23 = vld [vmem:[#allocation10 + $0x2a8] ss:$24 sps:$4 sm:$0xff]  }
 0x959   :  { %3157 = vmatpush1.bf16.msra.mxu0 %v10181_v45  ;;  %3877 = vmatpush1.bf16.msra.mxu1 %v7343_v22  ;;  %v7357_v45 = vld [vmem:[#allocation10 + $0xc] ss:$24 sps:$4 sm:$0xff]   ;;  %v7421_v22 = vld [vmem:[#allocation10 + $0xa0] ss:$24 sps:$4 sm:$0xff]  }
 0x95a   :  { %3158 = vmatprep.subr.bf16.mxu0 %v10184_v12  ;;  %3878 = vmatprep.subr.bf16.mxu1 %v7348_v11  ;;  %v7355_v12 = vld [vmem:[#allocation10 + $0x8] ss:$24 sps:$4 sm:$0xff]   ;;  %v7402_v11 = vld [vmem:[#allocation10 + $0x2dc] ss:$24 sps:$4 sm:$0xff]  }
 0x95d   :  { %3159 = vmatpush1.bf16.msra.mxu0 %v10189_v54  ;;  %3879 = vmatpush1.bf16.msra.mxu1 %v7346_v37  ;;  %v12869_v54 = vld [vmem:[#allocation17_spill] sm:$0xff]  ;;  %v7429_v37 = vld [vmem:[#allocation10 + $0xd4] ss:$24 sps:$4 sm:$0xff]  }
 0x95e   :  { %3160 = vmatprep.subr.bf16.mxu0 %v10192_v42  ;;  %3880 = vmatprep.subr.bf16.mxu1 %v7351_v43  ;;  %v10300_v40 = vpack.c.bf16 %v12869_v54, %v12868_v16  ;;  %v7360_v42 = vld [vmem:[#allocation10 + $0x3c] ss:$24 sps:$4 sm:$0xff]   ;;  %v7400_v43 = vld [vmem:[#allocation10 + $0x2d8] ss:$24 sps:$4 sm:$0xff]  }
 0x95f   :  { %v7433_v16 = vld [vmem:[#allocation10 + $0x100] ss:$24 sps:$4 sm:$0xff]   ;;  %v7441_v54 = vld [vmem:[#allocation10 + $0x134] ss:$24 sps:$4 sm:$0xff]  }
 0x961   :  { %3161 = vmatpush1.bf16.msra.mxu0 %v10197_v29  ;;  %3881 = vmatpush1.bf16.msra.mxu1 %v7349_v21  ;;  %v7358_v29 = vld [vmem:[#allocation10 + $0x38] ss:$24 sps:$4 sm:$0xff]  }
 0x962   :  { %3162 = vmatprep.subr.bf16.mxu0 %v10200_v1  ;;  %3882 = vmatprep.subr.bf16.mxu1 %v7354_v35  ;;  %v7363_v1 = vld [vmem:[#allocation10 + $0x6c] ss:$24 sps:$4 sm:$0xff]   ;;  %v7427_v21 = vld [vmem:[#allocation10 + $0xd0] ss:$24 sps:$4 sm:$0xff]  }
 0x963   :  { %v10325_v35 = vld [vmem:[#allocation11 + $0x4] ss:$24 sps:$4 sm:$0xff]  }
 0x965   :  { %3163 = vmatpush1.bf16.msra.mxu0 %v10205_v6  ;;  %3883 = vmatpush1.bf16.msra.mxu1 %v7352_v13  ;;  %v7361_v6 = vld [vmem:[#allocation10 + $0x68] ss:$24 sps:$4 sm:$0xff]   ;;  %v7435_v13 = vld [vmem:[#allocation10 + $0x104] ss:$24 sps:$4 sm:$0xff]  }
 0x966   :  { %3925 = vmatprep.subr.bf16.mxu0 %v7357_v45  ;;  %3998 = vmatprep.subr.bf16.mxu1 %v7405_v39  ;;  %v10327_v45 = vld [vmem:[#allocation11] ss:$24 sps:$4 sm:$0xff]   ;;  %v10389_v39 = vld [vmem:[#allocation11 + $0x1e4] ss:$24 sps:$4 sm:$0xff]  }
 0x968   :  { %3165 = vmatmul.mubr.bf16.vlgmr.msra.gmra.mrb[76].mxu0 %v10258_v27  ;;  %3885 = vmatmul.mubr.bf16.vlgmr.msra.gmra.mrb[64].mxu1 %v10300_v40  ;;  %v7369_v27 = vld [vmem:[#allocation10 + $0xcc] ss:$24 sps:$4 sm:$0xff]  }
 0x969   :  { %3894 = vmatprep.mubr.bf16.mxu1 %v10304_v47  ;;  %3926 = vmatpush1.bf16.msra.mxu0 %v7355_v12  ;;  %v10330_v12 = vld [vmem:[#allocation11 + $0x34] ss:$24 sps:$4 sm:$0xff]  }
 0x96a   :  { %3957 = vmatprep.mubr.bf16.mxu0 %v10264_v53  ;;  %3927 = vmatprep.subr.bf16.mxu0 %v7360_v42  ;;  %v10335_v42 = vld [vmem:[#allocation11 + $0x30] ss:$24 sps:$4 sm:$0xff]  }
 0x96b   :  { %3999 = vmatpush1.bf16.msra.mxu1 %v7403_v4  ;;  %v10386_v4 = vld [vmem:[#allocation11 + $0x1b0] ss:$24 sps:$4 sm:$0xff]  }
 0x96c   :  { %4000 = vmatprep.subr.bf16.mxu1 %v7411_v15  ;;  %v7477_v15 = vld [vmem:[#allocation10 + $0x254] ss:$24 sps:$4 sm:$0xff]  }
 0x96d   :  { %3928 = vmatpush1.bf16.msra.mxu0 %v7358_v29  ;;  %v7447_v29 = vld [vmem:[#allocation10 + $0x164] ss:$24 sps:$4 sm:$0xff]  }
 0x96e   :  { %3929 = vmatprep.subr.bf16.mxu0 %v7363_v1  ;;  %v10341_v1 = vld [vmem:[#allocation11 + $0x60] ss:$24 sps:$4 sm:$0xff]  }
 0x96f   :  { %4001 = vmatpush1.bf16.msra.mxu1 %v7409_v28  ;;  %v10392_v28 = vld [vmem:[#allocation11 + $0x1e0] ss:$24 sps:$4 sm:$0xff]  }
 0x970   :  { %3895 = vmatmul.mubr.bf16.gmra.mrb[68].mxu1 %v10312_v60  ;;  %4002 = vmatprep.subr.bf16.mxu1 %v7417_v61  ;;  %v7481_v61 = vld [vmem:[#allocation10 + $0x280] ss:$24 sps:$4 sm:$0xff]  }
 0x971   :  { %3904 = vmatprep.mubr.bf16.mxu1 %v10316_v30  ;;  %3930 = vmatpush1.bf16.msra.mxu0 %v7361_v6  ;;  %v10344_v6 = vld [vmem:[#allocation11 + $0x94] ss:$24 sps:$4 sm:$0xff]  }
 0x972   :  { %3931 = vmatprep.subr.bf16.mxu0 %v7366_v31  ;;  %v10352_v31 = vld [vmem:[#allocation11 + $0xc4] ss:$24 sps:$4 sm:$0xff]  }
 0x973   :  { %4003 = vmatpush1.bf16.msra.mxu1 %v7415_v55  ;;  %v10398_v55 = vld [vmem:[#allocation11 + $0x210] ss:$24 sps:$4 sm:$0xff]  }
 0x974   :  { %4004 = vmatprep.subr.bf16.mxu1 %v7423_v19  ;;  %v7489_v19 = vld [vmem:[#allocation10 + $0x2b4] ss:$24 sps:$4 sm:$0xff]  }
 0x975   :  { %3932 = vmatpush1.bf16.msra.mxu0 %v7364_v59  ;;  %v10355_v59 = vld [vmem:[#allocation11 + $0xc0] ss:$24 sps:$4 sm:$0xff]  }
 0x976   :  { %3933 = vmatprep.subr.bf16.mxu0 %v7369_v27  ;;  %v10358_v27 = vld [vmem:[#allocation11 + $0xf4] ss:$24 sps:$4 sm:$0xff]  }
 0x977   :  { %4005 = vmatpush1.bf16.msra.mxu1 %v7421_v22  ;;  %v10404_v22 = vld [vmem:[#allocation11 + $0x240] ss:$24 sps:$4 sm:$0xff]  }
 0x978   :  { %3905 = vmatmul.mubr.bf16.gmra.mrb[72].mxu1 %v10322_v48  ;;  %4006 = vmatprep.subr.bf16.mxu1 %v7429_v37  ;;  %v7493_v37 = vld [vmem:[#allocation10 + $0x2e0] ss:$24 sps:$4 sm:$0xff]  }
 0x979   :  { %3934 = vmatpush1.bf16.msra.mxu0 %v7367_v7  ;;  %v10362_v7 = vld [vmem:[#allocation11 + $0xf0] ss:$24 sps:$4 sm:$0xff]  }
 0x97a   :  { %3935 = vmatprep.subr.bf16.mxu0 %v7372_v14  ;;  %v10365_v14 = vld [vmem:[#allocation11 + $0x124] ss:$24 sps:$4 sm:$0xff]  }
 0x97b   :  { %4007 = vmatpush1.bf16.msra.mxu1 %v7427_v21  ;;  %v10409_v21 = vld [vmem:[#allocation11 + $0xc] ss:$24 sps:$4 sm:$0xff]  }
 0x97c   :  { %4008 = vmatprep.subr.bf16.mxu1 %v7435_v13  ;;  %v10412_v13 = vld [vmem:[#allocation11 + $0x270] ss:$24 sps:$4 sm:$0xff]  }
 0x97d   :  { %3936 = vmatpush1.bf16.msra.mxu0 %v7370_v17  ;;  %v7453_v17 = vld [vmem:[#allocation10 + $0x194] ss:$24 sps:$4 sm:$0xff]   ;;  %12874 = vst [vmem:[#allocation103_spill] sm:$0xff] %v10412_v13 }
 0x97e   :  { %3937 = vmatprep.subr.bf16.mxu0 %v7375_v51  ;;  %v7451_v51 = vld [vmem:[#allocation10 + $0x190] ss:$24 sps:$4 sm:$0xff]  }
 0x97f   :  { %4009 = vmatpush1.bf16.msra.mxu1 %v7433_v16  ;;  %v10415_v16 = vld [vmem:[#allocation11 + $0x2a4] ss:$24 sps:$4 sm:$0xff]  }
 0x980   :  { %4010 = vmatprep.subr.bf16.mxu1 %v7441_v54  ;;  %12875 = vst [vmem:[#allocation104_spill] sm:$0xff] %v10415_v16  ;;  %v10419_v54 = vld [vmem:[#allocation11 + $0x2a0] ss:$24 sps:$4 sm:$0xff]  }
 0x981   :  { %3938 = vmatpush1.bf16.msra.mxu0 %v7373_v20  ;;  %v10368_v20 = vld [vmem:[#allocation11 + $0x120] ss:$24 sps:$4 sm:$0xff]   ;;  %12876 = vst [vmem:[#allocation105_spill] sm:$0xff] %v10419_v54 }
 0x982   :  { %3939 = vmatprep.subr.bf16.mxu0 %v7378_v52  ;;  %v10371_v52 = vld [vmem:[#allocation11 + $0x154] ss:$24 sps:$4 sm:$0xff]  }
 0x983   :  { %4011 = vmatpush1.bf16.msra.mxu1 %v7439_v57  ;;  %v10422_v57 = vld [vmem:[#allocation11 + $0x2d4] ss:$24 sps:$4 sm:$0xff]  }
 0x984   :  { %4012 = vmatprep.subr.bf16.mxu1 %v7447_v29  ;;  %12877 = vst [vmem:[#allocation106_spill] sm:$0xff] %v10422_v57  ;;  %v10425_v29 = vld [vmem:[#allocation11 + $0x2d0] ss:$24 sps:$4 sm:$0xff]  }
 0x985   :  { %3940 = vmatpush1.bf16.msra.mxu0 %v7376_v50  ;;  %v7459_v50 = vld [vmem:[#allocation10 + $0x1c4] ss:$24 sps:$4 sm:$0xff]   ;;  %12878 = vst [vmem:[#allocation107_spill] sm:$0xff] %v10425_v29 }
 0x986   :  { %3941 = vmatprep.subr.bf16.mxu0 %v7381_v9  ;;  %v7457_v9 = vld [vmem:[#allocation10 + $0x1c0] ss:$24 sps:$4 sm:$0xff]  }
 0x987   :  { %4013 = vmatpush1.bf16.msra.mxu1 %v7445_v44  ;;  %v10428_v44 = vld [vmem:[#allocation11 + $0x14] ss:$24 sps:$4 sm:$0xff]  }
 0x988   :  { %4014 = vmatprep.subr.bf16.mxu1 %v7453_v17  ;;  %12879 = vst [vmem:[#allocation108_spill] sm:$0xff] %v10428_v44 }
 0x989   :  { %3942 = vmatpush1.bf16.msra.mxu0 %v7379_v58  ;;  %v10374_v58 = vld [vmem:[#allocation11 + $0x150] ss:$24 sps:$4 sm:$0xff]  }
 0x98a   :  { %3943 = vmatprep.subr.bf16.mxu0 %v7384_v34  ;;  %v10377_v34 = vld [vmem:[#allocation11 + $0x184] ss:$24 sps:$4 sm:$0xff]  }
 0x98b   :  { %4015 = vmatpush1.bf16.msra.mxu1 %v7451_v51 }
 0x98c   :  { %4016 = vmatprep.subr.bf16.mxu1 %v7459_v50 }
 0x98d   :  { %3944 = vmatpush1.bf16.msra.mxu0 %v7382_v32  ;;  %v7465_v32 = vld [vmem:[#allocation10 + $0x1f4] ss:$24 sps:$4 sm:$0xff]  }
 0x98e   :  { %3945 = vmatprep.subr.bf16.mxu0 %v7387_v33  ;;  %v7463_v33 = vld [vmem:[#allocation10 + $0x1f0] ss:$24 sps:$4 sm:$0xff]  }
 0x98f   :  { %4017 = vmatpush1.bf16.msra.mxu1 %v7457_v9 }
 0x990   :  { %4018 = vmatprep.subr.bf16.mxu1 %v7465_v32 }
 0x991   :  { %3946 = vmatpush1.bf16.msra.mxu0 %v7385_v25  ;;  %v10380_v25 = vld [vmem:[#allocation11 + $0x180] ss:$24 sps:$4 sm:$0xff]  }
 0x992   :  { %3947 = vmatprep.subr.bf16.mxu0 %v7390_v46  ;;  %v10383_v46 = vld [vmem:[#allocation11 + $0x1b4] ss:$24 sps:$4 sm:$0xff]  }
 0x993   :  { %4019 = vmatpush1.bf16.msra.mxu1 %v7463_v33 }
 0x995   :  { %3948 = vmatpush1.bf16.msra.mxu0 %v7388_v0  ;;  %v7469_v0 = vld [vmem:[#allocation10 + $0x220] ss:$24 sps:$4 sm:$0xff]  }
 0x996   :  { %3949 = vmatprep.subr.bf16.mxu0 %v7393_v38  ;;  %v7471_v38 = vld [vmem:[#allocation10 + $0x224] ss:$24 sps:$4 sm:$0xff]  }
 0x997   :  { %4020 = vmatprep.subr.bf16.mxu1 %v7471_v38 }
 0x998   :  { %4021 = vmatpush1.bf16.msra.mxu1 %v7469_v0 }
 0x999   :  { %3950 = vmatpush1.bf16.msra.mxu0 %v7391_v8  ;;  %v7475_v8 = vld [vmem:[#allocation10 + $0x250] ss:$24 sps:$4 sm:$0xff]   ;;  %4022 = vmatprep.subr.bf16.mxu1 %v7477_v15 }
 0x99a   :  { %3951 = vmatprep.subr.bf16.mxu0 %v7396_v18  ;;  %v10395_v18 = vld [vmem:[#allocation11 + $0x214] ss:$24 sps:$4 sm:$0xff]  }
 0x99c   :  { %4023 = vmatpush1.bf16.msra.mxu1 %v7475_v8 }
 0x99d   :  { %3952 = vmatpush1.bf16.msra.mxu0 %v7394_v49  ;;  %v7483_v49 = vld [vmem:[#allocation10 + $0x284] ss:$24 sps:$4 sm:$0xff]  }
 0x99e   :  { %3953 = vmatprep.subr.bf16.mxu0 %v7399_v3  ;;  %4024 = vmatprep.subr.bf16.mxu1 %v7483_v49  ;;  %v10401_v3 = vld [vmem:[#allocation11 + $0x244] ss:$24 sps:$4 sm:$0xff]  }
 0x9a0   :  { %4025 = vmatpush1.bf16.msra.mxu1 %v7481_v61  ;;  %v12880_v61 = vld [vmem:[#allocation61_spill] sm:$0xff] }
 0x9a1   :  { %3954 = vmatpush1.bf16.msra.mxu0 %v7397_v23  ;;  %v7487_v23 = vld [vmem:[#allocation10 + $0x2b0] ss:$24 sps:$4 sm:$0xff]   ;;  %4026 = vmatprep.subr.bf16.mxu1 %v7489_v19 }
 0x9a2   :  { %3955 = vmatprep.subr.bf16.mxu0 %v7402_v11  ;;  %v10407_v11 = vld [vmem:[#allocation11 + $0x274] ss:$24 sps:$4 sm:$0xff]  }
 0x9a3   :  { %v12881_v19 = vld [vmem:[#allocation62_spill] sm:$0xff] }
 0x9a4   :  { %4027 = vmatpush1.bf16.msra.mxu1 %v7487_v23 }
 0x9a5   :  { %3956 = vmatpush1.bf16.msra.mxu0 %v7400_v43  ;;  %v7495_v43 = vld [vmem:[#allocation10 + $0x2e4] ss:$24 sps:$4 sm:$0xff]  }
 0x9a6   :  { %4607 = vmatprep.subr.bf16.mxu0 %v10325_v35  ;;  %4028 = vmatprep.subr.bf16.mxu1 %v7495_v43 }
 0x9a8   :  { %3958 = vmatmul.mubr.bf16.vlgmr.msra.gmra.mrb[80].mxu0 %v10300_v40  ;;  %4029 = vmatpush1.bf16.msra.mxu1 %v7493_v37 }
 0x9a9   :  { %3967 = vmatprep.mubr.bf16.mxu0 %v10304_v47  ;;  %4608 = vmatpush1.bf16.msra.mxu0 %v10327_v45 }
 0x9aa   :  { %4609 = vmatprep.subr.bf16.mxu0 %v10330_v12  ;;  %4648 = vmatprep.subr.bf16.mxu1 %v10409_v21 }
 0x9ad   :  { %4610 = vmatpush1.bf16.msra.mxu0 %v10335_v42 }
 0x9ae   :  { %4611 = vmatprep.subr.bf16.mxu0 %v10338_v24 }
 0x9b0   :  { %3968 = vmatmul.mubr.bf16.gmra.mrb[84].mxu0 %v10312_v60 }
 0x9b1   :  { %3977 = vmatprep.mubr.bf16.mxu0 %v10316_v30  ;;  %4612 = vmatpush1.bf16.msra.mxu0 %v10341_v1 }
 0x9b2   :  { %4613 = vmatprep.subr.bf16.mxu0 %v10344_v6 }
 0x9b5   :  { %4614 = vmatpush1.bf16.msra.mxu0 %v10349_v2 }
 0x9b6   :  { %4615 = vmatprep.subr.bf16.mxu0 %v10352_v31 }
 0x9b8   :  { %3978 = vmatmul.mubr.bf16.gmra.mrb[88].mxu0 %v10322_v48 }
 0x9b9   :  { %4616 = vmatpush1.bf16.msra.mxu0 %v10355_v59 }
 0x9ba   :  { %4617 = vmatprep.subr.bf16.mxu0 %v10358_v27 }
 0x9bd   :  { %4618 = vmatpush1.bf16.msra.mxu0 %v10362_v7 }
 0x9be   :  { %4619 = vmatprep.subr.bf16.mxu0 %v10365_v14 }
 0x9c1   :  { %4620 = vmatpush1.bf16.msra.mxu0 %v10368_v20 }
 0x9c2   :  { %4621 = vmatprep.subr.bf16.mxu0 %v10371_v52 }
 0x9c5   :  { %4622 = vmatpush1.bf16.msra.mxu0 %v10374_v58 }
 0x9c6   :  { %4623 = vmatprep.subr.bf16.mxu0 %v10377_v34 }
 0x9c9   :  { %4624 = vmatpush1.bf16.msra.mxu0 %v10380_v25 }
 0x9ca   :  { %4625 = vmatprep.subr.bf16.mxu0 %v10383_v46 }
 0x9cd   :  { %4626 = vmatpush1.bf16.msra.mxu0 %v10386_v4 }
 0x9ce   :  { %4627 = vmatprep.subr.bf16.mxu0 %v10389_v39 }
 0x9d1   :  { %4628 = vmatpush1.bf16.msra.mxu0 %v10392_v28 }
 0x9d2   :  { %4629 = vmatprep.subr.bf16.mxu0 %v10395_v18 }
 0x9d5   :  { %4630 = vmatpush1.bf16.msra.mxu0 %v10398_v55 }
 0x9d6   :  { %4631 = vmatprep.subr.bf16.mxu0 %v10401_v3 }
 0x9d9   :  { %4632 = vmatpush1.bf16.msra.mxu0 %v10404_v22 }
 0x9da   :  { %4633 = vmatprep.subr.bf16.mxu0 %v10407_v11 }
 0x9dd   :  { %4634 = vmatpush1.bf16.msra.mxu0 %v10412_v13  ;;  %v10673_v13 = vld [vmem:[#allocation11 + $0x2b4] ss:$24 sps:$4 sm:$0xff]  }
 0x9de   :  { %4635 = vmatprep.subr.bf16.mxu0 %v10415_v16  ;;  %v10665_v16 = vld [vmem:[#allocation11 + $0x278] ss:$24 sps:$4 sm:$0xff]  }
 0x9df   :  { %12947 = vst [vmem:[#allocation94_spill] sm:$0xff] %v10665_v16 }
 0x9e1   :  { %4636 = vmatpush1.bf16.msra.mxu0 %v10419_v54 }
 0x9e2   :  { %4637 = vmatprep.subr.bf16.mxu0 %v10422_v57  ;;  %v12883_v57 = vld [vmem:[#allocation64_spill] sm:$0xff] }
 0x9e5   :  { %4638 = vmatpush1.bf16.msra.mxu0 %v10425_v29 }
 0x9e6   :  { %4689 = vmatprep.subr.bf16.mxu0 %v10428_v44  ;;  %v12882_v44 = vld [vmem:[#allocation63_spill] sm:$0xff] }
 0x9fb   :  { %v3084_v17 = vpop.f32.mrb[72].mxu0  ;;  %v3125_v51 = vpop.f32.mrb[60].mxu1 }
 0x9fc   :  { %v3085_v50 = vadd.f32 %v3084_v17, %v12857_v56  ;;  %v3126_v9 = vadd.f32 %v3125_v51, %v12858_v10  ;;  %v3086_v32 = vpop.f32.mrb[73].mxu0  ;;  %v3127_v33 = vpop.f32.mrb[61].mxu1 }
 0x9fd   :  { %v3087_v0 = vadd.f32 %v3086_v32, %v12859_v36  ;;  %v3128_v38 = vadd.f32 %v3127_v33, %v9183_v63  ;;  %v3088_v15 = vpop.f32.mrb[74].mxu0  ;;  %v3129_v8 = vpop.f32.mrb[62].mxu1 }
 0x9fe   :  { %v3173_v49 = vadd.f32 %v3085_v50, %v12880_v61  ;;  %v3187_v23 = vadd.f32 %v3126_v9, %v12881_v19  ;;  %v3089_v37 = vpop.f32.mrb[75].mxu0  ;;  %v3130_v43 = vpop.f32.mrb[63].mxu1 }
 0x9ff   :  { %v3174_v29 = vadd.f32 %v3087_v0, %v12882_v44  ;;  %v3188_v56 = vadd.f32 %v3128_v38, %v12883_v57 }
 0xa00   :  { %v6698_v17 = vmul.f32 -1.442695, %v3173_v49  ;;  %v6700_v51 = vmul.f32 -1.442695, %v3187_v23 }
 0xa01   :  { %v6699_v10 = vmul.f32 -1.442695, %v3174_v29  ;;  %v6701_v36 = vmul.f32 -1.442695, %v3188_v56 }
 0xa02   :  { %7799 = vpow2.f32 %v6698_v17 }
 0xa03   :  { %7801 = vpow2.f32 %v6699_v10 }
 0xa04   :  { %7803 = vpow2.f32 %v6700_v51 }
 0xa05   :  { %7805 = vpow2.f32 %v6701_v36  ;;  %v12888_v36 = vld [vmem:[#allocation81_spill] sm:$0xff] }
 0xa0c   :  { %v7800_v32 = vpop.eup %7799 }
 0xa0d   :  { %v7802_v63 = vpop.eup %7801  ;;  %v3181_v33 = vadd.f32 1.0, %v7800_v32 }
 0xa0e   :  { %v3182_v50 = vadd.f32 1.0, %v7802_v63  ;;  %v7804_v9 = vpop.eup %7803 }
 0xa0f   :  { %7807 = vrcp.f32 %v3181_v33  ;;  %v7806_v15 = vpop.eup %7805  ;;  %v3195_v8 = vadd.f32 1.0, %v7804_v9 }
 0xa10   :  { %7809 = vrcp.f32 %v3182_v50  ;;  %v3196_v44 = vadd.f32 1.0, %v7806_v15 }
 0xa11   :  { %7811 = vrcp.f32 %v3195_v8 }
 0xa12   :  { %7813 = vrcp.f32 %v3196_v44 }
 0xa19   :  { %v7808_v49 = vpop.eup %7807 }
 0xa1a   :  { %v7810_v43 = vpop.eup %7809 }
 0xa1b   :  { %v7812_v15 = vpop.eup %7811 }
 0xa1c   :  { %v7814_v8 = vpop.eup %7813  ;;  %v3207_v44 = vsub.f32 1.0, %v7812_v15 }
 0xa3b   :  { %v3166_v0 = vpop.f32.mrb[76].mxu0  ;;  %v10440_v57 = vpop.f32.mrb[64].mxu1 }
 0xa3c   :  { %12884 = vst [vmem:[#allocation109_spill] sm:$0xff] %v10440_v57  ;;  %v3167_v29 = vadd.f32 %v3166_v0, %v12573_v41  ;;  %v3168_v38 = vpop.f32.mrb[77].mxu0  ;;  %v10443_v61 = vpop.f32.mrb[65].mxu1  ;;  %v12889_v41 = vld [vmem:[#allocation82_spill] sm:$0xff] }
 0xa3d   :  { %12885 = vst [vmem:[#allocation110_spill] sm:$0xff] %v10443_v61  ;;  %v3169_v19 = vadd.f32 %v3168_v38, %v9186_v62  ;;  %v3170_v23 = vpop.f32.mrb[78].mxu0  ;;  %v10446_v37 = vpop.f32.mrb[66].mxu1  ;;  %v10641_v61 = vld [vmem:[#allocation11 + $0x254] ss:$24 sps:$4 sm:$0xff]  }
 0xa3e   :  { %12886 = vst [vmem:[#allocation111_spill] sm:$0xff] %v10446_v37  ;;  %v3201_v56 = vmul.f32 %v7808_v49, %v3167_v29  ;;  %v3171_v17 = vpop.f32.mrb[79].mxu0  ;;  %v10448_v10 = vpop.f32.mrb[67].mxu1  ;;  %v3208_v49 = vsub.f32 1.0, %v7814_v8  ;;  %v10568_v37 = vld [vmem:[#allocation11 + $0x158] ss:$24 sps:$4 sm:$0xff]  }
 0xa3f   :  { %12887 = vst [vmem:[#allocation112_spill] sm:$0xff] %v10448_v10  ;;  %v3202_v51 = vmul.f32 %v7810_v43, %v3169_v19  ;;  %v10563_v10 = vld [vmem:[#allocation11 + $0x164] ss:$24 sps:$4 sm:$0xff]   ;;  %12938 = vst [vmem:[#allocation90_spill] sm:$0xff] %v10641_v61 }
 0xa40   :  { %v3203_v32 = vadd.f32 %v3201_v56, %v12888_v36  ;;  %v3211_v56 = vmul.f32 %v7812_v15, %v10250_v5  ;;  %v3212_v36 = vmul.f32 %v7814_v8, %v10252_v26  ;;  %v12898_v15 = vmov 0   ;;  %v10480_v8 = vld [vmem:[#allocation11 + $0x10] ss:$24 sps:$4 sm:$0xff]   ;;  %12912 = vst [vmem:[#allocation55_spill] sm:$0xff] %v10563_v10 }
 0xa41   :  { %v3204_v63 = vadd.f32 %v3202_v51, %v12889_v41  ;;  %12899 = vst [vmem:[#allocation50_spill] sm:$0xff] %v10480_v8 }
 0xa42   :  { %7815 = vtanh.f32 %v3203_v32 }
 0xa43   :  { %7817 = vtanh.f32 %v3204_v63  ;;  %v10452_v33 = vpop.f32.mrb[68].mxu1 }
 0xa44   :  { %12890 = vst [vmem:[#allocation113_spill] sm:$0xff] %v10452_v33  ;;  %v10454_v62 = vpop.f32.mrb[69].mxu1  ;;  %v10557_v33 = vld [vmem:[#allocation11 + $0x130] ss:$24 sps:$4 sm:$0xff]  }
 0xa45   :  { %12891 = vst [vmem:[#allocation114_spill] sm:$0xff] %v10454_v62  ;;  %v10456_v50 = vpop.f32.mrb[70].mxu1  ;;  %v10550_v62 = vld [vmem:[#allocation11 + $0x134] ss:$24 sps:$4 sm:$0xff]   ;;  %12911 = vst [vmem:[#allocation54_spill] sm:$0xff] %v10557_v33 }
 0xa46   :  { %12892 = vst [vmem:[#allocation115_spill] sm:$0xff] %v10456_v50  ;;  %v10458_v9 = vpop.f32.mrb[71].mxu1  ;;  %v10548_v50 = vld [vmem:[#allocation11 + $0x12c] ss:$24 sps:$4 sm:$0xff]   ;;  %12910 = vst [vmem:[#allocation53_spill] sm:$0xff] %v10550_v62 }
 0xa47   :  { %12893 = vst [vmem:[#allocation116_spill] sm:$0xff] %v10458_v9  ;;  %v10545_v9 = vld [vmem:[#allocation11 + $0x100] ss:$24 sps:$4 sm:$0xff]  }
 0xa48   :  { %12909 = vst [vmem:[#allocation32_spill] sm:$0xff] %v10545_v9 }
 0xa4b   :  { %v10460_v0 = vpop.f32.mrb[72].mxu1 }
 0xa4c   :  { %12894 = vst [vmem:[#allocation117_spill] sm:$0xff] %v10460_v0  ;;  %v7816_v29 = vpop.eup %7815  ;;  %v10462_v38 = vpop.f32.mrb[73].mxu1 }
 0xa4d   :  { %12895 = vst [vmem:[#allocation69_spill] sm:$0xff] %v10462_v38  ;;  %v7818_v19 = vpop.eup %7817  ;;  %v10464_v23 = vpop.f32.mrb[74].mxu1  ;;  %v3209_v43 = vmul.f32 %v7816_v29, %v3207_v44  ;;  %v10478_v44 = vld [vmem:[#allocation11 + $0x8] ss:$24 sps:$4 sm:$0xff]   ;;  %v10482_v29 = vld [vmem:[#allocation11 + $0x3c] ss:$24 sps:$4 sm:$0xff]  }
 0xa4e   :  { %12896 = vst [vmem:[#allocation70_spill] sm:$0xff] %v10464_v23  ;;  %v10467_v17 = vpop.f32.mrb[75].mxu1  ;;  %v3210_v51 = vmul.f32 %v7818_v19, %v3208_v49  ;;  %v10496_v49 = vld [vmem:[#allocation11 + $0x6c] ss:$24 sps:$4 sm:$0xff]   ;;  %v10543_v38 = vld [vmem:[#allocation11 + $0xf8] ss:$24 sps:$4 sm:$0xff]  }
 0xa4f   :  { %12897 = vst [vmem:[#allocation49_spill] sm:$0xff] %v10467_v17  ;;  %v3213_v32 = vadd.f32 %v3211_v56, %v3209_v43  ;;  %v10498_v19 = vld [vmem:[#allocation11 + $0x74] ss:$24 sps:$4 sm:$0xff]   ;;  %v10506_v43 = vld [vmem:[#allocation11 + $0x70] ss:$24 sps:$4 sm:$0xff]  }
 0xa50   :  { %v3214_v41 = vadd.f32 %v3212_v36, %v3210_v51  ;;  %12902 = vst [vmem:[#allocation75_spill] sm:$0xff] %v10498_v19  ;;  %12903 = vst [vmem:[#allocation76_spill] sm:$0xff] %v10506_v43  ;;  %v10512_v56 = vld [vmem:[#allocation11 + $0xa4] ss:$24 sps:$4 sm:$0xff]   ;;  %v10517_v51 = vld [vmem:[#allocation11 + $0x98] ss:$24 sps:$4 sm:$0xff]  }
 0xa51   :  { %v10472_v0 = vpack.c.bf16 %v3213_v32, %v10250_v5  ;;  %v10490_v5 = vld [vmem:[#allocation11 + $0x38] ss:$24 sps:$4 sm:$0xff]   ;;  %12904 = vst [vmem:[#allocation27_spill] sm:$0xff] %v10512_v56  ;;  %v10523_v32 = vld [vmem:[#allocation11 + $0xcc] ss:$24 sps:$4 sm:$0xff]  }
 0xa52   :  { %v3243_v63 = vpack.c.bf16 %v3214_v41, %v10252_v26  ;;  %v10484_v26 = vld [vmem:[#allocation11 + $0x44] ss:$24 sps:$4 sm:$0xff]   ;;  %v10519_v36 = vld [vmem:[#allocation11 + $0xa0] ss:$24 sps:$4 sm:$0xff]   ;;  %v10525_v41 = vld [vmem:[#allocation11 + $0xd4] ss:$24 sps:$4 sm:$0xff]  }
 0xa53   :  { %12900 = vst [vmem:[#allocation51_spill] sm:$0xff] %v10484_v26  ;;  %12905 = vst [vmem:[#allocation28_spill] sm:$0xff] %v10519_v36  ;;  %v10532_v17 = vld [vmem:[#allocation11 + $0xd0] ss:$24 sps:$4 sm:$0xff]   ;;  %v10538_v23 = vld [vmem:[#allocation11 + $0x104] ss:$24 sps:$4 sm:$0xff]  }
 0xa54   :  { %3914 = vmatprep.mubr.bf16.mxu1 %v3243_v63  ;;  %3987 = vmatprep.mubr.bf16.mxu0 %v3243_v63  ;;  %12906 = vst [vmem:[#allocation29_spill] sm:$0xff] %v10525_v41  ;;  %12907 = vst [vmem:[#allocation30_spill] sm:$0xff] %v10532_v17 }
 0xa55   :  { %3915 = vmatmul.mubr.bf16.gmra.mrb[76].mxu1 %v10472_v0  ;;  %3988 = vmatmul.mubr.bf16.gmra.mrb[92].mxu0 %v10472_v0  ;;  %12908 = vst [vmem:[#allocation31_spill] sm:$0xff] %v10538_v23 }
 0xa56   :  { %4030 = vmatprep.mubr.bf16.mxu1 %v10264_v53  ;;  %4639 = vmatprep.mubr.bf16.mxu0 %v12898_v15  ;;  %v10492_v53 = vld [vmem:[#allocation11 + $0x40] ss:$24 sps:$4 sm:$0xff]  }
 0xa57   :  { %12901 = vst [vmem:[#allocation52_spill] sm:$0xff] %v10492_v53 }
 0xa5d   :  { %4031 = vmatmul.mubr.bf16.vlgmr.msra.gmra.mrb[80].mxu1 %v10300_v40  ;;  %4640 = vmatmul.mubr.bf16.vlgmr.msra.gmra.mrb[96].mxu0 %v12898_v15  ;;  %v10504_v40 = vld [vmem:[#allocation11 + $0x68] ss:$24 sps:$4 sm:$0xff]  }
 0xa5e   :  { %4649 = vmatpush1.bf16.msra.mxu1 %v10478_v44  ;;  %4690 = vmatpush1.bf16.msra.mxu0 %v10480_v8 }
 0xa5f   :  { %4040 = vmatprep.mubr.bf16.mxu1 %v10304_v47  ;;  %4650 = vmatprep.subr.bf16.mxu1 %v10482_v29  ;;  %v10510_v47 = vld [vmem:[#allocation11 + $0x9c] ss:$24 sps:$4 sm:$0xff]  }
 0xa60   :  { %4691 = vmatprep.subr.bf16.mxu0 %v10484_v26  ;;  %4721 = vmatprep.mubr.bf16.mxu0 %v12898_v15  ;;  %v10621_v26 = vld [vmem:[#allocation11 + $0x21c] ss:$24 sps:$4 sm:$0xff]  }
 0xa61   :  { %12930 = vst [vmem:[#allocation22_spill] sm:$0xff] %v10621_v26 }
 0xa62   :  { %4651 = vmatpush1.bf16.msra.mxu1 %v10490_v5  ;;  %4692 = vmatpush1.bf16.msra.mxu0 %v10492_v53  ;;  %v10609_v53 = vld [vmem:[#allocation11 + $0x1f4] ss:$24 sps:$4 sm:$0xff]  }
 0xa63   :  { %4652 = vmatprep.subr.bf16.mxu1 %v10496_v49  ;;  %4693 = vmatprep.subr.bf16.mxu0 %v10498_v19  ;;  %v10603_v19 = vld [vmem:[#allocation11 + $0x1c0] ss:$24 sps:$4 sm:$0xff]   ;;  %12926 = vst [vmem:[#allocation43_spill] sm:$0xff] %v10609_v53 }
 0xa64   :  { %12924 = vst [vmem:[#allocation73_spill] sm:$0xff] %v10603_v19 }
 0xa65   :  { %4041 = vmatmul.mubr.bf16.gmra.mrb[84].mxu1 %v10312_v60  ;;  %v10530_v60 = vld [vmem:[#allocation11 + $0xc8] ss:$24 sps:$4 sm:$0xff]  }
 0xa66   :  { %4653 = vmatpush1.bf16.msra.mxu1 %v10504_v40  ;;  %4694 = vmatpush1.bf16.msra.mxu0 %v10506_v43  ;;  %v10601_v43 = vld [vmem:[#allocation11 + $0x1b8] ss:$24 sps:$4 sm:$0xff]  }
 0xa67   :  { %4050 = vmatprep.mubr.bf16.mxu1 %v10316_v30  ;;  %4654 = vmatprep.subr.bf16.mxu1 %v10510_v47  ;;  %v10536_v30 = vld [vmem:[#allocation11 + $0xfc] ss:$24 sps:$4 sm:$0xff]   ;;  %12923 = vst [vmem:[#allocation48_spill] sm:$0xff] %v10601_v43 }
 0xa68   :  { %4695 = vmatprep.subr.bf16.mxu0 %v10512_v56 }
 0xa6a   :  { %4655 = vmatpush1.bf16.msra.mxu1 %v10517_v51  ;;  %4696 = vmatpush1.bf16.msra.mxu0 %v10519_v36 }
 0xa6b   :  { %4656 = vmatprep.subr.bf16.mxu1 %v10523_v32  ;;  %4697 = vmatprep.subr.bf16.mxu0 %v10525_v41  ;;  %v10591_v41 = vld [vmem:[#allocation11 + $0x1c4] ss:$24 sps:$4 sm:$0xff]  }
 0xa6c   :  { %12919 = vst [vmem:[#allocation72_spill] sm:$0xff] %v10591_v41 }
 0xa6d   :  { %4051 = vmatmul.mubr.bf16.gmra.mrb[88].mxu1 %v10322_v48  ;;  %v10555_v48 = vld [vmem:[#allocation11 + $0x128] ss:$24 sps:$4 sm:$0xff]  }
 0xa6e   :  { %4657 = vmatpush1.bf16.msra.mxu1 %v10530_v60  ;;  %4698 = vmatpush1.bf16.msra.mxu0 %v10532_v17 }
 0xa6f   :  { %4060 = vmatprep.mubr.bf16.mxu1 %v3243_v63  ;;  %4658 = vmatprep.subr.bf16.mxu1 %v10536_v30  ;;  %v10561_v63 = vld [vmem:[#allocation11 + $0x15c] ss:$24 sps:$4 sm:$0xff]  }
 0xa70   :  { %4699 = vmatprep.subr.bf16.mxu0 %v10538_v23  ;;  %v10574_v23 = vld [vmem:[#allocation11 + $0x18c] ss:$24 sps:$4 sm:$0xff]  }
 0xa72   :  { %4659 = vmatpush1.bf16.msra.mxu1 %v10543_v38  ;;  %4700 = vmatpush1.bf16.msra.mxu0 %v10545_v9  ;;  %v10570_v9 = vld [vmem:[#allocation11 + $0x160] ss:$24 sps:$4 sm:$0xff]  }
 0xa73   :  { %4660 = vmatprep.subr.bf16.mxu1 %v10548_v50  ;;  %4701 = vmatprep.subr.bf16.mxu0 %v10550_v62  ;;  %12913 = vst [vmem:[#allocation56_spill] sm:$0xff] %v10570_v9  ;;  %v10576_v62 = vld [vmem:[#allocation11 + $0x194] ss:$24 sps:$4 sm:$0xff]  }
 0xa74   :  { %12914 = vst [vmem:[#allocation77_spill] sm:$0xff] %v10576_v62 }
 0xa75   :  { %4061 = vmatmul.mubr.bf16.gmra.mrb[92].mxu1 %v10472_v0  ;;  %v10581_v0 = vld [vmem:[#allocation11 + $0x188] ss:$24 sps:$4 sm:$0xff]  }
 0xa76   :  { %4661 = vmatpush1.bf16.msra.mxu1 %v10555_v48  ;;  %4702 = vmatpush1.bf16.msra.mxu0 %v10557_v33  ;;  %12915 = vst [vmem:[#allocation78_spill] sm:$0xff] %v10581_v0  ;;  %v10583_v33 = vld [vmem:[#allocation11 + $0x190] ss:$24 sps:$4 sm:$0xff]  }
 0xa77   :  { %4662 = vmatprep.subr.bf16.mxu1 %v10561_v63  ;;  %4703 = vmatprep.subr.bf16.mxu0 %v10563_v10  ;;  %12916 = vst [vmem:[#allocation47_spill] sm:$0xff] %v10583_v33  ;;  %v10589_v10 = vld [vmem:[#allocation11 + $0x1bc] ss:$24 sps:$4 sm:$0xff]  }
 0xa78   :  { %4680 = vmatprep.mubr.bf16.mxu1 %v12898_v15  ;;  %12918 = vst [vmem:[#allocation71_spill] sm:$0xff] %v10589_v10 }
 0xa7a   :  { %4663 = vmatpush1.bf16.msra.mxu1 %v10568_v37  ;;  %4704 = vmatpush1.bf16.msra.mxu0 %v10570_v9 }
 0xa7b   :  { %v10585_v17 = vpop.f32.mrb[80].mxu0  ;;  %4664 = vmatprep.subr.bf16.mxu1 %v10574_v23  ;;  %4705 = vmatprep.subr.bf16.mxu0 %v10576_v62  ;;  %v10607_v62 = vld [vmem:[#allocation11 + $0x1ec] ss:$24 sps:$4 sm:$0xff]  }
 0xa7c   :  { %12917 = vst [vmem:[#allocation44_spill] sm:$0xff] %v10585_v17  ;;  %v10593_v36 = vpop.f32.mrb[81].mxu0  ;;  %12925 = vst [vmem:[#allocation74_spill] sm:$0xff] %v10607_v62  ;;  %v10633_v17 = vld [vmem:[#allocation11 + $0x218] ss:$24 sps:$4 sm:$0xff]  }
 0xa7d   :  { %12920 = vst [vmem:[#allocation118_spill] sm:$0xff] %v10593_v36  ;;  %v10595_v56 = vpop.f32.mrb[82].mxu0  ;;  %12935 = vst [vmem:[#allocation37_spill] sm:$0xff] %v10633_v17 }
 0xa7e   :  { %12921 = vst [vmem:[#allocation119_spill] sm:$0xff] %v10595_v56  ;;  %4665 = vmatpush1.bf16.msra.mxu1 %v10581_v0  ;;  %4706 = vmatpush1.bf16.msra.mxu0 %v10583_v33  ;;  %v10599_v9 = vpop.f32.mrb[83].mxu0  ;;  %v10613_v56 = vld [vmem:[#allocation11 + $0x1e8] ss:$24 sps:$4 sm:$0xff]  }
 0xa7f   :  { %12922 = vst [vmem:[#allocation120_spill] sm:$0xff] %v10599_v9  ;;  %4666 = vmatprep.subr.bf16.mxu1 %v10589_v10  ;;  %4707 = vmatprep.subr.bf16.mxu0 %v10591_v41  ;;  %12927 = vst [vmem:[#allocation19_spill] sm:$0xff] %v10613_v56  ;;  %v10615_v33 = vld [vmem:[#allocation11 + $0x1f0] ss:$24 sps:$4 sm:$0xff]   ;;  %v10623_v41 = vld [vmem:[#allocation11 + $0x224] ss:$24 sps:$4 sm:$0xff]  }
 0xa80   :  { %12928 = vst [vmem:[#allocation20_spill] sm:$0xff] %v10615_v33  ;;  %12931 = vst [vmem:[#allocation24_spill] sm:$0xff] %v10623_v41 }
 0xa82   :  { %4667 = vmatpush1.bf16.msra.mxu1 %v10601_v43  ;;  %4708 = vmatpush1.bf16.msra.mxu0 %v10603_v19 }
 0xa83   :  { %v10617_v9 = vpop.f32.mrb[84].mxu0  ;;  %4668 = vmatprep.subr.bf16.mxu1 %v10607_v62  ;;  %4709 = vmatprep.subr.bf16.mxu0 %v10609_v53  ;;  %v10639_v53 = vld [vmem:[#allocation11 + $0x24c] ss:$24 sps:$4 sm:$0xff]  }
 0xa84   :  { %12929 = vst [vmem:[#allocation21_spill] sm:$0xff] %v10617_v9  ;;  %v10625_v8 = vpop.f32.mrb[85].mxu0  ;;  %v10635_v9 = vld [vmem:[#allocation11 + $0x220] ss:$24 sps:$4 sm:$0xff]   ;;  %12937 = vst [vmem:[#allocation89_spill] sm:$0xff] %v10639_v53 }
 0xa85   :  { %12932 = vst [vmem:[#allocation26_spill] sm:$0xff] %v10625_v8  ;;  %v10627_v36 = vpop.f32.mrb[86].mxu0  ;;  %12936 = vst [vmem:[#allocation38_spill] sm:$0xff] %v10635_v9  ;;  %v10647_v8 = vld [vmem:[#allocation11 + $0x250] ss:$24 sps:$4 sm:$0xff]  }
 0xa86   :  { %12933 = vst [vmem:[#allocation87_spill] sm:$0xff] %v10627_v36  ;;  %4669 = vmatpush1.bf16.msra.mxu1 %v10613_v56  ;;  %4710 = vmatpush1.bf16.msra.mxu0 %v10615_v33  ;;  %v10631_v19 = vpop.f32.mrb[87].mxu0  ;;  %v10645_v36 = vld [vmem:[#allocation11 + $0x248] ss:$24 sps:$4 sm:$0xff]   ;;  %12940 = vst [vmem:[#allocation40_spill] sm:$0xff] %v10647_v8 }
 0xa87   :  { %12934 = vst [vmem:[#allocation88_spill] sm:$0xff] %v10631_v19  ;;  %4670 = vmatprep.subr.bf16.mxu1 %v10621_v26  ;;  %4711 = vmatprep.subr.bf16.mxu0 %v10623_v41  ;;  %12939 = vst [vmem:[#allocation39_spill] sm:$0xff] %v10645_v36  ;;  %v10653_v33 = vld [vmem:[#allocation11 + $0x27c] ss:$24 sps:$4 sm:$0xff]  }
 0xa88   :  { %12942 = vst [vmem:[#allocation91_spill] sm:$0xff] %v10653_v33  ;;  %v10655_v41 = vld [vmem:[#allocation11 + $0x284] ss:$24 sps:$4 sm:$0xff]  }
 0xa89   :  { %12943 = vst [vmem:[#allocation84_spill] sm:$0xff] %v10655_v41 }
 0xa8a   :  { %4671 = vmatpush1.bf16.msra.mxu1 %v10633_v17  ;;  %4712 = vmatpush1.bf16.msra.mxu0 %v10635_v9 }
 0xa8b   :  { %v10649_v19 = vpop.f32.mrb[88].mxu0  ;;  %4672 = vmatprep.subr.bf16.mxu1 %v10639_v53  ;;  %4713 = vmatprep.subr.bf16.mxu0 %v10641_v61  ;;  %v10671_v61 = vld [vmem:[#allocation11 + $0x2ac] ss:$24 sps:$4 sm:$0xff]  }
 0xa8c   :  { %12941 = vst [vmem:[#allocation23_spill] sm:$0xff] %v10649_v19  ;;  %v10657_v57 = vpop.f32.mrb[89].mxu0  ;;  %v10667_v19 = vld [vmem:[#allocation11 + $0x280] ss:$24 sps:$4 sm:$0xff]   ;;  %12948 = vst [vmem:[#allocation95_spill] sm:$0xff] %v10671_v61 }
 0xa8d   :  { %12944 = vst [vmem:[#allocation25_spill] sm:$0xff] %v10657_v57  ;;  %v10659_v54 = vpop.f32.mrb[90].mxu0  ;;  %v10679_v57 = vld [vmem:[#allocation11 + $0x2b0] ss:$24 sps:$4 sm:$0xff]  }
 0xa8e   :  { %12945 = vst [vmem:[#allocation92_spill] sm:$0xff] %v10659_v54  ;;  %4673 = vmatpush1.bf16.msra.mxu1 %v10645_v36  ;;  %4714 = vmatpush1.bf16.msra.mxu0 %v10647_v8  ;;  %v10663_v9 = vpop.f32.mrb[91].mxu0  ;;  %v10677_v54 = vld [vmem:[#allocation11 + $0x2a8] ss:$24 sps:$4 sm:$0xff]   ;;  %v10685_v8 = vld [vmem:[#allocation11 + $0x2e4] ss:$24 sps:$4 sm:$0xff]  }
 0xa8f   :  { %12946 = vst [vmem:[#allocation93_spill] sm:$0xff] %v10663_v9  ;;  %4674 = vmatprep.subr.bf16.mxu1 %v10653_v33  ;;  %4715 = vmatprep.subr.bf16.mxu0 %v10655_v41  ;;  %12949 = vst [vmem:[#allocation96_spill] sm:$0xff] %v10677_v54  ;;  %v10683_v9 = vld [vmem:[#allocation11 + $0x2dc] ss:$24 sps:$4 sm:$0xff]   ;;  %v10689_v41 = vld [vmem:[#allocation11 + $0x2d8] ss:$24 sps:$4 sm:$0xff]  }
 0xa90   :  { %12950 = vst [vmem:[#allocation97_spill] sm:$0xff] %v10683_v9  ;;  %12951 = vst [vmem:[#allocation98_spill] sm:$0xff] %v10689_v41 }
 0xa92   :  { %4675 = vmatpush1.bf16.msra.mxu1 %v10665_v16  ;;  %4716 = vmatpush1.bf16.msra.mxu0 %v10667_v19  ;;  %v10691_v16 = vld [vmem:[#allocation11 + $0x2e0] ss:$24 sps:$4 sm:$0xff]  }
 0xa93   :  { %4676 = vmatprep.subr.bf16.mxu1 %v10671_v61  ;;  %4717 = vmatprep.subr.bf16.mxu0 %v10673_v13 }
 0xa96   :  { %4677 = vmatpush1.bf16.msra.mxu1 %v10677_v54  ;;  %4718 = vmatpush1.bf16.msra.mxu0 %v10679_v57 }
 0xa97   :  { %4678 = vmatprep.subr.bf16.mxu1 %v10683_v9  ;;  %4719 = vmatprep.subr.bf16.mxu0 %v10685_v8 }
 0xa9a   :  { %4679 = vmatpush1.bf16.msra.mxu1 %v10689_v41  ;;  %4720 = vmatpush1.bf16.msra.mxu0 %v10691_v16 }
 0xa9b   :  { %4784 = vmatprep.subr.bf16.mxu1 %v10325_v35  ;;  %4825 = vmatprep.subr.bf16.mxu0 %v10409_v21 }
 0xa9d   :  { %4681 = vmatmul.mubr.bf16.vlgmr.msra.gmra.mrb[96].mxu1 %v12898_v15  ;;  %4722 = vmatmul.mubr.bf16.vlgmr.msra.gmra.mrb[100].mxu0 %v12898_v15 }
 0xa9e   :  { %4785 = vmatpush1.bf16.msra.mxu1 %v10327_v45  ;;  %4826 = vmatpush1.bf16.msra.mxu0 %v10478_v44  ;;  %v12952_v45 = vld [vmem:[#allocation103_spill] sm:$0xff] }
 0xa9f   :  { %4786 = vmatprep.subr.bf16.mxu1 %v10330_v12  ;;  %4827 = vmatprep.subr.bf16.mxu0 %v10482_v29  ;;  %v12953_v12 = vld [vmem:[#allocation94_spill] sm:$0xff] }
 0xaa2   :  { %4787 = vmatpush1.bf16.msra.mxu1 %v10335_v42  ;;  %4828 = vmatpush1.bf16.msra.mxu0 %v10490_v5  ;;  %v12954_v42 = vld [vmem:[#allocation104_spill] sm:$0xff] }
 0xaa3   :  { %4788 = vmatprep.subr.bf16.mxu1 %v10338_v24  ;;  %4829 = vmatprep.subr.bf16.mxu0 %v10496_v49  ;;  %v12955_v24 = vld [vmem:[#allocation105_spill] sm:$0xff] }
 0xaa6   :  { %4789 = vmatpush1.bf16.msra.mxu1 %v10341_v1  ;;  %4830 = vmatpush1.bf16.msra.mxu0 %v10504_v40  ;;  %v12956_v1 = vld [vmem:[#allocation106_spill] sm:$0xff] }
 0xaa7   :  { %4790 = vmatprep.subr.bf16.mxu1 %v10344_v6  ;;  %4831 = vmatprep.subr.bf16.mxu0 %v10510_v47  ;;  %v12957_v6 = vld [vmem:[#allocation107_spill] sm:$0xff] }
 0xaaa   :  { %4791 = vmatpush1.bf16.msra.mxu1 %v10349_v2  ;;  %4832 = vmatpush1.bf16.msra.mxu0 %v10517_v51  ;;  %v12958_v2 = vld [vmem:[#allocation108_spill] sm:$0xff] }
 0xaab   :  { %4792 = vmatprep.subr.bf16.mxu1 %v10352_v31  ;;  %4833 = vmatprep.subr.bf16.mxu0 %v10523_v32 }
 0xaae   :  { %4793 = vmatpush1.bf16.msra.mxu1 %v10355_v59  ;;  %4834 = vmatpush1.bf16.msra.mxu0 %v10530_v60 }
 0xaaf   :  { %4794 = vmatprep.subr.bf16.mxu1 %v10358_v27  ;;  %4835 = vmatprep.subr.bf16.mxu0 %v10536_v30 }
 0xab2   :  { %4795 = vmatpush1.bf16.msra.mxu1 %v10362_v7  ;;  %4836 = vmatpush1.bf16.msra.mxu0 %v10543_v38 }
 0xab3   :  { %4796 = vmatprep.subr.bf16.mxu1 %v10365_v14  ;;  %4837 = vmatprep.subr.bf16.mxu0 %v10548_v50  ;;  %v10776_v14 = vld [vmem:[%s11966_s7] sm:$0x3f] }
 0xab6   :  { %4797 = vmatpush1.bf16.msra.mxu1 %v10368_v20  ;;  %4838 = vmatpush1.bf16.msra.mxu0 %v10555_v48 }
 0xab7   :  { %4798 = vmatprep.subr.bf16.mxu1 %v10371_v52  ;;  %4839 = vmatprep.subr.bf16.mxu0 %v10561_v63 }
 0xaba   :  { %4799 = vmatpush1.bf16.msra.mxu1 %v10374_v58  ;;  %4840 = vmatpush1.bf16.msra.mxu0 %v10568_v37 }
 0xabb   :  { %4800 = vmatprep.subr.bf16.mxu1 %v10377_v34  ;;  %4841 = vmatprep.subr.bf16.mxu0 %v10574_v23 }
 0xabe   :  { %4801 = vmatpush1.bf16.msra.mxu1 %v10380_v25  ;;  %4842 = vmatpush1.bf16.msra.mxu0 %v10581_v0  ;;  %v12967_v25 = vld [vmem:[#allocation33_spill] sm:$0xff] }
 0xabf   :  { %4802 = vmatprep.subr.bf16.mxu1 %v10383_v46  ;;  %4843 = vmatprep.subr.bf16.mxu0 %v10589_v10  ;;  %v10793_v46 = vrot.slane %v10776_v14, %v12967_v25 }
 0xac1   :  { %12968 = vst [vmem:[#allocation58_spill] sm:$0xff] %v10793_v46 }
 0xac2   :  { %4803 = vmatpush1.bf16.msra.mxu1 %v10386_v4  ;;  %4844 = vmatpush1.bf16.msra.mxu0 %v10601_v43 }
 0xac3   :  { %4804 = vmatprep.subr.bf16.mxu1 %v10389_v39  ;;  %4845 = vmatprep.subr.bf16.mxu0 %v10607_v62 }
 0xac6   :  { %4805 = vmatpush1.bf16.msra.mxu1 %v10392_v28  ;;  %4846 = vmatpush1.bf16.msra.mxu0 %v10613_v56 }
 0xac7   :  { %4806 = vmatprep.subr.bf16.mxu1 %v10395_v18  ;;  %4847 = vmatprep.subr.bf16.mxu0 %v10621_v26 }
 0xaca   :  { %4807 = vmatpush1.bf16.msra.mxu1 %v10398_v55  ;;  %4848 = vmatpush1.bf16.msra.mxu0 %v10633_v17 }
 0xacb   :  { %4808 = vmatprep.subr.bf16.mxu1 %v10401_v3  ;;  %4849 = vmatprep.subr.bf16.mxu0 %v10639_v53 }
 0xace   :  { %4809 = vmatpush1.bf16.msra.mxu1 %v10404_v22  ;;  %4850 = vmatpush1.bf16.msra.mxu0 %v10645_v36 }
 0xacf   :  { %4810 = vmatprep.subr.bf16.mxu1 %v10407_v11  ;;  %4851 = vmatprep.subr.bf16.mxu0 %v10653_v33 }
 0xad2   :  { %4811 = vmatpush1.bf16.msra.mxu1 %v12952_v45  ;;  %4852 = vmatpush1.bf16.msra.mxu0 %v12953_v12 }
 0xad3   :  { %4812 = vmatprep.subr.bf16.mxu1 %v12954_v42  ;;  %4853 = vmatprep.subr.bf16.mxu0 %v10671_v61  ;;  %v12975_v61 = vld [vmem:[#allocation110_spill] sm:$0xff] }
 0xad6   :  { %4813 = vmatpush1.bf16.msra.mxu1 %v12955_v24  ;;  %4854 = vmatpush1.bf16.msra.mxu0 %v10677_v54 }
 0xad7   :  { %4814 = vmatprep.subr.bf16.mxu1 %v12956_v1  ;;  %4855 = vmatprep.subr.bf16.mxu0 %v10683_v9 }
 0xada   :  { %4815 = vmatpush1.bf16.msra.mxu1 %v12957_v6  ;;  %4856 = vmatpush1.bf16.msra.mxu0 %v10689_v41 }
 0xadb   :  { %4866 = vmatprep.subr.bf16.mxu1 %v12958_v2  ;;  %4961 = vmatprep.subr.bf16.mxu0 %v10325_v35  ;;  %v10785_v35 = vld [vmem:[%s11967_s8] sm:$0x3f] }
 0xadc   :  { %v10797_v15 = vrot.slane %v10785_v35, %v12967_v25 }
 0xade   :  { %12969 = vst [vmem:[#allocation59_spill] sm:$0xff] %v10797_v15 }
 0xb28   :  { %v10765_v31 = vpop.f32.mrb[76].mxu1  ;;  %v10767_v59 = vpop.f32.mrb[92].mxu0 }
 0xb29   :  { %12959 = vst [vmem:[#allocation99_spill] sm:$0xff] %v10765_v31  ;;  %12960 = vst [vmem:[#allocation100_spill] sm:$0xff] %v10767_v59  ;;  %v10769_v27 = vpop.f32.mrb[77].mxu1  ;;  %v10771_v7 = vpop.f32.mrb[93].mxu0  ;;  %v12974_v31 = vld [vmem:[#allocation65_spill] sm:$0xff] }
 0xb2a   :  { %12961 = vst [vmem:[#allocation101_spill] sm:$0xff] %v10769_v27  ;;  %12962 = vst [vmem:[#allocation102_spill] sm:$0xff] %v10771_v7  ;;  %v10778_v20 = vpop.f32.mrb[78].mxu1  ;;  %v10780_v52 = vpop.f32.mrb[94].mxu0  ;;  %v10813_v41 = vrot.slane %v10776_v14, %v12974_v31 }
 0xb2b   :  { %12963 = vst [vmem:[#allocation66_spill] sm:$0xff] %v10778_v20  ;;  %12964 = vst [vmem:[#allocation83_spill] sm:$0xff] %v10780_v52  ;;  %v10787_v58 = vpop.f32.mrb[79].mxu1  ;;  %v10789_v34 = vpop.f32.mrb[95].mxu0  ;;  %v12970_v20 = vld [vmem:[#allocation36_spill] sm:$0xff] }
 0xb2c   :  { %12965 = vst [vmem:[#allocation68_spill] sm:$0xff] %v10787_v58  ;;  %12966 = vst [vmem:[#allocation57_spill] sm:$0xff] %v10789_v34  ;;  %v10801_v52 = vrot.slane %v10776_v14, %v12970_v20  ;;  %v10805_v7 = vrot.slane %v10785_v35, %v12970_v20  ;;  %v12973_v34 = vld [vmem:[#allocation109_spill] sm:$0xff]  ;;  %v12976_v20 = vld [vmem:[#allocation67_spill] sm:$0xff] }
 0xb2d   :  { %v3887_v59 = vadd.f32 %v12973_v34, %v10793_v46  ;;  %v10822_v33 = vrot.slane %v10776_v14, %v12976_v20 }
 0xb2e   :  { %12971 = vst [vmem:[#allocation60_spill] sm:$0xff] %v10801_v52  ;;  %12972 = vst [vmem:[#allocation79_spill] sm:$0xff] %v10805_v7  ;;  %v3889_v12 = vadd.f32 %v12975_v61, %v10801_v52 }
 0xb30   :  { %v10807_v27 = vpop.f32.mrb[80].mxu1  ;;  %v4641_v58 = vpop.f32.mrb[96].mxu0 }
 0xb31   :  { %v4642_v25 = vadd.f32 %v4641_v58, %v10797_v15  ;;  %v10816_v9 = vpop.f32.mrb[81].mxu1  ;;  %v4643_v54 = vpop.f32.mrb[97].mxu0 }
 0xb32   :  { %v4644_v36 = vadd.f32 %v4643_v54, %v10805_v7  ;;  %v4036_v53 = vpop.f32.mrb[82].mxu1  ;;  %v4645_v34 = vpop.f32.mrb[98].mxu0 }
 0xb33   :  { %v4730_v46 = vadd.f32 %v4642_v25, %v3887_v59  ;;  %v10826_v17 = vadd.f32 %v4036_v53, %v10813_v41  ;;  %v4038_v26 = vpop.f32.mrb[83].mxu1  ;;  %v4646_v58 = vpop.f32.mrb[99].mxu0 }
 0xb34   :  { %v4731_v15 = vadd.f32 %v4644_v36, %v3889_v12  ;;  %v10829_v56 = vadd.f32 %v4038_v26, %v10822_v33 }
 0xb35   :  { %12977 = vst [vmem:[#allocation80_spill] sm:$0xff] %v10826_v17 }
 0xb36   :  { %12978 = vst [vmem:[#allocation86_spill] sm:$0xff] %v10829_v56 }
 0xb38   :  { %v4042_v62 = vpop.f32.mrb[84].mxu1 }
 0xb39   :  { %v10832_v61 = vadd.f32 %v4042_v62, %v10813_v41  ;;  %v4044_v52 = vpop.f32.mrb[85].mxu1 }
 0xb3a   :  { %v10835_v43 = vadd.f32 %v4044_v52, %v10822_v33  ;;  %v4046_v54 = vpop.f32.mrb[86].mxu1 }
 0xb3b   :  { %12979 = vst [vmem:[#allocation18_spill] sm:$0xff] %v10832_v61  ;;  %v10838_v59 = vadd.f32 %v4046_v54, %v10813_v41  ;;  %v4048_v53 = vpop.f32.mrb[87].mxu1  ;;  %v12999_v61 = vld [vmem:[#allocation118_spill] sm:$0xff] }
 0xb3c   :  { %12980 = vst [vmem:[#allocation85_spill] sm:$0xff] %v10835_v43  ;;  %v10841_v25 = vadd.f32 %v4048_v53, %v10822_v33  ;;  %v6895_v43 = vmul.f32 -1.442695, %v4731_v15  ;;  %v12995_v15 = vld [vmem:[#allocation35_spill] sm:$0xff] }
 0xb3d   :  { %12981 = vst [vmem:[#allocation17_spill] sm:$0xff] %v10838_v59 }
 0xb3e   :  { %12982 = vst [vmem:[#allocation42_spill] sm:$0xff] %v10841_v25 }
 0xb40   :  { %v4052_v36 = vpop.f32.mrb[88].mxu1 }
 0xb41   :  { %v10844_v26 = vadd.f32 %v4052_v36, %v10813_v41  ;;  %v4054_v12 = vpop.f32.mrb[89].mxu1 }
 0xb42   :  { %v10847_v62 = vadd.f32 %v4054_v12, %v10822_v33  ;;  %v4056_v34 = vpop.f32.mrb[90].mxu1 }
 0xb43   :  { %12983 = vst [vmem:[#allocation46_spill] sm:$0xff] %v10844_v26  ;;  %v10850_v52 = vadd.f32 %v4056_v34, %v10813_v41  ;;  %v4058_v58 = vpop.f32.mrb[91].mxu1 }
 0xb44   :  { %12984 = vst [vmem:[#allocation41_spill] sm:$0xff] %v10847_v62  ;;  %v10853_v54 = vadd.f32 %v4058_v58, %v10822_v33 }
 0xb45   :  { %12985 = vst [vmem:[#allocation45_spill] sm:$0xff] %v10850_v52  ;;  %v6894_v52 = vmul.f32 -1.442695, %v4730_v46  ;;  %v10877_v46 = vrot.slane %v10785_v35, %v12974_v31 }
 0xb46   :  { %12986 = vst [vmem:[#allocation61_spill] sm:$0xff] %v10853_v54 }
 0xb47   :  { %7819 = vpow2.f32 %v6894_v52  ;;  %12994 = vst [vmem:[#allocation104_spill] sm:$0xff] %v10877_v46  ;;  %v10889_v52 = vrot.slane %v10785_v35, %v12976_v20 }
 0xb48   :  { %v4062_v59 = vpop.f32.mrb[92].mxu1  ;;  %7821 = vpow2.f32 %v6895_v43  ;;  %v10881_v43 = vrot.slane %v10776_v14, %v12995_v15 }
 0xb49   :  { %v10856_v53 = vadd.f32 %v4062_v59, %v10813_v41  ;;  %v4064_v25 = vpop.f32.mrb[93].mxu1 }
 0xb4a   :  { %v10859_v36 = vadd.f32 %v4064_v25, %v10822_v33  ;;  %v4066_v26 = vpop.f32.mrb[94].mxu1  ;;  %v12991_v25 = vld [vmem:[#allocation34_spill] sm:$0xff]  ;;  %12996 = vst [vmem:[#allocation105_spill] sm:$0xff] %v10881_v43 }
 0xb4b   :  { %12987 = vst [vmem:[#allocation62_spill] sm:$0xff] %v10856_v53  ;;  %v10862_v12 = vadd.f32 %v4066_v26, %v10813_v41  ;;  %v4068_v62 = vpop.f32.mrb[95].mxu1  ;;  %v10873_v26 = vrot.slane %v10785_v35, %v12991_v25 }
 0xb4c   :  { %12988 = vst [vmem:[#allocation63_spill] sm:$0xff] %v10859_v36  ;;  %v10865_v34 = vadd.f32 %v4068_v62, %v10822_v33  ;;  %v10869_v36 = vrot.slane %v10776_v14, %v12991_v25  ;;  %v10885_v62 = vrot.slane %v10785_v35, %v12995_v15  ;;  %v3962_v15 = vadd.f32 %v12999_v61, %v10881_v43 }
 0xb4d   :  { %12989 = vst [vmem:[#allocation64_spill] sm:$0xff] %v10862_v12  ;;  %12993 = vst [vmem:[#allocation103_spill] sm:$0xff] %v10873_v26 }
 0xb4e   :  { %12990 = vst [vmem:[#allocation81_spill] sm:$0xff] %v10865_v34  ;;  %12992 = vst [vmem:[#allocation82_spill] sm:$0xff] %v10869_v36 }
 0xb4f   :  { %12997 = vst [vmem:[#allocation106_spill] sm:$0xff] %v10885_v62 }
 0xb51   :  { %v7820_v58 = vpop.eup %7819 }
 0xb52   :  { %v7822_v54 = vpop.eup %7821  ;;  %v4738_v59 = vadd.f32 1.0, %v7820_v58  ;;  %v12998_v58 = vld [vmem:[#allocation44_spill] sm:$0xff] }
 0xb53   :  { %v4739_v53 = vadd.f32 1.0, %v7822_v54 }
 0xb54   :  { %7823 = vrcp.f32 %v4738_v59  ;;  %v3960_v59 = vadd.f32 %v12998_v58, %v10869_v36  ;;  %v4033_v58 = vadd.f32 %v10807_v27, %v10813_v41 }
 0xb55   :  { %7825 = vrcp.f32 %v4739_v53 }
 0xb5e   :  { %v7824_v12 = vpop.eup %7823 }
 0xb5f   :  { %v7826_v7 = vpop.eup %7825 }
 0xb70   :  { %v4682_v54 = vpop.f32.mrb[96].mxu1  ;;  %v4723_v53 = vpop.f32.mrb[100].mxu0 }
 0xb71   :  { %v4683_v31 = vadd.f32 %v4682_v54, %v10873_v26  ;;  %v4724_v25 = vadd.f32 %v4723_v53, %v10877_v46  ;;  %v4684_v34 = vpop.f32.mrb[97].mxu1  ;;  %v4725_v14 = vpop.f32.mrb[101].mxu0  ;;  %v4035_v46 = vadd.f32 %v10816_v9, %v10822_v33 }
 0xb72   :  { %v4685_v56 = vadd.f32 %v4684_v34, %v10885_v62  ;;  %v4726_v20 = vadd.f32 %v4725_v14, %v10889_v52  ;;  %v4686_v35 = vpop.f32.mrb[98].mxu1  ;;  %v4727_v17 = vpop.f32.mrb[102].mxu0 }
 0xb73   :  { %v4744_v36 = vadd.f32 %v4683_v31, %v3960_v59  ;;  %v4758_v54 = vmul.f32 %v7824_v12, %v4724_v25  ;;  %v4687_v26 = vpop.f32.mrb[99].mxu1  ;;  %v4728_v53 = vpop.f32.mrb[103].mxu0  ;;  %v13003_v25 = vld [vmem:[#allocation51_spill] sm:$0xff] }
 0xb74   :  { %v4745_v10 = vadd.f32 %v4685_v56, %v3962_v15  ;;  %v4759_v0 = vmul.f32 %v7826_v7, %v4726_v20  ;;  %v10917_v15 = vld [vmem:[#allocation11] ss:$24 sps:$4 sm:$0xff]   ;;  %v10920_v20 = vld [vmem:[#allocation11 + $0x34] ss:$24 sps:$4 sm:$0xff]   ;;  %v10925_v53 = vld [vmem:[#allocation11 + $0x30] ss:$24 sps:$4 sm:$0xff]  }
 0xb75   :  { %v6896_v61 = vmul.f32 -1.442695, %v4744_v36  ;;  %v4760_v43 = vadd.f32 %v4758_v54, %v4033_v58  ;;  %v13004_v58 = vld [vmem:[#allocation52_spill] sm:$0xff]  ;;  %v13005_v54 = vld [vmem:[#allocation75_spill] sm:$0xff] }
 0xb76   :  { %v6897_v34 = vmul.f32 -1.442695, %v4745_v10  ;;  %v4761_v62 = vadd.f32 %v4759_v0, %v4035_v46 }
 0xb77   :  { %7827 = vpow2.f32 %v6896_v61  ;;  %v10928_v61 = vld [vmem:[#allocation11 + $0x64] ss:$24 sps:$4 sm:$0xff]  }
 0xb78   :  { %7829 = vpow2.f32 %v6897_v34  ;;  %v13006_v34 = vld [vmem:[#allocation76_spill] sm:$0xff] }
 0xb81   :  { %v7828_v17 = vpop.eup %7827 }
 0xb82   :  { %v4752_v14 = vadd.f32 1.0, %v7828_v17  ;;  %v7830_v35 = vpop.eup %7829  ;;  %v13007_v17 = vld [vmem:[#allocation27_spill] sm:$0xff] }
 0xb83   :  { %v4753_v41 = vadd.f32 1.0, %v7830_v35  ;;  %v10936_v35 = vld [vmem:[#allocation11 + $0x94] ss:$24 sps:$4 sm:$0xff]  }
 0xb84   :  { %7831 = vrcp.f32 %v4752_v14  ;;  %v10933_v14 = vld [vmem:[#allocation11 + $0x60] ss:$24 sps:$4 sm:$0xff]  }
 0xb85   :  { %7833 = vtanh.f32 %v4760_v43 }
 0xb86   :  { %7835 = vrcp.f32 %v4753_v41  ;;  %v13008_v41 = vld [vmem:[#allocation28_spill] sm:$0xff] }
 0xb87   :  { %7837 = vtanh.f32 %v4761_v62  ;;  %v13002_v62 = vld [vmem:[#allocation50_spill] sm:$0xff] }
 0xb8e   :  { %v7832_v27 = vpop.eup %7831 }
 0xb8f   :  { %v7834_v12 = vpop.eup %7833  ;;  %v4764_v26 = vsub.f32 1.0, %v7832_v27  ;;  %v4768_v7 = vmul.f32 0.0, %v7832_v27  ;;  %v13009_v27 = vld [vmem:[#allocation29_spill] sm:$0xff] }
 0xb90   :  { %v7836_v33 = vpop.eup %7835 }
 0xb91   :  { %v4765_v9 = vsub.f32 1.0, %v7836_v33  ;;  %v4766_v56 = vmul.f32 %v7834_v12, %v4764_v26  ;;  %v7838_v36 = vpop.eup %7837  ;;  %v4769_v0 = vmul.f32 0.0, %v7836_v33  ;;  %v10941_v12 = vld [vmem:[#allocation11 + $0x90] ss:$24 sps:$4 sm:$0xff]   ;;  %v10944_v26 = vld [vmem:[#allocation11 + $0xc4] ss:$24 sps:$4 sm:$0xff]  }
 0xb92   :  { %v13010_v33 = vld [vmem:[#allocation30_spill] sm:$0xff] }
 0xb93   :  { %v4767_v10 = vmul.f32 %v7838_v36, %v4765_v9  ;;  %v10903_v46 = vadd.f32 %v4768_v7, %v4766_v56  ;;  %v13011_v9 = vld [vmem:[#allocation31_spill] sm:$0xff]  ;;  %v10949_v56 = vld [vmem:[#allocation11 + $0xc0] ss:$24 sps:$4 sm:$0xff]  }
 0xb94   :  { %13012 = vst [vmem:[#allocation109_spill] sm:$0xff] %v10949_v56  ;;  %v10952_v7 = vld [vmem:[#allocation11 + $0xf4] ss:$24 sps:$4 sm:$0xff]   ;;  %v13014_v36 = vld [vmem:[#allocation32_spill] sm:$0xff] }
 0xb95   :  { %13000 = vst [vmem:[#allocation107_spill] sm:$0xff] %v10903_v46  ;;  %v10905_v59 = vadd.f32 %v4769_v0, %v4767_v10  ;;  %v10911_v43 = vpack.c.bf16 %v10903_v46, %v10903_v46  ;;  %13013 = vst [vmem:[#allocation65_spill] sm:$0xff] %v10952_v7  ;;  %v13015_v10 = vld [vmem:[#allocation53_spill] sm:$0xff]  ;;  %v10957_v0 = vld [vmem:[#allocation11 + $0xf0] ss:$24 sps:$4 sm:$0xff]  }
 0xb96   :  { %13016 = vst [vmem:[#allocation110_spill] sm:$0xff] %v10957_v0 }
 0xb97   :  { %13001 = vst [vmem:[#allocation108_spill] sm:$0xff] %v10905_v59  ;;  %v4783_v31 = vpack.c.bf16 %v10905_v59, %v10905_v59 }
 0xb99   :  { %4816 = vmatprep.mubr.bf16.mxu1 %v4783_v31  ;;  %4857 = vmatprep.mubr.bf16.mxu0 %v4783_v31 }
 0xb9a   :  { %4817 = vmatmul.mubr.bf16.vlgmr.msra.gmra.mrb[100].mxu1 %v10911_v43  ;;  %4858 = vmatmul.mubr.bf16.vlgmr.msra.gmra.mrb[104].mxu0 %v10911_v43 }
 0xb9b   :  { %4867 = vmatpush1.bf16.msra.mxu1 %v13002_v62  ;;  %4898 = vmatprep.mubr.bf16.mxu1 %v4783_v31  ;;  %v10960_v31 = vld [vmem:[#allocation11 + $0x124] ss:$24 sps:$4 sm:$0xff]  }
 0xb9c   :  { %4868 = vmatprep.subr.bf16.mxu1 %v13003_v25  ;;  %4962 = vmatpush1.bf16.msra.mxu0 %v10917_v15  ;;  %13017 = vst [vmem:[#allocation67_spill] sm:$0xff] %v10960_v31 }
 0xb9d   :  { %4963 = vmatprep.subr.bf16.mxu0 %v10920_v20 }
 0xb9f   :  { %4869 = vmatpush1.bf16.msra.mxu1 %v13004_v58 }
 0xba0   :  { %4870 = vmatprep.subr.bf16.mxu1 %v13005_v54  ;;  %4964 = vmatpush1.bf16.msra.mxu0 %v10925_v53 }
 0xba1   :  { %4965 = vmatprep.subr.bf16.mxu0 %v10928_v61 }
 0xba3   :  { %4871 = vmatpush1.bf16.msra.mxu1 %v13006_v34 }
 0xba4   :  { %4872 = vmatprep.subr.bf16.mxu1 %v13007_v17  ;;  %4966 = vmatpush1.bf16.msra.mxu0 %v10933_v14 }
 0xba5   :  { %4967 = vmatprep.subr.bf16.mxu0 %v10936_v35 }
 0xba7   :  { %4873 = vmatpush1.bf16.msra.mxu1 %v13008_v41 }
 0xba8   :  { %4874 = vmatprep.subr.bf16.mxu1 %v13009_v27  ;;  %4968 = vmatpush1.bf16.msra.mxu0 %v10941_v12 }
 0xba9   :  { %4969 = vmatprep.subr.bf16.mxu0 %v10944_v26 }
 0xbab   :  { %4875 = vmatpush1.bf16.msra.mxu1 %v13010_v33  ;;  %v13019_v33 = vld [vmem:[#allocation55_spill] sm:$0xff] }
 0xbac   :  { %4876 = vmatprep.subr.bf16.mxu1 %v13011_v9  ;;  %4970 = vmatpush1.bf16.msra.mxu0 %v10949_v56  ;;  %v13018_v9 = vld [vmem:[#allocation54_spill] sm:$0xff]  ;;  %v10965_v56 = vld [vmem:[#allocation11 + $0x120] ss:$24 sps:$4 sm:$0xff]  }
 0xbad   :  { %4971 = vmatprep.subr.bf16.mxu0 %v10952_v7  ;;  %13020 = vst [vmem:[#allocation34_spill] sm:$0xff] %v10965_v56  ;;  %v10968_v7 = vld [vmem:[#allocation11 + $0x154] ss:$24 sps:$4 sm:$0xff]  }
 0xbae   :  { %13021 = vst [vmem:[#allocation35_spill] sm:$0xff] %v10968_v7 }
 0xbaf   :  { %4877 = vmatpush1.bf16.msra.mxu1 %v13014_v36  ;;  %v13023_v36 = vld [vmem:[#allocation77_spill] sm:$0xff] }
 0xbb0   :  { %4878 = vmatprep.subr.bf16.mxu1 %v13015_v10  ;;  %4972 = vmatpush1.bf16.msra.mxu0 %v10957_v0  ;;  %v13022_v10 = vld [vmem:[#allocation56_spill] sm:$0xff]  ;;  %v10973_v0 = vld [vmem:[#allocation11 + $0x150] ss:$24 sps:$4 sm:$0xff]  }
 0xbb1   :  { %4973 = vmatprep.subr.bf16.mxu0 %v10960_v31  ;;  %v10976_v31 = vld [vmem:[#allocation11 + $0x184] ss:$24 sps:$4 sm:$0xff]  }
 0xbb2   :  { %13024 = vst [vmem:[#allocation44_spill] sm:$0xff] %v10976_v31 }
 0xbb3   :  { %4879 = vmatpush1.bf16.msra.mxu1 %v13018_v9  ;;  %v13026_v9 = vld [vmem:[#allocation72_spill] sm:$0xff] }
 0xbb4   :  { %4880 = vmatprep.subr.bf16.mxu1 %v13019_v33  ;;  %4974 = vmatpush1.bf16.msra.mxu0 %v10965_v56  ;;  %v13025_v33 = vld [vmem:[#allocation47_spill] sm:$0xff]  ;;  %v10981_v56 = vld [vmem:[#allocation11 + $0x180] ss:$24 sps:$4 sm:$0xff]  }
 0xbb5   :  { %4975 = vmatprep.subr.bf16.mxu0 %v10968_v7  ;;  %13027 = vst [vmem:[#allocation118_spill] sm:$0xff] %v10981_v56  ;;  %v10984_v7 = vld [vmem:[#allocation11 + $0x1b4] ss:$24 sps:$4 sm:$0xff]  }
 0xbb6   :  { %13028 = vst [vmem:[#allocation50_spill] sm:$0xff] %v10984_v7 }
 0xbb7   :  { %4881 = vmatpush1.bf16.msra.mxu1 %v13022_v10  ;;  %v13030_v10 = vld [vmem:[#allocation43_spill] sm:$0xff] }
 0xbb8   :  { %4882 = vmatprep.subr.bf16.mxu1 %v13023_v36  ;;  %4976 = vmatpush1.bf16.msra.mxu0 %v10973_v0  ;;  %v13029_v36 = vld [vmem:[#allocation73_spill] sm:$0xff] }
 0xbb9   :  { %4977 = vmatprep.subr.bf16.mxu0 %v10976_v31  ;;  %v13031_v31 = vld [vmem:[#allocation20_spill] sm:$0xff] }
 0xbbb   :  { %4883 = vmatpush1.bf16.msra.mxu1 %v13025_v33  ;;  %v13032_v33 = vld [vmem:[#allocation24_spill] sm:$0xff] }
 0xbbc   :  { %4884 = vmatprep.subr.bf16.mxu1 %v13026_v9  ;;  %4978 = vmatpush1.bf16.msra.mxu0 %v10981_v56  ;;  %v13033_v56 = vld [vmem:[#allocation38_spill] sm:$0xff] }
 0xbbd   :  { %4979 = vmatprep.subr.bf16.mxu0 %v10984_v7  ;;  %v13034_v9 = vld [vmem:[#allocation90_spill] sm:$0xff] }
 0xbbf   :  { %4885 = vmatpush1.bf16.msra.mxu1 %v13029_v36 }
 0xbc0   :  { %4886 = vmatprep.subr.bf16.mxu1 %v13030_v10  ;;  %4980 = vmatpush1.bf16.msra.mxu0 %v10386_v4  ;;  %v13035_v10 = vld [vmem:[#allocation40_spill] sm:$0xff] }
 0xbc1   :  { %4981 = vmatprep.subr.bf16.mxu0 %v10389_v39  ;;  %v13036_v4 = vld [vmem:[#allocation84_spill] sm:$0xff]  ;;  %v13037_v39 = vld [vmem:[#allocation78_spill] sm:$0xff] }
 0xbc3   :  { %4887 = vmatpush1.bf16.msra.mxu1 %v13031_v31 }
 0xbc4   :  { %4888 = vmatprep.subr.bf16.mxu1 %v13032_v33  ;;  %4982 = vmatpush1.bf16.msra.mxu0 %v10392_v28  ;;  %v13038_v28 = vld [vmem:[#allocation71_spill] sm:$0xff] }
 0xbc5   :  { %4983 = vmatprep.subr.bf16.mxu0 %v10395_v18  ;;  %v13039_v18 = vld [vmem:[#allocation48_spill] sm:$0xff] }
 0xbc7   :  { %4889 = vmatpush1.bf16.msra.mxu1 %v13033_v56 }
 0xbc8   :  { %4890 = vmatprep.subr.bf16.mxu1 %v13034_v9  ;;  %4984 = vmatpush1.bf16.msra.mxu0 %v10398_v55  ;;  %v13040_v55 = vld [vmem:[#allocation74_spill] sm:$0xff] }
 0xbc9   :  { %4985 = vmatprep.subr.bf16.mxu0 %v10401_v3  ;;  %v13041_v3 = vld [vmem:[#allocation19_spill] sm:$0xff] }
 0xbcb   :  { %4891 = vmatpush1.bf16.msra.mxu1 %v13035_v10 }
 0xbcc   :  { %4892 = vmatprep.subr.bf16.mxu1 %v13036_v4  ;;  %4986 = vmatpush1.bf16.msra.mxu0 %v10404_v22  ;;  %v13042_v22 = vld [vmem:[#allocation22_spill] sm:$0xff] }
 0xbcd   :  { %4987 = vmatprep.subr.bf16.mxu0 %v10407_v11  ;;  %v13043_v11 = vld [vmem:[#allocation37_spill] sm:$0xff] }
 0xbcf   :  { %4893 = vmatpush1.bf16.msra.mxu1 %v10667_v19 }
 0xbd0   :  { %4894 = vmatprep.subr.bf16.mxu1 %v10673_v13  ;;  %4988 = vmatpush1.bf16.msra.mxu0 %v12952_v45  ;;  %v13057_v45 = vld [vmem:[#allocation59_spill] sm:$0xff] }
 0xbd1   :  { %4989 = vmatprep.subr.bf16.mxu0 %v12954_v42 }
 0xbd3   :  { %4895 = vmatpush1.bf16.msra.mxu1 %v10679_v57 }
 0xbd4   :  { %4896 = vmatprep.subr.bf16.mxu1 %v10685_v8  ;;  %4990 = vmatpush1.bf16.msra.mxu0 %v12955_v24  ;;  %v13058_v24 = vld [vmem:[#allocation103_spill] sm:$0xff] }
 0xbd5   :  { %4991 = vmatprep.subr.bf16.mxu0 %v12956_v1 }
 0xbd7   :  { %4897 = vmatpush1.bf16.msra.mxu1 %v10691_v16 }
 0xbd8   :  { %5002 = vmatprep.subr.bf16.mxu1 %v10409_v21  ;;  %4992 = vmatpush1.bf16.msra.mxu0 %v12957_v6  ;;  %v13044_v21 = vld [vmem:[#allocation89_spill] sm:$0xff] }
 0xbd9   :  { %5043 = vmatprep.subr.bf16.mxu0 %v12958_v2 }
 0xbda   :  { %4899 = vmatmul.mubr.bf16.vlgmr.msra.gmra.mrb[104].mxu1 %v10911_v43  ;;  %v13059_v43 = vld [vmem:[#allocation60_spill] sm:$0xff] }
 0xbdb   :  { %5003 = vmatpush1.bf16.msra.mxu1 %v10478_v44  ;;  %v13049_v44 = vld [vmem:[#allocation96_spill] sm:$0xff] }
 0xbdc   :  { %5004 = vmatprep.subr.bf16.mxu1 %v10482_v29  ;;  %v13050_v29 = vld [vmem:[#allocation97_spill] sm:$0xff] }
 0xbdf   :  { %5005 = vmatpush1.bf16.msra.mxu1 %v10490_v5  ;;  %v13051_v5 = vld [vmem:[#allocation98_spill] sm:$0xff] }
 0xbe0   :  { %5006 = vmatprep.subr.bf16.mxu1 %v10496_v49  ;;  %v11047_v49 = vld [vmem:[#allocation11 + $0x4] ss:$24 sps:$4 sm:$0xff]  }
 0xbe1   :  { %13052 = vst [vmem:[#allocation51_spill] sm:$0xff] %v11047_v49 }
 0xbe3   :  { %5007 = vmatpush1.bf16.msra.mxu1 %v10504_v40 }
 0xbe4   :  { %5008 = vmatprep.subr.bf16.mxu1 %v10510_v47 }
 0xbe7   :  { %5009 = vmatpush1.bf16.msra.mxu1 %v10517_v51  ;;  %v13053_v51 = vld [vmem:[#allocation58_spill] sm:$0xff] }
 0xbe8   :  { %5010 = vmatprep.subr.bf16.mxu1 %v10523_v32  ;;  %v13054_v32 = vld [vmem:[#allocation111_spill] sm:$0xff] }
 0xbeb   :  { %5011 = vmatpush1.bf16.msra.mxu1 %v10530_v60  ;;  %v3891_v60 = vadd.f32 %v13054_v32, %v13053_v51 }
 0xbec   :  { %5012 = vmatprep.subr.bf16.mxu1 %v10536_v30  ;;  %v13055_v30 = vld [vmem:[#allocation82_spill] sm:$0xff] }
 0xbef   :  { %5013 = vmatpush1.bf16.msra.mxu1 %v10543_v38  ;;  %v13047_v38 = vld [vmem:[#allocation94_spill] sm:$0xff] }
 0xbf0   :  { %5014 = vmatprep.subr.bf16.mxu1 %v10548_v50  ;;  %v13045_v50 = vld [vmem:[#allocation39_spill] sm:$0xff] }
 0xbf3   :  { %5015 = vmatpush1.bf16.msra.mxu1 %v10555_v48  ;;  %v13056_v48 = vld [vmem:[#allocation119_spill] sm:$0xff] }
 0xbf4   :  { %5016 = vmatprep.subr.bf16.mxu1 %v10561_v63  ;;  %v3964_v63 = vadd.f32 %v13056_v48, %v13055_v30 }
 0xbf7   :  { %5017 = vmatpush1.bf16.msra.mxu1 %v10568_v37  ;;  %v13046_v37 = vld [vmem:[#allocation91_spill] sm:$0xff] }
 0xbf8   :  { %5018 = vmatprep.subr.bf16.mxu1 %v10574_v23  ;;  %v13048_v23 = vld [vmem:[#allocation95_spill] sm:$0xff] }
 0xbfb   :  { %5019 = vmatpush1.bf16.msra.mxu1 %v13037_v39  ;;  %v13060_v39 = vld [vmem:[#allocation112_spill] sm:$0xff] }
 0xbfc   :  { %5020 = vmatprep.subr.bf16.mxu1 %v13038_v28  ;;  %v3893_v28 = vadd.f32 %v13060_v39, %v13059_v43 }
 0xbff   :  { %5021 = vmatpush1.bf16.msra.mxu1 %v13039_v18 }
 0xc00   :  { %5022 = vmatprep.subr.bf16.mxu1 %v13040_v55 }
 0xc03   :  { %5023 = vmatpush1.bf16.msra.mxu1 %v13041_v3 }
 0xc04   :  { %5024 = vmatprep.subr.bf16.mxu1 %v13042_v22 }
 0xc07   :  { %5025 = vmatpush1.bf16.msra.mxu1 %v13043_v11 }
 0xc08   :  { %5026 = vmatprep.subr.bf16.mxu1 %v13044_v21 }
 0xc0b   :  { %5027 = vmatpush1.bf16.msra.mxu1 %v13045_v50 }
 0xc0c   :  { %5028 = vmatprep.subr.bf16.mxu1 %v13046_v37 }
 0xc0f   :  { %5029 = vmatpush1.bf16.msra.mxu1 %v13047_v38  ;;  %v13064_v38 = vld [vmem:[#allocation106_spill] sm:$0xff] }
 0xc10   :  { %5030 = vmatprep.subr.bf16.mxu1 %v13048_v23 }
 0xc13   :  { %5031 = vmatpush1.bf16.msra.mxu1 %v13049_v44  ;;  %v13063_v44 = vld [vmem:[#allocation79_spill] sm:$0xff] }
 0xc14   :  { %5032 = vmatprep.subr.bf16.mxu1 %v13050_v29  ;;  %v13062_v29 = vld [vmem:[#allocation120_spill] sm:$0xff] }
 0xc17   :  { %5033 = vmatpush1.bf16.msra.mxu1 %v13051_v5  ;;  %v13061_v5 = vld [vmem:[#allocation105_spill] sm:$0xff] }
 0xc18   :  { %5138 = vmatprep.subr.bf16.mxu1 %v11047_v49  ;;  %v3966_v49 = vadd.f32 %v13062_v29, %v13061_v5 }
 0xc6d   :  { %v4818_v40 = vpop.f32.mrb[100].mxu1  ;;  %v4859_v47 = vpop.f32.mrb[104].mxu0 }
 0xc6e   :  { %v4819_v42 = vadd.f32 %v4818_v40, %v13057_v45  ;;  %v4860_v1 = vadd.f32 %v4859_v47, %v13058_v24  ;;  %v4820_v6 = vpop.f32.mrb[101].mxu1  ;;  %v4861_v2 = vpop.f32.mrb[105].mxu0 }
 0xc6f   :  { %v4821_v23 = vadd.f32 %v4820_v6, %v13063_v44  ;;  %v4862_v37 = vadd.f32 %v4861_v2, %v13064_v38  ;;  %v4822_v32 = vpop.f32.mrb[102].mxu1  ;;  %v4863_v51 = vpop.f32.mrb[106].mxu0 }
 0xc70   :  { %v4907_v50 = vadd.f32 %v4819_v42, %v3891_v60  ;;  %v4921_v48 = vadd.f32 %v4860_v1, %v3964_v63  ;;  %v4823_v30 = vpop.f32.mrb[103].mxu1  ;;  %v4864_v40 = vpop.f32.mrb[107].mxu0 }
 0xc71   :  { %v4908_v45 = vadd.f32 %v4821_v23, %v3893_v28  ;;  %v4922_v47 = vadd.f32 %v4862_v37, %v3966_v49  ;;  %v13065_v37 = vld [vmem:[#allocation104_spill] sm:$0xff] }
 0xc72   :  { %v6898_v24 = vmul.f32 -1.442695, %v4907_v50  ;;  %v6900_v39 = vmul.f32 -1.442695, %v4921_v48  ;;  %v13066_v28 = vld [vmem:[#allocation80_spill] sm:$0xff]  ;;  %v13067_v48 = vld [vmem:[#allocation86_spill] sm:$0xff] }
 0xc73   :  { %v6899_v21 = vmul.f32 -1.442695, %v4908_v45  ;;  %v6901_v43 = vmul.f32 -1.442695, %v4922_v47 }
 0xc74   :  { %7839 = vpow2.f32 %v6898_v24 }
 0xc75   :  { %7841 = vpow2.f32 %v6899_v21 }
 0xc76   :  { %7843 = vpow2.f32 %v6900_v39 }
 0xc77   :  { %7845 = vpow2.f32 %v6901_v43 }
 0xc7e   :  { %v7840_v11 = vpop.eup %7839 }
 0xc7f   :  { %v7842_v29 = vpop.eup %7841  ;;  %v4915_v6 = vadd.f32 1.0, %v7840_v11 }
 0xc80   :  { %v4916_v2 = vadd.f32 1.0, %v7842_v29  ;;  %v7844_v51 = vpop.eup %7843 }
 0xc81   :  { %7847 = vrcp.f32 %v4915_v6  ;;  %v7846_v60 = vpop.eup %7845  ;;  %v4929_v30 = vadd.f32 1.0, %v7844_v51 }
 0xc82   :  { %7849 = vrcp.f32 %v4916_v2  ;;  %v4930_v63 = vadd.f32 1.0, %v7846_v60 }
 0xc83   :  { %7851 = vrcp.f32 %v4929_v30 }
 0xc84   :  { %7853 = vrcp.f32 %v4930_v63 }
 0xc8b   :  { %v7848_v45 = vpop.eup %7847 }
 0xc8c   :  { %v7850_v24 = vpop.eup %7849 }
 0xc8d   :  { %v7852_v47 = vpop.eup %7851 }
 0xc8e   :  { %v7854_v39 = vpop.eup %7853  ;;  %v4941_v29 = vsub.f32 1.0, %v7852_v47 }
 0xc8f   :  { %v4942_v2 = vsub.f32 1.0, %v7854_v39 }
 0xcad   :  { %v4900_v23 = vpop.f32.mrb[104].mxu1 }
 0xcae   :  { %v4901_v50 = vadd.f32 %v4900_v23, %v13065_v37  ;;  %v4902_v49 = vpop.f32.mrb[105].mxu1  ;;  %v4945_v23 = vmul.f32 %v7852_v47, %v10903_v46  ;;  %v13087_v47 = vld [vmem:[#allocation118_spill] sm:$0xff]  ;;  %v13123_v46 = vld [vmem:[#allocation89_spill] sm:$0xff] }
 0xcaf   :  { %v4903_v21 = vadd.f32 %v4902_v49, %v10889_v52  ;;  %v4904_v42 = vpop.f32.mrb[106].mxu1 }
 0xcb0   :  { %v4935_v1 = vmul.f32 %v7848_v45, %v4901_v50  ;;  %v4905_v43 = vpop.f32.mrb[107].mxu1  ;;  %v4946_v50 = vmul.f32 %v7854_v39, %v10905_v59  ;;  %v13076_v42 = vld [vmem:[#allocation110_spill] sm:$0xff]  ;;  %v13088_v39 = vld [vmem:[#allocation43_spill] sm:$0xff]  ;;  %v13122_v59 = vld [vmem:[#allocation37_spill] sm:$0xff] }
 0xcb1   :  { %v4936_v11 = vmul.f32 %v7850_v24, %v4903_v21  ;;  %v13079_v24 = vld [vmem:[#allocation55_spill] sm:$0xff] }
 0xcb2   :  { %v4937_v32 = vadd.f32 %v4935_v1, %v13066_v28  ;;  %v13080_v1 = vld [vmem:[#allocation34_spill] sm:$0xff]  ;;  %v13081_v43 = vld [vmem:[#allocation35_spill] sm:$0xff]  ;;  %v13083_v28 = vld [vmem:[#allocation77_spill] sm:$0xff] }
 0xcb3   :  { %v4938_v40 = vadd.f32 %v4936_v11, %v13067_v48  ;;  %v13082_v11 = vld [vmem:[#allocation56_spill] sm:$0xff]  ;;  %v13085_v48 = vld [vmem:[#allocation47_spill] sm:$0xff] }
 0xcb4   :  { %7855 = vtanh.f32 %v4937_v32  ;;  %v13084_v32 = vld [vmem:[#allocation44_spill] sm:$0xff] }
 0xcb5   :  { %7857 = vtanh.f32 %v4938_v40  ;;  %v13086_v40 = vld [vmem:[#allocation72_spill] sm:$0xff] }
 0xcbe   :  { %v7856_v6 = vpop.eup %7855 }
 0xcbf   :  { %v7858_v51 = vpop.eup %7857  ;;  %v4943_v60 = vmul.f32 %v7856_v6, %v4941_v29  ;;  %v11118_v29 = vld [vmem:[#allocation11 + $0x1b0] ss:$24 sps:$4 sm:$0xff]   ;;  %v11121_v6 = vld [vmem:[#allocation11 + $0x1e4] ss:$24 sps:$4 sm:$0xff]  }
 0xcc0   :  { %v4944_v30 = vmul.f32 %v7858_v51, %v4942_v2  ;;  %13089 = vst [vmem:[#allocation76_spill] sm:$0xff] %v11118_v29  ;;  %13090 = vst [vmem:[#allocation27_spill] sm:$0xff] %v11121_v6  ;;  %v11126_v2 = vld [vmem:[#allocation11 + $0x1e0] ss:$24 sps:$4 sm:$0xff]   ;;  %v11129_v51 = vld [vmem:[#allocation11 + $0x214] ss:$24 sps:$4 sm:$0xff]  }
 0xcc1   :  { %v11068_v63 = vadd.f32 %v4945_v23, %v4943_v60  ;;  %13091 = vst [vmem:[#allocation28_spill] sm:$0xff] %v11126_v2  ;;  %13092 = vst [vmem:[#allocation29_spill] sm:$0xff] %v11129_v51  ;;  %v11137_v60 = vld [vmem:[#allocation11 + $0x244] ss:$24 sps:$4 sm:$0xff]  }
 0xcc2   :  { %v11070_v49 = vadd.f32 %v4946_v50, %v4944_v30  ;;  %13094 = vst [vmem:[#allocation20_spill] sm:$0xff] %v11137_v60  ;;  %v11178_v23 = vld [vmem:[#allocation11 + $0x3c] ss:$24 sps:$4 sm:$0xff]   ;;  %v11184_v30 = vld [vmem:[#allocation11 + $0x6c] ss:$24 sps:$4 sm:$0xff]  }
 0xcc3   :  { %13068 = vst [vmem:[#allocation52_spill] sm:$0xff] %v11068_v63  ;;  %v11076_v21 = vpack.c.bf16 %v11068_v63, %v11068_v63  ;;  %13105 = vst [vmem:[#allocation22_spill] sm:$0xff] %v11178_v23  ;;  %v11187_v50 = vld [vmem:[#allocation11 + $0x68] ss:$24 sps:$4 sm:$0xff]  }
 0xcc4   :  { %13069 = vst [vmem:[#allocation75_spill] sm:$0xff] %v11070_v49  ;;  %v4960_v45 = vpack.c.bf16 %v11070_v49, %v11070_v49  ;;  %13107 = vst [vmem:[#allocation119_spill] sm:$0xff] %v11184_v30 }
 0xcc5   :  { %13108 = vst [vmem:[#allocation112_spill] sm:$0xff] %v11187_v50 }
 0xcc6   :  { %4993 = vmatprep.mubr.bf16.mxu0 %v4960_v45  ;;  %5034 = vmatprep.mubr.bf16.mxu1 %v4960_v45 }
 0xcc7   :  { %4994 = vmatmul.mubr.bf16.vlgmr.msra.gmra.mrb[108].mxu0 %v11076_v21  ;;  %5035 = vmatmul.mubr.bf16.vlgmr.msra.gmra.mrb[108].mxu1 %v11076_v21 }
 0xcc8   :  { %5044 = vmatpush1.bf16.msra.mxu0 %v13002_v62  ;;  %5075 = vmatprep.mubr.bf16.mxu0 %v4960_v45  ;;  %v13070_v62 = vld [vmem:[#allocation30_spill] sm:$0xff]  ;;  %v11190_v45 = vld [vmem:[#allocation11 + $0x9c] ss:$24 sps:$4 sm:$0xff]  }
 0xcc9   :  { %5045 = vmatprep.subr.bf16.mxu0 %v13003_v25  ;;  %5139 = vmatpush1.bf16.msra.mxu1 %v10917_v15  ;;  %v13071_v25 = vld [vmem:[#allocation31_spill] sm:$0xff]  ;;  %13109 = vst [vmem:[#allocation105_spill] sm:$0xff] %v11190_v45 }
 0xcca   :  { %5140 = vmatprep.subr.bf16.mxu1 %v10920_v20 }
 0xccc   :  { %5046 = vmatpush1.bf16.msra.mxu0 %v13004_v58  ;;  %v13072_v58 = vld [vmem:[#allocation109_spill] sm:$0xff] }
 0xccd   :  { %5047 = vmatprep.subr.bf16.mxu0 %v13005_v54  ;;  %5141 = vmatpush1.bf16.msra.mxu1 %v10925_v53  ;;  %v13073_v54 = vld [vmem:[#allocation65_spill] sm:$0xff] }
 0xcce   :  { %5142 = vmatprep.subr.bf16.mxu1 %v10928_v61 }
 0xcd0   :  { %5048 = vmatpush1.bf16.msra.mxu0 %v13006_v34  ;;  %v13074_v34 = vld [vmem:[#allocation32_spill] sm:$0xff] }
 0xcd1   :  { %5049 = vmatprep.subr.bf16.mxu0 %v13007_v17  ;;  %5143 = vmatpush1.bf16.msra.mxu1 %v10933_v14  ;;  %v13075_v17 = vld [vmem:[#allocation53_spill] sm:$0xff] }
 0xcd2   :  { %5144 = vmatprep.subr.bf16.mxu1 %v10936_v35 }
 0xcd4   :  { %5050 = vmatpush1.bf16.msra.mxu0 %v13008_v41  ;;  %v13077_v41 = vld [vmem:[#allocation67_spill] sm:$0xff] }
 0xcd5   :  { %5051 = vmatprep.subr.bf16.mxu0 %v13009_v27  ;;  %5145 = vmatpush1.bf16.msra.mxu1 %v10941_v12  ;;  %v13078_v27 = vld [vmem:[#allocation54_spill] sm:$0xff] }
 0xcd6   :  { %5146 = vmatprep.subr.bf16.mxu1 %v10944_v26 }
 0xcd8   :  { %5052 = vmatpush1.bf16.msra.mxu0 %v13070_v62  ;;  %v11196_v62 = vld [vmem:[#allocation11 + $0xcc] ss:$24 sps:$4 sm:$0xff]  }
 0xcd9   :  { %5053 = vmatprep.subr.bf16.mxu0 %v13071_v25  ;;  %5147 = vmatpush1.bf16.msra.mxu1 %v13072_v58  ;;  %13111 = vst [vmem:[#allocation79_spill] sm:$0xff] %v11196_v62  ;;  %v11199_v25 = vld [vmem:[#allocation11 + $0xc8] ss:$24 sps:$4 sm:$0xff]  }
 0xcda   :  { %5148 = vmatprep.subr.bf16.mxu1 %v13073_v54  ;;  %13112 = vst [vmem:[#allocation106_spill] sm:$0xff] %v11199_v25 }
 0xcdc   :  { %5054 = vmatpush1.bf16.msra.mxu0 %v13074_v34  ;;  %v11202_v34 = vld [vmem:[#allocation11 + $0xfc] ss:$24 sps:$4 sm:$0xff]  }
 0xcdd   :  { %5055 = vmatprep.subr.bf16.mxu0 %v13075_v17  ;;  %5149 = vmatpush1.bf16.msra.mxu1 %v13076_v42  ;;  %13113 = vst [vmem:[#allocation104_spill] sm:$0xff] %v11202_v34  ;;  %v11205_v17 = vld [vmem:[#allocation11 + $0xf8] ss:$24 sps:$4 sm:$0xff]  }
 0xcde   :  { %5150 = vmatprep.subr.bf16.mxu1 %v13077_v41  ;;  %13114 = vst [vmem:[#allocation80_spill] sm:$0xff] %v11205_v17 }
 0xce0   :  { %5056 = vmatpush1.bf16.msra.mxu0 %v13078_v27  ;;  %v11208_v27 = vld [vmem:[#allocation11 + $0x12c] ss:$24 sps:$4 sm:$0xff]  }
 0xce1   :  { %5057 = vmatprep.subr.bf16.mxu0 %v13079_v24  ;;  %5151 = vmatpush1.bf16.msra.mxu1 %v13080_v1  ;;  %13115 = vst [vmem:[#allocation86_spill] sm:$0xff] %v11208_v27  ;;  %v11211_v24 = vld [vmem:[#allocation11 + $0x128] ss:$24 sps:$4 sm:$0xff]  }
 0xce2   :  { %5152 = vmatprep.subr.bf16.mxu1 %v13081_v43  ;;  %13116 = vst [vmem:[#allocation30_spill] sm:$0xff] %v11211_v24 }
 0xce4   :  { %5058 = vmatpush1.bf16.msra.mxu0 %v13082_v11  ;;  %v11214_v11 = vld [vmem:[#allocation11 + $0x15c] ss:$24 sps:$4 sm:$0xff]  }
 0xce5   :  { %5059 = vmatprep.subr.bf16.mxu0 %v13083_v28  ;;  %5153 = vmatpush1.bf16.msra.mxu1 %v10973_v0  ;;  %13117 = vst [vmem:[#allocation31_spill] sm:$0xff] %v11214_v11  ;;  %v11217_v28 = vld [vmem:[#allocation11 + $0x158] ss:$24 sps:$4 sm:$0xff]  }
 0xce6   :  { %5154 = vmatprep.subr.bf16.mxu1 %v13084_v32  ;;  %13118 = vst [vmem:[#allocation109_spill] sm:$0xff] %v11217_v28 }
 0xce8   :  { %5060 = vmatpush1.bf16.msra.mxu0 %v13085_v48  ;;  %v11220_v48 = vld [vmem:[#allocation11 + $0x18c] ss:$24 sps:$4 sm:$0xff]  }
 0xce9   :  { %5061 = vmatprep.subr.bf16.mxu0 %v13086_v40  ;;  %5155 = vmatpush1.bf16.msra.mxu1 %v13087_v47  ;;  %13119 = vst [vmem:[#allocation65_spill] sm:$0xff] %v11220_v48  ;;  %v11223_v40 = vld [vmem:[#allocation11 + $0x188] ss:$24 sps:$4 sm:$0xff]  }
 0xcea   :  { %5156 = vmatprep.subr.bf16.mxu1 %v10984_v7  ;;  %13120 = vst [vmem:[#allocation32_spill] sm:$0xff] %v11223_v40 }
 0xcec   :  { %5062 = vmatpush1.bf16.msra.mxu0 %v13029_v36  ;;  %v11134_v36 = vld [vmem:[#allocation11 + $0x210] ss:$24 sps:$4 sm:$0xff]  }
 0xced   :  { %5063 = vmatprep.subr.bf16.mxu0 %v13088_v39  ;;  %5157 = vmatpush1.bf16.msra.mxu1 %v11118_v29  ;;  %13093 = vst [vmem:[#allocation73_spill] sm:$0xff] %v11134_v36  ;;  %v11226_v39 = vld [vmem:[#allocation11 + $0x1bc] ss:$24 sps:$4 sm:$0xff]  }
 0xcee   :  { %5158 = vmatprep.subr.bf16.mxu1 %v11121_v6  ;;  %13121 = vst [vmem:[#allocation53_spill] sm:$0xff] %v11226_v39 }
 0xcf0   :  { %5064 = vmatpush1.bf16.msra.mxu0 %v13031_v31  ;;  %v11145_v31 = vld [vmem:[#allocation11 + $0x274] ss:$24 sps:$4 sm:$0xff]  }
 0xcf1   :  { %5065 = vmatprep.subr.bf16.mxu0 %v13032_v33  ;;  %5159 = vmatpush1.bf16.msra.mxu1 %v11126_v2  ;;  %v11142_v33 = vld [vmem:[#allocation11 + $0x240] ss:$24 sps:$4 sm:$0xff]   ;;  %13096 = vst [vmem:[#allocation38_spill] sm:$0xff] %v11145_v31 }
 0xcf2   :  { %5160 = vmatprep.subr.bf16.mxu1 %v11129_v51  ;;  %13095 = vst [vmem:[#allocation24_spill] sm:$0xff] %v11142_v33 }
 0xcf4   :  { %5066 = vmatpush1.bf16.msra.mxu0 %v13033_v56  ;;  %v11153_v56 = vld [vmem:[#allocation11 + $0x2a4] ss:$24 sps:$4 sm:$0xff]  }
 0xcf5   :  { %5067 = vmatprep.subr.bf16.mxu0 %v13034_v9  ;;  %5161 = vmatpush1.bf16.msra.mxu1 %v11134_v36  ;;  %v11150_v9 = vld [vmem:[#allocation11 + $0x270] ss:$24 sps:$4 sm:$0xff]   ;;  %13098 = vst [vmem:[#allocation40_spill] sm:$0xff] %v11153_v56 }
 0xcf6   :  { %5162 = vmatprep.subr.bf16.mxu1 %v11137_v60  ;;  %13097 = vst [vmem:[#allocation90_spill] sm:$0xff] %v11150_v9 }
 0xcf8   :  { %5068 = vmatpush1.bf16.msra.mxu0 %v13035_v10  ;;  %v11158_v10 = vld [vmem:[#allocation11 + $0x2a0] ss:$24 sps:$4 sm:$0xff]  }
 0xcf9   :  { %5069 = vmatprep.subr.bf16.mxu0 %v13036_v4  ;;  %5163 = vmatpush1.bf16.msra.mxu1 %v11142_v33  ;;  %13099 = vst [vmem:[#allocation84_spill] sm:$0xff] %v11158_v10  ;;  %v11161_v4 = vld [vmem:[#allocation11 + $0x2d4] ss:$24 sps:$4 sm:$0xff]  }
 0xcfa   :  { %5164 = vmatprep.subr.bf16.mxu1 %v11145_v31  ;;  %13100 = vst [vmem:[#allocation78_spill] sm:$0xff] %v11161_v4 }
 0xcfc   :  { %5070 = vmatpush1.bf16.msra.mxu0 %v10667_v19  ;;  %v11168_v19 = vld [vmem:[#allocation11 + $0x2d0] ss:$24 sps:$4 sm:$0xff]  }
 0xcfd   :  { %5071 = vmatprep.subr.bf16.mxu0 %v10673_v13  ;;  %5165 = vmatpush1.bf16.msra.mxu1 %v11150_v9  ;;  %v11165_v13 = vld [vmem:[#allocation11 + $0xc] ss:$24 sps:$4 sm:$0xff]   ;;  %13102 = vst [vmem:[#allocation48_spill] sm:$0xff] %v11168_v19 }
 0xcfe   :  { %5166 = vmatprep.subr.bf16.mxu1 %v11153_v56  ;;  %13101 = vst [vmem:[#allocation71_spill] sm:$0xff] %v11165_v13 }
 0xd00   :  { %5072 = vmatpush1.bf16.msra.mxu0 %v10679_v57  ;;  %v11171_v57 = vld [vmem:[#allocation11 + $0x14] ss:$24 sps:$4 sm:$0xff]  }
 0xd01   :  { %5073 = vmatprep.subr.bf16.mxu0 %v10685_v8  ;;  %5167 = vmatpush1.bf16.msra.mxu1 %v11158_v10  ;;  %13103 = vst [vmem:[#allocation74_spill] sm:$0xff] %v11171_v57  ;;  %v11175_v8 = vld [vmem:[#allocation11 + $0x8] ss:$24 sps:$4 sm:$0xff]  }
 0xd02   :  { %5168 = vmatprep.subr.bf16.mxu1 %v11161_v4  ;;  %13104 = vst [vmem:[#allocation19_spill] sm:$0xff] %v11175_v8 }
 0xd04   :  { %5074 = vmatpush1.bf16.msra.mxu0 %v10691_v16  ;;  %v11181_v16 = vld [vmem:[#allocation11 + $0x38] ss:$24 sps:$4 sm:$0xff]  }
 0xd05   :  { %5179 = vmatprep.subr.bf16.mxu0 %v11165_v13  ;;  %5169 = vmatpush1.bf16.msra.mxu1 %v11168_v19  ;;  %13106 = vst [vmem:[#allocation111_spill] sm:$0xff] %v11181_v16 }
 0xd06   :  { %5220 = vmatprep.subr.bf16.mxu1 %v11171_v57 }
 0xd07   :  { %5076 = vmatmul.mubr.bf16.vlgmr.msra.gmra.mrb[112].mxu0 %v11076_v21  ;;  %v11193_v21 = vld [vmem:[#allocation11 + $0x98] ss:$24 sps:$4 sm:$0xff]  }
 0xd08   :  { %5180 = vmatpush1.bf16.msra.mxu0 %v11175_v8  ;;  %13110 = vst [vmem:[#allocation120_spill] sm:$0xff] %v11193_v21 }
 0xd09   :  { %5181 = vmatprep.subr.bf16.mxu0 %v11178_v23 }
 0xd0c   :  { %5182 = vmatpush1.bf16.msra.mxu0 %v11181_v16 }
 0xd0d   :  { %5183 = vmatprep.subr.bf16.mxu0 %v11184_v30 }
 0xd10   :  { %5184 = vmatpush1.bf16.msra.mxu0 %v11187_v50 }
 0xd11   :  { %5185 = vmatprep.subr.bf16.mxu0 %v11190_v45 }
 0xd14   :  { %5186 = vmatpush1.bf16.msra.mxu0 %v11193_v21  ;;  %v13138_v21 = vld [vmem:[#allocation60_spill] sm:$0xff] }
 0xd15   :  { %5187 = vmatprep.subr.bf16.mxu0 %v11196_v62 }
 0xd18   :  { %5188 = vmatpush1.bf16.msra.mxu0 %v11199_v25  ;;  %v13137_v25 = vld [vmem:[#allocation103_spill] sm:$0xff] }
 0xd19   :  { %5189 = vmatprep.subr.bf16.mxu0 %v11202_v34  ;;  %v13136_v34 = vld [vmem:[#allocation59_spill] sm:$0xff] }
 0xd1c   :  { %5190 = vmatpush1.bf16.msra.mxu0 %v11205_v17  ;;  %v13135_v17 = vld [vmem:[#allocation21_spill] sm:$0xff] }
 0xd1d   :  { %5191 = vmatprep.subr.bf16.mxu0 %v11208_v27 }
 0xd20   :  { %5192 = vmatpush1.bf16.msra.mxu0 %v11211_v24  ;;  %v13132_v24 = vld [vmem:[#allocation58_spill] sm:$0xff] }
 0xd21   :  { %5193 = vmatprep.subr.bf16.mxu0 %v11214_v11  ;;  %v13127_v11 = vld [vmem:[#allocation95_spill] sm:$0xff] }
 0xd24   :  { %5194 = vmatpush1.bf16.msra.mxu0 %v11217_v28  ;;  %v13125_v28 = vld [vmem:[#allocation91_spill] sm:$0xff] }
 0xd25   :  { %5195 = vmatprep.subr.bf16.mxu0 %v11220_v48  ;;  %v13124_v48 = vld [vmem:[#allocation39_spill] sm:$0xff] }
 0xd28   :  { %5196 = vmatpush1.bf16.msra.mxu0 %v11223_v40  ;;  %v13126_v40 = vld [vmem:[#allocation94_spill] sm:$0xff] }
 0xd29   :  { %5197 = vmatprep.subr.bf16.mxu0 %v11226_v39  ;;  %v13128_v39 = vld [vmem:[#allocation96_spill] sm:$0xff] }
 0xd2c   :  { %5198 = vmatpush1.bf16.msra.mxu0 %v13039_v18  ;;  %v13129_v18 = vld [vmem:[#allocation97_spill] sm:$0xff] }
 0xd2d   :  { %5199 = vmatprep.subr.bf16.mxu0 %v13040_v55  ;;  %v13130_v55 = vld [vmem:[#allocation98_spill] sm:$0xff] }
 0xd30   :  { %5200 = vmatpush1.bf16.msra.mxu0 %v13041_v3  ;;  %v13131_v3 = vld [vmem:[#allocation51_spill] sm:$0xff] }
 0xd31   :  { %5201 = vmatprep.subr.bf16.mxu0 %v13042_v22 }
 0xd34   :  { %5202 = vmatpush1.bf16.msra.mxu0 %v13122_v59 }
 0xd35   :  { %5203 = vmatprep.subr.bf16.mxu0 %v13123_v46  ;;  %v13133_v46 = vld [vmem:[#allocation113_spill] sm:$0xff] }
 0xd36   :  { %v3897_v27 = vadd.f32 %v13133_v46, %v13132_v24 }
 0xd38   :  { %5204 = vmatpush1.bf16.msra.mxu0 %v13124_v48  ;;  %v13134_v48 = vld [vmem:[#allocation82_spill] sm:$0xff] }
 0xd39   :  { %5205 = vmatprep.subr.bf16.mxu0 %v13125_v28  ;;  %v3970_v28 = vadd.f32 %v13135_v17, %v13134_v48 }
 0xd3c   :  { %5206 = vmatpush1.bf16.msra.mxu0 %v13126_v40 }
 0xd3d   :  { %5207 = vmatprep.subr.bf16.mxu0 %v13127_v11 }
 0xd40   :  { %5208 = vmatpush1.bf16.msra.mxu0 %v13128_v39 }
 0xd41   :  { %5209 = vmatprep.subr.bf16.mxu0 %v13129_v18  ;;  %v13139_v18 = vld [vmem:[#allocation114_spill] sm:$0xff] }
 0xd42   :  { %v3899_v45 = vadd.f32 %v13139_v18, %v13138_v21 }
 0xd44   :  { %5210 = vmatpush1.bf16.msra.mxu0 %v13130_v55  ;;  %v13140_v55 = vld [vmem:[#allocation26_spill] sm:$0xff] }
 0xd45   :  { %5315 = vmatprep.subr.bf16.mxu0 %v13131_v3  ;;  %v3972_v3 = vadd.f32 %v13140_v55, %v13061_v5 }
 0xd9a   :  { %v4995_v22 = vpop.f32.mrb[108].mxu0  ;;  %v5036_v59 = vpop.f32.mrb[108].mxu1 }
 0xd9b   :  { %v4996_v40 = vadd.f32 %v4995_v22, %v13136_v34  ;;  %v5037_v11 = vadd.f32 %v5036_v59, %v13137_v25  ;;  %v4997_v62 = vpop.f32.mrb[109].mxu0  ;;  %v5038_v39 = vpop.f32.mrb[109].mxu1 }
 0xd9c   :  { %v4998_v50 = vadd.f32 %v4997_v62, %v13063_v44  ;;  %v5039_v30 = vadd.f32 %v5038_v39, %v13064_v38  ;;  %v4999_v46 = vpop.f32.mrb[110].mxu0  ;;  %v5040_v24 = vpop.f32.mrb[110].mxu1 }
 0xd9d   :  { %v5084_v16 = vadd.f32 %v4996_v40, %v3897_v27  ;;  %v5098_v17 = vadd.f32 %v5037_v11, %v3970_v28  ;;  %v5000_v48 = vpop.f32.mrb[111].mxu0  ;;  %v5041_v22 = vpop.f32.mrb[111].mxu1  ;;  %v13141_v40 = vld [vmem:[#allocation18_spill] sm:$0xff]  ;;  %v13142_v46 = vld [vmem:[#allocation85_spill] sm:$0xff] }
 0xd9e   :  { %v5085_v34 = vadd.f32 %v4998_v50, %v3899_v45  ;;  %v5099_v59 = vadd.f32 %v5039_v30, %v3972_v3 }
 0xd9f   :  { %v6902_v25 = vmul.f32 -1.442695, %v5084_v16  ;;  %v6904_v18 = vmul.f32 -1.442695, %v5098_v17 }
 0xda0   :  { %v6903_v23 = vmul.f32 -1.442695, %v5085_v34  ;;  %v6905_v21 = vmul.f32 -1.442695, %v5099_v59 }
 0xda1   :  { %7859 = vpow2.f32 %v6902_v25 }
 0xda2   :  { %7861 = vpow2.f32 %v6903_v23 }
 0xda3   :  { %7863 = vpow2.f32 %v6904_v18 }
 0xda4   :  { %7865 = vpow2.f32 %v6905_v21 }
 0xdab   :  { %v7860_v8 = vpop.eup %7859 }
 0xdac   :  { %v7862_v55 = vpop.eup %7861  ;;  %v5092_v62 = vadd.f32 1.0, %v7860_v8 }
 0xdad   :  { %v5093_v39 = vadd.f32 1.0, %v7862_v55  ;;  %v7864_v27 = vpop.eup %7863 }
 0xdae   :  { %7867 = vrcp.f32 %v5092_v62  ;;  %v7866_v24 = vpop.eup %7865  ;;  %v5106_v48 = vadd.f32 1.0, %v7864_v27 }
 0xdaf   :  { %7869 = vrcp.f32 %v5093_v39  ;;  %v5107_v28 = vadd.f32 1.0, %v7866_v24 }
 0xdb0   :  { %7871 = vrcp.f32 %v5106_v48 }
 0xdb1   :  { %7873 = vrcp.f32 %v5107_v28 }
 0xdb8   :  { %v7868_v45 = vpop.eup %7867 }
 0xdb9   :  { %v7870_v34 = vpop.eup %7869 }
 0xdba   :  { %v7872_v22 = vpop.eup %7871 }
 0xdbb   :  { %v7874_v59 = vpop.eup %7873  ;;  %v5118_v18 = vsub.f32 1.0, %v7872_v22  ;;  %v5122_v24 = vmul.f32 %v7872_v22, %v11068_v63  ;;  %v11313_v22 = vld [vmem:[#allocation11 + $0x100] ss:$24 sps:$4 sm:$0xff]  }
 0xdbc   :  { %v5119_v62 = vsub.f32 1.0, %v7874_v59  ;;  %v11361_v63 = vld [vmem:[#allocation11 + $0x220] ss:$24 sps:$4 sm:$0xff]  }
 0xdbd   :  { %13150 = vst [vmem:[#allocation77_spill] sm:$0xff] %v11361_v63 }
 0xdda   :  { %v5077_v50 = vpop.f32.mrb[112].mxu0 }
 0xddb   :  { %v5078_v16 = vadd.f32 %v5077_v50, %v13065_v37  ;;  %v5079_v30 = vpop.f32.mrb[113].mxu0  ;;  %v5123_v50 = vmul.f32 %v7874_v59, %v11070_v49  ;;  %v11316_v59 = vld [vmem:[#allocation11 + $0x134] ss:$24 sps:$4 sm:$0xff]   ;;  %v11356_v49 = vld [vmem:[#allocation11 + $0x224] ss:$24 sps:$4 sm:$0xff]  }
 0xddc   :  { %v5080_v23 = vadd.f32 %v5079_v30, %v10889_v52  ;;  %v5081_v25 = vpop.f32.mrb[114].mxu0  ;;  %13149 = vst [vmem:[#allocation56_spill] sm:$0xff] %v11356_v49 }
 0xddd   :  { %v5112_v3 = vmul.f32 %v7868_v45, %v5078_v16  ;;  %v5082_v21 = vpop.f32.mrb[115].mxu0  ;;  %v11276_v25 = vld [vmem:[#allocation11 + $0x44] ss:$24 sps:$4 sm:$0xff]  }
 0xdde   :  { %v5113_v8 = vmul.f32 %v7870_v34, %v5080_v23  ;;  %v11273_v23 = vld [vmem:[#allocation11 + $0x10] ss:$24 sps:$4 sm:$0xff]   ;;  %v11281_v34 = vld [vmem:[#allocation11 + $0x40] ss:$24 sps:$4 sm:$0xff]  }
 0xddf   :  { %v5114_v11 = vadd.f32 %v5112_v3, %v13141_v40  ;;  %v11284_v3 = vld [vmem:[#allocation11 + $0x74] ss:$24 sps:$4 sm:$0xff]   ;;  %v11289_v21 = vld [vmem:[#allocation11 + $0x70] ss:$24 sps:$4 sm:$0xff]   ;;  %v11297_v40 = vld [vmem:[#allocation11 + $0xa0] ss:$24 sps:$4 sm:$0xff]  }
 0xde0   :  { %v5115_v17 = vadd.f32 %v5113_v8, %v13142_v46  ;;  %v11292_v8 = vld [vmem:[#allocation11 + $0xa4] ss:$24 sps:$4 sm:$0xff]   ;;  %v11305_v46 = vld [vmem:[#allocation11 + $0xd0] ss:$24 sps:$4 sm:$0xff]  }
 0xde1   :  { %7875 = vtanh.f32 %v5114_v11  ;;  %v11300_v11 = vld [vmem:[#allocation11 + $0xd4] ss:$24 sps:$4 sm:$0xff]  }
 0xde2   :  { %7877 = vtanh.f32 %v5115_v17  ;;  %v11308_v17 = vld [vmem:[#allocation11 + $0x104] ss:$24 sps:$4 sm:$0xff]  }
 0xdeb   :  { %v7876_v55 = vpop.eup %7875 }
 0xdec   :  { %v7878_v39 = vpop.eup %7877  ;;  %v5120_v27 = vmul.f32 %v7876_v55, %v5118_v18  ;;  %v11321_v18 = vld [vmem:[#allocation11 + $0x130] ss:$24 sps:$4 sm:$0xff]   ;;  %v11324_v55 = vld [vmem:[#allocation11 + $0x164] ss:$24 sps:$4 sm:$0xff]  }
 0xded   :  { %v5121_v48 = vmul.f32 %v7878_v39, %v5119_v62  ;;  %v11329_v62 = vld [vmem:[#allocation11 + $0x160] ss:$24 sps:$4 sm:$0xff]   ;;  %v11332_v39 = vld [vmem:[#allocation11 + $0x194] ss:$24 sps:$4 sm:$0xff]  }
 0xdee   :  { %v11261_v28 = vadd.f32 %v5122_v24, %v5120_v27  ;;  %v11337_v27 = vld [vmem:[#allocation11 + $0x190] ss:$24 sps:$4 sm:$0xff]   ;;  %v11340_v24 = vld [vmem:[#allocation11 + $0x1c4] ss:$24 sps:$4 sm:$0xff]  }
 0xdef   :  { %v11263_v16 = vadd.f32 %v5123_v50, %v5121_v48  ;;  %13145 = vst [vmem:[#allocation54_spill] sm:$0xff] %v11340_v24  ;;  %v11345_v48 = vld [vmem:[#allocation11 + $0x1c0] ss:$24 sps:$4 sm:$0xff]   ;;  %v11348_v50 = vld [vmem:[#allocation11 + $0x1f4] ss:$24 sps:$4 sm:$0xff]  }
 0xdf0   :  { %13143 = vst [vmem:[#allocation110_spill] sm:$0xff] %v11261_v28  ;;  %v11269_v45 = vpack.c.bf16 %v11261_v28, %v11261_v28  ;;  %13146 = vst [vmem:[#allocation55_spill] sm:$0xff] %v11345_v48 }
 0xdf1   :  { %13144 = vst [vmem:[#allocation67_spill] sm:$0xff] %v11263_v16  ;;  %v5137_v30 = vpack.c.bf16 %v11263_v16, %v11263_v16  ;;  %13147 = vst [vmem:[#allocation34_spill] sm:$0xff] %v11348_v50 }
 0xdf3   :  { %5170 = vmatprep.mubr.bf16.mxu1 %v5137_v30  ;;  %5211 = vmatprep.mubr.bf16.mxu0 %v5137_v30 }
 0xdf4   :  { %5171 = vmatmul.mubr.bf16.vlgmr.msra.gmra.mrb[112].mxu1 %v11269_v45  ;;  %5212 = vmatmul.mubr.bf16.vlgmr.msra.gmra.mrb[116].mxu0 %v11269_v45 }
 0xdf5   :  { %5221 = vmatpush1.bf16.msra.mxu1 %v11273_v23  ;;  %5252 = vmatprep.mubr.bf16.mxu1 %v5137_v30  ;;  %v11353_v30 = vld [vmem:[#allocation11 + $0x1f0] ss:$24 sps:$4 sm:$0xff]  }
 0xdf6   :  { %5222 = vmatprep.subr.bf16.mxu1 %v11276_v25  ;;  %5316 = vmatpush1.bf16.msra.mxu0 %v10917_v15  ;;  %13148 = vst [vmem:[#allocation35_spill] sm:$0xff] %v11353_v30 }
 0xdf7   :  { %5317 = vmatprep.subr.bf16.mxu0 %v10920_v20 }
 0xdf9   :  { %5223 = vmatpush1.bf16.msra.mxu1 %v11281_v34 }
 0xdfa   :  { %5224 = vmatprep.subr.bf16.mxu1 %v11284_v3  ;;  %5318 = vmatpush1.bf16.msra.mxu0 %v10925_v53 }
 0xdfb   :  { %5319 = vmatprep.subr.bf16.mxu0 %v10928_v61 }
 0xdfd   :  { %5225 = vmatpush1.bf16.msra.mxu1 %v11289_v21 }
 0xdfe   :  { %5226 = vmatprep.subr.bf16.mxu1 %v11292_v8  ;;  %5320 = vmatpush1.bf16.msra.mxu0 %v10933_v14 }
 0xdff   :  { %5321 = vmatprep.subr.bf16.mxu0 %v10936_v35 }
 0xe01   :  { %5227 = vmatpush1.bf16.msra.mxu1 %v11297_v40 }
 0xe02   :  { %5228 = vmatprep.subr.bf16.mxu1 %v11300_v11  ;;  %5322 = vmatpush1.bf16.msra.mxu0 %v10941_v12 }
 0xe03   :  { %5323 = vmatprep.subr.bf16.mxu0 %v10944_v26 }
 0xe05   :  { %5229 = vmatpush1.bf16.msra.mxu1 %v11305_v46 }
 0xe06   :  { %5230 = vmatprep.subr.bf16.mxu1 %v11308_v17  ;;  %5324 = vmatpush1.bf16.msra.mxu0 %v13072_v58 }
 0xe07   :  { %5325 = vmatprep.subr.bf16.mxu0 %v13073_v54 }
 0xe09   :  { %5231 = vmatpush1.bf16.msra.mxu1 %v11313_v22 }
 0xe0a   :  { %5232 = vmatprep.subr.bf16.mxu1 %v11316_v59  ;;  %5326 = vmatpush1.bf16.msra.mxu0 %v13076_v42 }
 0xe0b   :  { %5327 = vmatprep.subr.bf16.mxu0 %v13077_v41 }
 0xe0d   :  { %5233 = vmatpush1.bf16.msra.mxu1 %v11321_v18 }
 0xe0e   :  { %5234 = vmatprep.subr.bf16.mxu1 %v11324_v55  ;;  %5328 = vmatpush1.bf16.msra.mxu0 %v13080_v1 }
 0xe0f   :  { %5329 = vmatprep.subr.bf16.mxu0 %v13081_v43 }
 0xe11   :  { %5235 = vmatpush1.bf16.msra.mxu1 %v11329_v62 }
 0xe12   :  { %5236 = vmatprep.subr.bf16.mxu1 %v11332_v39  ;;  %5330 = vmatpush1.bf16.msra.mxu0 %v10973_v0 }
 0xe13   :  { %5331 = vmatprep.subr.bf16.mxu0 %v13084_v32 }
 0xe15   :  { %5237 = vmatpush1.bf16.msra.mxu1 %v11337_v27 }
 0xe16   :  { %5238 = vmatprep.subr.bf16.mxu1 %v11340_v24  ;;  %5332 = vmatpush1.bf16.msra.mxu0 %v13087_v47 }
 0xe17   :  { %5333 = vmatprep.subr.bf16.mxu0 %v10984_v7 }
 0xe19   :  { %5239 = vmatpush1.bf16.msra.mxu1 %v11345_v48 }
 0xe1a   :  { %5240 = vmatprep.subr.bf16.mxu1 %v11348_v50  ;;  %5334 = vmatpush1.bf16.msra.mxu0 %v11118_v29  ;;  %v11364_v50 = vld [vmem:[#allocation11 + $0x254] ss:$24 sps:$4 sm:$0xff]  }
 0xe1b   :  { %5335 = vmatprep.subr.bf16.mxu0 %v11121_v6  ;;  %13151 = vst [vmem:[#allocation44_spill] sm:$0xff] %v11364_v50 }
 0xe1d   :  { %5241 = vmatpush1.bf16.msra.mxu1 %v11353_v30  ;;  %v11369_v30 = vld [vmem:[#allocation11 + $0x250] ss:$24 sps:$4 sm:$0xff]  }
 0xe1e   :  { %5242 = vmatprep.subr.bf16.mxu1 %v11356_v49  ;;  %5336 = vmatpush1.bf16.msra.mxu0 %v11126_v2  ;;  %13152 = vst [vmem:[#allocation47_spill] sm:$0xff] %v11369_v30  ;;  %v11372_v49 = vld [vmem:[#allocation11 + $0x284] ss:$24 sps:$4 sm:$0xff]  }
 0xe1f   :  { %5337 = vmatprep.subr.bf16.mxu0 %v11129_v51  ;;  %13153 = vst [vmem:[#allocation72_spill] sm:$0xff] %v11372_v49  ;;  %v13197_v51 = vld [vmem:[#allocation60_spill] sm:$0xff] }
 0xe20   :  { %v13198_v2 = vld [vmem:[#allocation116_spill] sm:$0xff] }
 0xe21   :  { %5243 = vmatpush1.bf16.msra.mxu1 %v11361_v63  ;;  %v11377_v63 = vld [vmem:[#allocation11 + $0x280] ss:$24 sps:$4 sm:$0xff]   ;;  %v3903_v6 = vadd.f32 %v13198_v2, %v13197_v51 }
 0xe22   :  { %5244 = vmatprep.subr.bf16.mxu1 %v11364_v50  ;;  %5338 = vmatpush1.bf16.msra.mxu0 %v11134_v36  ;;  %13154 = vst [vmem:[#allocation43_spill] sm:$0xff] %v11377_v63  ;;  %v11380_v50 = vld [vmem:[#allocation11 + $0x2b4] ss:$24 sps:$4 sm:$0xff]  }
 0xe23   :  { %5339 = vmatprep.subr.bf16.mxu0 %v11137_v60  ;;  %13155 = vst [vmem:[#allocation37_spill] sm:$0xff] %v11380_v50 }
 0xe25   :  { %5245 = vmatpush1.bf16.msra.mxu1 %v11369_v30  ;;  %v11385_v30 = vld [vmem:[#allocation11 + $0x2b0] ss:$24 sps:$4 sm:$0xff]  }
 0xe26   :  { %5246 = vmatprep.subr.bf16.mxu1 %v11372_v49  ;;  %5340 = vmatpush1.bf16.msra.mxu0 %v11142_v33  ;;  %13156 = vst [vmem:[#allocation89_spill] sm:$0xff] %v11385_v30  ;;  %v11388_v49 = vld [vmem:[#allocation11 + $0x2e4] ss:$24 sps:$4 sm:$0xff]   ;;  %v13196_v33 = vld [vmem:[#allocation103_spill] sm:$0xff] }
 0xe27   :  { %5341 = vmatprep.subr.bf16.mxu0 %v11145_v31  ;;  %13157 = vst [vmem:[#allocation39_spill] sm:$0xff] %v11388_v49  ;;  %v13195_v31 = vld [vmem:[#allocation59_spill] sm:$0xff] }
 0xe29   :  { %5247 = vmatpush1.bf16.msra.mxu1 %v11377_v63  ;;  %v11393_v63 = vld [vmem:[#allocation11 + $0x2e0] ss:$24 sps:$4 sm:$0xff]  }
 0xe2a   :  { %5248 = vmatprep.subr.bf16.mxu1 %v11380_v50  ;;  %5342 = vmatpush1.bf16.msra.mxu0 %v11150_v9  ;;  %13158 = vst [vmem:[#allocation91_spill] sm:$0xff] %v11393_v63  ;;  %v13164_v9 = vld [vmem:[#allocation105_spill] sm:$0xff] }
 0xe2b   :  { %5343 = vmatprep.subr.bf16.mxu0 %v11153_v56  ;;  %v13160_v56 = vld [vmem:[#allocation22_spill] sm:$0xff] }
 0xe2d   :  { %5249 = vmatpush1.bf16.msra.mxu1 %v11385_v30  ;;  %v13159_v30 = vld [vmem:[#allocation19_spill] sm:$0xff] }
 0xe2e   :  { %5250 = vmatprep.subr.bf16.mxu1 %v11388_v49  ;;  %5344 = vmatpush1.bf16.msra.mxu0 %v11158_v10  ;;  %v13161_v49 = vld [vmem:[#allocation111_spill] sm:$0xff] }
 0xe2f   :  { %5345 = vmatprep.subr.bf16.mxu0 %v11161_v4  ;;  %v13162_v10 = vld [vmem:[#allocation119_spill] sm:$0xff]  ;;  %v13163_v4 = vld [vmem:[#allocation112_spill] sm:$0xff] }
 0xe31   :  { %5251 = vmatpush1.bf16.msra.mxu1 %v11393_v63  ;;  %v13165_v63 = vld [vmem:[#allocation120_spill] sm:$0xff] }
 0xe32   :  { %5356 = vmatprep.subr.bf16.mxu1 %v11165_v13  ;;  %5346 = vmatpush1.bf16.msra.mxu0 %v11168_v19  ;;  %v13166_v13 = vld [vmem:[#allocation79_spill] sm:$0xff]  ;;  %v13167_v19 = vld [vmem:[#allocation106_spill] sm:$0xff] }
 0xe33   :  { %5397 = vmatprep.subr.bf16.mxu0 %v11171_v57  ;;  %v13168_v57 = vld [vmem:[#allocation104_spill] sm:$0xff] }
 0xe34   :  { %5253 = vmatmul.mubr.bf16.vlgmr.msra.gmra.mrb[116].mxu1 %v11269_v45  ;;  %v13169_v45 = vld [vmem:[#allocation80_spill] sm:$0xff] }
 0xe35   :  { %5357 = vmatpush1.bf16.msra.mxu1 %v13159_v30  ;;  %v13170_v30 = vld [vmem:[#allocation86_spill] sm:$0xff] }
 0xe36   :  { %5358 = vmatprep.subr.bf16.mxu1 %v13160_v56  ;;  %v13171_v56 = vld [vmem:[#allocation30_spill] sm:$0xff] }
 0xe39   :  { %5359 = vmatpush1.bf16.msra.mxu1 %v13161_v49  ;;  %v13172_v49 = vld [vmem:[#allocation31_spill] sm:$0xff] }
 0xe3a   :  { %5360 = vmatprep.subr.bf16.mxu1 %v13162_v10  ;;  %v13173_v10 = vld [vmem:[#allocation109_spill] sm:$0xff] }
 0xe3d   :  { %5361 = vmatpush1.bf16.msra.mxu1 %v13163_v4  ;;  %v13174_v4 = vld [vmem:[#allocation65_spill] sm:$0xff] }
 0xe3e   :  { %5362 = vmatprep.subr.bf16.mxu1 %v13164_v9  ;;  %v13175_v9 = vld [vmem:[#allocation32_spill] sm:$0xff] }
 0xe41   :  { %5363 = vmatpush1.bf16.msra.mxu1 %v13165_v63  ;;  %v13176_v63 = vld [vmem:[#allocation53_spill] sm:$0xff] }
 0xe42   :  { %5364 = vmatprep.subr.bf16.mxu1 %v13166_v13  ;;  %v11418_v13 = vld [vmem:[#allocation11 + $0x1b8] ss:$24 sps:$4 sm:$0xff]  }
 0xe43   :  { %13177 = vst [vmem:[#allocation94_spill] sm:$0xff] %v11418_v13 }
 0xe45   :  { %5365 = vmatpush1.bf16.msra.mxu1 %v13167_v19  ;;  %v13194_v19 = vld [vmem:[#allocation87_spill] sm:$0xff] }
 0xe46   :  { %5366 = vmatprep.subr.bf16.mxu1 %v13168_v57  ;;  %v11421_v57 = vld [vmem:[#allocation11 + $0x1ec] ss:$24 sps:$4 sm:$0xff]  }
 0xe47   :  { %13178 = vst [vmem:[#allocation95_spill] sm:$0xff] %v11421_v57 }
 0xe49   :  { %5367 = vmatpush1.bf16.msra.mxu1 %v13169_v45 }
 0xe4a   :  { %5368 = vmatprep.subr.bf16.mxu1 %v13170_v30  ;;  %v11424_v30 = vld [vmem:[#allocation11 + $0x1e8] ss:$24 sps:$4 sm:$0xff]  }
 0xe4b   :  { %13179 = vst [vmem:[#allocation96_spill] sm:$0xff] %v11424_v30 }
 0xe4d   :  { %5369 = vmatpush1.bf16.msra.mxu1 %v13171_v56  ;;  %v13192_v56 = vld [vmem:[#allocation115_spill] sm:$0xff] }
 0xe4e   :  { %5370 = vmatprep.subr.bf16.mxu1 %v13172_v49  ;;  %v11427_v49 = vld [vmem:[#allocation11 + $0x21c] ss:$24 sps:$4 sm:$0xff]  }
 0xe4f   :  { %13180 = vst [vmem:[#allocation97_spill] sm:$0xff] %v11427_v49 }
 0xe51   :  { %5371 = vmatpush1.bf16.msra.mxu1 %v13173_v10  ;;  %v13191_v10 = vld [vmem:[#allocation58_spill] sm:$0xff] }
 0xe52   :  { %5372 = vmatprep.subr.bf16.mxu1 %v13174_v4  ;;  %v11430_v4 = vld [vmem:[#allocation11 + $0x218] ss:$24 sps:$4 sm:$0xff]   ;;  %v3901_v45 = vadd.f32 %v13192_v56, %v13191_v10 }
 0xe53   :  { %13181 = vst [vmem:[#allocation98_spill] sm:$0xff] %v11430_v4 }
 0xe55   :  { %5373 = vmatpush1.bf16.msra.mxu1 %v13175_v9 }
 0xe56   :  { %5374 = vmatprep.subr.bf16.mxu1 %v13176_v63  ;;  %v11433_v63 = vld [vmem:[#allocation11 + $0x24c] ss:$24 sps:$4 sm:$0xff]  }
 0xe57   :  { %13182 = vst [vmem:[#allocation113_spill] sm:$0xff] %v11433_v63 }
 0xe59   :  { %5375 = vmatpush1.bf16.msra.mxu1 %v11418_v13  ;;  %v11436_v13 = vld [vmem:[#allocation11 + $0x248] ss:$24 sps:$4 sm:$0xff]  }
 0xe5a   :  { %5376 = vmatprep.subr.bf16.mxu1 %v11421_v57  ;;  %13183 = vst [vmem:[#allocation21_spill] sm:$0xff] %v11436_v13  ;;  %v11439_v57 = vld [vmem:[#allocation11 + $0x27c] ss:$24 sps:$4 sm:$0xff]  }
 0xe5b   :  { %13184 = vst [vmem:[#allocation114_spill] sm:$0xff] %v11439_v57 }
 0xe5d   :  { %5377 = vmatpush1.bf16.msra.mxu1 %v11424_v30  ;;  %v11442_v30 = vld [vmem:[#allocation11 + $0x278] ss:$24 sps:$4 sm:$0xff]  }
 0xe5e   :  { %5378 = vmatprep.subr.bf16.mxu1 %v11427_v49  ;;  %13185 = vst [vmem:[#allocation26_spill] sm:$0xff] %v11442_v30  ;;  %v11445_v49 = vld [vmem:[#allocation11 + $0x2ac] ss:$24 sps:$4 sm:$0xff]  }
 0xe5f   :  { %13186 = vst [vmem:[#allocation18_spill] sm:$0xff] %v11445_v49 }
 0xe61   :  { %5379 = vmatpush1.bf16.msra.mxu1 %v11430_v4  ;;  %v11448_v4 = vld [vmem:[#allocation11 + $0x2a8] ss:$24 sps:$4 sm:$0xff]  }
 0xe62   :  { %5380 = vmatprep.subr.bf16.mxu1 %v11433_v63  ;;  %13187 = vst [vmem:[#allocation85_spill] sm:$0xff] %v11448_v4  ;;  %v11451_v63 = vld [vmem:[#allocation11 + $0x2dc] ss:$24 sps:$4 sm:$0xff]  }
 0xe63   :  { %13188 = vst [vmem:[#allocation121_spill] sm:$0xff] %v11451_v63 }
 0xe65   :  { %5381 = vmatpush1.bf16.msra.mxu1 %v11436_v13  ;;  %v11454_v13 = vld [vmem:[#allocation11 + $0x2d8] ss:$24 sps:$4 sm:$0xff]  }
 0xe66   :  { %5382 = vmatprep.subr.bf16.mxu1 %v11439_v57  ;;  %13189 = vst [vmem:[#allocation122_spill] sm:$0xff] %v11454_v13  ;;  %v13190_v57 = vld [vmem:[#allocation51_spill] sm:$0xff] }
 0xe69   :  { %5383 = vmatpush1.bf16.msra.mxu1 %v11442_v30 }
 0xe6a   :  { %5384 = vmatprep.subr.bf16.mxu1 %v11445_v49  ;;  %v13193_v49 = vld [vmem:[#allocation82_spill] sm:$0xff] }
 0xe6b   :  { %v3974_v50 = vadd.f32 %v13194_v19, %v13193_v49 }
 0xe6d   :  { %5385 = vmatpush1.bf16.msra.mxu1 %v11448_v4 }
 0xe6e   :  { %5386 = vmatprep.subr.bf16.mxu1 %v11451_v63 }
 0xe71   :  { %5387 = vmatpush1.bf16.msra.mxu1 %v11454_v13  ;;  %v13199_v13 = vld [vmem:[#allocation88_spill] sm:$0xff] }
 0xe72   :  { %5492 = vmatprep.subr.bf16.mxu1 %v13190_v57  ;;  %v3976_v57 = vadd.f32 %v13199_v13, %v13061_v5 }
 0xec7   :  { %v5172_v9 = vpop.f32.mrb[112].mxu1  ;;  %v5213_v30 = vpop.f32.mrb[116].mxu0 }
 0xec8   :  { %v5173_v4 = vadd.f32 %v5172_v9, %v13195_v31  ;;  %v5214_v60 = vadd.f32 %v5213_v30, %v13196_v33  ;;  %v5174_v36 = vpop.f32.mrb[113].mxu1  ;;  %v5215_v63 = vpop.f32.mrb[117].mxu0 }
 0xec9   :  { %v5175_v29 = vadd.f32 %v5174_v36, %v13063_v44  ;;  %v5216_v48 = vadd.f32 %v5215_v63, %v13064_v38  ;;  %v5176_v56 = vpop.f32.mrb[114].mxu1  ;;  %v5217_v10 = vpop.f32.mrb[118].mxu0 }
 0xeca   :  { %v5261_v7 = vadd.f32 %v5173_v4, %v3901_v45  ;;  %v5275_v19 = vadd.f32 %v5214_v60, %v3974_v50  ;;  %v5177_v49 = vpop.f32.mrb[115].mxu1  ;;  %v5218_v9 = vpop.f32.mrb[119].mxu0  ;;  %v13200_v50 = vld [vmem:[#allocation17_spill] sm:$0xff]  ;;  %v13201_v56 = vld [vmem:[#allocation42_spill] sm:$0xff] }
 0xecb   :  { %v5262_v31 = vadd.f32 %v5175_v29, %v3903_v6  ;;  %v5276_v30 = vadd.f32 %v5216_v48, %v3976_v57 }
 0xecc   :  { %v6906_v33 = vmul.f32 -1.442695, %v5261_v7  ;;  %v6908_v2 = vmul.f32 -1.442695, %v5275_v19 }
 0xecd   :  { %v6907_v47 = vmul.f32 -1.442695, %v5262_v31  ;;  %v6909_v51 = vmul.f32 -1.442695, %v5276_v30 }
 0xece   :  { %7879 = vpow2.f32 %v6906_v33 }
 0xecf   :  { %7881 = vpow2.f32 %v6907_v47 }
 0xed0   :  { %7883 = vpow2.f32 %v6908_v2 }
 0xed1   :  { %7885 = vpow2.f32 %v6909_v51 }
 0xed8   :  { %v7880_v24 = vpop.eup %7879 }
 0xed9   :  { %v7882_v13 = vpop.eup %7881  ;;  %v5269_v36 = vadd.f32 1.0, %v7880_v24 }
 0xeda   :  { %v5270_v63 = vadd.f32 1.0, %v7882_v13  ;;  %v7884_v10 = vpop.eup %7883 }
 0xedb   :  { %7887 = vrcp.f32 %v5269_v36  ;;  %v7886_v60 = vpop.eup %7885  ;;  %v5283_v49 = vadd.f32 1.0, %v7884_v10 }
 0xedc   :  { %7889 = vrcp.f32 %v5270_v63  ;;  %v5284_v4 = vadd.f32 1.0, %v7886_v60 }
 0xedd   :  { %7891 = vrcp.f32 %v5283_v49 }
 0xede   :  { %7893 = vrcp.f32 %v5284_v4 }
 0xee5   :  { %v7888_v33 = vpop.eup %7887 }
 0xee6   :  { %v7890_v57 = vpop.eup %7889 }
 0xee7   :  { %v7892_v9 = vpop.eup %7891 }
 0xee8   :  { %v7894_v30 = vpop.eup %7893  ;;  %v5295_v2 = vsub.f32 1.0, %v7892_v9  ;;  %v5299_v60 = vmul.f32 %v7892_v9, %v11261_v28  ;;  %v13230_v9 = vld [vmem:[#allocation78_spill] sm:$0xff]  ;;  %v13244_v28 = vld [vmem:[#allocation104_spill] sm:$0xff] }
 0xee9   :  { %v5296_v36 = vsub.f32 1.0, %v7894_v30 }
 0xf07   :  { %v5254_v29 = vpop.f32.mrb[116].mxu1 }
 0xf08   :  { %v5255_v7 = vadd.f32 %v5254_v29, %v13065_v37  ;;  %v5256_v6 = vpop.f32.mrb[117].mxu1  ;;  %v5300_v29 = vmul.f32 %v7894_v30, %v11263_v16  ;;  %v13231_v30 = vld [vmem:[#allocation91_spill] sm:$0xff]  ;;  %v13243_v16 = vld [vmem:[#allocation106_spill] sm:$0xff] }
 0xf09   :  { %v5257_v47 = vadd.f32 %v5256_v6, %v10889_v52  ;;  %v5258_v31 = vpop.f32.mrb[118].mxu1 }
 0xf0a   :  { %v5289_v48 = vmul.f32 %v7888_v33, %v5255_v7  ;;  %v5259_v51 = vpop.f32.mrb[119].mxu1  ;;  %v13221_v31 = vld [vmem:[#allocation24_spill] sm:$0xff] }
 0xf0b   :  { %v5290_v24 = vmul.f32 %v7890_v57, %v5257_v47  ;;  %v13220_v47 = vld [vmem:[#allocation72_spill] sm:$0xff]  ;;  %v13222_v57 = vld [vmem:[#allocation38_spill] sm:$0xff]  ;;  %v13224_v51 = vld [vmem:[#allocation37_spill] sm:$0xff] }
 0xf0c   :  { %v5291_v45 = vadd.f32 %v5289_v48, %v13200_v50  ;;  %v13223_v48 = vld [vmem:[#allocation43_spill] sm:$0xff]  ;;  %v13226_v50 = vld [vmem:[#allocation40_spill] sm:$0xff] }
 0xf0d   :  { %v5292_v19 = vadd.f32 %v5290_v24, %v13201_v56  ;;  %v13225_v24 = vld [vmem:[#allocation90_spill] sm:$0xff]  ;;  %v13228_v56 = vld [vmem:[#allocation39_spill] sm:$0xff] }
 0xf0e   :  { %7895 = vtanh.f32 %v5291_v45  ;;  %v13227_v45 = vld [vmem:[#allocation89_spill] sm:$0xff] }
 0xf0f   :  { %7897 = vtanh.f32 %v5292_v19  ;;  %v13229_v19 = vld [vmem:[#allocation84_spill] sm:$0xff] }
 0xf18   :  { %v7896_v13 = vpop.eup %7895 }
 0xf19   :  { %v7898_v63 = vpop.eup %7897  ;;  %v5297_v10 = vmul.f32 %v7896_v13, %v5295_v2  ;;  %v13232_v2 = vld [vmem:[#allocation71_spill] sm:$0xff]  ;;  %v13233_v13 = vld [vmem:[#allocation48_spill] sm:$0xff] }
 0xf1a   :  { %v5298_v49 = vmul.f32 %v7898_v63, %v5296_v36  ;;  %v13234_v36 = vld [vmem:[#allocation74_spill] sm:$0xff]  ;;  %v13235_v63 = vld [vmem:[#allocation19_spill] sm:$0xff] }
 0xf1b   :  { %v11476_v4 = vadd.f32 %v5299_v60, %v5297_v10  ;;  %v13236_v10 = vld [vmem:[#allocation22_spill] sm:$0xff]  ;;  %v13237_v60 = vld [vmem:[#allocation111_spill] sm:$0xff] }
 0xf1c   :  { %v11478_v7 = vadd.f32 %v5300_v29, %v5298_v49  ;;  %v13238_v49 = vld [vmem:[#allocation119_spill] sm:$0xff]  ;;  %v13239_v29 = vld [vmem:[#allocation112_spill] sm:$0xff] }
 0xf1d   :  { %13202 = vst [vmem:[#allocation115_spill] sm:$0xff] %v11476_v4  ;;  %v11484_v33 = vpack.c.bf16 %v11476_v4, %v11476_v4 }
 0xf1e   :  { %13203 = vst [vmem:[#allocation87_spill] sm:$0xff] %v11478_v7  ;;  %v5314_v6 = vpack.c.bf16 %v11478_v7, %v11478_v7 }
 0xf20   :  { %5347 = vmatprep.mubr.bf16.mxu0 %v5314_v6  ;;  %5388 = vmatprep.mubr.bf16.mxu1 %v5314_v6 }
 0xf21   :  { %5348 = vmatmul.mubr.bf16.vlgmr.msra.gmra.mrb[120].mxu0 %v11484_v33  ;;  %5389 = vmatmul.mubr.bf16.vlgmr.msra.gmra.mrb[120].mxu1 %v11484_v33 }
 0xf22   :  { %5398 = vmatpush1.bf16.msra.mxu0 %v11273_v23  ;;  %5429 = vmatprep.mubr.bf16.mxu0 %v5314_v6  ;;  %v13240_v6 = vld [vmem:[#allocation105_spill] sm:$0xff] }
 0xf23   :  { %5399 = vmatprep.subr.bf16.mxu0 %v11276_v25  ;;  %5493 = vmatpush1.bf16.msra.mxu1 %v10917_v15  ;;  %v13204_v15 = vld [vmem:[#allocation54_spill] sm:$0xff] }
 0xf24   :  { %5494 = vmatprep.subr.bf16.mxu1 %v10920_v20  ;;  %v13205_v20 = vld [vmem:[#allocation118_spill] sm:$0xff] }
 0xf26   :  { %5400 = vmatpush1.bf16.msra.mxu0 %v11281_v34 }
 0xf27   :  { %5401 = vmatprep.subr.bf16.mxu0 %v11284_v3  ;;  %5495 = vmatpush1.bf16.msra.mxu1 %v10925_v53  ;;  %v13206_v53 = vld [vmem:[#allocation50_spill] sm:$0xff] }
 0xf28   :  { %5496 = vmatprep.subr.bf16.mxu1 %v10928_v61  ;;  %v13207_v61 = vld [vmem:[#allocation55_spill] sm:$0xff] }
 0xf2a   :  { %5402 = vmatpush1.bf16.msra.mxu0 %v11289_v21 }
 0xf2b   :  { %5403 = vmatprep.subr.bf16.mxu0 %v11292_v8  ;;  %5497 = vmatpush1.bf16.msra.mxu1 %v10933_v14  ;;  %v13208_v14 = vld [vmem:[#allocation34_spill] sm:$0xff] }
 0xf2c   :  { %5498 = vmatprep.subr.bf16.mxu1 %v10936_v35  ;;  %v13209_v35 = vld [vmem:[#allocation76_spill] sm:$0xff] }
 0xf2e   :  { %5404 = vmatpush1.bf16.msra.mxu0 %v11297_v40 }
 0xf2f   :  { %5405 = vmatprep.subr.bf16.mxu0 %v11300_v11  ;;  %5499 = vmatpush1.bf16.msra.mxu1 %v10941_v12  ;;  %v13210_v12 = vld [vmem:[#allocation27_spill] sm:$0xff] }
 0xf30   :  { %5500 = vmatprep.subr.bf16.mxu1 %v10944_v26  ;;  %v13211_v26 = vld [vmem:[#allocation35_spill] sm:$0xff] }
 0xf32   :  { %5406 = vmatpush1.bf16.msra.mxu0 %v11305_v46 }
 0xf33   :  { %5407 = vmatprep.subr.bf16.mxu0 %v11308_v17  ;;  %5501 = vmatpush1.bf16.msra.mxu1 %v13072_v58  ;;  %v13213_v58 = vld [vmem:[#allocation28_spill] sm:$0xff] }
 0xf34   :  { %5502 = vmatprep.subr.bf16.mxu1 %v13073_v54  ;;  %v13214_v54 = vld [vmem:[#allocation29_spill] sm:$0xff] }
 0xf36   :  { %5408 = vmatpush1.bf16.msra.mxu0 %v11313_v22 }
 0xf37   :  { %5409 = vmatprep.subr.bf16.mxu0 %v11316_v59  ;;  %5503 = vmatpush1.bf16.msra.mxu1 %v13076_v42  ;;  %v13215_v42 = vld [vmem:[#allocation77_spill] sm:$0xff] }
 0xf38   :  { %5504 = vmatprep.subr.bf16.mxu1 %v13077_v41  ;;  %v13216_v41 = vld [vmem:[#allocation44_spill] sm:$0xff] }
 0xf3a   :  { %5410 = vmatpush1.bf16.msra.mxu0 %v11321_v18 }
 0xf3b   :  { %5411 = vmatprep.subr.bf16.mxu0 %v11324_v55  ;;  %5505 = vmatpush1.bf16.msra.mxu1 %v13080_v1  ;;  %v13217_v1 = vld [vmem:[#allocation73_spill] sm:$0xff] }
 0xf3c   :  { %5506 = vmatprep.subr.bf16.mxu1 %v13081_v43  ;;  %v13218_v43 = vld [vmem:[#allocation20_spill] sm:$0xff] }
 0xf3e   :  { %5412 = vmatpush1.bf16.msra.mxu0 %v11329_v62 }
 0xf3f   :  { %5413 = vmatprep.subr.bf16.mxu0 %v11332_v39  ;;  %5507 = vmatpush1.bf16.msra.mxu1 %v10973_v0  ;;  %v13212_v0 = vld [vmem:[#allocation56_spill] sm:$0xff] }
 0xf40   :  { %5508 = vmatprep.subr.bf16.mxu1 %v13084_v32  ;;  %v13219_v32 = vld [vmem:[#allocation47_spill] sm:$0xff] }
 0xf42   :  { %5414 = vmatpush1.bf16.msra.mxu0 %v11337_v27 }
 0xf43   :  { %5415 = vmatprep.subr.bf16.mxu0 %v13204_v15  ;;  %5509 = vmatpush1.bf16.msra.mxu1 %v13205_v20  ;;  %v13241_v20 = vld [vmem:[#allocation120_spill] sm:$0xff] }
 0xf44   :  { %5510 = vmatprep.subr.bf16.mxu1 %v13206_v53  ;;  %v13242_v53 = vld [vmem:[#allocation79_spill] sm:$0xff] }
 0xf46   :  { %5416 = vmatpush1.bf16.msra.mxu0 %v13207_v61 }
 0xf47   :  { %5417 = vmatprep.subr.bf16.mxu0 %v13208_v14  ;;  %5511 = vmatpush1.bf16.msra.mxu1 %v13209_v35 }
 0xf48   :  { %5512 = vmatprep.subr.bf16.mxu1 %v13210_v12 }
 0xf4a   :  { %5418 = vmatpush1.bf16.msra.mxu0 %v13211_v26 }
 0xf4b   :  { %5419 = vmatprep.subr.bf16.mxu0 %v13212_v0  ;;  %5513 = vmatpush1.bf16.msra.mxu1 %v13213_v58 }
 0xf4c   :  { %5514 = vmatprep.subr.bf16.mxu1 %v13214_v54 }
 0xf4e   :  { %5420 = vmatpush1.bf16.msra.mxu0 %v13215_v42 }
 0xf4f   :  { %5421 = vmatprep.subr.bf16.mxu0 %v13216_v41  ;;  %5515 = vmatpush1.bf16.msra.mxu1 %v13217_v1 }
 0xf50   :  { %5516 = vmatprep.subr.bf16.mxu1 %v13218_v43 }
 0xf52   :  { %5422 = vmatpush1.bf16.msra.mxu0 %v13219_v32 }
 0xf53   :  { %5423 = vmatprep.subr.bf16.mxu0 %v13220_v47  ;;  %5517 = vmatpush1.bf16.msra.mxu1 %v13221_v31 }
 0xf54   :  { %5518 = vmatprep.subr.bf16.mxu1 %v13222_v57 }
 0xf56   :  { %5424 = vmatpush1.bf16.msra.mxu0 %v13223_v48 }
 0xf57   :  { %5425 = vmatprep.subr.bf16.mxu0 %v13224_v51  ;;  %5519 = vmatpush1.bf16.msra.mxu1 %v13225_v24 }
 0xf58   :  { %5520 = vmatprep.subr.bf16.mxu1 %v13226_v50 }
 0xf5a   :  { %5426 = vmatpush1.bf16.msra.mxu0 %v13227_v45 }
 0xf5b   :  { %5427 = vmatprep.subr.bf16.mxu0 %v13228_v56  ;;  %5521 = vmatpush1.bf16.msra.mxu1 %v13229_v19  ;;  %v13273_v56 = vld [vmem:[#allocation60_spill] sm:$0xff] }
 0xf5c   :  { %5522 = vmatprep.subr.bf16.mxu1 %v13230_v9  ;;  %v13272_v9 = vld [vmem:[#allocation103_spill] sm:$0xff] }
 0xf5e   :  { %5428 = vmatpush1.bf16.msra.mxu0 %v13231_v30  ;;  %v13271_v30 = vld [vmem:[#allocation59_spill] sm:$0xff] }
 0xf5f   :  { %5533 = vmatprep.subr.bf16.mxu0 %v13232_v2  ;;  %5523 = vmatpush1.bf16.msra.mxu1 %v13233_v13  ;;  %v13270_v2 = vld [vmem:[#allocation23_spill] sm:$0xff] }
 0xf60   :  { %5574 = vmatprep.subr.bf16.mxu1 %v13234_v36  ;;  %v13267_v36 = vld [vmem:[#allocation58_spill] sm:$0xff] }
 0xf61   :  { %5430 = vmatmul.mubr.bf16.vlgmr.msra.gmra.mrb[124].mxu0 %v11484_v33  ;;  %v13245_v33 = vld [vmem:[#allocation80_spill] sm:$0xff] }
 0xf62   :  { %5534 = vmatpush1.bf16.msra.mxu0 %v13235_v63  ;;  %v13246_v63 = vld [vmem:[#allocation86_spill] sm:$0xff] }
 0xf63   :  { %5535 = vmatprep.subr.bf16.mxu0 %v13236_v10  ;;  %v13247_v10 = vld [vmem:[#allocation30_spill] sm:$0xff] }
 0xf66   :  { %5536 = vmatpush1.bf16.msra.mxu0 %v13237_v60  ;;  %v13248_v60 = vld [vmem:[#allocation31_spill] sm:$0xff] }
 0xf67   :  { %5537 = vmatprep.subr.bf16.mxu0 %v13238_v49  ;;  %v13249_v49 = vld [vmem:[#allocation109_spill] sm:$0xff] }
 0xf6a   :  { %5538 = vmatpush1.bf16.msra.mxu0 %v13239_v29  ;;  %v13250_v29 = vld [vmem:[#allocation65_spill] sm:$0xff] }
 0xf6b   :  { %5539 = vmatprep.subr.bf16.mxu0 %v13240_v6  ;;  %v13251_v6 = vld [vmem:[#allocation32_spill] sm:$0xff] }
 0xf6e   :  { %5540 = vmatpush1.bf16.msra.mxu0 %v13241_v20  ;;  %v13252_v20 = vld [vmem:[#allocation53_spill] sm:$0xff] }
 0xf6f   :  { %5541 = vmatprep.subr.bf16.mxu0 %v13242_v53  ;;  %v13253_v53 = vld [vmem:[#allocation94_spill] sm:$0xff] }
 0xf72   :  { %5542 = vmatpush1.bf16.msra.mxu0 %v13243_v16  ;;  %v13254_v16 = vld [vmem:[#allocation95_spill] sm:$0xff] }
 0xf73   :  { %5543 = vmatprep.subr.bf16.mxu0 %v13244_v28  ;;  %v13255_v28 = vld [vmem:[#allocation96_spill] sm:$0xff] }
 0xf76   :  { %5544 = vmatpush1.bf16.msra.mxu0 %v13245_v33  ;;  %v13256_v33 = vld [vmem:[#allocation97_spill] sm:$0xff] }
 0xf77   :  { %5545 = vmatprep.subr.bf16.mxu0 %v13246_v63  ;;  %v13257_v63 = vld [vmem:[#allocation98_spill] sm:$0xff] }
 0xf7a   :  { %5546 = vmatpush1.bf16.msra.mxu0 %v13247_v10  ;;  %v13258_v10 = vld [vmem:[#allocation113_spill] sm:$0xff] }
 0xf7b   :  { %5547 = vmatprep.subr.bf16.mxu0 %v13248_v60  ;;  %v13259_v60 = vld [vmem:[#allocation21_spill] sm:$0xff] }
 0xf7e   :  { %5548 = vmatpush1.bf16.msra.mxu0 %v13249_v49  ;;  %v13260_v49 = vld [vmem:[#allocation114_spill] sm:$0xff] }
 0xf7f   :  { %5549 = vmatprep.subr.bf16.mxu0 %v13250_v29  ;;  %v13261_v29 = vld [vmem:[#allocation26_spill] sm:$0xff] }
 0xf82   :  { %5550 = vmatpush1.bf16.msra.mxu0 %v13251_v6  ;;  %v13262_v6 = vld [vmem:[#allocation18_spill] sm:$0xff] }
 0xf83   :  { %5551 = vmatprep.subr.bf16.mxu0 %v13252_v20  ;;  %v13263_v20 = vld [vmem:[#allocation85_spill] sm:$0xff] }
 0xf86   :  { %5552 = vmatpush1.bf16.msra.mxu0 %v13253_v53  ;;  %v13264_v53 = vld [vmem:[#allocation121_spill] sm:$0xff] }
 0xf87   :  { %5553 = vmatprep.subr.bf16.mxu0 %v13254_v16  ;;  %v13265_v16 = vld [vmem:[#allocation122_spill] sm:$0xff] }
 0xf8a   :  { %5554 = vmatpush1.bf16.msra.mxu0 %v13255_v28  ;;  %v13266_v28 = vld [vmem:[#allocation51_spill] sm:$0xff] }
 0xf8b   :  { %5555 = vmatprep.subr.bf16.mxu0 %v13256_v33 }
 0xf8e   :  { %5556 = vmatpush1.bf16.msra.mxu0 %v13257_v63 }
 0xf8f   :  { %5557 = vmatprep.subr.bf16.mxu0 %v13258_v10  ;;  %v13268_v10 = vld [vmem:[#allocation117_spill] sm:$0xff] }
 0xf90   :  { %v3907_v13 = vadd.f32 %v13268_v10, %v13267_v36 }
 0xf92   :  { %5558 = vmatpush1.bf16.msra.mxu0 %v13259_v60  ;;  %v13269_v60 = vld [vmem:[#allocation82_spill] sm:$0xff] }
 0xf93   :  { %5559 = vmatprep.subr.bf16.mxu0 %v13260_v49  ;;  %v3980_v49 = vadd.f32 %v13270_v2, %v13269_v60 }
 0xf96   :  { %5560 = vmatpush1.bf16.msra.mxu0 %v13261_v29 }
 0xf97   :  { %5561 = vmatprep.subr.bf16.mxu0 %v13262_v6 }
 0xf9a   :  { %5562 = vmatpush1.bf16.msra.mxu0 %v13263_v20 }
 0xf9b   :  { %5563 = vmatprep.subr.bf16.mxu0 %v13264_v53  ;;  %v13274_v53 = vld [vmem:[#allocation69_spill] sm:$0xff] }
 0xf9c   :  { %v3909_v45 = vadd.f32 %v13274_v53, %v13273_v56 }
 0xf9e   :  { %5564 = vmatpush1.bf16.msra.mxu0 %v13265_v16  ;;  %v13275_v16 = vld [vmem:[#allocation25_spill] sm:$0xff] }
 0xf9f   :  { %5669 = vmatprep.subr.bf16.mxu0 %v13266_v28  ;;  %v3982_v28 = vadd.f32 %v13275_v16, %v13061_v5 }
 0xff4   :  { %v5349_v33 = vpop.f32.mrb[120].mxu0  ;;  %v5390_v63 = vpop.f32.mrb[120].mxu1 }
 0xff5   :  { %v5350_v29 = vadd.f32 %v5349_v33, %v13271_v30  ;;  %v5391_v6 = vadd.f32 %v5390_v63, %v13272_v9  ;;  %v5351_v19 = vpop.f32.mrb[121].mxu0  ;;  %v5392_v20 = vpop.f32.mrb[121].mxu1 }
 0xff6   :  { %v5352_v50 = vadd.f32 %v5351_v19, %v13063_v44  ;;  %v5393_v24 = vadd.f32 %v5392_v20, %v13064_v38  ;;  %v5353_v10 = vpop.f32.mrb[122].mxu0  ;;  %v5394_v36 = vpop.f32.mrb[122].mxu1 }
 0xff7   :  { %v5438_v51 = vadd.f32 %v5350_v29, %v3907_v13  ;;  %v5452_v2 = vadd.f32 %v5391_v6, %v3980_v49  ;;  %v5354_v60 = vpop.f32.mrb[123].mxu0  ;;  %v5395_v33 = vpop.f32.mrb[123].mxu1  ;;  %v13276_v6 = vld [vmem:[#allocation46_spill] sm:$0xff]  ;;  %v13277_v10 = vld [vmem:[#allocation41_spill] sm:$0xff] }
 0xff8   :  { %v5439_v30 = vadd.f32 %v5352_v50, %v3909_v45  ;;  %v5453_v63 = vadd.f32 %v5393_v24, %v3982_v28 }
 0xff9   :  { %v6910_v9 = vmul.f32 -1.442695, %v5438_v51  ;;  %v6912_v53 = vmul.f32 -1.442695, %v5452_v2 }
 0xffa   :  { %v6911_v48 = vmul.f32 -1.442695, %v5439_v30  ;;  %v6913_v56 = vmul.f32 -1.442695, %v5453_v63 }
 0xffb   :  { %7899 = vpow2.f32 %v6910_v9 }
 0xffc   :  { %7901 = vpow2.f32 %v6911_v48 }
 0xffd   :  { %7903 = vpow2.f32 %v6912_v53 }
 0xffe   :  { %7905 = vpow2.f32 %v6913_v56 }
0x1005   :  { %v7900_v57 = vpop.eup %7899 }
0x1006   :  { %v7902_v16 = vpop.eup %7901  ;;  %v5446_v19 = vadd.f32 1.0, %v7900_v57 }
0x1007   :  { %v5447_v20 = vadd.f32 1.0, %v7902_v16  ;;  %v7904_v13 = vpop.eup %7903 }
0x1008   :  { %7907 = vrcp.f32 %v5446_v19  ;;  %v7906_v36 = vpop.eup %7905  ;;  %v5460_v60 = vadd.f32 1.0, %v7904_v13 }
0x1009   :  { %7909 = vrcp.f32 %v5447_v20  ;;  %v5461_v49 = vadd.f32 1.0, %v7906_v36 }
0x100a   :  { %7911 = vrcp.f32 %v5460_v60 }
0x100b   :  { %7913 = vrcp.f32 %v5461_v49 }
0x1012   :  { %v7908_v45 = vpop.eup %7907 }
0x1013   :  { %v7910_v30 = vpop.eup %7909 }
0x1014   :  { %v7912_v33 = vpop.eup %7911 }
0x1015   :  { %v7914_v63 = vpop.eup %7913  ;;  %v5472_v53 = vsub.f32 1.0, %v7912_v33  ;;  %v5476_v36 = vmul.f32 %v7912_v33, %v11476_v4  ;;  %v11657_v33 = vld [vmem:[#allocation11 + $0xf0] ss:$24 sps:$4 sm:$0xff]  }
0x1016   :  { %v5473_v19 = vsub.f32 1.0, %v7914_v63  ;;  %v13292_v4 = vld [vmem:[#allocation74_spill] sm:$0xff] }
0x1034   :  { %v5431_v50 = vpop.f32.mrb[124].mxu0 }
0x1035   :  { %v5432_v51 = vadd.f32 %v5431_v50, %v13065_v37  ;;  %v5433_v24 = vpop.f32.mrb[125].mxu0  ;;  %v5477_v50 = vmul.f32 %v7914_v63, %v11478_v7  ;;  %v11660_v63 = vld [vmem:[#allocation11 + $0x124] ss:$24 sps:$4 sm:$0xff]   ;;  %v13289_v7 = vld [vmem:[#allocation91_spill] sm:$0xff] }
0x1036   :  { %v5434_v48 = vadd.f32 %v5433_v24, %v10889_v52  ;;  %v5435_v9 = vpop.f32.mrb[126].mxu0 }
0x1037   :  { %v5466_v29 = vmul.f32 %v7908_v45, %v5432_v51  ;;  %v5436_v56 = vpop.f32.mrb[127].mxu0  ;;  %v11620_v9 = vld [vmem:[#allocation11 + $0x34] ss:$24 sps:$4 sm:$0xff]  }
0x1038   :  { %v5467_v57 = vmul.f32 %v7910_v30, %v5434_v48  ;;  %v11617_v48 = vld [vmem:[#allocation11] ss:$24 sps:$4 sm:$0xff]   ;;  %v11625_v30 = vld [vmem:[#allocation11 + $0x30] ss:$24 sps:$4 sm:$0xff]  }
0x1039   :  { %v5468_v28 = vadd.f32 %v5466_v29, %v13276_v6  ;;  %v11628_v29 = vld [vmem:[#allocation11 + $0x64] ss:$24 sps:$4 sm:$0xff]   ;;  %v11633_v56 = vld [vmem:[#allocation11 + $0x60] ss:$24 sps:$4 sm:$0xff]   ;;  %v11641_v6 = vld [vmem:[#allocation11 + $0x90] ss:$24 sps:$4 sm:$0xff]  }
0x103a   :  { %v5469_v2 = vadd.f32 %v5467_v57, %v13277_v10  ;;  %v11636_v57 = vld [vmem:[#allocation11 + $0x94] ss:$24 sps:$4 sm:$0xff]   ;;  %v11649_v10 = vld [vmem:[#allocation11 + $0xc0] ss:$24 sps:$4 sm:$0xff]  }
0x103b   :  { %7915 = vtanh.f32 %v5468_v28  ;;  %v11644_v28 = vld [vmem:[#allocation11 + $0xc4] ss:$24 sps:$4 sm:$0xff]  }
0x103c   :  { %7917 = vtanh.f32 %v5469_v2  ;;  %v11652_v2 = vld [vmem:[#allocation11 + $0xf4] ss:$24 sps:$4 sm:$0xff]  }
0x1045   :  { %v7916_v16 = vpop.eup %7915 }
0x1046   :  { %v7918_v20 = vpop.eup %7917  ;;  %v5474_v13 = vmul.f32 %v7916_v16, %v5472_v53  ;;  %v11665_v53 = vld [vmem:[#allocation11 + $0x120] ss:$24 sps:$4 sm:$0xff]   ;;  %v11668_v16 = vld [vmem:[#allocation11 + $0x154] ss:$24 sps:$4 sm:$0xff]  }
0x1047   :  { %v5475_v60 = vmul.f32 %v7918_v20, %v5473_v19  ;;  %v11673_v19 = vld [vmem:[#allocation11 + $0x150] ss:$24 sps:$4 sm:$0xff]   ;;  %v11676_v20 = vld [vmem:[#allocation11 + $0x184] ss:$24 sps:$4 sm:$0xff]  }
0x1048   :  { %v11603_v49 = vadd.f32 %v5476_v36, %v5474_v13  ;;  %v11681_v13 = vld [vmem:[#allocation11 + $0x180] ss:$24 sps:$4 sm:$0xff]   ;;  %v11684_v36 = vld [vmem:[#allocation11 + $0x1b4] ss:$24 sps:$4 sm:$0xff]  }
0x1049   :  { %v11605_v51 = vadd.f32 %v5477_v50, %v5475_v60  ;;  %13278 = vst [vmem:[#allocation116_spill] sm:$0xff] %v11681_v13  ;;  %13279 = vst [vmem:[#allocation88_spill] sm:$0xff] %v11684_v36  ;;  %v13284_v60 = vld [vmem:[#allocation40_spill] sm:$0xff]  ;;  %v13285_v50 = vld [vmem:[#allocation89_spill] sm:$0xff] }
0x104a   :  { %v11611_v45 = vpack.c.bf16 %v11603_v49, %v11603_v49 }
0x104b   :  { %v5491_v24 = vpack.c.bf16 %v11605_v51, %v11605_v51 }
0x104d   :  { %5524 = vmatprep.mubr.bf16.mxu1 %v5491_v24  ;;  %5565 = vmatprep.mubr.bf16.mxu0 %v5491_v24 }
0x104e   :  { %5525 = vmatmul.mubr.bf16.vlgmr.msra.gmra.mrb[124].mxu1 %v11611_v45  ;;  %5566 = vmatmul.mubr.bf16.vlgmr.msra.gmra.mrb[128].mxu0 %v11611_v45 }
0x104f   :  { %5575 = vmatpush1.bf16.msra.mxu1 %v11273_v23  ;;  %5606 = vmatprep.mubr.bf16.mxu1 %v5491_v24  ;;  %v13288_v24 = vld [vmem:[#allocation78_spill] sm:$0xff] }
0x1050   :  { %5576 = vmatprep.subr.bf16.mxu1 %v11276_v25  ;;  %5670 = vmatpush1.bf16.msra.mxu0 %v11617_v48 }
0x1051   :  { %5671 = vmatprep.subr.bf16.mxu0 %v11620_v9 }
0x1053   :  { %5577 = vmatpush1.bf16.msra.mxu1 %v11281_v34 }
0x1054   :  { %5578 = vmatprep.subr.bf16.mxu1 %v11284_v3  ;;  %5672 = vmatpush1.bf16.msra.mxu0 %v11625_v30 }
0x1055   :  { %5673 = vmatprep.subr.bf16.mxu0 %v11628_v29 }
0x1057   :  { %5579 = vmatpush1.bf16.msra.mxu1 %v11289_v21 }
0x1058   :  { %5580 = vmatprep.subr.bf16.mxu1 %v11292_v8  ;;  %5674 = vmatpush1.bf16.msra.mxu0 %v11633_v56 }
0x1059   :  { %5675 = vmatprep.subr.bf16.mxu0 %v11636_v57 }
0x105b   :  { %5581 = vmatpush1.bf16.msra.mxu1 %v11297_v40 }
0x105c   :  { %5582 = vmatprep.subr.bf16.mxu1 %v11300_v11  ;;  %5676 = vmatpush1.bf16.msra.mxu0 %v11641_v6 }
0x105d   :  { %5677 = vmatprep.subr.bf16.mxu0 %v11644_v28 }
0x105f   :  { %5583 = vmatpush1.bf16.msra.mxu1 %v11305_v46 }
0x1060   :  { %5584 = vmatprep.subr.bf16.mxu1 %v11308_v17  ;;  %5678 = vmatpush1.bf16.msra.mxu0 %v11649_v10 }
0x1061   :  { %5679 = vmatprep.subr.bf16.mxu0 %v11652_v2 }
0x1063   :  { %5585 = vmatpush1.bf16.msra.mxu1 %v11313_v22 }
0x1064   :  { %5586 = vmatprep.subr.bf16.mxu1 %v11316_v59  ;;  %5680 = vmatpush1.bf16.msra.mxu0 %v11657_v33 }
0x1065   :  { %5681 = vmatprep.subr.bf16.mxu0 %v11660_v63 }
0x1067   :  { %5587 = vmatpush1.bf16.msra.mxu1 %v11321_v18 }
0x1068   :  { %5588 = vmatprep.subr.bf16.mxu1 %v11324_v55  ;;  %5682 = vmatpush1.bf16.msra.mxu0 %v11665_v53 }
0x1069   :  { %5683 = vmatprep.subr.bf16.mxu0 %v11668_v16 }
0x106b   :  { %5589 = vmatpush1.bf16.msra.mxu1 %v11329_v62 }
0x106c   :  { %5590 = vmatprep.subr.bf16.mxu1 %v11332_v39  ;;  %5684 = vmatpush1.bf16.msra.mxu0 %v11673_v19 }
0x106d   :  { %5685 = vmatprep.subr.bf16.mxu0 %v11676_v20 }
0x106f   :  { %5591 = vmatpush1.bf16.msra.mxu1 %v11337_v27 }
0x1070   :  { %5592 = vmatprep.subr.bf16.mxu1 %v13204_v15  ;;  %5686 = vmatpush1.bf16.msra.mxu0 %v11681_v13 }
0x1071   :  { %5687 = vmatprep.subr.bf16.mxu0 %v11684_v36 }
0x1073   :  { %5593 = vmatpush1.bf16.msra.mxu1 %v13207_v61 }
0x1074   :  { %5594 = vmatprep.subr.bf16.mxu1 %v13208_v14  ;;  %5688 = vmatpush1.bf16.msra.mxu0 %v13209_v35  ;;  %v13280_v35 = vld [vmem:[#allocation38_spill] sm:$0xff] }
0x1075   :  { %5689 = vmatprep.subr.bf16.mxu0 %v13210_v12  ;;  %v13281_v12 = vld [vmem:[#allocation43_spill] sm:$0xff] }
0x1077   :  { %5595 = vmatpush1.bf16.msra.mxu1 %v13211_v26 }
0x1078   :  { %5596 = vmatprep.subr.bf16.mxu1 %v13212_v0  ;;  %5690 = vmatpush1.bf16.msra.mxu0 %v13213_v58  ;;  %v13282_v58 = vld [vmem:[#allocation37_spill] sm:$0xff]  ;;  %v13330_v0 = vld [vmem:[#allocation60_spill] sm:$0xff] }
0x1079   :  { %5691 = vmatprep.subr.bf16.mxu0 %v13214_v54  ;;  %v13283_v54 = vld [vmem:[#allocation90_spill] sm:$0xff] }
0x107b   :  { %5597 = vmatpush1.bf16.msra.mxu1 %v13215_v42 }
0x107c   :  { %5598 = vmatprep.subr.bf16.mxu1 %v13216_v41  ;;  %5692 = vmatpush1.bf16.msra.mxu0 %v13217_v1  ;;  %v13286_v1 = vld [vmem:[#allocation39_spill] sm:$0xff] }
0x107d   :  { %5693 = vmatprep.subr.bf16.mxu0 %v13218_v43  ;;  %v13287_v43 = vld [vmem:[#allocation84_spill] sm:$0xff]  ;;  %v13329_v41 = vld [vmem:[#allocation103_spill] sm:$0xff] }
0x107f   :  { %5599 = vmatpush1.bf16.msra.mxu1 %v13219_v32  ;;  %v13328_v32 = vld [vmem:[#allocation59_spill] sm:$0xff] }
0x1080   :  { %5600 = vmatprep.subr.bf16.mxu1 %v13220_v47  ;;  %5694 = vmatpush1.bf16.msra.mxu0 %v13221_v31  ;;  %v13290_v31 = vld [vmem:[#allocation71_spill] sm:$0xff]  ;;  %v13327_v47 = vld [vmem:[#allocation92_spill] sm:$0xff] }
0x1081   :  { %5695 = vmatprep.subr.bf16.mxu0 %v13280_v35  ;;  %v13291_v35 = vld [vmem:[#allocation48_spill] sm:$0xff] }
0x1083   :  { %5601 = vmatpush1.bf16.msra.mxu1 %v13281_v12 }
0x1084   :  { %5602 = vmatprep.subr.bf16.mxu1 %v13282_v58  ;;  %5696 = vmatpush1.bf16.msra.mxu0 %v13283_v54  ;;  %v13293_v54 = vld [vmem:[#allocation19_spill] sm:$0xff]  ;;  %v13324_v58 = vld [vmem:[#allocation58_spill] sm:$0xff] }
0x1085   :  { %5697 = vmatprep.subr.bf16.mxu0 %v13284_v60  ;;  %v13294_v60 = vld [vmem:[#allocation22_spill] sm:$0xff] }
0x1087   :  { %5603 = vmatpush1.bf16.msra.mxu1 %v13285_v50  ;;  %v13295_v50 = vld [vmem:[#allocation111_spill] sm:$0xff] }
0x1088   :  { %5604 = vmatprep.subr.bf16.mxu1 %v13286_v1  ;;  %5698 = vmatpush1.bf16.msra.mxu0 %v13287_v43  ;;  %v13296_v1 = vld [vmem:[#allocation119_spill] sm:$0xff]  ;;  %v13297_v43 = vld [vmem:[#allocation112_spill] sm:$0xff] }
0x1089   :  { %5699 = vmatprep.subr.bf16.mxu0 %v13288_v24  ;;  %v13298_v24 = vld [vmem:[#allocation105_spill] sm:$0xff] }
0x108b   :  { %5605 = vmatpush1.bf16.msra.mxu1 %v13289_v7  ;;  %v13299_v7 = vld [vmem:[#allocation120_spill] sm:$0xff] }
0x108c   :  { %5710 = vmatprep.subr.bf16.mxu1 %v13290_v31  ;;  %5700 = vmatpush1.bf16.msra.mxu0 %v13291_v35  ;;  %v13300_v31 = vld [vmem:[#allocation79_spill] sm:$0xff]  ;;  %v13301_v35 = vld [vmem:[#allocation106_spill] sm:$0xff] }
0x108d   :  { %5751 = vmatprep.subr.bf16.mxu0 %v13292_v4  ;;  %v13302_v4 = vld [vmem:[#allocation104_spill] sm:$0xff] }
0x108e   :  { %5607 = vmatmul.mubr.bf16.vlgmr.msra.gmra.mrb[128].mxu1 %v11611_v45  ;;  %v13303_v45 = vld [vmem:[#allocation80_spill] sm:$0xff] }
0x108f   :  { %5711 = vmatpush1.bf16.msra.mxu1 %v13293_v54  ;;  %v13304_v54 = vld [vmem:[#allocation86_spill] sm:$0xff] }
0x1090   :  { %5712 = vmatprep.subr.bf16.mxu1 %v13294_v60  ;;  %v13305_v60 = vld [vmem:[#allocation30_spill] sm:$0xff] }
0x1093   :  { %5713 = vmatpush1.bf16.msra.mxu1 %v13295_v50  ;;  %v13306_v50 = vld [vmem:[#allocation31_spill] sm:$0xff] }
0x1094   :  { %5714 = vmatprep.subr.bf16.mxu1 %v13296_v1  ;;  %v13307_v1 = vld [vmem:[#allocation109_spill] sm:$0xff] }
0x1097   :  { %5715 = vmatpush1.bf16.msra.mxu1 %v13297_v43  ;;  %v13308_v43 = vld [vmem:[#allocation65_spill] sm:$0xff] }
0x1098   :  { %5716 = vmatprep.subr.bf16.mxu1 %v13298_v24  ;;  %v13309_v24 = vld [vmem:[#allocation32_spill] sm:$0xff] }
0x109b   :  { %5717 = vmatpush1.bf16.msra.mxu1 %v13299_v7  ;;  %v13310_v7 = vld [vmem:[#allocation53_spill] sm:$0xff] }
0x109c   :  { %5718 = vmatprep.subr.bf16.mxu1 %v13300_v31  ;;  %v13311_v31 = vld [vmem:[#allocation94_spill] sm:$0xff] }
0x109f   :  { %5719 = vmatpush1.bf16.msra.mxu1 %v13301_v35  ;;  %v13312_v35 = vld [vmem:[#allocation95_spill] sm:$0xff] }
0x10a0   :  { %5720 = vmatprep.subr.bf16.mxu1 %v13302_v4  ;;  %v13313_v4 = vld [vmem:[#allocation96_spill] sm:$0xff] }
0x10a3   :  { %5721 = vmatpush1.bf16.msra.mxu1 %v13303_v45  ;;  %v13314_v45 = vld [vmem:[#allocation97_spill] sm:$0xff] }
0x10a4   :  { %5722 = vmatprep.subr.bf16.mxu1 %v13304_v54  ;;  %v13315_v54 = vld [vmem:[#allocation98_spill] sm:$0xff] }
0x10a7   :  { %5723 = vmatpush1.bf16.msra.mxu1 %v13305_v60  ;;  %v13316_v60 = vld [vmem:[#allocation113_spill] sm:$0xff] }
0x10a8   :  { %5724 = vmatprep.subr.bf16.mxu1 %v13306_v50  ;;  %v13317_v50 = vld [vmem:[#allocation21_spill] sm:$0xff] }
0x10ab   :  { %5725 = vmatpush1.bf16.msra.mxu1 %v13307_v1  ;;  %v13318_v1 = vld [vmem:[#allocation114_spill] sm:$0xff] }
0x10ac   :  { %5726 = vmatprep.subr.bf16.mxu1 %v13308_v43  ;;  %v13319_v43 = vld [vmem:[#allocation26_spill] sm:$0xff] }
0x10af   :  { %5727 = vmatpush1.bf16.msra.mxu1 %v13309_v24  ;;  %v13320_v24 = vld [vmem:[#allocation18_spill] sm:$0xff] }
0x10b0   :  { %5728 = vmatprep.subr.bf16.mxu1 %v13310_v7  ;;  %v13321_v7 = vld [vmem:[#allocation85_spill] sm:$0xff] }
0x10b3   :  { %5729 = vmatpush1.bf16.msra.mxu1 %v13311_v31  ;;  %v13322_v31 = vld [vmem:[#allocation121_spill] sm:$0xff] }
0x10b4   :  { %5730 = vmatprep.subr.bf16.mxu1 %v13312_v35  ;;  %v13323_v35 = vld [vmem:[#allocation122_spill] sm:$0xff] }
0x10b7   :  { %5731 = vmatpush1.bf16.msra.mxu1 %v13313_v4  ;;  %v8285_v4 = vld [vmem:[#allocation11 + $0x4] ss:$24 sps:$4 sm:$0xff]  }
0x10b8   :  { %5732 = vmatprep.subr.bf16.mxu1 %v13314_v45 }
0x10bb   :  { %5733 = vmatpush1.bf16.msra.mxu1 %v13315_v54 }
0x10bc   :  { %5734 = vmatprep.subr.bf16.mxu1 %v13316_v60  ;;  %v13325_v60 = vld [vmem:[#allocation70_spill] sm:$0xff] }
0x10bd   :  { %v3911_v12 = vadd.f32 %v13325_v60, %v13324_v58 }
0x10bf   :  { %5735 = vmatpush1.bf16.msra.mxu1 %v13317_v50  ;;  %v13326_v50 = vld [vmem:[#allocation82_spill] sm:$0xff] }
0x10c0   :  { %5736 = vmatprep.subr.bf16.mxu1 %v13318_v1  ;;  %v3984_v1 = vadd.f32 %v13327_v47, %v13326_v50 }
0x10c3   :  { %5737 = vmatpush1.bf16.msra.mxu1 %v13319_v43 }
0x10c4   :  { %5738 = vmatprep.subr.bf16.mxu1 %v13320_v24 }
0x10c7   :  { %5739 = vmatpush1.bf16.msra.mxu1 %v13321_v7 }
0x10c8   :  { %5740 = vmatprep.subr.bf16.mxu1 %v13322_v31  ;;  %v13331_v31 = vld [vmem:[#allocation49_spill] sm:$0xff] }
0x10c9   :  { %v3913_v26 = vadd.f32 %v13331_v31, %v13330_v0 }
0x10cb   :  { %5741 = vmatpush1.bf16.msra.mxu1 %v13323_v35  ;;  %v13332_v35 = vld [vmem:[#allocation93_spill] sm:$0xff] }
0x10cc   :  { %5846 = vmatprep.subr.bf16.mxu1 %v8285_v4  ;;  %v3986_v4 = vadd.f32 %v13332_v35, %v13061_v5 }
0x1121   :  { %v5526_v45 = vpop.f32.mrb[124].mxu1  ;;  %v5567_v54 = vpop.f32.mrb[128].mxu0 }
0x1122   :  { %v5527_v43 = vadd.f32 %v5526_v45, %v13328_v32  ;;  %v5568_v24 = vadd.f32 %v5567_v54, %v13329_v41  ;;  %v5528_v42 = vpop.f32.mrb[125].mxu1  ;;  %v5569_v7 = vpop.f32.mrb[129].mxu0 }
0x1123   :  { %v5529_v14 = vadd.f32 %v5528_v42, %v13063_v44  ;;  %v5570_v61 = vadd.f32 %v5569_v7, %v13064_v38  ;;  %v5530_v60 = vpop.f32.mrb[126].mxu1  ;;  %v5571_v58 = vpop.f32.mrb[130].mxu0 }
0x1124   :  { %v5615_v36 = vadd.f32 %v5527_v43, %v3911_v12  ;;  %v5629_v47 = vadd.f32 %v5568_v24, %v3984_v1  ;;  %v5531_v50 = vpop.f32.mrb[127].mxu1  ;;  %v5572_v45 = vpop.f32.mrb[131].mxu0  ;;  %v13333_v24 = vld [vmem:[#allocation45_spill] sm:$0xff] }
0x1125   :  { %v5616_v32 = vadd.f32 %v5529_v14, %v3913_v26  ;;  %v5630_v54 = vadd.f32 %v5570_v61, %v3986_v4  ;;  %v13334_v60 = vld [vmem:[#allocation61_spill] sm:$0xff] }
0x1126   :  { %v6914_v41 = vmul.f32 -1.442695, %v5615_v36  ;;  %v6916_v31 = vmul.f32 -1.442695, %v5629_v47 }
0x1127   :  { %v6915_v13 = vmul.f32 -1.442695, %v5616_v32  ;;  %v6917_v0 = vmul.f32 -1.442695, %v5630_v54 }
0x1128   :  { %7919 = vpow2.f32 %v6914_v41 }
0x1129   :  { %7921 = vpow2.f32 %v6915_v13 }
0x112a   :  { %7923 = vpow2.f32 %v6916_v31 }
0x112b   :  { %7925 = vpow2.f32 %v6917_v0 }
0x1132   :  { %v7920_v15 = vpop.eup %7919 }
0x1133   :  { %v7922_v35 = vpop.eup %7921  ;;  %v5623_v42 = vadd.f32 1.0, %v7920_v15 }
0x1134   :  { %v5624_v7 = vadd.f32 1.0, %v7922_v35  ;;  %v7924_v12 = vpop.eup %7923 }
0x1135   :  { %7927 = vrcp.f32 %v5623_v42  ;;  %v7926_v58 = vpop.eup %7925  ;;  %v5637_v50 = vadd.f32 1.0, %v7924_v12 }
0x1136   :  { %7929 = vrcp.f32 %v5624_v7  ;;  %v5638_v1 = vadd.f32 1.0, %v7926_v58 }
0x1137   :  { %7931 = vrcp.f32 %v5637_v50 }
0x1138   :  { %7933 = vrcp.f32 %v5638_v1 }
0x113f   :  { %v7928_v41 = vpop.eup %7927 }
0x1140   :  { %v7930_v36 = vpop.eup %7929 }
0x1141   :  { %v7932_v45 = vpop.eup %7931 }
0x1142   :  { %v7934_v54 = vpop.eup %7933  ;;  %v5649_v31 = vsub.f32 1.0, %v7932_v45  ;;  %v5653_v58 = vmul.f32 %v7932_v45, %v11603_v49  ;;  %v8313_v45 = vld [vmem:[#allocation11 + $0x128] ss:$24 sps:$4 sm:$0xff]  }
0x1143   :  { %v5650_v42 = vsub.f32 1.0, %v7934_v54 }
0x1161   :  { %v5608_v14 = vpop.f32.mrb[128].mxu1 }
0x1162   :  { %v5609_v61 = vadd.f32 %v5608_v14, %v13065_v37  ;;  %v5610_v26 = vpop.f32.mrb[129].mxu1  ;;  %v5654_v14 = vmul.f32 %v7934_v54, %v11605_v51  ;;  %v8314_v54 = vld [vmem:[#allocation11 + $0x15c] ss:$24 sps:$4 sm:$0xff]  }
0x1163   :  { %v5611_v32 = vadd.f32 %v5610_v26, %v10889_v52  ;;  %v5612_v13 = vpop.f32.mrb[130].mxu1 }
0x1164   :  { %v5643_v43 = vmul.f32 %v7928_v41, %v5609_v61  ;;  %v5613_v0 = vpop.f32.mrb[131].mxu1  ;;  %v8304_v13 = vld [vmem:[#allocation11 + $0x6c] ss:$24 sps:$4 sm:$0xff]  }
0x1165   :  { %v5644_v15 = vmul.f32 %v7930_v36, %v5611_v32  ;;  %v8303_v32 = vld [vmem:[#allocation11 + $0x38] ss:$24 sps:$4 sm:$0xff]   ;;  %v8305_v36 = vld [vmem:[#allocation11 + $0x68] ss:$24 sps:$4 sm:$0xff]  }
0x1166   :  { %v5645_v4 = vadd.f32 %v5643_v43, %v13333_v24  ;;  %v8306_v43 = vld [vmem:[#allocation11 + $0x9c] ss:$24 sps:$4 sm:$0xff]   ;;  %v8307_v0 = vld [vmem:[#allocation11 + $0x98] ss:$24 sps:$4 sm:$0xff]   ;;  %v8309_v24 = vld [vmem:[#allocation11 + $0xc8] ss:$24 sps:$4 sm:$0xff]  }
0x1167   :  { %v5646_v47 = vadd.f32 %v5644_v15, %v13334_v60  ;;  %v8308_v15 = vld [vmem:[#allocation11 + $0xcc] ss:$24 sps:$4 sm:$0xff]   ;;  %v8311_v60 = vld [vmem:[#allocation11 + $0xf8] ss:$24 sps:$4 sm:$0xff]  }
0x1168   :  { %7935 = vtanh.f32 %v5645_v4  ;;  %v8310_v4 = vld [vmem:[#allocation11 + $0xfc] ss:$24 sps:$4 sm:$0xff]  }
0x1169   :  { %7937 = vtanh.f32 %v5646_v47  ;;  %v8312_v47 = vld [vmem:[#allocation11 + $0x12c] ss:$24 sps:$4 sm:$0xff]  }
0x1172   :  { %v7936_v35 = vpop.eup %7935 }
0x1173   :  { %v7938_v7 = vpop.eup %7937  ;;  %v5651_v12 = vmul.f32 %v7936_v35, %v5649_v31  ;;  %v8315_v31 = vld [vmem:[#allocation11 + $0x158] ss:$24 sps:$4 sm:$0xff]   ;;  %v8316_v35 = vld [vmem:[#allocation11 + $0x18c] ss:$24 sps:$4 sm:$0xff]  }
0x1174   :  { %v5652_v50 = vmul.f32 %v7938_v7, %v5650_v42  ;;  %v8317_v42 = vld [vmem:[#allocation11 + $0x188] ss:$24 sps:$4 sm:$0xff]   ;;  %v8318_v7 = vld [vmem:[#allocation11 + $0x1bc] ss:$24 sps:$4 sm:$0xff]  }
0x1175   :  { %v11765_v1 = vadd.f32 %v5653_v58, %v5651_v12  ;;  %v13351_v12 = vld [vmem:[#allocation94_spill] sm:$0xff]  ;;  %v13352_v58 = vld [vmem:[#allocation95_spill] sm:$0xff] }
0x1176   :  { %v11767_v61 = vadd.f32 %v5654_v14, %v5652_v50  ;;  %v13353_v50 = vld [vmem:[#allocation96_spill] sm:$0xff]  ;;  %v13354_v14 = vld [vmem:[#allocation97_spill] sm:$0xff] }
0x1177   :  { %v11773_v41 = vpack.c.bf16 %v11765_v1, %v11765_v1 }
0x1178   :  { %v5668_v26 = vpack.c.bf16 %v11767_v61, %v11767_v61 }
0x117a   :  { %5701 = vmatprep.mubr.bf16.mxu0 %v5668_v26  ;;  %5742 = vmatprep.mubr.bf16.mxu1 %v5668_v26 }
0x117b   :  { %5702 = vmatmul.mubr.bf16.vlgmr.msra.gmra.mrb[132].mxu0 %v11773_v41  ;;  %5743 = vmatmul.mubr.bf16.vlgmr.msra.gmra.mrb[132].mxu1 %v11773_v41 }
0x117c   :  { %5752 = vmatpush1.bf16.msra.mxu0 %v11273_v23  ;;  %5783 = vmatprep.mubr.bf16.mxu0 %v5668_v26  ;;  %v13335_v23 = vld [vmem:[#allocation54_spill] sm:$0xff] }
0x117d   :  { %5753 = vmatprep.subr.bf16.mxu0 %v11276_v25  ;;  %5847 = vmatpush1.bf16.msra.mxu1 %v11617_v48  ;;  %v13336_v25 = vld [vmem:[#allocation116_spill] sm:$0xff]  ;;  %v13355_v26 = vld [vmem:[#allocation98_spill] sm:$0xff] }
0x117e   :  { %5848 = vmatprep.subr.bf16.mxu1 %v11620_v9  ;;  %v8292_v48 = vld [vmem:[#allocation11 + $0x240] ss:$24 sps:$4 sm:$0xff]   ;;  %v8293_v9 = vld [vmem:[#allocation11 + $0x274] ss:$24 sps:$4 sm:$0xff]  }
0x1180   :  { %5754 = vmatpush1.bf16.msra.mxu0 %v11281_v34  ;;  %v13337_v34 = vld [vmem:[#allocation88_spill] sm:$0xff] }
0x1181   :  { %5755 = vmatprep.subr.bf16.mxu0 %v11284_v3  ;;  %5849 = vmatpush1.bf16.msra.mxu1 %v11625_v30  ;;  %v13338_v3 = vld [vmem:[#allocation55_spill] sm:$0xff] }
0x1182   :  { %5850 = vmatprep.subr.bf16.mxu1 %v11628_v29  ;;  %v13346_v30 = vld [vmem:[#allocation43_spill] sm:$0xff]  ;;  %v13347_v29 = vld [vmem:[#allocation37_spill] sm:$0xff] }
0x1184   :  { %5756 = vmatpush1.bf16.msra.mxu0 %v11289_v21  ;;  %v13339_v21 = vld [vmem:[#allocation34_spill] sm:$0xff] }
0x1185   :  { %5757 = vmatprep.subr.bf16.mxu0 %v11292_v8  ;;  %5851 = vmatpush1.bf16.msra.mxu1 %v11633_v56  ;;  %v8286_v8 = vld [vmem:[#allocation11 + $0x1b0] ss:$24 sps:$4 sm:$0xff]  }
0x1186   :  { %5852 = vmatprep.subr.bf16.mxu1 %v11636_v57  ;;  %v8294_v56 = vld [vmem:[#allocation11 + $0x270] ss:$24 sps:$4 sm:$0xff]   ;;  %v8295_v57 = vld [vmem:[#allocation11 + $0x2a4] ss:$24 sps:$4 sm:$0xff]  }
0x1188   :  { %5758 = vmatpush1.bf16.msra.mxu0 %v11297_v40  ;;  %v8287_v40 = vld [vmem:[#allocation11 + $0x1e4] ss:$24 sps:$4 sm:$0xff]  }
0x1189   :  { %5759 = vmatprep.subr.bf16.mxu0 %v11300_v11  ;;  %5853 = vmatpush1.bf16.msra.mxu1 %v11641_v6  ;;  %v13340_v11 = vld [vmem:[#allocation35_spill] sm:$0xff]  ;;  %v13348_v6 = vld [vmem:[#allocation89_spill] sm:$0xff] }
0x118a   :  { %5854 = vmatprep.subr.bf16.mxu1 %v11644_v28  ;;  %v13349_v28 = vld [vmem:[#allocation39_spill] sm:$0xff] }
0x118c   :  { %5760 = vmatpush1.bf16.msra.mxu0 %v11305_v46  ;;  %v13341_v46 = vld [vmem:[#allocation56_spill] sm:$0xff] }
0x118d   :  { %5761 = vmatprep.subr.bf16.mxu0 %v11308_v17  ;;  %5855 = vmatpush1.bf16.msra.mxu1 %v11649_v10  ;;  %v8288_v17 = vld [vmem:[#allocation11 + $0x1e0] ss:$24 sps:$4 sm:$0xff]  }
0x118e   :  { %5856 = vmatprep.subr.bf16.mxu1 %v11652_v2  ;;  %v8296_v10 = vld [vmem:[#allocation11 + $0x2a0] ss:$24 sps:$4 sm:$0xff]   ;;  %v8297_v2 = vld [vmem:[#allocation11 + $0x2d4] ss:$24 sps:$4 sm:$0xff]  }
0x1190   :  { %5762 = vmatpush1.bf16.msra.mxu0 %v11313_v22  ;;  %v8289_v22 = vld [vmem:[#allocation11 + $0x214] ss:$24 sps:$4 sm:$0xff]  }
0x1191   :  { %5763 = vmatprep.subr.bf16.mxu0 %v11316_v59  ;;  %5857 = vmatpush1.bf16.msra.mxu1 %v11657_v33  ;;  %v13342_v59 = vld [vmem:[#allocation77_spill] sm:$0xff]  ;;  %v13350_v33 = vld [vmem:[#allocation91_spill] sm:$0xff] }
0x1192   :  { %5858 = vmatprep.subr.bf16.mxu1 %v11660_v63  ;;  %v8298_v63 = vld [vmem:[#allocation11 + $0xc] ss:$24 sps:$4 sm:$0xff]  }
0x1194   :  { %5764 = vmatpush1.bf16.msra.mxu0 %v11321_v18  ;;  %v13343_v18 = vld [vmem:[#allocation44_spill] sm:$0xff] }
0x1195   :  { %5765 = vmatprep.subr.bf16.mxu0 %v11324_v55  ;;  %5859 = vmatpush1.bf16.msra.mxu1 %v11665_v53  ;;  %v8290_v55 = vld [vmem:[#allocation11 + $0x210] ss:$24 sps:$4 sm:$0xff]  }
0x1196   :  { %5860 = vmatprep.subr.bf16.mxu1 %v11668_v16  ;;  %v8299_v53 = vld [vmem:[#allocation11 + $0x2d0] ss:$24 sps:$4 sm:$0xff]   ;;  %v8300_v16 = vld [vmem:[#allocation11 + $0x14] ss:$24 sps:$4 sm:$0xff]  }
0x1198   :  { %5766 = vmatpush1.bf16.msra.mxu0 %v11329_v62  ;;  %v8291_v62 = vld [vmem:[#allocation11 + $0x244] ss:$24 sps:$4 sm:$0xff]  }
0x1199   :  { %5767 = vmatprep.subr.bf16.mxu0 %v11332_v39  ;;  %5861 = vmatpush1.bf16.msra.mxu1 %v11673_v19  ;;  %v13344_v39 = vld [vmem:[#allocation47_spill] sm:$0xff]  ;;  %v8301_v19 = vld [vmem:[#allocation11 + $0x8] ss:$24 sps:$4 sm:$0xff]  }
0x119a   :  { %5862 = vmatprep.subr.bf16.mxu1 %v11676_v20  ;;  %v8302_v20 = vld [vmem:[#allocation11 + $0x3c] ss:$24 sps:$4 sm:$0xff]  }
0x119c   :  { %5768 = vmatpush1.bf16.msra.mxu0 %v11337_v27  ;;  %v13345_v27 = vld [vmem:[#allocation72_spill] sm:$0xff] }
0x119d   :  { %5769 = vmatprep.subr.bf16.mxu0 %v13335_v23  ;;  %5863 = vmatpush1.bf16.msra.mxu1 %v13336_v25  ;;  %v13357_v23 = vld [vmem:[#allocation21_spill] sm:$0xff]  ;;  %v13358_v25 = vld [vmem:[#allocation114_spill] sm:$0xff] }
0x119e   :  { %5864 = vmatprep.subr.bf16.mxu1 %v13337_v34  ;;  %v13359_v34 = vld [vmem:[#allocation26_spill] sm:$0xff] }
0x11a0   :  { %5770 = vmatpush1.bf16.msra.mxu0 %v13338_v3  ;;  %v13360_v3 = vld [vmem:[#allocation18_spill] sm:$0xff] }
0x11a1   :  { %5771 = vmatprep.subr.bf16.mxu0 %v13339_v21  ;;  %5865 = vmatpush1.bf16.msra.mxu1 %v8286_v8  ;;  %v13361_v21 = vld [vmem:[#allocation85_spill] sm:$0xff] }
0x11a2   :  { %5866 = vmatprep.subr.bf16.mxu1 %v8287_v40  ;;  %v13362_v8 = vld [vmem:[#allocation121_spill] sm:$0xff]  ;;  %v13363_v40 = vld [vmem:[#allocation122_spill] sm:$0xff] }
0x11a4   :  { %5772 = vmatpush1.bf16.msra.mxu0 %v13340_v11 }
0x11a5   :  { %5773 = vmatprep.subr.bf16.mxu0 %v13341_v46  ;;  %5867 = vmatpush1.bf16.msra.mxu1 %v8288_v17  ;;  %v13364_v17 = vld [vmem:[#allocation58_spill] sm:$0xff] }
0x11a6   :  { %5868 = vmatprep.subr.bf16.mxu1 %v8289_v22  ;;  %v13365_v22 = vld [vmem:[#allocation99_spill] sm:$0xff] }
0x11a8   :  { %5774 = vmatpush1.bf16.msra.mxu0 %v13342_v59  ;;  %v3917_v59 = vadd.f32 %v13365_v22, %v13364_v17 }
0x11a9   :  { %5775 = vmatprep.subr.bf16.mxu0 %v13343_v18  ;;  %5869 = vmatpush1.bf16.msra.mxu1 %v8290_v55  ;;  %v13366_v18 = vld [vmem:[#allocation82_spill] sm:$0xff]  ;;  %v13367_v55 = vld [vmem:[#allocation100_spill] sm:$0xff] }
0x11aa   :  { %5870 = vmatprep.subr.bf16.mxu1 %v8291_v62  ;;  %v3990_v62 = vadd.f32 %v13367_v55, %v13366_v18 }
0x11ac   :  { %5776 = vmatpush1.bf16.msra.mxu0 %v13344_v39  ;;  %v13368_v39 = vld [vmem:[#allocation59_spill] sm:$0xff] }
0x11ad   :  { %5777 = vmatprep.subr.bf16.mxu0 %v13345_v27  ;;  %5871 = vmatpush1.bf16.msra.mxu1 %v8292_v48  ;;  %v13369_v48 = vld [vmem:[#allocation103_spill] sm:$0xff] }
0x11ae   :  { %5872 = vmatprep.subr.bf16.mxu1 %v8293_v9 }
0x11b0   :  { %5778 = vmatpush1.bf16.msra.mxu0 %v13346_v30 }
0x11b1   :  { %5779 = vmatprep.subr.bf16.mxu0 %v13347_v29  ;;  %5873 = vmatpush1.bf16.msra.mxu1 %v8294_v56  ;;  %v13370_v56 = vld [vmem:[#allocation60_spill] sm:$0xff] }
0x11b2   :  { %5874 = vmatprep.subr.bf16.mxu1 %v8295_v57  ;;  %v13371_v57 = vld [vmem:[#allocation101_spill] sm:$0xff] }
0x11b4   :  { %5780 = vmatpush1.bf16.msra.mxu0 %v13348_v6  ;;  %v3919_v6 = vadd.f32 %v13371_v57, %v13370_v56 }
0x11b5   :  { %5781 = vmatprep.subr.bf16.mxu0 %v13349_v28  ;;  %5875 = vmatpush1.bf16.msra.mxu1 %v8296_v10  ;;  %v13372_v28 = vld [vmem:[#allocation102_spill] sm:$0xff] }
0x11b6   :  { %5876 = vmatprep.subr.bf16.mxu1 %v8297_v2  ;;  %v3992_v10 = vadd.f32 %v13372_v28, %v13061_v5 }
0x11b8   :  { %5782 = vmatpush1.bf16.msra.mxu0 %v13350_v33 }
0x11b9   :  { %5887 = vmatprep.subr.bf16.mxu0 %v8298_v63  ;;  %5877 = vmatpush1.bf16.msra.mxu1 %v8299_v53 }
0x11ba   :  { %5928 = vmatprep.subr.bf16.mxu1 %v8300_v16 }
0x11bb   :  { %5784 = vmatmul.mubr.bf16.vlgmr.msra.gmra.mrb[136].mxu0 %v11773_v41  ;;  %v13356_v41 = vld [vmem:[#allocation113_spill] sm:$0xff] }
0x11bc   :  { %5888 = vmatpush1.bf16.msra.mxu0 %v8301_v19 }
0x11bd   :  { %5889 = vmatprep.subr.bf16.mxu0 %v8302_v20 }
0x11c0   :  { %5890 = vmatpush1.bf16.msra.mxu0 %v8303_v32 }
0x11c1   :  { %5891 = vmatprep.subr.bf16.mxu0 %v8304_v13 }
0x11c4   :  { %5892 = vmatpush1.bf16.msra.mxu0 %v8305_v36 }
0x11c5   :  { %5893 = vmatprep.subr.bf16.mxu0 %v8306_v43 }
0x11c8   :  { %5894 = vmatpush1.bf16.msra.mxu0 %v8307_v0 }
0x11c9   :  { %5895 = vmatprep.subr.bf16.mxu0 %v8308_v15 }
0x11cc   :  { %5896 = vmatpush1.bf16.msra.mxu0 %v8309_v24 }
0x11cd   :  { %5897 = vmatprep.subr.bf16.mxu0 %v8310_v4 }
0x11d0   :  { %5898 = vmatpush1.bf16.msra.mxu0 %v8311_v60 }
0x11d1   :  { %5899 = vmatprep.subr.bf16.mxu0 %v8312_v47 }
0x11d4   :  { %5900 = vmatpush1.bf16.msra.mxu0 %v8313_v45 }
0x11d5   :  { %5901 = vmatprep.subr.bf16.mxu0 %v8314_v54 }
0x11d8   :  { %5902 = vmatpush1.bf16.msra.mxu0 %v8315_v31 }
0x11d9   :  { %5903 = vmatprep.subr.bf16.mxu0 %v8316_v35 }
0x11dc   :  { %5904 = vmatpush1.bf16.msra.mxu0 %v8317_v42 }
0x11dd   :  { %5905 = vmatprep.subr.bf16.mxu0 %v8318_v7 }
0x11e0   :  { %5906 = vmatpush1.bf16.msra.mxu0 %v13351_v12 }
0x11e1   :  { %5907 = vmatprep.subr.bf16.mxu0 %v13352_v58 }
0x11e4   :  { %5908 = vmatpush1.bf16.msra.mxu0 %v13353_v50 }
0x11e5   :  { %5909 = vmatprep.subr.bf16.mxu0 %v13354_v14 }
0x11e8   :  { %5910 = vmatpush1.bf16.msra.mxu0 %v13355_v26 }
0x11e9   :  { %5911 = vmatprep.subr.bf16.mxu0 %v13356_v41 }
0x11ec   :  { %5912 = vmatpush1.bf16.msra.mxu0 %v13357_v23 }
0x11ed   :  { %5913 = vmatprep.subr.bf16.mxu0 %v13358_v25 }
0x11f0   :  { %5914 = vmatpush1.bf16.msra.mxu0 %v13359_v34 }
0x11f1   :  { %5915 = vmatprep.subr.bf16.mxu0 %v13360_v3  ;;  %v13373_v3 = vld [vmem:[#allocation62_spill] sm:$0xff] }
0x11f4   :  { %5916 = vmatpush1.bf16.msra.mxu0 %v13361_v21 }
0x11f5   :  { %5917 = vmatprep.subr.bf16.mxu0 %v13362_v8  ;;  %v13374_v8 = vld [vmem:[#allocation63_spill] sm:$0xff] }
0x11f8   :  { %5918 = vmatpush1.bf16.msra.mxu0 %v13363_v40 }
0x124e   :  { %v5703_v11 = vpop.f32.mrb[132].mxu0  ;;  %v5744_v46 = vpop.f32.mrb[132].mxu1 }
0x124f   :  { %v5704_v27 = vadd.f32 %v5703_v11, %v13368_v39  ;;  %v5745_v9 = vadd.f32 %v5744_v46, %v13369_v48  ;;  %v5705_v30 = vpop.f32.mrb[133].mxu0  ;;  %v5746_v29 = vpop.f32.mrb[133].mxu1 }
0x1250   :  { %v5706_v2 = vadd.f32 %v5705_v30, %v13063_v44  ;;  %v5747_v33 = vadd.f32 %v5746_v29, %v13064_v38  ;;  %v5707_v63 = vpop.f32.mrb[134].mxu0  ;;  %v5748_v53 = vpop.f32.mrb[134].mxu1 }
0x1251   :  { %v5792_v16 = vadd.f32 %v5704_v27, %v3917_v59  ;;  %v5806_v19 = vadd.f32 %v5745_v9, %v3990_v62  ;;  %v5708_v20 = vpop.f32.mrb[135].mxu0  ;;  %v5749_v32 = vpop.f32.mrb[135].mxu1  ;;  %v8321_v63 = vld [vmem:[#allocation11 + $0x40] ss:$24 sps:$4 sm:$0xff]   ;;  %v8322_v53 = vld [vmem:[#allocation11 + $0x74] ss:$24 sps:$4 sm:$0xff]  }
0x1252   :  { %v5793_v13 = vadd.f32 %v5706_v2, %v3919_v6  ;;  %v5807_v36 = vadd.f32 %v5747_v33, %v3992_v10  ;;  %v8319_v2 = vld [vmem:[#allocation11 + $0x10] ss:$24 sps:$4 sm:$0xff]   ;;  %v8320_v33 = vld [vmem:[#allocation11 + $0x44] ss:$24 sps:$4 sm:$0xff]   ;;  %v8325_v20 = vld [vmem:[#allocation11 + $0xa0] ss:$24 sps:$4 sm:$0xff]  }
0x1253   :  { %v6918_v43 = vmul.f32 -1.442695, %v5792_v16  ;;  %v6920_v15 = vmul.f32 -1.442695, %v5806_v19  ;;  %v8323_v16 = vld [vmem:[#allocation11 + $0x70] ss:$24 sps:$4 sm:$0xff]  }
0x1254   :  { %v6919_v0 = vmul.f32 -1.442695, %v5793_v13  ;;  %v6921_v24 = vmul.f32 -1.442695, %v5807_v36  ;;  %v8324_v19 = vld [vmem:[#allocation11 + $0xa4] ss:$24 sps:$4 sm:$0xff]  }
0x1255   :  { %7939 = vpow2.f32 %v6918_v43  ;;  %v8326_v32 = vld [vmem:[#allocation11 + $0xd4] ss:$24 sps:$4 sm:$0xff]   ;;  %v8327_v13 = vld [vmem:[#allocation11 + $0xd0] ss:$24 sps:$4 sm:$0xff]   ;;  %v8328_v36 = vld [vmem:[#allocation11 + $0x104] ss:$24 sps:$4 sm:$0xff]  }
0x1256   :  { %7941 = vpow2.f32 %v6919_v0  ;;  %v8329_v43 = vld [vmem:[#allocation11 + $0x100] ss:$24 sps:$4 sm:$0xff]   ;;  %v8330_v0 = vld [vmem:[#allocation11 + $0x134] ss:$24 sps:$4 sm:$0xff]  }
0x1257   :  { %7943 = vpow2.f32 %v6920_v15  ;;  %v8331_v15 = vld [vmem:[#allocation11 + $0x130] ss:$24 sps:$4 sm:$0xff]  }
0x1258   :  { %7945 = vpow2.f32 %v6921_v24  ;;  %v8332_v24 = vld [vmem:[#allocation11 + $0x164] ss:$24 sps:$4 sm:$0xff]  }
0x125f   :  { %v7940_v4 = vpop.eup %7939 }
0x1260   :  { %v7942_v60 = vpop.eup %7941  ;;  %v5800_v47 = vadd.f32 1.0, %v7940_v4  ;;  %v8333_v4 = vld [vmem:[#allocation11 + $0x160] ss:$24 sps:$4 sm:$0xff]  }
0x1261   :  { %v5801_v45 = vadd.f32 1.0, %v7942_v60  ;;  %v7944_v54 = vpop.eup %7943  ;;  %v8334_v60 = vld [vmem:[#allocation11 + $0x194] ss:$24 sps:$4 sm:$0xff]  }
0x1262   :  { %7947 = vrcp.f32 %v5800_v47  ;;  %v7946_v31 = vpop.eup %7945  ;;  %v5814_v35 = vadd.f32 1.0, %v7944_v54  ;;  %v8335_v47 = vld [vmem:[#allocation11 + $0x190] ss:$24 sps:$4 sm:$0xff]   ;;  %v8337_v54 = vld [vmem:[#allocation11 + $0x1c0] ss:$24 sps:$4 sm:$0xff]  }
0x1263   :  { %7949 = vrcp.f32 %v5801_v45  ;;  %v5815_v42 = vadd.f32 1.0, %v7946_v31  ;;  %v8336_v45 = vld [vmem:[#allocation11 + $0x1c4] ss:$24 sps:$4 sm:$0xff]   ;;  %v8338_v31 = vld [vmem:[#allocation11 + $0x1f4] ss:$24 sps:$4 sm:$0xff]  }
0x1264   :  { %7951 = vrcp.f32 %v5814_v35  ;;  %v8339_v35 = vld [vmem:[#allocation11 + $0x1f0] ss:$24 sps:$4 sm:$0xff]  }
0x1265   :  { %7953 = vrcp.f32 %v5815_v42  ;;  %v8340_v42 = vld [vmem:[#allocation11 + $0x224] ss:$24 sps:$4 sm:$0xff]  }
0x126c   :  { %v7948_v50 = vpop.eup %7947 }
0x126d   :  { %v7950_v41 = vpop.eup %7949 }
0x126e   :  { %v7952_v11 = vpop.eup %7951 }
0x126f   :  { %v7954_v46 = vpop.eup %7953  ;;  %v5826_v22 = vsub.f32 1.0, %v7952_v11  ;;  %v5830_v9 = vmul.f32 %v7952_v11, %v11765_v1  ;;  %v7601_v11 = vld [vmem:[#allocation13 + $0x20] ss:$8 sps:$4 sm:$0xff]  }
0x1270   :  { %v5827_v55 = vsub.f32 1.0, %v7954_v46  ;;  %v5831_v29 = vmul.f32 %v7954_v46, %v11767_v61  ;;  %v7606_v46 = vld [vmem:[#allocation13 + $0x34] ss:$8 sps:$4 sm:$0xff]  }
0x128e   :  { %v5785_v7 = vpop.f32.mrb[136].mxu0 }
0x128f   :  { %v5786_v12 = vadd.f32 %v5785_v7, %v13065_v37  ;;  %v5787_v58 = vpop.f32.mrb[137].mxu0  ;;  %v8341_v7 = vld [vmem:[#allocation11 + $0x220] ss:$24 sps:$4 sm:$0xff]  }
0x1290   :  { %v5788_v14 = vadd.f32 %v5787_v58, %v10889_v52  ;;  %v5789_v26 = vpop.f32.mrb[138].mxu0  ;;  %v8343_v58 = vld [vmem:[#allocation11 + $0x250] ss:$24 sps:$4 sm:$0xff]  }
0x1291   :  { %v5820_v23 = vmul.f32 %v7948_v50, %v5786_v12  ;;  %v5790_v25 = vpop.f32.mrb[139].mxu0  ;;  %v8342_v12 = vld [vmem:[#allocation11 + $0x254] ss:$24 sps:$4 sm:$0xff]   ;;  %v8344_v50 = vld [vmem:[#allocation11 + $0x284] ss:$24 sps:$4 sm:$0xff]  }
0x1292   :  { %v5821_v34 = vmul.f32 %v7950_v41, %v5788_v14  ;;  %v8345_v14 = vld [vmem:[#allocation11 + $0x280] ss:$24 sps:$4 sm:$0xff]   ;;  %v8346_v26 = vld [vmem:[#allocation11 + $0x2b4] ss:$24 sps:$4 sm:$0xff]   ;;  %v8347_v41 = vld [vmem:[#allocation11 + $0x2b0] ss:$24 sps:$4 sm:$0xff]  }
0x1293   :  { %v5822_v21 = vadd.f32 %v5820_v23, %v13373_v3  ;;  %v8348_v23 = vld [vmem:[#allocation11 + $0x2e4] ss:$24 sps:$4 sm:$0xff]   ;;  %v8349_v25 = vld [vmem:[#allocation11 + $0x2e0] ss:$24 sps:$4 sm:$0xff]  }
0x1294   :  { %v5823_v40 = vadd.f32 %v5821_v34, %v13374_v8  ;;  %v7595_v34 = vld [vmem:[#allocation13] ss:$8 sps:$4 sm:$0xff]   ;;  %v7597_v3 = vld [vmem:[#allocation13 + $0x4] ss:$8 sps:$4 sm:$0xff]   ;;  %v7598_v8 = vld [vmem:[#allocation13 + $0x10] ss:$8 sps:$4 sm:$0xff]  }
0x1295   :  { %7955 = vtanh.f32 %v5822_v21  ;;  %v7600_v21 = vld [vmem:[#allocation13 + $0x14] ss:$8 sps:$4 sm:$0xff]   ;;  %6219 = vmatprep.subr.bf16.mxu0 %v7597_v3 }
0x1296   :  { %7957 = vtanh.f32 %v5823_v40  ;;  %v7603_v40 = vld [vmem:[#allocation13 + $0x24] ss:$8 sps:$4 sm:$0xff]  }
0x129f   :  { %v7956_v59 = vpop.eup %7955 }
0x12a0   :  { %v7958_v62 = vpop.eup %7957  ;;  %v5828_v27 = vmul.f32 %v7956_v59, %v5826_v22  ;;  %v7604_v22 = vld [vmem:[#allocation13 + $0x30] ss:$8 sps:$4 sm:$0xff]   ;;  %v7609_v59 = vld [vmem:[#allocation13 + $0x44] ss:$8 sps:$4 sm:$0xff]  }
0x12a1   :  { %v5829_v30 = vmul.f32 %v7958_v62, %v5827_v55  ;;  %v7607_v55 = vld [vmem:[#allocation13 + $0x40] ss:$8 sps:$4 sm:$0xff]   ;;  %v7612_v62 = vld [vmem:[#allocation13 + $0x54] ss:$8 sps:$4 sm:$0xff]  }
0x12a2   :  { %v11858_v57 = vadd.f32 %v5830_v9, %v5828_v27  ;;  %v7610_v27 = vld [vmem:[#allocation13 + $0x50] ss:$8 sps:$4 sm:$0xff]   ;;  %v7615_v9 = vld [vmem:[#allocation13 + $0x64] ss:$8 sps:$4 sm:$0xff]  }
0x12a3   :  { %v11860_v6 = vadd.f32 %v5831_v29, %v5829_v30  ;;  %v7613_v30 = vld [vmem:[#allocation13 + $0x60] ss:$8 sps:$4 sm:$0xff]   ;;  %v7618_v29 = vld [vmem:[#allocation13 + $0x74] ss:$8 sps:$4 sm:$0xff]  }
0x12a4   :  { %v11866_v10 = vpack.c.bf16 %v11858_v57, %v11858_v57 }
0x12a5   :  { %v5845_v28 = vpack.c.bf16 %v11860_v6, %v11860_v6 }
0x12a7   :  { %5878 = vmatprep.mubr.bf16.mxu1 %v5845_v28  ;;  %5919 = vmatprep.mubr.bf16.mxu0 %v5845_v28 }
0x12a8   :  { %5879 = vmatmul.mubr.bf16.vlgmr.msra.gmra.mrb[136].mxu1 %v11866_v10  ;;  %5920 = vmatmul.mubr.bf16.vlgmr.msra.gmra.mrb[140].mxu0 %v11866_v10 }
0x12a9   :  { %5929 = vmatpush1.bf16.msra.mxu1 %v8319_v2  ;;  %5960 = vmatprep.mubr.bf16.mxu1 %v5845_v28  ;;  %v7616_v28 = vld [vmem:[#allocation13 + $0x70] ss:$8 sps:$4 sm:$0xff]   ;;  %v7619_v2 = vld [vmem:[#allocation13 + $0x80] ss:$8 sps:$4 sm:$0xff]  }
0x12aa   :  { %5930 = vmatprep.subr.bf16.mxu1 %v8320_v33  ;;  %6220 = vmatpush1.bf16.msra.mxu0 %v7595_v34  ;;  %v7624_v33 = vld [vmem:[#allocation13 + $0x94] ss:$8 sps:$4 sm:$0xff]  }
0x12ab   :  { %6221 = vmatprep.subr.bf16.mxu0 %v7600_v21  ;;  %v13376_v34 = vld [vmem:[#allocation83_spill] sm:$0xff] }
0x12ac   :  { %v3994_v3 = vadd.f32 %v13376_v34, %v13366_v18  ;;  %v13387_v34 = vld [vmem:[#allocation115_spill] sm:$0xff] }
0x12ad   :  { %5931 = vmatpush1.bf16.msra.mxu1 %v8321_v63  ;;  %v7622_v63 = vld [vmem:[#allocation13 + $0x90] ss:$8 sps:$4 sm:$0xff]  }
0x12ae   :  { %5932 = vmatprep.subr.bf16.mxu1 %v8322_v53  ;;  %6222 = vmatpush1.bf16.msra.mxu0 %v7598_v8  ;;  %v7627_v53 = vld [vmem:[#allocation13 + $0xa4] ss:$8 sps:$4 sm:$0xff]  }
0x12af   :  { %6223 = vmatprep.subr.bf16.mxu0 %v7603_v40 }
0x12b1   :  { %5933 = vmatpush1.bf16.msra.mxu1 %v8323_v16  ;;  %v7625_v16 = vld [vmem:[#allocation13 + $0xa0] ss:$8 sps:$4 sm:$0xff]  }
0x12b2   :  { %5934 = vmatprep.subr.bf16.mxu1 %v8324_v19  ;;  %6224 = vmatpush1.bf16.msra.mxu0 %v7601_v11  ;;  %v7630_v19 = vld [vmem:[#allocation13 + $0xb4] ss:$8 sps:$4 sm:$0xff]  }
0x12b3   :  { %6225 = vmatprep.subr.bf16.mxu0 %v7606_v46  ;;  %v13377_v46 = vld [vmem:[#allocation68_spill] sm:$0xff] }
0x12b5   :  { %5935 = vmatpush1.bf16.msra.mxu1 %v8325_v20  ;;  %v7628_v20 = vld [vmem:[#allocation13 + $0xb0] ss:$8 sps:$4 sm:$0xff]  }
0x12b6   :  { %5936 = vmatprep.subr.bf16.mxu1 %v8326_v32  ;;  %6226 = vmatpush1.bf16.msra.mxu0 %v7604_v22  ;;  %v7633_v32 = vld [vmem:[#allocation13 + $0xc4] ss:$8 sps:$4 sm:$0xff]   ;;  %v3923_v22 = vadd.f32 %v13377_v46, %v13370_v56 }
0x12b7   :  { %6227 = vmatprep.subr.bf16.mxu0 %v7609_v59  ;;  %v13378_v59 = vld [vmem:[#allocation57_spill] sm:$0xff] }
0x12b9   :  { %5937 = vmatpush1.bf16.msra.mxu1 %v8327_v13  ;;  %v7631_v13 = vld [vmem:[#allocation13 + $0xc0] ss:$8 sps:$4 sm:$0xff]  }
0x12ba   :  { %5938 = vmatprep.subr.bf16.mxu1 %v8328_v36  ;;  %6228 = vmatpush1.bf16.msra.mxu0 %v7607_v55  ;;  %v7636_v36 = vld [vmem:[#allocation13 + $0xd4] ss:$8 sps:$4 sm:$0xff]   ;;  %v3996_v55 = vadd.f32 %v13378_v59, %v13061_v5 }
0x12bb   :  { %6229 = vmatprep.subr.bf16.mxu0 %v7612_v62 }
0x12bd   :  { %5939 = vmatpush1.bf16.msra.mxu1 %v8329_v43  ;;  %v7634_v43 = vld [vmem:[#allocation13 + $0xd0] ss:$8 sps:$4 sm:$0xff]  }
0x12be   :  { %5940 = vmatprep.subr.bf16.mxu1 %v8330_v0  ;;  %6230 = vmatpush1.bf16.msra.mxu0 %v7610_v27  ;;  %v7639_v0 = vld [vmem:[#allocation13 + $0xe4] ss:$8 sps:$4 sm:$0xff]  }
0x12bf   :  { %6231 = vmatprep.subr.bf16.mxu0 %v7615_v9 }
0x12c1   :  { %5941 = vmatpush1.bf16.msra.mxu1 %v8331_v15  ;;  %v7637_v15 = vld [vmem:[#allocation13 + $0xe0] ss:$8 sps:$4 sm:$0xff]  }
0x12c2   :  { %5942 = vmatprep.subr.bf16.mxu1 %v8332_v24  ;;  %6232 = vmatpush1.bf16.msra.mxu0 %v7613_v30  ;;  %v7642_v24 = vld [vmem:[#allocation13 + $0xf4] ss:$8 sps:$4 sm:$0xff]  }
0x12c3   :  { %6233 = vmatprep.subr.bf16.mxu0 %v7618_v29 }
0x12c5   :  { %5943 = vmatpush1.bf16.msra.mxu1 %v8333_v4  ;;  %v7640_v4 = vld [vmem:[#allocation13 + $0xf0] ss:$8 sps:$4 sm:$0xff]  }
0x12c6   :  { %5944 = vmatprep.subr.bf16.mxu1 %v8334_v60  ;;  %6234 = vmatpush1.bf16.msra.mxu0 %v7616_v28  ;;  %v7643_v60 = vld [vmem:[%s11970_s11 + $0x40] sm:$0xff]  }
0x12c9   :  { %5945 = vmatpush1.bf16.msra.mxu1 %v8335_v47  ;;  %v7644_v47 = vld [vmem:[%s11970_s11] sm:$0xff]  }
0x12ca   :  { %5946 = vmatprep.subr.bf16.mxu1 %v8336_v45  ;;  %v7645_v45 = vld [vmem:[%s11970_s11 + $0x48] sm:$0xff]  }
0x12cd   :  { %5947 = vmatpush1.bf16.msra.mxu1 %v8337_v54  ;;  %v7646_v54 = vld [vmem:[%s11970_s11 + $0x8] sm:$0xff]  }
0x12ce   :  { %5948 = vmatprep.subr.bf16.mxu1 %v8338_v31  ;;  %v7647_v31 = vld [vmem:[%s11970_s11 + $0x50] sm:$0xff]  }
0x12d1   :  { %5949 = vmatpush1.bf16.msra.mxu1 %v8339_v35  ;;  %v7648_v35 = vld [vmem:[%s11970_s11 + $0x10] sm:$0xff]  }
0x12d2   :  { %5950 = vmatprep.subr.bf16.mxu1 %v8340_v42  ;;  %v7649_v42 = vld [vmem:[%s11970_s11 + $0x58] sm:$0xff]  }
0x12d5   :  { %5951 = vmatpush1.bf16.msra.mxu1 %v8341_v7  ;;  %v7650_v7 = vld [vmem:[%s11970_s11 + $0x18] sm:$0xff]  }
0x12d6   :  { %5952 = vmatprep.subr.bf16.mxu1 %v8342_v12  ;;  %v7651_v12 = vld [vmem:[%s11970_s11 + $0x60] sm:$0xff]  }
0x12d9   :  { %5953 = vmatpush1.bf16.msra.mxu1 %v8343_v58  ;;  %v7652_v58 = vld [vmem:[%s11970_s11 + $0x20] sm:$0xff]  }
0x12da   :  { %5954 = vmatprep.subr.bf16.mxu1 %v8344_v50  ;;  %v7653_v50 = vld [vmem:[%s11970_s11 + $0x68] sm:$0xff]  }
0x12dd   :  { %5955 = vmatpush1.bf16.msra.mxu1 %v8345_v14  ;;  %v7654_v14 = vld [vmem:[%s11970_s11 + $0x28] sm:$0xff]  }
0x12de   :  { %5956 = vmatprep.subr.bf16.mxu1 %v8346_v26 }
0x12e1   :  { %5957 = vmatpush1.bf16.msra.mxu1 %v8347_v41 }
0x12e2   :  { %5958 = vmatprep.subr.bf16.mxu1 %v8348_v23  ;;  %v13375_v23 = vld [vmem:[#allocation66_spill] sm:$0xff] }
0x12e5   :  { %5959 = vmatpush1.bf16.msra.mxu1 %v8349_v25  ;;  %v3921_v25 = vadd.f32 %v13375_v23, %v13364_v17 }
0x12e6   :  { %6975 = vmatprep.subr.bf16.mxu1 %v7643_v60 }
0x12e8   :  { %5961 = vmatmul.mubr.bf16.vlgmr.msra.gmra.mrb[140].mxu1 %v11866_v10  ;;  %v7621_v10 = vld [vmem:[#allocation13 + $0x84] ss:$8 sps:$4 sm:$0xff]  }
0x12e9   :  { %6235 = vmatprep.subr.bf16.mxu0 %v7621_v10  ;;  %6976 = vmatpush3.bf16.msra.mxu1 %v7644_v47 }
0x12ea   :  { %6236 = vmatpush1.bf16.msra.mxu0 %v7619_v2  ;;  %6977 = vmatprep.subr.bf16.mxu1 %v7645_v45  ;;  %v13379_v45 = vld [vmem:[#allocation64_spill] sm:$0xff] }
0x12eb   :  { %6237 = vmatprep.subr.bf16.mxu0 %v7624_v33 }
0x12ed   :  { %6978 = vmatpush3.bf16.msra.mxu1 %v7646_v54 }
0x12ee   :  { %6238 = vmatpush1.bf16.msra.mxu0 %v7622_v63  ;;  %6979 = vmatprep.subr.bf16.mxu1 %v7647_v31  ;;  %v13380_v31 = vld [vmem:[#allocation81_spill] sm:$0xff] }
0x12ef   :  { %6239 = vmatprep.subr.bf16.mxu0 %v7627_v53 }
0x12f1   :  { %6980 = vmatpush3.bf16.msra.mxu1 %v7648_v35 }
0x12f2   :  { %6240 = vmatpush1.bf16.msra.mxu0 %v7625_v16  ;;  %6981 = vmatprep.subr.bf16.mxu1 %v7649_v42  ;;  %v13381_v42 = vld [vmem:[#allocation107_spill] sm:$0xff] }
0x12f3   :  { %6241 = vmatprep.subr.bf16.mxu0 %v7630_v19 }
0x12f5   :  { %6982 = vmatpush3.bf16.msra.mxu1 %v7650_v7  ;;  %v13382_v7 = vld [vmem:[#allocation52_spill] sm:$0xff] }
0x12f6   :  { %6242 = vmatpush1.bf16.msra.mxu0 %v7628_v20  ;;  %6983 = vmatprep.subr.bf16.mxu1 %v7651_v12  ;;  %v13383_v12 = vld [vmem:[#allocation108_spill] sm:$0xff] }
0x12f7   :  { %6243 = vmatprep.subr.bf16.mxu0 %v7633_v32 }
0x12f9   :  { %6984 = vmatpush3.bf16.msra.mxu1 %v7652_v58  ;;  %v13384_v58 = vld [vmem:[#allocation75_spill] sm:$0xff] }
0x12fa   :  { %6244 = vmatpush1.bf16.msra.mxu0 %v7631_v13  ;;  %6985 = vmatprep.subr.bf16.mxu1 %v7653_v50  ;;  %v4950_v50 = vadd.f32 %v13384_v58, %v13383_v12 }
0x12fb   :  { %6245 = vmatprep.subr.bf16.mxu0 %v7636_v36 }
0x12fd   :  { %6986 = vmatpush3.bf16.msra.mxu1 %v7654_v14 }
0x12fe   :  { %6246 = vmatpush1.bf16.msra.mxu0 %v7634_v43 }
0x12ff   :  { %6247 = vmatprep.subr.bf16.mxu0 %v7639_v0 }
0x1302   :  { %6248 = vmatpush1.bf16.msra.mxu0 %v7637_v15 }
0x1303   :  { %6249 = vmatprep.subr.bf16.mxu0 %v7642_v24 }
0x1306   :  { %6250 = vmatpush1.bf16.msra.mxu0 %v7640_v4 }
0x137b   :  { %v5880_v26 = vpop.f32.mrb[136].mxu1  ;;  %v5921_v41 = vpop.f32.mrb[140].mxu0 }
0x137c   :  { %v5881_v21 = vadd.f32 %v5880_v26, %v13368_v39  ;;  %v5922_v8 = vadd.f32 %v5921_v41, %v13369_v48  ;;  %v5882_v40 = vpop.f32.mrb[137].mxu1  ;;  %v5923_v11 = vpop.f32.mrb[141].mxu0  ;;  %v13386_v41 = vld [vmem:[#allocation67_spill] sm:$0xff] }
0x137d   :  { %v5883_v62 = vadd.f32 %v5882_v40, %v13063_v44  ;;  %v5924_v27 = vadd.f32 %v5923_v11, %v13064_v38  ;;  %v5884_v17 = vpop.f32.mrb[138].mxu1  ;;  %v5925_v9 = vpop.f32.mrb[142].mxu0  ;;  %v5127_v23 = vadd.f32 %v13386_v41, %v4950_v50 }
0x137e   :  { %v5969_v30 = vadd.f32 %v5881_v21, %v3921_v25  ;;  %v5983_v18 = vadd.f32 %v5922_v8, %v3994_v3  ;;  %v5885_v29 = vpop.f32.mrb[139].mxu1  ;;  %v5926_v39 = vpop.f32.mrb[143].mxu0  ;;  %v13388_v21 = vld [vmem:[#allocation87_spill] sm:$0xff] }
0x137f   :  { %v5970_v28 = vadd.f32 %v5883_v62, %v3923_v22  ;;  %v5984_v48 = vadd.f32 %v5924_v27, %v3996_v55  ;;  %v5304_v8 = vadd.f32 %v13388_v21, %v5127_v23 }
0x1380   :  { %v6922_v10 = vmul.f32 -1.442695, %v5969_v30  ;;  %v6924_v56 = vmul.f32 -1.442695, %v5983_v18 }
0x1381   :  { %v6923_v2 = vmul.f32 -1.442695, %v5970_v28  ;;  %v6925_v33 = vmul.f32 -1.442695, %v5984_v48  ;;  %v5481_v22 = vadd.f32 %v11605_v51, %v5304_v8 }
0x1382   :  { %7959 = vpow2.f32 %v6922_v10 }
0x1383   :  { %7961 = vpow2.f32 %v6923_v2  ;;  %v5658_v9 = vadd.f32 %v11767_v61, %v5481_v22  ;;  %v7656_v61 = vld [vmem:[%s11970_s11 + $0x30] sm:$0xff]  }
0x1384   :  { %7963 = vpow2.f32 %v6924_v56  ;;  %v6047_v56 = vld [vmem:[%s11969_s10] sm:$0x3] }
0x1385   :  { %7965 = vpow2.f32 %v6925_v33  ;;  %v13389_v33 = vld [vmem:[#allocation33_spill] sm:$0xff] }
0x138c   :  { %v7960_v63 = vpop.eup %7959 }
0x138d   :  { %v7962_v5 = vpop.eup %7961  ;;  %v5977_v44 = vadd.f32 1.0, %v7960_v63  ;;  %v6052_v63 = vrot.slane %v6047_v56, %v13389_v33 }
0x138e   :  { %v5978_v38 = vadd.f32 1.0, %v7962_v5  ;;  %v7964_v53 = vpop.eup %7963  ;;  %v13390_v5 = vld [vmem:[#allocation36_spill] sm:$0xff] }
0x138f   :  { %7967 = vrcp.f32 %v5977_v44  ;;  %v7966_v16 = vpop.eup %7965  ;;  %v5991_v19 = vadd.f32 1.0, %v7964_v53  ;;  %v6056_v44 = vrot.slane %v6047_v56, %v13390_v5 }
0x1390   :  { %7969 = vrcp.f32 %v5978_v38  ;;  %v5992_v20 = vadd.f32 1.0, %v7966_v16 }
0x1391   :  { %7971 = vrcp.f32 %v5991_v19 }
0x1392   :  { %7973 = vrcp.f32 %v5992_v20 }
0x1399   :  { %v7968_v43 = vpop.eup %7967 }
0x139a   :  { %v7970_v24 = vpop.eup %7969 }
0x139b   :  { %v7972_v26 = vpop.eup %7971 }
0x139c   :  { %v7974_v25 = vpop.eup %7973  ;;  %v6003_v11 = vsub.f32 1.0, %v7972_v26  ;;  %v6007_v17 = vmul.f32 %v7972_v26, %v11858_v57 }
0x139d   :  { %v6004_v59 = vsub.f32 1.0, %v7974_v25  ;;  %v6008_v18 = vmul.f32 %v7974_v25, %v11860_v6 }
0x13bb   :  { %v5962_v32 = vpop.f32.mrb[140].mxu1 }
0x13bc   :  { %v5963_v13 = vadd.f32 %v5962_v32, %v13065_v37  ;;  %v5964_v36 = vpop.f32.mrb[141].mxu1  ;;  %v4949_v37 = vadd.f32 %v13382_v7, %v13381_v42 }
0x13bd   :  { %v5965_v0 = vadd.f32 %v5964_v36, %v10889_v52  ;;  %v5966_v15 = vpop.f32.mrb[142].mxu1  ;;  %v13385_v52 = vld [vmem:[#allocation110_spill] sm:$0xff] }
0x13be   :  { %v5997_v4 = vmul.f32 %v7968_v43, %v5963_v13  ;;  %v5967_v60 = vpop.f32.mrb[143].mxu1  ;;  %v5126_v14 = vadd.f32 %v13385_v52, %v4949_v37 }
0x13bf   :  { %v5998_v47 = vmul.f32 %v7970_v24, %v5965_v0  ;;  %v6958_v24 = vld [vmem:[#allocation5] ss:$0 sm:$0xff] }
0x13c0   :  { %v5999_v54 = vadd.f32 %v5997_v4, %v13379_v45  ;;  %v5303_v3 = vadd.f32 %v13387_v34, %v5126_v14 }
0x13c1   :  { %v6000_v35 = vadd.f32 %v5998_v47, %v13380_v31 }
0x13c2   :  { %7975 = vtanh.f32 %v5999_v54  ;;  %v5480_v40 = vadd.f32 %v11603_v49, %v5303_v3  ;;  %v5835_v49 = vadd.f32 %v11860_v6, %v5658_v9  ;;  %v7658_v6 = vld [vmem:[%s11970_s11 + $0x38] sm:$0xff]  }
0x13c3   :  { %7977 = vtanh.f32 %v6000_v35 }
0x13c4   :  { %v5657_v62 = vadd.f32 %v11765_v1, %v5480_v40  ;;  %v7655_v1 = vld [vmem:[%s11970_s11 + $0x70] sm:$0xff]  }
0x13c5   :  { %6987 = vmatprep.subr.bf16.mxu1 %v7655_v1 }
0x13c6   :  { %v5834_v29 = vadd.f32 %v11858_v57, %v5657_v62  ;;  %6988 = vmatpush3.bf16.msra.mxu1 %v7656_v61  ;;  %v7657_v57 = vld [vmem:[%s11970_s11 + $0x78] sm:$0xff]  }
0x13c7   :  { %6989 = vmatprep.subr.bf16.mxu1 %v7657_v57 }
0x13ca   :  { %6990 = vmatpush3.bf16.msra.mxu1 %v7658_v6 }
0x13cc   :  { %v7976_v46 = vpop.eup %7975 }
0x13cd   :  { %v7978_v55 = vpop.eup %7977  ;;  %v6005_v27 = vmul.f32 %v7976_v46, %v6003_v11 }
0x13ce   :  { %v6006_v30 = vmul.f32 %v7978_v55, %v6004_v59 }
0x13cf   :  { %v6009_v39 = vadd.f32 %v6007_v17, %v6005_v27 }
0x13d0   :  { %v6010_v28 = vadd.f32 %v6008_v18, %v6006_v30 }
0x13d1   :  { %v6011_v48 = vadd.f32 %v6009_v39, %v5834_v29 }
0x13d2   :  { %v6012_v51 = vadd.f32 %v6010_v28, %v5835_v49 }
0x13d3   :  { %v6013_v2 = vpack.c.bf16 %v6011_v48, %v6011_v48 }
0x13d4   :  { %v6014_v10 = vpack.c.bf16 %v6012_v51, %v6012_v51 }
0x13d6   :  { %6251 = vmatprep.mubr.bf16.mxu0 %v6014_v10 }
0x13d7   :  { %6252 = vmatmul.mubr.bf16.vlgmr.msra.gmra.mrb[144].mxu0 %v6013_v2 }
0x14aa   :  { %v6253_v38 = vpop.f32.mrb[144].mxu0 }
0x14ab   :  { %v6254_v53 = vadd.f32 %v6253_v38, %v6052_v63  ;;  %v6255_v16 = vpop.f32.mrb[145].mxu0 }
0x14ac   :  { %v6256_v19 = vadd.f32 %v6255_v16, %v6056_v44  ;;  %v6257_v20 = vpop.f32.mrb[146].mxu0 }
0x14ad   :  { %v6260_v32 = vmax.f32 %v6254_v53, 0.0  ;;  %v6258_v13 = vpop.f32.mrb[147].mxu0 }
0x14ae   :  { %v6261_v36 = vmax.f32 %v6256_v19, 0.0 }
0x14af   :  { %v6262_v0 = vpack.c.bf16 %v6260_v32, %v6260_v32 }
0x14b0   :  { %v6263_v43 = vpack.c.bf16 %v6261_v36, %v6261_v36 }
0x14b2   :  { %6431 = vmatprep.mubr.bf16.mxu1 %v6263_v43 }
0x14b3   :  { %6432 = vmatmul.mubr.bf16.vlgmr.msra.gmra.mrb[144].mxu1 %v6262_v0 }
0x1586   :  { %v6991_v15 = vpop.f32.mrb[144].mxu1 }
0x1587   :  { %v6992_v4 = vpop.f32.mrb[145].mxu1 }
0x1588   :  { %v6993_v60 = vadd.f32 %v6992_v4, %v6991_v15  ;;  %v6994_v47 = vpop.f32.mrb[146].mxu1 }
0x1589   :  { %v6995_v45 = vpop.f32.mrb[147].mxu1 }
0x158a   :  { %v6434_v54 = vadd.f32 %v6993_v60, %v6958_v24 }
0x158c   :  { %v6439_v31 = vmax.f32 %v6434_v54, 0.0 }
0x158e   :  { %6441 = vst.msk [vmem:[%s11972_s13] sm:$0xff] %vm6440_vm0, %v6439_v31 }
0x158f   :  { %6446 = vsyncpa [#allocation7], 1 }
0x1590   :  { %6447 = vsyncpa [#allocation9], 1 }
0x1591   :  { %6448 = vsyncpa [#allocation12], 1 }

</bundles_post_ra>
